<compile_context>
chip_gen: v5e
topology: v5e:2x2
jax: 0.10.0
libtpu: 0.0.40
codegen_flags: <defaults>
</compile_context>

<pallas_src>
import math
import functools

import jax
import jax.numpy as jnp
from jax.experimental import pallas as pl
from jax.experimental.pallas import tpu as pltpu


# ---------------------------------------------------------------------------
# math helpers
# ---------------------------------------------------------------------------

def _gelu(x, approx):
    if approx:
        # tanh-approx GELU -> EUP (its own VLIW slot; frees VALU when not MXU-bound)
        return jax.nn.gelu(x, approximate=True)
    # PyTorch nn.GELU() default: exact erf-based GELU (kept exact for parity).
    return 0.5 * x * (1.0 + jax.lax.erf(x * (1.0 / math.sqrt(2.0))))


def _ln_padded(h, gamma, beta, n_true, eps):
    """LayerNorm over a lane-padded feature axis.

    Requires padded columns of `h` to be exactly 0 and gamma/beta to be 0 on pads.
    Uses the centered (two-pass) variance with a lane mask, so there is no
    E[x^2]-mu^2 catastrophic cancellation.
    """
    n_pad = h.shape[-1]
    inv_n = 1.0 / float(n_true)
    mu = jnp.sum(h, axis=-1, keepdims=True) * inv_n          # pads are 0 -> true sum
    centered = h - mu
    if n_pad != n_true:
        mask = jax.lax.broadcasted_iota(jnp.int32, (1, n_pad), 1) < n_true
        centered = jnp.where(mask, centered, 0.0)
    var = jnp.sum(centered * centered, axis=-1, keepdims=True) * inv_n
    # gamma/beta are 0 on padded cols -> output pads stay exactly 0.
    return centered * jax.lax.rsqrt(var + eps) * gamma + beta


def _round_up(n, m):
    return ((n + m - 1) // m) * m


def _pad2(a, rows, cols):
    r, c = a.shape
    return jnp.pad(a, ((0, rows - r), (0, cols - c)))


# ---------------------------------------------------------------------------
# kernel
# ---------------------------------------------------------------------------

def dense_layers_kernel(
    x_ref,                      # (block_b, fin_p)  f32 (cast in-kernel to MXU dtype)
    w1_ref, ln1_ref,            # (fin_p, fin_p),  (8, fin_p)   rows: [b1, g1, be1, 0..]
    w2_ref, ln2_ref,            # (fin_p, fmid_p), (8, fmid_p)
    w3_ref, b3_ref,             # (fmid_p, fh_p),  (8, fh_p)
    w4_ref, b4_ref,             # (fh_p, fout_p),  (8, fout_p)
    o_ref,                      # (block_b, fout_p)
    *, n1, n2, eps, approx_gelu,
):
    cdt = w1_ref.dtype                       # MXU compute dtype (bf16 or f32)
    x = x_ref[...].astype(cdt)               # in-kernel cast: no separate HBM cast pass

    # --- Linear(fin, fin) + LayerNorm(fin) + GELU  (+ Dropout as identity) ---
    ln1 = ln1_ref[...]
    h = jnp.dot(x, w1_ref[...], preferred_element_type=jnp.float32) + ln1[0:1]
    h = _ln_padded(h, ln1[1:2], ln1[2:3], n1, eps)
    h = _gelu(h, approx_gelu)
    # TODO(synk): nn.Dropout(0.3) treated as inference-mode identity (eval()); no mask/scale.

    # --- Linear(fin, fin//2) + LayerNorm(fin//2) + GELU ---
    ln2 = ln2_ref[...]
    h = jnp.dot(h.astype(cdt), w2_ref[...], preferred_element_type=jnp.float32) + ln2[0:1]
    h = _ln_padded(h, ln2[1:2], ln2[2:3], n2, eps)
    h = _gelu(h, approx_gelu)

    # --- Linear(fin//2, 64) + GELU   (64 lane-padded to 128) ---
    h = jnp.dot(h.astype(cdt), w3_ref[...], preferred_element_type=jnp.float32) + b3_ref[0:1, :]
    h = _gelu(h, approx_gelu)

    # --- fc_end: Linear(64, fout)    (fout lane-padded to a multiple of 128) ---
    out = jnp.dot(h.astype(cdt), w4_ref[...], preferred_element_type=jnp.float32) + b4_ref[0:1, :]
    o_ref[...] = out.astype(o_ref.dtype)


# ---------------------------------------------------------------------------
# parameter packing / padding (host side)
# ---------------------------------------------------------------------------

def pack_params(p, *, compute_dtype=jnp.bfloat16):
    """Zero-pad feature dims to multiples of 128 lanes, pack bias/LN vectors into
    one (8, N) array per stage, cast matmul weights to the MXU compute dtype
    (biases / LayerNorm params stay f32)."""
    fin = p["w1"].shape[0]
    fmid = p["w2"].shape[1]
    fout = p["w4"].shape[1]
    fin_p = _round_up(fin, 128)
    fmid_p = _round_up(fmid, 128)
    fh_p = _round_up(64, 128)          # hidden 64 -> 128 lanes
    fout_p = _round_up(fout, 128)

    packed = {
        "w1": _pad2(p["w1"], fin_p, fin_p).astype(compute_dtype),
        "ln1": _pad2(jnp.concatenate([p["b1"], p["g1"], p["be1"]], axis=0), 8, fin_p
                     ).astype(jnp.float32),
        "w2": _pad2(p["w2"], fin_p, fmid_p).astype(compute_dtype),
        "ln2": _pad2(jnp.concatenate([p["b2"], p["g2"], p["be2"]], axis=0), 8, fmid_p
                     ).astype(jnp.float32),
        "w3": _pad2(p["w3"], fmid_p, fh_p).astype(compute_dtype),
        "b3": _pad2(p["b3"], 8, fh_p).astype(jnp.float32),
        "w4": _pad2(p["w4"], fh_p, fout_p).astype(compute_dtype),
        "b4": _pad2(p["b4"], 8, fout_p).astype(jnp.float32),
        "fin": fin, "fmid": fmid, "fout": fout,
        "fin_p": fin_p, "fmid_p": fmid_p, "fh_p": fh_p, "fout_p": fout_p,
    }
    return packed


def _choose_block_b(B, requested, *, min_blocks=1):
    """MXU-friendly batch tile.  Single grid block for small batches by default
    (single-TC v5e/v6e); pass min_blocks=2 to split work across v7x's two TCs."""
    b8 = _round_up(B, 8)
    if min_blocks > 1:
        per_core = _round_up((b8 + min_blocks - 1) // min_blocks, 8)
        if per_core >= 128:
            per_core = _round_up(per_core, 128)
        requested = min(requested, max(8, per_core))
    bb = min(requested, b8)
    if bb >= 128:
        bb = _round_up(bb, 128)       # full MXU M passes (128 v5e, 256-friendly v6e/v7x)
    return max(8, bb)


# ---------------------------------------------------------------------------
# forward wrapper
# ---------------------------------------------------------------------------

def dense_layers_forward(x, packed, *, block_b=256, min_blocks=1,
                         approx_gelu=False, out_dtype=jnp.float32):
    """x: (B, fin) float32.  packed: output of pack_params."""
    B, fin = x.shape
    assert fin == packed["fin"]
    fin_p, fmid_p = packed["fin_p"], packed["fmid_p"]
    fh_p, fout_p = packed["fh_p"], packed["fout_p"]
    fmid, fout = packed["fmid"], packed["fout"]

    bb = _choose_block_b(B, block_b, min_blocks=min_blocks)
    Bp = _round_up(B, bb)

    xp = x
    if Bp != B or fin_p != fin:
        xp = jnp.pad(x, ((0, Bp - B), (0, fin_p - fin)))
    # x stays f32 in HBM; the kernel casts it to the MXU compute dtype in-register.

    kernel = functools.partial(dense_layers_kernel, n1=fin, n2=fmid, eps=1e-5,
                               approx_gelu=approx_gelu)

    weight_names = ("w1", "ln1", "w2", "ln2", "w3", "b3", "w4", "b4")
    out_itemsize = jnp.dtype(out_dtype).itemsize
    weight_bytes = sum(int(packed[k].size) * packed[k].dtype.itemsize
                       for k in weight_names)

    # cost estimate at the padded shapes the kernel actually executes
    flops = 2 * Bp * (fin_p * fin_p + fin_p * fmid_p + fmid_p * fh_p + fh_p * fout_p)
    transcendentals = Bp * (fin_p + fmid_p + fh_p)
    bytes_accessed = int(xp.size * xp.dtype.itemsize + weight_bytes
                         + Bp * fout_p * out_itemsize)

    # explicit VMEM budget: single-buffered resident weights + double-buffered
    # x/out tiles + headroom for the largest f32 intermediates of stages 1-2.
    vmem_needed = (
        weight_bytes
        + 2 * bb * fin_p * 4
        + 2 * bb * fout_p * out_itemsize
        + 4 * bb * max(fin_p, fmid_p) * 4
    )
    vmem_limit = int(min(max(vmem_needed + (4 << 20), 32 << 20), 128 << 20))
    # TODO(synk): for fin_p >= ~2048, switch w1/w2 to a K-tiled reduction grid axis
    # (f32 VMEM accumulator, K axis last, "arbitrary") instead of fully-resident.

    def _const(arr):
        # grid-constant weight/bias: resident in VMEM, never re-DMA'd -> single buffer
        return pl.BlockSpec(arr.shape, lambda i: (0, 0), pipeline_mode=pl.Buffered(1))

    grid_spec = pltpu.PrefetchScalarGridSpec(
        num_scalar_prefetch=0,
        grid=(Bp // bb,),
        in_specs=[
            pl.BlockSpec((bb, fin_p), lambda i: (i, 0)),            # x tile
            _const(packed["w1"]), _const(packed["ln1"]),
            _const(packed["w2"]), _const(packed["ln2"]),
            _const(packed["w3"]), _const(packed["b3"]),
            _const(packed["w4"]), _const(packed["b4"]),
        ],
        out_specs=pl.BlockSpec((bb, fout_p), lambda i: (i, 0)),     # lane-dense output
    )

    out = pl.pallas_call(
        kernel,
        out_shape=jax.ShapeDtypeStruct((Bp, fout_p), out_dtype),
        grid_spec=grid_spec,
        compiler_params=pltpu.CompilerParams(
            dimension_semantics=("parallel",),
            vmem_limit_bytes=vmem_limit),
        cost_estimate=pl.CostEstimate(
            flops=int(flops), transcendentals=int(transcendentals),
            bytes_accessed=bytes_accessed),
    )(xp, *(packed[k] for k in weight_names))

    if Bp != B or fout_p != fout:
        out = out[:B, :fout]
    return out


# ---------------------------------------------------------------------------
# synthetic params + pure-JAX reference
# ---------------------------------------------------------------------------

def init_params(key, features_in, features_out):
    """Deterministic synthetic parameters (Linear weights stored as (in, out))."""
    fmid = features_in // 2
    keys = jax.random.split(key, 8)
    scale = 0.05
    return {
        "w1": jax.random.normal(keys[0], (features_in, features_in), jnp.float32) * scale,
        "b1": jax.random.normal(keys[1], (1, features_in), jnp.float32) * scale,
        "g1": jnp.ones((1, features_in), jnp.float32),
        "be1": jnp.zeros((1, features_in), jnp.float32),
        "w2": jax.random.normal(keys[2], (features_in, fmid), jnp.float32) * scale,
        "b2": jax.random.normal(keys[3], (1, fmid), jnp.float32) * scale,
        "g2": jnp.ones((1, fmid), jnp.float32),
        "be2": jnp.zeros((1, fmid), jnp.float32),
        "w3": jax.random.normal(keys[4], (fmid, 64), jnp.float32) * scale,
        "b3": jax.random.normal(keys[5], (1, 64), jnp.float32) * scale,
        "w4": jax.random.normal(keys[6], (64, features_out), jnp.float32) * scale,
        "b4": jax.random.normal(keys[7], (1, features_out), jnp.float32) * scale,
    }


def _ln_ref(x, gamma, beta, eps=1e-5):
    mu = jnp.mean(x, axis=-1, keepdims=True)
    var = jnp.mean((x - mu) ** 2, axis=-1, keepdims=True)
    return (x - mu) * jax.lax.rsqrt(var + eps) * gamma + beta


def reference_forward(x, p):
    h = x @ p["w1"] + p["b1"]
    h = _ln_ref(h, p["g1"], p["be1"])
    h = _gelu(h, False)
    h = h @ p["w2"] + p["b2"]
    h = _ln_ref(h, p["g2"], p["be2"])
    h = _gelu(h, False)
    h = h @ p["w3"] + p["b3"]
    h = _gelu(h, False)
    return h @ p["w4"] + p["b4"]


# ---------------------------------------------------------------------------
# main
# ---------------------------------------------------------------------------

if __name__ == "__main__":
    features_in = 128
    features_out = 32
    batch = 200   # deliberately not a tile multiple -> exercises batch padding/slicing

    key = jax.random.PRNGKey(0)
    kx, kp = jax.random.split(key)
    x = jax.random.normal(kx, (batch, features_in), jnp.float32)
    params = init_params(kp, features_in, features_out)
    ref = reference_forward(x, params)

    # 1) strict f32 MXU-operand path (parity validation: exact GELU, f32 output)
    packed_f32 = pack_params(params, compute_dtype=jnp.float32)
    out_f32 = jax.block_until_ready(dense_layers_forward(x, packed_f32))
    assert out_f32.shape == (batch, features_out)
    assert jnp.allclose(out_f32, ref, atol=2e-4, rtol=2e-4), "f32 kernel mismatch vs reference"

    # 2) bf16 MXU operands, f32 accumulation / LayerNorm / GELU, f32 output
    packed_bf16 = pack_params(params, compute_dtype=jnp.bfloat16)
    out_bf16 = jax.block_until_ready(dense_layers_forward(x, packed_bf16))
    assert out_bf16.shape == (batch, features_out)
    assert jnp.allclose(out_bf16, ref, atol=3e-2, rtol=3e-2), "bf16 kernel mismatch vs reference"

    # 3) fast path: bf16 operands + tanh-approx GELU (EUP) + bf16 output (looser tol)
    out_fast = jax.block_until_ready(
        dense_layers_forward(x, packed_bf16, approx_gelu=True, out_dtype=jnp.bfloat16))
    assert out_fast.shape == (batch, features_out)
    assert jnp.allclose(out_fast.astype(jnp.float32), ref, atol=8e-2, rtol=8e-2), \
        "fast-path kernel mismatch vs reference"

    print("KERNEL_OK")
</pallas_src>

<mosaic_0001>
module attributes {stable_mosaic.version = 11 : i64} {
  func.func @dense_layers_kernel(%arg0: i32, %arg1: memref<256x128xf32, #tpu.memory_space<vmem>>, %arg2: memref<128x128xf32, #tpu.memory_space<vmem>>, %arg3: memref<8x128xf32, #tpu.memory_space<vmem>>, %arg4: memref<128x128xf32, #tpu.memory_space<vmem>>, %arg5: memref<8x128xf32, #tpu.memory_space<vmem>>, %arg6: memref<128x128xf32, #tpu.memory_space<vmem>>, %arg7: memref<8x128xf32, #tpu.memory_space<vmem>>, %arg8: memref<128x128xf32, #tpu.memory_space<vmem>>, %arg9: memref<8x128xf32, #tpu.memory_space<vmem>>, %arg10: memref<256x128xf32, #tpu.memory_space<vmem>>) attributes {dimension_semantics = [#tpu.dimension_semantics<parallel>], iteration_bounds = array<i64: 1>, scalar_prefetch = 0 : i64, scratch_operands = 0 : i64, tpu.core_type = #tpu.core_type<tc>, window_params = [{transform_indices = @transform_0, window_bounds = array<i64: 256, 128>}, {pipeline_mode = #tpu.pipeline_mode<synchronous>, transform_indices = @transform_1, window_bounds = array<i64: 128, 128>}, {pipeline_mode = #tpu.pipeline_mode<synchronous>, transform_indices = @transform_2, window_bounds = array<i64: 8, 128>}, {pipeline_mode = #tpu.pipeline_mode<synchronous>, transform_indices = @transform_3, window_bounds = array<i64: 128, 128>}, {pipeline_mode = #tpu.pipeline_mode<synchronous>, transform_indices = @transform_4, window_bounds = array<i64: 8, 128>}, {pipeline_mode = #tpu.pipeline_mode<synchronous>, transform_indices = @transform_5, window_bounds = array<i64: 128, 128>}, {pipeline_mode = #tpu.pipeline_mode<synchronous>, transform_indices = @transform_6, window_bounds = array<i64: 8, 128>}, {pipeline_mode = #tpu.pipeline_mode<synchronous>, transform_indices = @transform_7, window_bounds = array<i64: 128, 128>}, {pipeline_mode = #tpu.pipeline_mode<synchronous>, transform_indices = @transform_8, window_bounds = array<i64: 8, 128>}, {transform_indices = @transform_9, window_bounds = array<i64: 256, 128>}]} {
    %c0 = arith.constant 0 : index
    %c0_0 = arith.constant 0 : index
    %0 = vector.load %arg1[%c0, %c0_0] : memref<256x128xf32, #tpu.memory_space<vmem>>, vector<256x128xf32>
    %c0_1 = arith.constant 0 : index
    %c0_2 = arith.constant 0 : index
    %1 = vector.load %arg3[%c0_1, %c0_2] : memref<8x128xf32, #tpu.memory_space<vmem>>, vector<8x128xf32>
    %c0_3 = arith.constant 0 : index
    %c0_4 = arith.constant 0 : index
    %2 = vector.load %arg2[%c0_3, %c0_4] : memref<128x128xf32, #tpu.memory_space<vmem>>, vector<128x128xf32>
    %cst = arith.constant dense<0.000000e+00> : vector<256x128xf32>
    %3 = tpu.matmul %0, %2, %cst {dimension_numbers = #tpu.dot_dimension_numbers<[1], [0], [0], [1], [0, 0, 1, 1], [], []>} : vector<256x128xf32>, vector<128x128xf32>, vector<256x128xf32> -> vector<256x128xf32>
    %4 = vector.extract_strided_slice %1 {offsets = [0, 0], sizes = [1, 128], strides = [1, 1]} : vector<8x128xf32> to vector<1x128xf32>
    %5 = vector.broadcast %4 : vector<1x128xf32> to vector<256x128xf32>
    %6 = arith.addf %3, %5 : vector<256x128xf32>
    %7 = vector.extract_strided_slice %1 {offsets = [1, 0], sizes = [1, 128], strides = [1, 1]} : vector<8x128xf32> to vector<1x128xf32>
    %8 = vector.extract_strided_slice %1 {offsets = [2, 0], sizes = [1, 128], strides = [1, 1]} : vector<8x128xf32> to vector<1x128xf32>
    %cst_5 = arith.constant dense<0.000000e+00> : vector<256xf32>
    %9 = vector.multi_reduction <add>, %6, %cst_5 [1] : vector<256x128xf32> to vector<256xf32>
    %10 = vector.shape_cast %9 : vector<256xf32> to vector<256x1xf32>
    %cst_6 = arith.constant 7.812500e-03 : f32
    %11 = vector.broadcast %cst_6 : f32 to vector<256x1xf32>
    %12 = arith.mulf %10, %11 : vector<256x1xf32>
    %13 = vector.broadcast %12 : vector<256x1xf32> to vector<256x128xf32>
    %14 = arith.subf %6, %13 : vector<256x128xf32>
    %15 = arith.mulf %14, %14 : vector<256x128xf32>
    %cst_7 = arith.constant dense<0.000000e+00> : vector<256xf32>
    %16 = vector.multi_reduction <add>, %15, %cst_7 [1] : vector<256x128xf32> to vector<256xf32>
    %17 = vector.shape_cast %16 : vector<256xf32> to vector<256x1xf32>
    %cst_8 = arith.constant 7.812500e-03 : f32
    %18 = vector.broadcast %cst_8 : f32 to vector<256x1xf32>
    %19 = arith.mulf %17, %18 : vector<256x1xf32>
    %cst_9 = arith.constant 9.99999974E-6 : f32
    %20 = vector.broadcast %cst_9 : f32 to vector<256x1xf32>
    %21 = arith.addf %19, %20 : vector<256x1xf32>
    %22 = math.rsqrt %21 : vector<256x1xf32>
    %23 = vector.broadcast %22 : vector<256x1xf32> to vector<256x128xf32>
    %24 = arith.mulf %14, %23 : vector<256x128xf32>
    %25 = vector.broadcast %7 : vector<1x128xf32> to vector<256x128xf32>
    %26 = arith.mulf %24, %25 : vector<256x128xf32>
    %27 = vector.broadcast %8 : vector<1x128xf32> to vector<256x128xf32>
    %28 = arith.addf %26, %27 : vector<256x128xf32>
    %cst_10 = arith.constant 5.000000e-01 : f32
    %29 = vector.broadcast %cst_10 : f32 to vector<256x128xf32>
    %30 = arith.mulf %29, %28 : vector<256x128xf32>
    %cst_11 = arith.constant 0.707106769 : f32
    %31 = vector.broadcast %cst_11 : f32 to vector<256x128xf32>
    %32 = arith.mulf %28, %31 : vector<256x128xf32>
    %33 = math.erf %32 : vector<256x128xf32>
    %cst_12 = arith.constant 1.000000e+00 : f32
    %34 = vector.broadcast %cst_12 : f32 to vector<256x128xf32>
    %35 = arith.addf %34, %33 : vector<256x128xf32>
    %36 = arith.mulf %30, %35 : vector<256x128xf32>
    %c0_13 = arith.constant 0 : index
    %c0_14 = arith.constant 0 : index
    %37 = vector.load %arg5[%c0_13, %c0_14] : memref<8x128xf32, #tpu.memory_space<vmem>>, vector<8x128xf32>
    %c0_15 = arith.constant 0 : index
    %c0_16 = arith.constant 0 : index
    %38 = vector.load %arg4[%c0_15, %c0_16] : memref<128x128xf32, #tpu.memory_space<vmem>>, vector<128x128xf32>
    %cst_17 = arith.constant dense<0.000000e+00> : vector<256x128xf32>
    %39 = tpu.matmul %36, %38, %cst_17 {dimension_numbers = #tpu.dot_dimension_numbers<[1], [0], [0], [1], [0, 0, 1, 1], [], []>} : vector<256x128xf32>, vector<128x128xf32>, vector<256x128xf32> -> vector<256x128xf32>
    %40 = vector.extract_strided_slice %37 {offsets = [0, 0], sizes = [1, 128], strides = [1, 1]} : vector<8x128xf32> to vector<1x128xf32>
    %41 = vector.broadcast %40 : vector<1x128xf32> to vector<256x128xf32>
    %42 = arith.addf %39, %41 : vector<256x128xf32>
    %43 = vector.extract_strided_slice %37 {offsets = [1, 0], sizes = [1, 128], strides = [1, 1]} : vector<8x128xf32> to vector<1x128xf32>
    %44 = vector.extract_strided_slice %37 {offsets = [2, 0], sizes = [1, 128], strides = [1, 1]} : vector<8x128xf32> to vector<1x128xf32>
    %cst_18 = arith.constant dense<0.000000e+00> : vector<256xf32>
    %45 = vector.multi_reduction <add>, %42, %cst_18 [1] : vector<256x128xf32> to vector<256xf32>
    %46 = vector.shape_cast %45 : vector<256xf32> to vector<256x1xf32>
    %cst_19 = arith.constant 1.562500e-02 : f32
    %47 = vector.broadcast %cst_19 : f32 to vector<256x1xf32>
    %48 = arith.mulf %46, %47 : vector<256x1xf32>
    %49 = vector.broadcast %48 : vector<256x1xf32> to vector<256x128xf32>
    %50 = arith.subf %42, %49 : vector<256x128xf32>
    %51 = tpu.iota {dimensions = array<i32: 1>} : vector<1x128xi32>
    %c64_i32 = arith.constant 64 : i32
    %52 = vector.broadcast %c64_i32 : i32 to vector<1x128xi32>
    %53 = arith.cmpi slt, %51, %52 : vector<1x128xi32>
    %cst_20 = arith.constant 0.000000e+00 : f32
    %54 = vector.shape_cast %53 : vector<1x128xi1> to vector<1x128xi1>
    %55 = vector.broadcast %54 : vector<1x128xi1> to vector<256x128xi1>
    %56 = vector.broadcast %cst_20 : f32 to vector<256x128xf32>
    %57 = arith.select %55, %50, %56 : vector<256x128xi1>, vector<256x128xf32>
    %58 = arith.mulf %57, %57 : vector<256x128xf32>
    %cst_21 = arith.constant dense<0.000000e+00> : vector<256xf32>
    %59 = vector.multi_reduction <add>, %58, %cst_21 [1] : vector<256x128xf32> to vector<256xf32>
    %60 = vector.shape_cast %59 : vector<256xf32> to vector<256x1xf32>
    %cst_22 = arith.constant 1.562500e-02 : f32
    %61 = vector.broadcast %cst_22 : f32 to vector<256x1xf32>
    %62 = arith.mulf %60, %61 : vector<256x1xf32>
    %cst_23 = arith.constant 9.99999974E-6 : f32
    %63 = vector.broadcast %cst_23 : f32 to vector<256x1xf32>
    %64 = arith.addf %62, %63 : vector<256x1xf32>
    %65 = math.rsqrt %64 : vector<256x1xf32>
    %66 = vector.broadcast %65 : vector<256x1xf32> to vector<256x128xf32>
    %67 = arith.mulf %57, %66 : vector<256x128xf32>
    %68 = vector.broadcast %43 : vector<1x128xf32> to vector<256x128xf32>
    %69 = arith.mulf %67, %68 : vector<256x128xf32>
    %70 = vector.broadcast %44 : vector<1x128xf32> to vector<256x128xf32>
    %71 = arith.addf %69, %70 : vector<256x128xf32>
    %cst_24 = arith.constant 5.000000e-01 : f32
    %72 = vector.broadcast %cst_24 : f32 to vector<256x128xf32>
    %73 = arith.mulf %72, %71 : vector<256x128xf32>
    %cst_25 = arith.constant 0.707106769 : f32
    %74 = vector.broadcast %cst_25 : f32 to vector<256x128xf32>
    %75 = arith.mulf %71, %74 : vector<256x128xf32>
    %76 = math.erf %75 : vector<256x128xf32>
    %cst_26 = arith.constant 1.000000e+00 : f32
    %77 = vector.broadcast %cst_26 : f32 to vector<256x128xf32>
    %78 = arith.addf %77, %76 : vector<256x128xf32>
    %79 = arith.mulf %73, %78 : vector<256x128xf32>
    %c0_27 = arith.constant 0 : index
    %c0_28 = arith.constant 0 : index
    %80 = vector.load %arg6[%c0_27, %c0_28] : memref<128x128xf32, #tpu.memory_space<vmem>>, vector<128x128xf32>
    %cst_29 = arith.constant dense<0.000000e+00> : vector<256x128xf32>
    %81 = tpu.matmul %79, %80, %cst_29 {dimension_numbers = #tpu.dot_dimension_numbers<[1], [0], [0], [1], [0, 0, 1, 1], [], []>} : vector<256x128xf32>, vector<128x128xf32>, vector<256x128xf32> -> vector<256x128xf32>
    %c0_30 = arith.constant 0 : index
    %c0_31 = arith.constant 0 : index
    %82 = vector.load %arg7[%c0_30, %c0_31] : memref<8x128xf32, #tpu.memory_space<vmem>>, vector<1x128xf32>
    %83 = vector.broadcast %82 : vector<1x128xf32> to vector<256x128xf32>
    %84 = arith.addf %81, %83 : vector<256x128xf32>
    %cst_32 = arith.constant 5.000000e-01 : f32
    %85 = vector.broadcast %cst_32 : f32 to vector<256x128xf32>
    %86 = arith.mulf %85, %84 : vector<256x128xf32>
    %cst_33 = arith.constant 0.707106769 : f32
    %87 = vector.broadcast %cst_33 : f32 to vector<256x128xf32>
    %88 = arith.mulf %84, %87 : vector<256x128xf32>
    %89 = math.erf %88 : vector<256x128xf32>
    %cst_34 = arith.constant 1.000000e+00 : f32
    %90 = vector.broadcast %cst_34 : f32 to vector<256x128xf32>
    %91 = arith.addf %90, %89 : vector<256x128xf32>
    %92 = arith.mulf %86, %91 : vector<256x128xf32>
    %c0_35 = arith.constant 0 : index
    %c0_36 = arith.constant 0 : index
    %93 = vector.load %arg8[%c0_35, %c0_36] : memref<128x128xf32, #tpu.memory_space<vmem>>, vector<128x128xf32>
    %cst_37 = arith.constant dense<0.000000e+00> : vector<256x128xf32>
    %94 = tpu.matmul %92, %93, %cst_37 {dimension_numbers = #tpu.dot_dimension_numbers<[1], [0], [0], [1], [0, 0, 1, 1], [], []>} : vector<256x128xf32>, vector<128x128xf32>, vector<256x128xf32> -> vector<256x128xf32>
    %c0_38 = arith.constant 0 : index
    %c0_39 = arith.constant 0 : index
    %95 = vector.load %arg9[%c0_38, %c0_39] : memref<8x128xf32, #tpu.memory_space<vmem>>, vector<1x128xf32>
    %96 = vector.broadcast %95 : vector<1x128xf32> to vector<256x128xf32>
    %97 = arith.addf %94, %96 : vector<256x128xf32>
    %c0_40 = arith.constant 0 : index
    %c0_41 = arith.constant 0 : index
    %98 = vector.load %arg10[%c0_40, %c0_41] : memref<256x128xf32, #tpu.memory_space<vmem>>, vector<256x128xf32>
    tpu.vector_store %arg10[%c0_40, %c0_41], %97 {strides = array<i32>} : memref<256x128xf32, #tpu.memory_space<vmem>>, vector<256x128xf32>,
    return
  }
  func.func @transform_0(%arg0: i32) -> (i32, i32) {
    %c0_i32 = arith.constant 0 : i32
    %c0_i32_0 = arith.constant 0 : i32
    return %arg0, %c0_i32 : i32, i32
  }
  func.func @transform_1(%arg0: i32) -> (i32, i32) {
    %c0_i32 = arith.constant 0 : i32
    %c0_i32_0 = arith.constant 0 : i32
    %c0_i32_1 = arith.constant 0 : i32
    return %c0_i32, %c0_i32_0 : i32, i32
  }
  func.func @transform_2(%arg0: i32) -> (i32, i32) {
    %c0_i32 = arith.constant 0 : i32
    %c0_i32_0 = arith.constant 0 : i32
    %c0_i32_1 = arith.constant 0 : i32
    return %c0_i32, %c0_i32_0 : i32, i32
  }
  func.func @transform_3(%arg0: i32) -> (i32, i32) {
    %c0_i32 = arith.constant 0 : i32
    %c0_i32_0 = arith.constant 0 : i32
    %c0_i32_1 = arith.constant 0 : i32
    return %c0_i32, %c0_i32_0 : i32, i32
  }
  func.func @transform_4(%arg0: i32) -> (i32, i32) {
    %c0_i32 = arith.constant 0 : i32
    %c0_i32_0 = arith.constant 0 : i32
    %c0_i32_1 = arith.constant 0 : i32
    return %c0_i32, %c0_i32_0 : i32, i32
  }
  func.func @transform_5(%arg0: i32) -> (i32, i32) {
    %c0_i32 = arith.constant 0 : i32
    %c0_i32_0 = arith.constant 0 : i32
    %c0_i32_1 = arith.constant 0 : i32
    return %c0_i32, %c0_i32_0 : i32, i32
  }
  func.func @transform_6(%arg0: i32) -> (i32, i32) {
    %c0_i32 = arith.constant 0 : i32
    %c0_i32_0 = arith.constant 0 : i32
    %c0_i32_1 = arith.constant 0 : i32
    return %c0_i32, %c0_i32_0 : i32, i32
  }
  func.func @transform_7(%arg0: i32) -> (i32, i32) {
    %c0_i32 = arith.constant 0 : i32
    %c0_i32_0 = arith.constant 0 : i32
    %c0_i32_1 = arith.constant 0 : i32
    return %c0_i32, %c0_i32_0 : i32, i32
  }
  func.func @transform_8(%arg0: i32) -> (i32, i32) {
    %c0_i32 = arith.constant 0 : i32
    %c0_i32_0 = arith.constant 0 : i32
    %c0_i32_1 = arith.constant 0 : i32
    return %c0_i32, %c0_i32_0 : i32, i32
  }
  func.func @transform_9(%arg0: i32) -> (i32, i32) {
    %c0_i32 = arith.constant 0 : i32
    %c0_i32_0 = arith.constant 0 : i32
    return %arg0, %c0_i32 : i32, i32
  }
}

</mosaic_0001>

<bundles_post_ra>
// kernel: tpu_custom_call.1
= control target key start
LH: loop header
LB: loop body
LE: loop exit
PB: predicated region body
PF: predicated region fallthrough
CT: control target
= control target key end

     0   :  { %14 = vsyncpa [#allocation3], 0  ;;  %s12155_s0 = inlined_call_operand.hbm [shape: f32[256,128], index: 0, kind: input, shape index: {}]   ;;  %s12156_s1 = inlined_call_operand.hbm [shape: f32[128,128], index: 1, kind: input, shape index: {}]   ;;  %s12157_s2 = inlined_call_operand.hbm [shape: f32[8,128], index: 2, kind: input, shape index: {}]   ;;  %s12158_s3 = inlined_call_operand.hbm [shape: f32[128,128], index: 3, kind: input, shape index: {}]   ;;  %s12159_s4 = inlined_call_operand.hbm [shape: f32[8,128], index: 4, kind: input, shape index: {}]   ;;  %s12160_s5 = inlined_call_operand.hbm [shape: f32[128,128], index: 5, kind: input, shape index: {}]   ;;  %s12161_s6 = inlined_call_operand.hbm [shape: f32[8,128], index: 6, kind: input, shape index: {}]   ;;  %s12162_s7 = inlined_call_operand.hbm [shape: f32[128,128], index: 7, kind: input, shape index: {}]   ;;  %s12163_s8 = inlined_call_operand.hbm [shape: f32[8,128], index: 8, kind: input, shape index: {}]   ;;  %s12164_s9 = inlined_call_operand.hbm [shape: f32[256,128], index: 9, kind: output, shape index: {}]  }
   0x1   :  { %15 = vsyncpa [#allocation6], 0 }
   0x2   :  { %16 = vsyncpa [#allocation9], 0 }
   0x3   :  { %17 = vsyncpa [#allocation12], 0 }
   0x4   :  { %18 = vsyncpa [#allocation15], 0 }
   0x5   :  { %19 = vsyncpa [#allocation4], 0  ;;  %s37_s11 = sshll.u32 %s12156_s1, 4  ;;  %s7138_s12 = smov [#allocation5]   ;;  %s38_s11 = int_to_ptr.hbm [resolvable:$true] %s37_s11 }
   0x6   :  { %s39_s13 = sshll.u32 %s7138_s12, 4  ;;  %s61_s16 = sshll.u32 %s12158_s3, 4  ;;  %s40_s13 = int_to_ptr.vmem [resolvable:$true] %s39_s13  ;;  %s62_s16 = int_to_ptr.hbm [resolvable:$true] %s61_s16 }
   0x7   :  { %s7139_s17 = smov 128   ;;  %s7140_s18 = smov 8  }
   0x8   :  { %45 = dma.hbm_to_vmem [thread:$0]  %s38_s11, 2048, %s40_s13, [#allocation6], %s7139_s17, %s7139_s17, %s7140_s18  }
   0x9   :  { %s7141_s19 = smov [#allocation8]   ;;  %s85_s1 = sshll.u32 %s12160_s5, 4  ;;  %s86_s1 = int_to_ptr.hbm [resolvable:$true] %s85_s1 }
   0xa   :  { %s63_s20 = sshll.u32 %s7141_s19, 4  ;;  %s109_s24 = sshll.u32 %s12162_s7, 4  ;;  %s64_s20 = int_to_ptr.vmem [resolvable:$true] %s63_s20  ;;  %s110_s24 = int_to_ptr.hbm [resolvable:$true] %s109_s24 }
   0xb   :  { %69 = dma.hbm_to_vmem [thread:$0]  %s62_s16, 2048, %s64_s20, [#allocation9], %s7139_s17, %s7139_s17, %s7140_s18  }
   0xc   :  { %s7142_s25 = smov [#allocation11]   ;;  %s7143_s27 = smov [#allocation14]  }
   0xd   :  { %s87_s26 = sshll.u32 %s7142_s25, 4  ;;  %s111_s5 = sshll.u32 %s7143_s27, 4  ;;  %s88_s26 = int_to_ptr.vmem [resolvable:$true] %s87_s26  ;;  %s112_s5 = int_to_ptr.vmem [resolvable:$true] %s111_s5 }
   0xe   :  { %93 = dma.hbm_to_vmem [thread:$0]  %s86_s1, 2048, %s88_s26, [#allocation12], %s7139_s17, %s7139_s17, %s7140_s18  }
   0xf   :  { %s24_s30 = sshll.u32 %s12155_s0, 4  ;;  %s51_s11 = sshll.u32 %s12157_s2, 4  ;;  %s25_s30 = int_to_ptr.hbm [resolvable:$true] %s24_s30  ;;  %s52_s11 = int_to_ptr.hbm [resolvable:$true] %s51_s11 }
  0x10   :  { %117 = dma.hbm_to_vmem [thread:$0]  %s110_s24, 2048, %s112_s5, [#allocation15], %s7139_s17, %s7139_s17, %s7140_s18  }
  0x11   :  { %s7144_s12 = smov [#allocation2]   ;;  %s7145_s14 = smov [#allocation7]  }
  0x12   :  { %s26_s13 = sshll.u32 %s7144_s12, 4  ;;  %s53_s0 = sshll.u32 %s7145_s14, 4  ;;  %s27_s13 = int_to_ptr.vmem [resolvable:$true] %s26_s13  ;;  %s54_s0 = int_to_ptr.vmem [resolvable:$true] %s53_s0 }
  0x13   :  { %32 = dma.hbm_to_vmem [thread:$0]  %s25_s30, 4096, %s27_s13, [#allocation3], %s7139_s17, %s7139_s17, %s7140_s18  }
  0x14   :  { %s75_s19 = sshll.u32 %s12159_s4, 4  ;;  %s99_s2 = sshll.u32 %s12161_s6, 4  ;;  %s76_s19 = int_to_ptr.hbm [resolvable:$true] %s75_s19  ;;  %s100_s2 = int_to_ptr.hbm [resolvable:$true] %s99_s2 }
  0x15   :  { %56 = dma.hbm_to_vmem [thread:$0]  %s52_s11, 128, %s54_s0, [#allocation6]  }
  0x16   :  { %s7146_s22 = smov [#allocation10]   ;;  %s7147_s3 = smov [#allocation13]  }
  0x17   :  { %s77_s1 = sshll.u32 %s7146_s22, 4  ;;  %s101_s23 = sshll.u32 %s7147_s3, 4  ;;  %s78_s1 = int_to_ptr.vmem [resolvable:$true] %s77_s1  ;;  %s102_s23 = int_to_ptr.vmem [resolvable:$true] %s101_s23 }
  0x18   :  { %80 = dma.hbm_to_vmem [thread:$0]  %s76_s19, 128, %s78_s1, [#allocation9]  }
  0x19   :  { %s123_s26 = sshll.u32 %s12163_s8, 4  ;;  %s7148_s4 = smov [#allocation16]   ;;  %s124_s26 = int_to_ptr.hbm [resolvable:$true] %s123_s26 }
  0x1a   :  { %104 = dma.hbm_to_vmem [thread:$0]  %s100_s2, 128, %s102_s23, [#allocation12]  }
  0x1b   :  { %s125_s27 = sshll.u32 %s7148_s4, 4  ;;  %s126_s27 = int_to_ptr.vmem [resolvable:$true] %s125_s27 }
  0x1c   :  { %128 = dma.hbm_to_vmem [thread:$0]  %s124_s26, 128, %s126_s27, [#allocation15]  }
  0x1d   :  { %7126 = dma.done.wait [#allocation3], 4096  }
  0x1e   :  { %7127 = vsyncadd [#allocation3], 4294963200 }
  0x1f   :  { %7128 = dma.done.wait [#allocation6], 2176  }
  0x20   :  { %7129 = vsyncadd [#allocation6], 4294965120 }
  0x21   :  { %7130 = dma.done.wait [#allocation9], 2176  }
  0x22   :  { %7131 = vsyncadd [#allocation9], 4294965120 }
  0x23   :  { %7132 = dma.done.wait [#allocation12], 2176  }
  0x24   :  { %7133 = vsyncadd [#allocation12], 4294965120 }
  0x25   :  { %7134 = dma.done.wait [#allocation15], 2176  }
  0x26   :  { %7135 = vsyncadd [#allocation15], 4294965120  ;;  %v213_v0 = vld [vmem:[#allocation5 + $0x78] sm:$0xff]  ;;  %v212_v1 = vld [vmem:[#allocation5 + $0x70] sm:$0xff]  ;;  %s7149_s6 = smov [#allocation17]   ;;  %s6432_s29 = sshll.u32 %s12164_s9, 4  ;;  %s6433_s29 = int_to_ptr.hbm [resolvable:$true] %s6432_s29 }
  0x27   :  { %215 = vmatpush.msra.mxu0 %v213_v0  ;;  %v211_v2 = vld [vmem:[#allocation5 + $0x68] sm:$0xff]  ;;  %v210_v3 = vld [vmem:[#allocation5 + $0x60] sm:$0xff]  ;;  %v209_v4 = vld [vmem:[#allocation5 + $0x58] sm:$0xff]  ;;  %s6430_s8 = sshll.u32 %s7149_s6, 4  ;;  %s6431_s8 = int_to_ptr.vmem [resolvable:$true] %s6430_s8 }
  0x28   :  { %v208_v5 = vld [vmem:[#allocation5 + $0x50] sm:$0xff]  ;;  %v207_v6 = vld [vmem:[#allocation5 + $0x48] sm:$0xff]  ;;  %v206_v7 = vld [vmem:[#allocation5 + $0x40] sm:$0xff] }
  0x29   :  { %216 = vmatpush.msra.mxu0 %v212_v1  ;;  %v205_v8 = vld [vmem:[#allocation5 + $0x38] sm:$0xff]  ;;  %v204_v9 = vld [vmem:[#allocation5 + $0x30] sm:$0xff]  ;;  %v203_v10 = vld [vmem:[#allocation5 + $0x28] sm:$0xff] }
  0x2a   :  { %v202_v11 = vld [vmem:[#allocation5 + $0x20] sm:$0xff]  ;;  %v201_v12 = vld [vmem:[#allocation5 + $0x18] sm:$0xff]  ;;  %v200_v13 = vld [vmem:[#allocation5 + $0x10] sm:$0xff] }
  0x2b   :  { %217 = vmatpush.msra.mxu0 %v211_v2  ;;  %v199_v14 = vld [vmem:[#allocation5 + $0x8] sm:$0xff]  ;;  %v198_v15 = vld [vmem:[#allocation5] sm:$0xff]  ;;  %v167_v18 = vld [vmem:[#allocation2 + $0x10] sm:$0xff] }
  0x2c   :  { %v165_v16 = vld [vmem:[#allocation2] sm:$0xff]  ;;  %v166_v17 = vld [vmem:[#allocation2 + $0x8] sm:$0xff]  ;;  %v168_v19 = vld [vmem:[#allocation2 + $0x18] sm:$0xff] }
  0x2d   :  { %218 = vmatpush.msra.mxu0 %v210_v3  ;;  %v169_v20 = vld [vmem:[#allocation2 + $0x20] sm:$0xff]  ;;  %v170_v21 = vld [vmem:[#allocation2 + $0x28] sm:$0xff]  ;;  %v171_v22 = vld [vmem:[#allocation2 + $0x30] sm:$0xff] }
  0x2e   :  { %v172_v23 = vld [vmem:[#allocation2 + $0x38] sm:$0xff]  ;;  %v173_v24 = vld [vmem:[#allocation2 + $0x40] sm:$0xff]  ;;  %v174_v25 = vld [vmem:[#allocation2 + $0x48] sm:$0xff] }
  0x2f   :  { %219 = vmatpush.msra.mxu0 %v209_v4  ;;  %v7242_v26 = vld [vmem:[#allocation7] sm:$0xff]  ;;  %v175_v27 = vld [vmem:[#allocation2 + $0x50] sm:$0xff]  ;;  %v176_v31 = vld [vmem:[#allocation2 + $0x58] sm:$0xff] }
  0x30   :  { %v7245_v28 = vperm.slane %v7242_v26, 0  ;;  %v177_v34 = vld [vmem:[#allocation2 + $0x60] sm:$0xff]  ;;  %v178_v37 = vld [vmem:[#allocation2 + $0x68] sm:$0xff]  ;;  %v179_v46 = vld [vmem:[#allocation2 + $0x70] sm:$0xff] }
  0x31   :  { %220 = vmatpush.msra.mxu0 %v208_v5  ;;  %v180_v47 = vld [vmem:[#allocation2 + $0x78] sm:$0xff]  ;;  %v181_v50 = vld [vmem:[#allocation2 + $0x80] sm:$0xff]  ;;  %v182_v56 = vld [vmem:[#allocation2 + $0x88] sm:$0xff] }
  0x32   :  { %v183_v63 = vld [vmem:[#allocation2 + $0x90] sm:$0xff]  ;;  %v184_v4 = vld [vmem:[#allocation2 + $0x98] sm:$0xff] }
  0x33   :  { %221 = vmatpush.msra.mxu0 %v207_v6 }
  0x35   :  { %222 = vmatpush.msra.mxu0 %v206_v7 }
  0x37   :  { %223 = vmatpush.msra.mxu0 %v205_v8 }
  0x39   :  { %224 = vmatpush.msra.mxu0 %v204_v9 }
  0x3b   :  { %225 = vmatpush.msra.mxu0 %v203_v10 }
  0x3d   :  { %226 = vmatpush.msra.mxu0 %v202_v11  ;;  %v185_v11 = vld [vmem:[#allocation2 + $0xa0] sm:$0xff] }
  0x3f   :  { %227 = vmatpush.msra.mxu0 %v201_v12 }
  0x41   :  { %228 = vmatpush.msra.mxu0 %v200_v13 }
  0x43   :  { %229 = vmatpush.msra.mxu0 %v199_v14 }
  0x45   :  { %230 = vmatpush.msra.mxu0 %v198_v15 }
  0x46   :  { %231 = vmatmul.f32.vlgmr.msra.gmra.mxu0 %v165_v16 }
  0x4e   :  { %234 = vmatmul.f32.gmra.mxu0 %v166_v17 }
  0x56   :  { %237 = vmatmul.f32.gmra.mxu0 %v167_v18 }
  0x5e   :  { %240 = vmatmul.f32.gmra.mxu0 %v168_v19 }
  0x66   :  { %243 = vmatmul.f32.gmra.mxu0 %v169_v20 }
  0x6e   :  { %246 = vmatmul.f32.gmra.mxu0 %v170_v21 }
  0x76   :  { %249 = vmatmul.f32.gmra.mxu0 %v171_v22 }
  0x7e   :  { %252 = vmatmul.f32.gmra.mxu0 %v172_v23 }
  0x86   :  { %255 = vmatmul.f32.gmra.mxu0 %v173_v24 }
  0x8e   :  { %258 = vmatmul.f32.gmra.mxu0 %v174_v25 }
  0x96   :  { %261 = vmatmul.f32.gmra.mxu0 %v175_v27 }
  0x9e   :  { %264 = vmatmul.f32.gmra.mxu0 %v176_v31 }
  0xa6   :  { %267 = vmatmul.f32.gmra.mxu0 %v177_v34 }
  0xae   :  { %270 = vmatmul.f32.gmra.mxu0 %v178_v37 }
  0xb6   :  { %273 = vmatmul.f32.gmra.mxu0 %v179_v46 }
  0xbe   :  { %276 = vmatmul.f32.gmra.mxu0 %v180_v47 }
  0xc3   :  { %v232_v29 = vpop.f32.mrf.mxu0 }
  0xc4   :  { %v233_v30 = vadd.f32 %v232_v29, %v7245_v28 }
  0xc6   :  { %328 = vadd.xlane.f32.xlu0 %v233_v30  ;;  %279 = vmatmul.f32.gmra.mxu0 %v181_v50 }
  0xcb   :  { %v235_v32 = vpop.f32.mrf.mxu0 }
  0xcc   :  { %v236_v33 = vadd.f32 %v235_v32, %v7245_v28 }
  0xce   :  { %330 = vadd.xlane.f32.xlu0 %v236_v33  ;;  %282 = vmatmul.f32.gmra.mxu0 %v182_v56  ;;  %v2458_v56 = vld [vmem:[#allocation8 + $0x78] sm:$0xff] }
  0xcf   :  { %2460 = vmatpush.msra.mxu1 %v2458_v56 }
  0xd3   :  { %v238_v35 = vpop.f32.mrf.mxu0 }
  0xd4   :  { %v239_v36 = vadd.f32 %v238_v35, %v7245_v28 }
  0xd6   :  { %332 = vadd.xlane.f32.xlu1 %v239_v36  ;;  %285 = vmatmul.f32.gmra.mxu0 %v183_v63 }
  0xdb   :  { %v241_v38 = vpop.f32.mrf.mxu0 }
  0xdc   :  { %v242_v39 = vadd.f32 %v241_v38, %v7245_v28 }
  0xde   :  { %334 = vadd.xlane.f32.xlu1 %v242_v39  ;;  %288 = vmatmul.f32.gmra.mxu0 %v184_v4 }
  0xe3   :  { %v244_v40 = vpop.f32.mrf.mxu0 }
  0xe4   :  { %v245_v41 = vadd.f32 %v244_v40, %v7245_v28 }
  0xe6   :  { %336 = vadd.xlane.f32.xlu2 %v245_v41  ;;  %291 = vmatmul.f32.gmra.mxu0 %v185_v11 }
  0xeb   :  { %v247_v42 = vpop.f32.mrf.mxu0 }
  0xec   :  { %v248_v43 = vadd.f32 %v247_v42, %v7245_v28 }
  0xee   :  { %338 = vadd.xlane.f32.xlu2 %v248_v43 }
  0xf3   :  { %v250_v44 = vpop.f32.mrf.mxu0 }
  0xf4   :  { %v7254_v45 = vadd.f32 %v250_v44, %v7245_v28 }
  0xf6   :  { %340 = vadd.xlane.f32.xlu1 %v7254_v45 }
  0xfb   :  { %v253_v48 = vpop.f32.mrf.mxu0 }
  0xfc   :  { %v7264_v59 = vadd.f32 %v253_v48, %v7245_v28 }
 0x103   :  { %v256_v54 = vpop.f32.mrf.mxu0 }
 0x104   :  { %v7272_v2 = vadd.f32 %v256_v54, %v7245_v28 }
 0x10b   :  { %v259_v62 = vpop.f32.mrf.mxu0 }
 0x10c   :  { %v7280_v9 = vadd.f32 %v259_v62, %v7245_v28 }
 0x113   :  { %v262_v7 = vpop.f32.mrf.mxu0 }
 0x114   :  { %v7288_v15 = vadd.f32 %v262_v7, %v7245_v28  ;;  %v2456_v7 = vld [vmem:[#allocation8 + $0x68] sm:$0xff] }
 0x11b   :  { %v265_v16 = vpop.f32.mrf.mxu0 }
 0x11c   :  { %v7296_v21 = vadd.f32 %v265_v16, %v7245_v28 }
 0x123   :  { %v268_v23 = vpop.f32.mrf.mxu0 }
 0x124   :  { %v7305_v29 = vadd.f32 %v268_v23, %v7245_v28  ;;  %v190_v23 = vld [vmem:[#allocation2 + $0xc8] sm:$0xff] }
 0x12b   :  { %v271_v31 = vpop.f32.mrf.mxu0 }
 0x12c   :  { %v7311_v32 = vadd.f32 %v271_v31, %v7245_v28 }
 0x133   :  { %v274_v34 = vpop.f32.mrf.mxu0 }
 0x139   :  { %v329_v49 = vpop.xlane.xlu0 %328 }
 0x13a   :  { %v392_v51 = vmul.f32 0.0078125, %v329_v49 }
 0x13b   :  { %v277_v44 = vpop.f32.mrf.mxu0 }
 0x13c   :  { %v7257_v52 = vsub.f32 %v233_v30, %v392_v51 }
 0x13e   :  { %v456_v53 = vmul.f32 %v7257_v52, %v7257_v52 }
 0x140   :  { %488 = vadd.xlane.f32.xlu0 %v456_v53 }
 0x141   :  { %v331_v55 = vpop.xlane.xlu0 %330 }
 0x142   :  { %v393_v57 = vmul.f32 0.0078125, %v331_v55  ;;  %v189_v55 = vld [vmem:[#allocation2 + $0xc0] sm:$0xff] }
 0x143   :  { %v7330_v4 = vpop.f32.mrf.mxu0 }
 0x144   :  { %v7261_v58 = vsub.f32 %v236_v33, %v393_v57  ;;  %v186_v33 = vld [vmem:[#allocation2 + $0xa8] sm:$0xff] }
 0x145   :  { %294 = vmatmul.f32.gmra.mxu0 %v186_v33 }
 0x146   :  { %v457_v60 = vmul.f32 %v7261_v58, %v7261_v58 }
 0x148   :  { %342 = vadd.xlane.f32.xlu0 %v7264_v59  ;;  %490 = vadd.xlane.f32.xlu2 %v457_v60 }
 0x149   :  { %v333_v61 = vpop.xlane.xlu1 %332 }
 0x14a   :  { %v394_v0 = vmul.f32 0.0078125, %v333_v61 }
 0x14c   :  { %v7269_v1 = vsub.f32 %v239_v36, %v394_v0  ;;  %v187_v36 = vld [vmem:[#allocation2 + $0xb0] sm:$0xff] }
 0x14d   :  { %297 = vmatmul.f32.gmra.mxu0 %v187_v36  ;;  %v7353_v36 = vadd.f32 %v277_v44, %v7245_v28  ;;  %v2451_v44 = vld [vmem:[#allocation8 + $0x40] sm:$0xff] }
 0x14e   :  { %v458_v3 = vmul.f32 %v7269_v1, %v7269_v1 }
 0x150   :  { %492 = vadd.xlane.f32.xlu1 %v458_v3  ;;  %344 = vadd.xlane.f32.xlu2 %v7272_v2  ;;  %v7328_v3 = vadd.f32 %v274_v34, %v7245_v28  ;;  %v2453_v34 = vld [vmem:[#allocation8 + $0x50] sm:$0xff] }
 0x151   :  { %v335_v5 = vpop.xlane.xlu1 %334 }
 0x152   :  { %v395_v6 = vmul.f32 0.0078125, %v335_v5 }
 0x154   :  { %v7277_v8 = vsub.f32 %v242_v39, %v395_v6 }
 0x156   :  { %v459_v10 = vmul.f32 %v7277_v8, %v7277_v8 }
 0x158   :  { %346 = vadd.xlane.f32.xlu1 %v7280_v9  ;;  %494 = vadd.xlane.f32.xlu0 %v459_v10  ;;  %v7334_v10 = vperm.slane %v7242_v26, 1 }
 0x159   :  { %v337_v12 = vpop.xlane.xlu2 %336 }
 0x15a   :  { %v396_v13 = vmul.f32 0.0078125, %v337_v12 }
 0x15c   :  { %v7285_v14 = vsub.f32 %v245_v41, %v396_v13  ;;  %v188_v41 = vld [vmem:[#allocation2 + $0xb8] sm:$0xff]  ;;  %v2455_v13 = vld [vmem:[#allocation8 + $0x60] sm:$0xff] }
 0x15d   :  { %300 = vmatmul.f32.gmra.mxu0 %v188_v41  ;;  %v7364_v41 = vpop.f32.mrf.mxu0 }
 0x15e   :  { %v460_v17 = vmul.f32 %v7285_v14, %v7285_v14 }
 0x160   :  { %348 = vadd.xlane.f32.xlu0 %v7288_v15  ;;  %496 = vadd.xlane.f32.xlu2 %v460_v17  ;;  %v7342_v17 = vperm.slane %v7242_v26, 2 }
 0x161   :  { %v339_v18 = vpop.xlane.xlu2 %338 }
 0x162   :  { %v397_v19 = vmul.f32 0.0078125, %v339_v18 }
 0x164   :  { %v7293_v20 = vsub.f32 %v248_v43, %v397_v19 }
 0x165   :  { %303 = vmatmul.f32.gmra.mxu0 %v189_v55 }
 0x166   :  { %v461_v22 = vmul.f32 %v7293_v20, %v7293_v20 }
 0x168   :  { %498 = vadd.xlane.f32.xlu1 %v461_v22  ;;  %350 = vadd.xlane.f32.xlu2 %v7296_v21 }
 0x169   :  { %v341_v24 = vpop.xlane.xlu1 %340 }
 0x16a   :  { %v398_v25 = vmul.f32 0.0078125, %v341_v24  ;;  %v2454_v24 = vld [vmem:[#allocation8 + $0x58] sm:$0xff] }
 0x16c   :  { %v7302_v27 = vsub.f32 %v7254_v45, %v398_v25 }
 0x16d   :  { %306 = vmatmul.f32.gmra.mxu0 %v190_v23  ;;  %v192_v23 = vld [vmem:[#allocation2 + $0xd8] sm:$0xff] }
 0x16e   :  { %v462_v30 = vmul.f32 %v7302_v27, %v7302_v27 }
 0x170   :  { %352 = vadd.xlane.f32.xlu1 %v7305_v29  ;;  %500 = vadd.xlane.f32.xlu0 %v462_v30 }
 0x178   :  { %354 = vadd.xlane.f32.xlu0 %v7311_v32 }
 0x1b3   :  { %v489_v35 = vpop.xlane.xlu0 %488 }
 0x1b4   :  { %v552_v37 = vmul.f32 0.0078125, %v489_v35 }
 0x1b6   :  { %v584_v38 = vadd.f32 1e-05, %v552_v37 }
 0x1b8   :  { %6559 = vrsqrt.f32 %v584_v38  ;;  %vm622_vm1 = vweird.f32 %v584_v38 }
 0x1bb   :  { %v491_v39 = vpop.xlane.xlu2 %490  ;;  %v343_v40 = vpop.xlane.xlu0 %342 }
 0x1bc   :  { %v553_v42 = vmul.f32 0.0078125, %v491_v39  ;;  %v399_v43 = vmul.f32 0.0078125, %v343_v40  ;;  %v2452_v40 = vld [vmem:[#allocation8 + $0x48] sm:$0xff] }
 0x1be   :  { %v6560_v45 = vpop.eup %6559  ;;  %v7314_v46 = vadd.f32 1e-05, %v553_v42  ;;  %v7317_v47 = vsub.f32 %v7264_v59, %v399_v43  ;;  %v2457_v59 = vld [vmem:[#allocation8 + $0x70] sm:$0xff] }
 0x1bf   :  { %v617_v48 = vmul.f32 %v6560_v45, %v584_v38  ;;  %vm623_vm0 = vweird.f32 %v6560_v45  ;;  %2461 = vmatpush.msra.mxu1 %v2457_v59 }
 0x1c0   :  { %6561 = vrsqrt.f32 %v7314_v46  ;;  %v463_v49 = vmul.f32 %v7317_v47, %v7317_v47  ;;  %vm624_vm2 = vmor %vm622_vm1, %vm623_vm0  ;;  %vm632_vm4 = vweird.f32 %v7314_v46 }
 0x1c1   :  { %v618_v50 = vmul.f32 %v6560_v45, %v617_v48  ;;  %2462 = vmatpush.msra.mxu1 %v2456_v7 }
 0x1c2   :  { %502 = vadd.xlane.f32.xlu2 %v463_v49 }
 0x1c3   :  { %v619_v51 = vmul.f32 0.5, %v618_v50  ;;  %v493_v53 = vpop.xlane.xlu1 %492  ;;  %v345_v54 = vpop.xlane.xlu2 %344  ;;  %2463 = vmatpush.msra.mxu1 %v2455_v13 }
 0x1c4   :  { %v554_v57 = vmul.f32 0.0078125, %v493_v53  ;;  %v400_v60 = vmul.f32 0.0078125, %v345_v54  ;;  %v2450_v53 = vld [vmem:[#allocation8 + $0x38] sm:$0xff] }
 0x1c5   :  { %v620_v61 = vsub.f32 1.5, %v619_v51  ;;  %2464 = vmatpush.msra.mxu1 %v2454_v24  ;;  %v191_v51 = vld [vmem:[#allocation2 + $0xd0] sm:$0xff]  ;;  %v2446_v24 = vld [vmem:[#allocation8 + $0x18] sm:$0xff] }
 0x1c6   :  { %v6562_v62 = vpop.eup %6561  ;;  %v7322_v63 = vadd.f32 1e-05, %v554_v57  ;;  %v7325_v0 = vsub.f32 %v7272_v2, %v400_v60  ;;  %309 = vmatmul.f32.gmra.mxu0 %v191_v51 }
 0x1c7   :  { %v621_v5 = vmul.f32 %v6560_v45, %v620_v61  ;;  %v627_v6 = vmul.f32 %v6562_v62, %v7314_v46  ;;  %vm633_vm3 = vweird.f32 %v6562_v62  ;;  %2465 = vmatpush.msra.mxu1 %v2453_v34  ;;  %v2449_v61 = vld [vmem:[#allocation8 + $0x30] sm:$0xff] }
 0x1c8   :  { %6563 = vrsqrt.f32 %v7322_v63  ;;  %v464_v2 = vmul.f32 %v7325_v0, %v7325_v0  ;;  %vm634_vm5 = vmor %vm632_vm4, %vm633_vm3  ;;  %vm642_vm7 = vweird.f32 %v7322_v63 }
 0x1c9   :  { %v625_v11 = vsel %vm624_vm2, %v6560_v45, %v621_v5  ;;  %v628_v12 = vmul.f32 %v6562_v62, %v627_v6  ;;  %2466 = vmatpush.msra.mxu1 %v2452_v40  ;;  %v7387_v6 = vadd.f32 %v7330_v4, %v7245_v28 }
 0x1ca   :  { %504 = vadd.xlane.f32.xlu1 %v464_v2  ;;  %356 = vadd.xlane.f32.xlu2 %v7328_v3  ;;  %v936_v16 = vmul.f32 %v625_v11, %v7257_v52 }
 0x1cb   :  { %v629_v18 = vmul.f32 0.5, %v628_v12  ;;  %v347_v19 = vpop.xlane.xlu1 %346  ;;  %v495_v22 = vpop.xlane.xlu0 %494  ;;  %2467 = vmatpush.msra.mxu1 %v2451_v44  ;;  %v2448_v12 = vld [vmem:[#allocation8 + $0x28] sm:$0xff] }
 0x1cc   :  { %v401_v25 = vmul.f32 0.0078125, %v347_v19  ;;  %v555_v30 = vmul.f32 0.0078125, %v495_v22  ;;  %v969_v31 = vmul.f32 %v7334_v10, %v936_v16  ;;  %v286_v22 = vpop.f32.mrf.mxu0 }
 0x1cd   :  { %v630_v33 = vsub.f32 1.5, %v629_v18  ;;  %2468 = vmatpush.msra.mxu1 %v2450_v53  ;;  %v2444_v53 = vld [vmem:[#allocation8 + $0x8] sm:$0xff] }
 0x1ce   :  { %v7345_v35 = vpop.eup %6563  ;;  %v7348_v26 = vsub.f32 %v7280_v9, %v401_v25  ;;  %v7350_v52 = vadd.f32 1e-05, %v555_v30  ;;  %v7356_v37 = vadd.f32 %v7342_v17, %v969_v31  ;;  %312 = vmatmul.f32.gmra.mxu0 %v192_v23  ;;  %v7456_v23 = vadd.f32 %v286_v22, %v7245_v28 }
 0x1cf   :  { %v631_v38 = vmul.f32 %v6562_v62, %v630_v33  ;;  %v637_v39 = vmul.f32 %v7345_v35, %v7322_v63  ;;  %vm643_vm6 = vweird.f32 %v7345_v35  ;;  %2469 = vmatpush.msra.mxu1 %v2449_v61  ;;  %v2447_v63 = vld [vmem:[#allocation8 + $0x20] sm:$0xff] }
 0x1d0   :  { %6565 = vrsqrt.f32 %v7350_v52  ;;  %v465_v9 = vmul.f32 %v7348_v26, %v7348_v26  ;;  %v7368_v45 = vmul.f32 0.70710677, %v7356_v37  ;;  %vm644_vm8 = vmor %vm642_vm7, %vm643_vm6  ;;  %vm652_vm10 = vweird.f32 %v7350_v52 }
 0x1d1   :  { %v635_v42 = vsel %vm634_vm5, %v6562_v62, %v631_v38  ;;  %v638_v43 = vmul.f32 %v7345_v35, %v637_v39  ;;  %2470 = vmatpush.msra.mxu1 %v2448_v12 }
 0x1d2   :  { %506 = vadd.xlane.f32.xlu0 %v465_v9  ;;  %358 = vadd.xlane.f32.xlu1 %v7353_v36  ;;  %v937_v46 = vmul.f32 %v635_v42, %v7261_v58  ;;  %v1098_v54 = vmul.f32 %v7368_v45, %v7368_v45  ;;  %v2445_v9 = vld [vmem:[#allocation8 + $0x10] sm:$0xff] }
 0x1d3   :  { %v639_v48 = vmul.f32 0.5, %v638_v43  ;;  %v497_v49 = vpop.xlane.xlu2 %496  ;;  %v349_v50 = vpop.xlane.xlu0 %348  ;;  %2471 = vmatpush.msra.mxu1 %v2447_v63 }
 0x1d4   :  { %v556_v55 = vmul.f32 0.0078125, %v497_v49  ;;  %v402_v56 = vmul.f32 0.0078125, %v349_v50  ;;  %v970_v57 = vmul.f32 %v7334_v10, %v937_v46  ;;  %v7376_v58 = vmin.f32 %v1098_v54, 16.0 }
 0x1d5   :  { %v640_v60 = vsub.f32 1.5, %v639_v48  ;;  %2472 = vmatpush.msra.mxu1 %v2446_v24 }
 0x1d6   :  { %v7378_v59 = vpop.eup %6565  ;;  %v7380_v62 = vadd.f32 1e-05, %v556_v55  ;;  %v7383_v5 = vsub.f32 %v7288_v15, %v402_v56  ;;  %v7390_v7 = vadd.f32 %v7342_v17, %v970_v57  ;;  %v1100_v13 = vmul.f32 2.1237322e-06, %v7376_v58 }
 0x1d7   :  { %v641_v2 = vmul.f32 %v7345_v35, %v640_v60  ;;  %v647_v11 = vmul.f32 %v7378_v59, %v7350_v52  ;;  %v1111_v19 = vmul.f32 3.8918573e-05, %v7376_v58  ;;  %vm653_vm9 = vweird.f32 %v7378_v59  ;;  %2473 = vmatpush.msra.mxu1 %v2445_v9  ;;  %v2443_v60 = vld [vmem:[#allocation8] sm:$0xff] }
 0x1d8   :  { %6567 = vrsqrt.f32 %v7380_v62  ;;  %v466_v15 = vmul.f32 %v7383_v5, %v7383_v5  ;;  %v1101_v18 = vadd.f32 0.00028619796, %v1100_v13  ;;  %v7407_v25 = vmul.f32 0.70710677, %v7390_v7  ;;  %vm7442_vm11 = vmor %vm652_vm10, %vm653_vm9 }
 0x1d9   :  { %v645_v4 = vsel %vm644_vm8, %v7345_v35, %v641_v2  ;;  %v648_v16 = vmul.f32 %v7378_v59, %v647_v11  ;;  %v1112_v38 = vadd.f32 0.001143296, %v1111_v19  ;;  %2474 = vmatpush.msra.mxu1 %v2444_v53  ;;  %vm662_vm13 = vweird.f32 %v7380_v62 }
 0x1da   :  { %360 = vadd.xlane.f32.xlu0 %v7387_v6  ;;  %508 = vadd.xlane.f32.xlu2 %v466_v15  ;;  %v938_v30 = vmul.f32 %v645_v4, %v7269_v1  ;;  %v1102_v35 = vmul.f32 %v1101_v18, %v7376_v58  ;;  %v1138_v42 = vmul.f32 %v7407_v25, %v7407_v25 }
 0x1db   :  { %v649_v31 = vmul.f32 0.5, %v648_v16  ;;  %v499_v33 = vpop.xlane.xlu1 %498  ;;  %v351_v34 = vpop.xlane.xlu2 %350  ;;  %v7416_v1 = vadd.f32 %v7364_v41, %v7245_v28  ;;  %v1113_v48 = vmul.f32 %v1112_v38, %v7376_v58  ;;  %2475 = vmatpush.msra.mxu1 %v2443_v60 }
 0x1dc   :  { %v557_v39 = vmul.f32 0.0078125, %v499_v33  ;;  %v403_v40 = vmul.f32 0.0078125, %v351_v34  ;;  %v971_v43 = vmul.f32 %v7334_v10, %v938_v30  ;;  %v1103_v46 = vadd.f32 0.0036580483, %v1102_v35  ;;  %v289_v33 = vpop.f32.mrf.mxu0 }
 0x1dd   :  { %v650_v44 = vsub.f32 1.5, %v649_v31  ;;  %v7426_v54 = vmin.f32 %v1138_v42, 16.0  ;;  %v1114_v61 = vadd.f32 0.014752088, %v1113_v48 }
 0x1de   :  { %v7419_v49 = vpop.eup %6567  ;;  %v7421_v50 = vadd.f32 1e-05, %v557_v39  ;;  %v7424_v51 = vsub.f32 %v7296_v21, %v403_v40  ;;  %v7429_v55 = vadd.f32 %v7342_v17, %v971_v43  ;;  %v1104_v57 = vmul.f32 %v1103_v46, %v7376_v58 }
 0x1df   :  { %v651_v41 = vmul.f32 %v7378_v59, %v650_v44  ;;  %v657_v56 = vmul.f32 %v7419_v49, %v7380_v62  ;;  %v1140_v12 = vmul.f32 2.1237322e-06, %v7426_v54  ;;  %v1115_v15 = vmul.f32 %v1114_v61, %v7376_v58 }
 0x1e0   :  { %6569 = vrsqrt.f32 %v7421_v50  ;;  %v467_v21 = vmul.f32 %v7424_v51, %v7424_v51  ;;  %v1105_v11 = vadd.f32 0.05243302, %v1104_v57  ;;  %v1151_v4 = vmul.f32 3.8918573e-05, %v7426_v54 }
 0x1e1   :  { %v658_v2 = vmul.f32 %v7419_v49, %v657_v56  ;;  %v7450_v16 = vmul.f32 0.70710677, %v7429_v55  ;;  %v655_v52 = vsel %vm7442_vm11, %v7378_v59, %v651_v41  ;;  %v1141_v24 = vadd.f32 0.00028619796, %v1140_v12 }
 0x1e2   :  { %510 = vadd.xlane.f32.xlu1 %v467_v21  ;;  %362 = vadd.xlane.f32.xlu2 %v7416_v1  ;;  %v1116_v34 = vadd.f32 0.112945676, %v1115_v15  ;;  %v1152_v35 = vadd.f32 0.001143296, %v1151_v4  ;;  %v1106_v39 = vmul.f32 %v1105_v11, %v7376_v58  ;;  %v939_v48 = vmul.f32 %v655_v52, %v7277_v8 }
 0x1e3   :  { %v659_v63 = vmul.f32 0.5, %v658_v2  ;;  %v353_v18 = vpop.xlane.xlu1 %352  ;;  %v501_v19 = vpop.xlane.xlu0 %500  ;;  %v1142_v40 = vmul.f32 %v1141_v24, %v7426_v54  ;;  %v1178_v59 = vmul.f32 %v7450_v16, %v7450_v16  ;;  %vm663_vm12 = vweird.f32 %v7419_v49 }
 0x1e4   :  { %v404_v30 = vmul.f32 0.0078125, %v353_v18  ;;  %v558_v31 = vmul.f32 0.0078125, %v501_v19  ;;  %v1117_v43 = vmul.f32 %v1116_v34, %v7376_v58  ;;  %v1153_v44 = vmul.f32 %v1152_v35, %v7426_v54  ;;  %vm7489_vm14 = vmor %vm662_vm13, %vm663_vm12  ;;  %v292_v34 = vpop.f32.mrf.mxu0 }
 0x1e5   :  { %v660_v38 = vsub.f32 1.5, %v659_v63  ;;  %v1107_v57 = vadd.f32 0.18741608, %v1106_v39  ;;  %v1143_v21 = vadd.f32 0.0036580483, %v1142_v40  ;;  %v7482_v61 = vmin.f32 %v1178_v59, 16.0 }
 0x1e6   :  { %v7462_v9 = vpop.eup %6569  ;;  %v7465_v22 = vsub.f32 %v7305_v29, %v404_v30  ;;  %v7467_v42 = vadd.f32 1e-05, %v558_v31  ;;  %v1118_v29 = vadd.f32 0.4994258, %v1117_v43  ;;  %v1154_v8 = vadd.f32 0.014752088, %v1153_v44 }
 0x1e7   :  { %v667_v46 = vmul.f32 %v7462_v9, %v7421_v50  ;;  %v661_v41 = vmul.f32 %v7419_v49, %v660_v38  ;;  %v1144_v12 = vmul.f32 %v1143_v21, %v7426_v54  ;;  %v972_v13 = vmul.f32 %v7334_v10, %v939_v48 }
 0x1e8   :  { %6571 = vrsqrt.f32 %v7467_v42  ;;  %v468_v53 = vmul.f32 %v7465_v22, %v7465_v22  ;;  %v1119_v60 = vmul.f32 %v1118_v29, %v7376_v58  ;;  %v1155_v63 = vmul.f32 %v1154_v8, %v7426_v54 }
 0x1e9   :  { %v668_v56 = vmul.f32 %v7462_v9, %v667_v46  ;;  %v665_v62 = vsel %vm7489_vm14, %v7419_v49, %v661_v41  ;;  %v7500_v18 = vadd.f32 %v289_v33, %v7245_v28  ;;  %v1108_v19 = vmul.f32 %v1107_v57, %v7376_v58 }
 0x1ea   :  { %512 = vadd.xlane.f32.xlu0 %v468_v53  ;;  %364 = vadd.xlane.f32.xlu1 %v7456_v23  ;;  %v7493_v52 = vadd.f32 1.0, %v1119_v60  ;;  %v1180_v24 = vmul.f32 2.1237322e-06, %v7482_v61  ;;  %v1145_v35 = vadd.f32 0.05243302, %v1144_v12  ;;  %v7514_v33 = vadd.f32 %v7342_v17, %v972_v13 }
 0x1eb   :  { %v669_v2 = vmul.f32 0.5, %v668_v56  ;;  %v355_v11 = vpop.xlane.xlu0 %354  ;;  %v1191_v38 = vmul.f32 3.8918573e-05, %v7482_v61  ;;  %v1156_v40 = vadd.f32 0.112945676, %v1155_v63  ;;  %v7520_v59 = vadd.f32 %v292_v34, %v7245_v28 }
 0x1ec   :  { %v405_v4 = vmul.f32 0.0078125, %v355_v11  ;;  %6573 = vrcp.f32 %v7493_v52  ;;  %v7523_v43 = vmul.f32 0.5, %v7356_v37  ;;  %v1109_v44 = vadd.f32 1.1283791, %v1108_v19 }
 0x1ed   :  { %v670_v39 = vsub.f32 1.5, %v669_v2  ;;  %v1181_v46 = vadd.f32 0.00028619796, %v1180_v24  ;;  %vm673_vm15 = vweird.f32 %v7462_v9  ;;  %v1146_v48 = vmul.f32 %v1145_v35, %v7426_v54 }
 0x1ee   :  { %v7504_v30 = vpop.eup %6571  ;;  %v7507_v31 = vsub.f32 %v7311_v32, %v405_v4  ;;  %v940_v32 = vmul.f32 %v665_v62, %v7285_v14  ;;  %v1157_v53 = vmul.f32 %v1156_v40, %v7426_v54  ;;  %v1192_v29 = vadd.f32 0.001143296, %v1191_v38 }
 0x1ef   :  { %v677_v49 = vmul.f32 %v7504_v30, %v7467_v42  ;;  %v671_v14 = vmul.f32 %v7462_v9, %v670_v39  ;;  %v1182_v56 = vmul.f32 %v1181_v46, %v7482_v61  ;;  %v7533_v37 = vmul.f32 0.70710677, %v7514_v33 }
 0x1f0   :  { %v469_v58 = vmul.f32 %v7507_v31, %v7507_v31  ;;  %vm672_vm0 = vweird.f32 %v7421_v50  ;;  %v1158_v21 = vadd.f32 0.4994258, %v1157_v53  ;;  %v1193_v60 = vmul.f32 %v1192_v29, %v7482_v61 }
 0x1f1   :  { %v678_v41 = vmul.f32 %v7504_v30, %v677_v49  ;;  %v973_v8 = vmul.f32 %v7334_v10, %v940_v32  ;;  %v1110_v2 = vmul.f32 %v1109_v44, %v7368_v45  ;;  %v1132_v12 = vand.u32 2147483648, %v7493_v52  ;;  %vm7543_vm1 = vmor %vm672_vm0, %vm673_vm15 }
 0x1f2   :  { %366 = vadd.xlane.f32.xlu0 %v7500_v18  ;;  %514 = vadd.xlane.f32.xlu2 %v469_v58  ;;  %v6574_v57 = vpop.eup %6573  ;;  %v1183_v13 = vadd.f32 0.0036580483, %v1182_v56  ;;  %v1147_v4 = vadd.f32 0.18741608, %v1146_v48  ;;  %v1159_v50 = vmul.f32 %v1158_v21, %v7426_v54  ;;  %v1194_v63 = vadd.f32 0.014752088, %v1193_v60 }
 0x1f3   :  { %v1122_v11 = vmul.f32 %v6574_v57, %v7493_v52  ;;  %v1218_v62 = vmul.f32 %v7533_v37, %v7533_v37  ;;  %v675_v45 = vsel %vm7543_vm1, %v7462_v9, %v671_v14  ;;  %v679_v19 = vmul.f32 0.5, %v678_v41 }
 0x1f4   :  { %v1184_v34 = vmul.f32 %v1183_v13, %v7482_v61  ;;  %v7554_v35 = vadd.f32 1.0, %v1159_v50  ;;  %v1195_v38 = vmul.f32 %v1194_v63, %v7482_v61  ;;  %v7560_v49 = vadd.f32 %v7342_v17, %v973_v8 }
 0x1f5   :  { %v1123_v24 = vsub.f32 1.0, %v1122_v11  ;;  %v7557_v39 = vmin.f32 %v1218_v62, 16.0  ;;  %vm1126_vm2 = vweird.f32 %v7493_v52  ;;  %vm1127_vm3 = vweird.f32 %v6574_v57 }
 0x1f6   :  { %v1130_v40 = vand.u32 2147483647, %v7493_v52  ;;  %vm683_vm4 = vweird.f32 %v7504_v30  ;;  %v1148_v9 = vmul.f32 %v1147_v4, %v7426_v54  ;;  %6575 = vrcp.f32 %v7554_v35  ;;  %vm1128_vm6 = vmor %vm1126_vm2, %vm1127_vm3 }
 0x1f7   :  { %v1124_v58 = vmul.f32 %v6574_v57, %v1123_v24  ;;  %v1185_v32 = vadd.f32 0.05243302, %v1184_v34  ;;  %v1196_v46 = vadd.f32 0.112945676, %v1195_v38  ;;  %v1220_v48 = vmul.f32 2.1237322e-06, %v7557_v39 }
 0x1f8   :  { %v941_v53 = vmul.f32 %v675_v45, %v7293_v20  ;;  %v680_v29 = vsub.f32 1.5, %v679_v19  ;;  %vm682_vm5 = vweird.f32 %v7467_v42  ;;  %v1133_v52 = vor.u32 1.1754944e-38, %v1132_v12 }
 0x1f9   :  { %v1125_v44 = vadd.f32 %v6574_v57, %v1124_v58  ;;  %v1231_v14 = vmul.f32 3.8918573e-05, %v7557_v39  ;;  %v7573_v41 = vmul.f32 0.70710677, %v7560_v49  ;;  %vm1131_vm7 = vcmp.eq.f32.partialorder %v1130_v40, 8.507059e+37  ;;  %vm7601_vm8 = vmor %vm682_vm5, %vm683_vm4 }
 0x1fa   :  { %368 = vadd.xlane.f32.xlu2 %v7520_v59  ;;  %v1197_v56 = vmul.f32 %v1196_v46, %v7482_v61  ;;  %v1221_v21 = vadd.f32 0.00028619796, %v1220_v48  ;;  %v1186_v8 = vmul.f32 %v1185_v32, %v7482_v61  ;;  %v1149_v15 = vadd.f32 1.1283791, %v1148_v9 }
 0x1fb   :  { %v1129_v54 = vsel %vm1128_vm6, %v6574_v57, %v1125_v44  ;;  %v1232_v11 = vadd.f32 0.001143296, %v1231_v14  ;;  %v1258_v20 = vmul.f32 %v7573_v41, %v7573_v41  ;;  %v974_v4 = vmul.f32 %v7334_v10, %v941_v53 }
 0x1fc   :  { %v1134_v60 = vsel %vm1131_vm7, %v1133_v52, %v1129_v54  ;;  %v1198_v12 = vadd.f32 0.4994258, %v1197_v56  ;;  %v6576_v50 = vpop.eup %6575  ;;  %v681_v63 = vmul.f32 %v7504_v30, %v680_v29  ;;  %v1222_v57 = vmul.f32 %v1221_v21, %v7557_v39 }
 0x1fd   :  { %v1135_v13 = vmul.f32 %v1134_v60, %v1110_v2  ;;  %v1233_v62 = vmul.f32 %v1232_v11, %v7557_v39  ;;  %v7583_v45 = vmin.f32 %v1258_v20, 16.0  ;;  %v1162_v24 = vmul.f32 %v6576_v50, %v7554_v35 }
 0x1fe   :  { %v1170_v34 = vand.u32 2147483647, %v7554_v35  ;;  %v1172_v2 = vand.u32 2147483648, %v7554_v35  ;;  %v1187_v38 = vadd.f32 0.18741608, %v1186_v8  ;;  %v1199_v58 = vmul.f32 %v1198_v12, %v7482_v61 }
 0x1ff   :  { %v6449_v19 = vclamps-f32 %v1135_v13, 1.0  ;;  %v1234_v40 = vadd.f32 0.014752088, %v1233_v62  ;;  %v1260_v9 = vmul.f32 2.1237322e-06, %v7583_v45  ;;  %v1163_v44 = vsub.f32 1.0, %v1162_v24 }
 0x200   :  { %v1271_v46 = vmul.f32 3.8918573e-05, %v7583_v45  ;;  %v7592_v48 = vadd.f32 %v7342_v17, %v974_v4  ;;  %v7594_v53 = vadd.f32 1.0, %v1199_v58  ;;  %v1223_v29 = vadd.f32 0.0036580483, %v1222_v57 }
 0x201   :  { %v2378_v32 = vadd.f32 1.0, %v6449_v19  ;;  %v1235_v52 = vmul.f32 %v1234_v40, %v7557_v39  ;;  %v1261_v14 = vadd.f32 0.00028619796, %v1260_v9  ;;  %v1164_v21 = vmul.f32 %v6576_v50, %v1163_v44 }
 0x202   :  { %vm1167_vm9 = vweird.f32 %v6576_v50  ;;  %v1272_v60 = vadd.f32 0.001143296, %v1271_v46  ;;  %v685_v8 = vsel %vm7601_vm8, %v7504_v30, %v681_v63  ;;  %vm1166_vm10 = vweird.f32 %v7554_v35 }
 0x203   :  { %v2410_v56 = vmul.f32 %v2378_v32, %v7523_v43  ;;  %6577 = vrcp.f32 %v7594_v53  ;;  %v1165_v11 = vadd.f32 %v6576_v50, %v1164_v21  ;;  %v1173_v42 = vor.u32 1.1754944e-38, %v1172_v2  ;;  %vm1168_vm11 = vmor %vm1166_vm10, %vm1167_vm9 }
 0x204   :  { %v1236_v20 = vadd.f32 0.112945676, %v1235_v52  ;;  %v1262_v13 = vmul.f32 %v1261_v14, %v7583_v45  ;;  %v1188_v43 = vmul.f32 %v1187_v38, %v7482_v61  ;;  %v1224_v12 = vmul.f32 %v1223_v29, %v7557_v39 }
 0x205   :  { %2476 = vmatmul.f32.vlgmr.msra.gmra.mxu1 %v2410_v56  ;;  %v1273_v4 = vmul.f32 %v1272_v60, %v7583_v45  ;;  %v7616_v57 = vmul.f32 0.70710677, %v7592_v48  ;;  %v1150_v30 = vmul.f32 %v1149_v15, %v7407_v25  ;;  %v1169_v35 = vsel %vm1168_vm11, %v6576_v50, %v1165_v11 }
 0x206   :  { %vm1171_vm12 = vcmp.eq.f32.partialorder %v1170_v34, 8.507059e+37  ;;  %v1237_v63 = vmul.f32 %v1236_v20, %v7557_v39  ;;  %v942_v61 = vmul.f32 %v685_v8, %v7302_v27  ;;  %v1035_v2 = vmul.f32 0.5, %v7390_v7 }
 0x207   :  { %v1174_v62 = vsel %vm1171_vm12, %v1173_v42, %v1169_v35  ;;  %v1274_v19 = vadd.f32 0.014752088, %v1273_v4  ;;  %v1298_v24 = vmul.f32 %v7616_v57, %v7616_v57  ;;  %v1263_v40 = vadd.f32 0.0036580483, %v1262_v13 }
 0x208   :  { %v1175_v38 = vmul.f32 %v1174_v62, %v1150_v30  ;;  %v1238_v58 = vadd.f32 0.4994258, %v1237_v63  ;;  %v1189_v32 = vadd.f32 1.1283791, %v1188_v43  ;;  %v1225_v44 = vadd.f32 0.05243302, %v1224_v12 }
 0x209   :  { %v6578_v9 = vpop.eup %6577  ;;  %v1275_v25 = vmul.f32 %v1274_v19, %v7583_v45  ;;  %v7625_v15 = vmin.f32 %v1298_v24, 16.0  ;;  %v1210_v46 = vand.u32 2147483647, %v7594_v53  ;;  %v1212_v29 = vand.u32 2147483648, %v7594_v53 }
 0x20a   :  { %v6450_v50 = vclamps-f32 %v1175_v38, 1.0  ;;  %v1202_v34 = vmul.f32 %v6578_v9, %v7594_v53  ;;  %v1239_v27 = vmul.f32 %v1238_v58, %v7557_v39  ;;  %v975_v14 = vmul.f32 %v7334_v10, %v942_v61 }
 0x20b   :  { %v1276_v7 = vadd.f32 0.112945676, %v1275_v25  ;;  %v1300_v52 = vmul.f32 2.1237322e-06, %v7625_v15  ;;  %v1264_v21 = vmul.f32 %v1263_v40, %v7583_v45  ;;  %v1311_v60 = vmul.f32 3.8918573e-05, %v7625_v15 }
 0x20c   :  { %v2379_v54 = vadd.f32 1.0, %v6450_v50  ;;  %v1203_v56 = vsub.f32 1.0, %v1202_v34  ;;  %v1226_v8 = vmul.f32 %v1225_v44, %v7557_v39  ;;  %v7636_v11 = vadd.f32 1.0, %v1239_v27 }
 0x20d   :  { %v1277_v42 = vmul.f32 %v1276_v7, %v7583_v45  ;;  %v1301_v20 = vadd.f32 0.00028619796, %v1300_v52  ;;  %vm1207_vm13 = vweird.f32 %v6578_v9  ;;  %v1312_v12 = vadd.f32 0.001143296, %v1311_v60 }
 0x20e   :  { %v2411_v13 = vmul.f32 %v2379_v54, %v1035_v2  ;;  %v1204_v43 = vmul.f32 %v6578_v9, %v1203_v56  ;;  %6579 = vrcp.f32 %v7636_v11  ;;  %v7641_v4 = vadd.f32 %v7342_v17, %v975_v14 }
 0x20f   :  { %vm1206_vm14 = vweird.f32 %v7594_v53  ;;  %v1265_v35 = vadd.f32 0.05243302, %v1264_v21  ;;  %v1278_v63 = vadd.f32 0.4994258, %v1277_v42  ;;  %v1213_v62 = vor.u32 1.1754944e-38, %v1212_v29 }
 0x210   :  { %2479 = vmatmul.f32.gmra.mxu1 %v2411_v13  ;;  %v1205_v30 = vadd.f32 %v6578_v9, %v1204_v43  ;;  %vm1208_vm15 = vmor %vm1206_vm14, %vm1207_vm13  ;;  %v1227_v19 = vadd.f32 0.18741608, %v1226_v8  ;;  %v1302_v24 = vmul.f32 %v1301_v20, %v7625_v15  ;;  %v1313_v61 = vmul.f32 %v1312_v12, %v7625_v15 }
 0x211   :  { %v1190_v2 = vmul.f32 %v1189_v32, %v7450_v16  ;;  %vm1211_vm0 = vcmp.eq.f32.partialorder %v1210_v46, 8.507059e+37  ;;  %v1279_v58 = vmul.f32 %v1278_v63, %v7583_v45  ;;  %v7649_v25 = vmul.f32 0.70710677, %v7641_v4 }
 0x212   :  { %v1209_v38 = vsel %vm1208_vm15, %v6578_v9, %v1205_v30  ;;  %v1314_v44 = vadd.f32 0.014752088, %v1313_v61  ;;  %v1266_v50 = vmul.f32 %v1265_v35, %v7583_v45  ;;  %v1228_v27 = vmul.f32 %v1227_v19, %v7557_v39 }
 0x213   :  { %v1214_v40 = vsel %vm1211_vm0, %v1213_v62, %v1209_v38  ;;  %v7652_v34 = vadd.f32 1.0, %v1279_v58  ;;  %v1303_v7 = vadd.f32 0.0036580483, %v1302_v24  ;;  %v1338_v9 = vmul.f32 %v7649_v25, %v7649_v25 }
 0x214   :  { %v1215_v53 = vmul.f32 %v1214_v40, %v1190_v2  ;;  %v6580_v29 = vpop.eup %6579  ;;  %v1315_v16 = vmul.f32 %v1314_v44, %v7625_v15  ;;  %v1036_v52 = vmul.f32 0.5, %v7429_v55  ;;  %v1252_v14 = vand.u32 2147483648, %v7636_v11 }
 0x215   :  { %v1242_v46 = vmul.f32 %v6580_v29, %v7636_v11  ;;  %6581 = vrcp.f32 %v7652_v34  ;;  %v1267_v21 = vadd.f32 0.18741608, %v1266_v50  ;;  %v1229_v39 = vadd.f32 1.1283791, %v1228_v27 }
 0x216   :  { %v6451_v32 = vclamps-f32 %v1215_v53, 1.0  ;;  %v1316_v60 = vadd.f32 0.112945676, %v1315_v16  ;;  %v1250_v8 = vand.u32 2147483647, %v7636_v11  ;;  %v1304_v42 = vmul.f32 %v1303_v7, %v7625_v15 }
 0x217   :  { %v1243_v56 = vsub.f32 1.0, %v1242_v46  ;;  %v7664_v20 = vmin.f32 %v1338_v9, 16.0  ;;  %vm1247_vm1 = vweird.f32 %v6580_v29  ;;  %vm1246_vm2 = vweird.f32 %v7636_v11 }
 0x218   :  { %v2380_v54 = vadd.f32 1.0, %v6451_v32  ;;  %v1317_v55 = vmul.f32 %v1316_v60, %v7625_v15  ;;  %v1253_v63 = vor.u32 1.1754944e-38, %v1252_v14  ;;  %v1268_v62 = vmul.f32 %v1267_v21, %v7583_v45  ;;  %vm1248_vm3 = vmor %vm1246_vm2, %vm1247_vm1 }
 0x219   :  { %v1244_v43 = vmul.f32 %v6580_v29, %v1243_v56  ;;  %v1340_v12 = vmul.f32 2.1237322e-06, %v7664_v20  ;;  %v1351_v30 = vmul.f32 3.8918573e-05, %v7664_v20  ;;  %v1305_v61 = vadd.f32 0.05243302, %v1304_v42 }
 0x21a   :  { %v2412_v13 = vmul.f32 %v2380_v54, %v1036_v52  ;;  %v1318_v19 = vadd.f32 0.4994258, %v1317_v55  ;;  %v1230_v58 = vmul.f32 %v1229_v39, %v7533_v37  ;;  %vm1251_vm4 = vcmp.eq.f32.partialorder %v1250_v8, 8.507059e+37 }
 0x21b   :  { %v1245_v35 = vadd.f32 %v6580_v29, %v1244_v43  ;;  %v6582_v24 = vpop.eup %6581  ;;  %v1341_v2 = vadd.f32 0.00028619796, %v1340_v12  ;;  %v1352_v38 = vadd.f32 0.001143296, %v1351_v30  ;;  %v1269_v7 = vadd.f32 1.1283791, %v1268_v62 }
 0x21c   :  { %2482 = vmatmul.f32.gmra.mxu1 %v2412_v13  ;;  %v1282_v11 = vmul.f32 %v6582_v24, %v7652_v34  ;;  %v1319_v53 = vmul.f32 %v1318_v19, %v7625_v15  ;;  %v1292_v9 = vand.u32 2147483648, %v7652_v34  ;;  %v1306_v32 = vmul.f32 %v1305_v61, %v7625_v15 }
 0x21d   :  { %v1249_v40 = vsel %vm1248_vm3, %v6580_v29, %v1245_v35  ;;  %v1353_v50 = vmul.f32 %v1352_v38, %v7664_v20  ;;  %v1342_v16 = vmul.f32 %v1341_v2, %v7664_v20  ;;  %vm1287_vm5 = vweird.f32 %v6582_v24 }
 0x21e   :  { %v1254_v44 = vsel %vm1251_vm4, %v1253_v63, %v1249_v40  ;;  %v1283_v45 = vsub.f32 1.0, %v1282_v11  ;;  %v1320_v46 = vadd.f32 1.0, %v1319_v53  ;;  %v1290_v14 = vand.u32 2147483647, %v7652_v34 }
 0x21f   :  { %v1255_v27 = vmul.f32 %v1254_v44, %v1230_v58  ;;  %v1354_v37 = vadd.f32 0.014752088, %v1353_v50  ;;  %v1037_v54 = vmul.f32 0.5, %v7514_v33  ;;  %vm1286_vm6 = vweird.f32 %v7652_v34 }
 0x220   :  { %v1284_v52 = vmul.f32 %v6582_v24, %v1283_v45  ;;  %6583 = vrcp.f32 %v1320_v46  ;;  %v1343_v60 = vadd.f32 0.0036580483, %v1342_v16  ;;  %v1270_v8 = vmul.f32 %v1269_v7, %v7573_v41  ;;  %vm1288_vm7 = vmor %vm1286_vm6, %vm1287_vm5 }
 0x221   :  { %v6452_v29 = vclamps-f32 %v1255_v27, 1.0  ;;  %v1355_v39 = vmul.f32 %v1354_v37, %v7664_v20  ;;  %v1293_v42 = vor.u32 1.1754944e-38, %v1292_v9  ;;  %v1307_v13 = vadd.f32 0.18741608, %v1306_v32 }
 0x222   :  { %v1285_v21 = vadd.f32 %v6582_v24, %v1284_v52  ;;  %vm1291_vm8 = vcmp.eq.f32.partialorder %v1290_v14, 8.507059e+37  ;;  %v1344_v34 = vmul.f32 %v1343_v60, %v7664_v20  ;;  %v1038_v2 = vmul.f32 0.5, %v7560_v49 }
 0x223   :  { %v2381_v56 = vadd.f32 1.0, %v6452_v29  ;;  %v1356_v12 = vadd.f32 0.112945676, %v1355_v39  ;;  %v1308_v62 = vmul.f32 %v1307_v13, %v7625_v15  ;;  %v1332_v11 = vand.u32 2147483648, %v1320_v46 }
 0x224   :  { %v1289_v55 = vsel %vm1288_vm7, %v6582_v24, %v1285_v21  ;;  %v1345_v24 = vadd.f32 0.05243302, %v1344_v34  ;;  %v1330_v27 = vand.u32 2147483647, %v1320_v46  ;;  %vm1326_vm10 = vweird.f32 %v1320_v46 }
 0x225   :  { %v2413_v43 = vmul.f32 %v2381_v56, %v1037_v54  ;;  %v1294_v30 = vsel %vm1291_vm8, %v1293_v42, %v1289_v55  ;;  %v1357_v35 = vmul.f32 %v1356_v12, %v7664_v20  ;;  %v1309_v40 = vadd.f32 1.1283791, %v1308_v62  ;;  %v295_v42 = vpop.f32.mrf.mxu0 }
 0x226   :  { %v1295_v33 = vmul.f32 %v1294_v30, %v1270_v8  ;;  %v6584_v63 = vpop.eup %6583  ;;  %v1346_v15 = vmul.f32 %v1345_v24, %v7664_v20  ;;  %v1333_v16 = vor.u32 1.1754944e-38, %v1332_v11  ;;  %vm1331_vm12 = vcmp.eq.f32.partialorder %v1330_v27, 8.507059e+37 }
 0x227   :  { %2485 = vmatmul.f32.gmra.mxu1 %v2413_v43  ;;  %v1322_v61 = vmul.f32 %v6584_v63, %v1320_v46  ;;  %v1358_v41 = vadd.f32 0.4994258, %v1357_v35  ;;  %vm1327_vm9 = vweird.f32 %v6584_v63  ;;  %v1310_v49 = vmul.f32 %v1309_v40, %v7616_v57  ;;  %v193_v40 = vld [vmem:[#allocation2 + $0xe0] sm:$0xff] }
 0x228   :  { %v6453_v19 = vclamps-f32 %v1295_v33, 1.0  ;;  %vm1328_vm11 = vmor %vm1326_vm10, %vm1327_vm9  ;;  %v1347_v14 = vadd.f32 0.18741608, %v1346_v15  ;;  %v1039_v46 = vmul.f32 0.5, %v7592_v48  ;;  %315 = vmatmul.f32.gmra.mxu0 %v193_v40 }
 0x229   :  { %v1323_v58 = vsub.f32 1.0, %v1322_v61  ;;  %v1359_v44 = vmul.f32 %v1358_v41, %v7664_v20 }
 0x22a   :  { %v2382_v38 = vadd.f32 1.0, %v6453_v19  ;;  %v1348_v39 = vmul.f32 %v1347_v14, %v7664_v20 }
 0x22b   :  { %v1324_v50 = vmul.f32 %v6584_v63, %v1323_v58  ;;  %v1360_v7 = vadd.f32 1.0, %v1359_v44 }
 0x22c   :  { %v2414_v53 = vmul.f32 %v2382_v38, %v1038_v2  ;;  %v1349_v34 = vadd.f32 1.1283791, %v1348_v39 }
 0x22d   :  { %v1325_v45 = vadd.f32 %v6584_v63, %v1324_v50  ;;  %6585 = vrcp.f32 %v1360_v7  ;;  %v1372_v12 = vand.u32 2147483648, %v1360_v7  ;;  %vm1366_vm14 = vweird.f32 %v1360_v7  ;;  %v298_v11 = vpop.f32.mrf.mxu0 }
 0x22e   :  { %v1350_v38 = vmul.f32 %v1349_v34, %v7649_v25  ;;  %v1040_v25 = vmul.f32 0.5, %v7641_v4 }
 0x22f   :  { %2488 = vmatmul.f32.gmra.mxu1 %v2414_v53  ;;  %v1329_v9 = vsel %vm1328_vm11, %v6584_v63, %v1325_v45  ;;  %v1370_v63 = vand.u32 2147483647, %v1360_v7  ;;  %v1373_v41 = vor.u32 1.1754944e-38, %v1372_v12 }
 0x230   :  { %v1334_v37 = vsel %vm1331_vm12, %v1333_v16, %v1329_v9 }
 0x231   :  { %v1335_v52 = vmul.f32 %v1334_v37, %v1310_v49  ;;  %vm1371_vm0 = vcmp.eq.f32.partialorder %v1370_v63, 8.507059e+37  ;;  %v7708_v37 = vadd.f32 %v295_v42, %v7245_v28 }
 0x233   :  { %v6454_v56 = vclamps-f32 %v1335_v52, 1.0  ;;  %v6586_v21 = vpop.eup %6585 }
 0x234   :  { %v1362_v8 = vmul.f32 %v6586_v21, %v1360_v7  ;;  %vm1367_vm13 = vweird.f32 %v6586_v21 }
 0x235   :  { %v503_v32 = vpop.xlane.xlu2 %502  ;;  %v2383_v60 = vadd.f32 1.0, %v6454_v56  ;;  %vm1368_vm15 = vmor %vm1366_vm14, %vm1367_vm13 }
 0x236   :  { %v559_v29 = vmul.f32 0.0078125, %v503_v32  ;;  %v1363_v57 = vsub.f32 1.0, %v1362_v8 }
 0x237   :  { %v2415_v13 = vmul.f32 %v2383_v60, %v1039_v46  ;;  %v194_v46 = vld [vmem:[#allocation2 + $0xe8] sm:$0xff]  ;;  %v301_v60 = vpop.f32.mrf.mxu0 }
 0x238   :  { %v591_v54 = vadd.f32 1e-05, %v559_v29  ;;  %v1364_v35 = vmul.f32 %v6586_v21, %v1363_v57  ;;  %318 = vmatmul.f32.gmra.mxu0 %v194_v46 }
 0x239   :  { %2491 = vmatmul.f32.gmra.mxu1 %v2415_v13 }
 0x23a   :  { %6587 = vrsqrt.f32 %v591_v54  ;;  %v1365_v20 = vadd.f32 %v6586_v21, %v1364_v35  ;;  %vm692_vm2 = vweird.f32 %v591_v54 }
 0x23c   :  { %v1369_v58 = vsel %vm1368_vm15, %v6586_v21, %v1365_v20 }
 0x23d   :  { %v505_v43 = vpop.xlane.xlu1 %504  ;;  %v357_v55 = vpop.xlane.xlu2 %356  ;;  %v1374_v44 = vsel %vm1371_vm0, %v1373_v41, %v1369_v58 }
 0x23e   :  { %v560_v30 = vmul.f32 0.0078125, %v505_v43  ;;  %v406_v33 = vmul.f32 0.0078125, %v357_v55 }
 0x23f   :  { %v304_v41 = vpop.f32.mrf.mxu0 }
 0x240   :  { %v6588_v62 = vpop.eup %6587  ;;  %v7692_v19 = vadd.f32 1e-05, %v560_v30  ;;  %v7695_v48 = vsub.f32 %v7328_v3, %v406_v33  ;;  %v1375_v3 = vmul.f32 %v1374_v44, %v1350_v38 }
 0x241   :  { %v687_v61 = vmul.f32 %v6588_v62, %v591_v54  ;;  %vm693_vm1 = vweird.f32 %v6588_v62 }
 0x242   :  { %6589 = vrsqrt.f32 %v7692_v19  ;;  %v470_v2 = vmul.f32 %v7695_v48, %v7695_v48  ;;  %v6455_v15 = vclamps-f32 %v1375_v3, 1.0  ;;  %vm694_vm3 = vmor %vm692_vm2, %vm693_vm1  ;;  %vm702_vm5 = vweird.f32 %v7692_v19 }
 0x243   :  { %v688_v24 = vmul.f32 %v6588_v62, %v687_v61  ;;  %v195_v61 = vld [vmem:[#allocation2 + $0xf0] sm:$0xff] }
 0x244   :  { %516 = vadd.xlane.f32.xlu1 %v470_v2  ;;  %v2384_v29 = vadd.f32 1.0, %v6455_v15  ;;  %321 = vmatmul.f32.gmra.mxu0 %v195_v61 }
 0x245   :  { %v689_v53 = vmul.f32 0.5, %v688_v24  ;;  %v359_v50 = vpop.xlane.xlu1 %358  ;;  %v507_v27 = vpop.xlane.xlu0 %506 }
 0x246   :  { %v407_v7 = vmul.f32 0.0078125, %v359_v50  ;;  %v561_v45 = vmul.f32 0.0078125, %v507_v27  ;;  %v2416_v4 = vmul.f32 %v2384_v29, %v1040_v25  ;;  %v7746_v50 = vadd.f32 %v301_v60, %v7245_v28 }
 0x247   :  { %v690_v16 = vsub.f32 1.5, %v689_v53 }
 0x248   :  { %v6590_v49 = vpop.eup %6589  ;;  %v7703_v9 = vsub.f32 %v7353_v36, %v407_v7  ;;  %v7705_v32 = vadd.f32 1e-05, %v561_v45  ;;  %2494 = vmatmul.f32.gmra.mxu1 %v2416_v4  ;;  %v307_v4 = vpop.f32.mrf.mxu0 }
 0x249   :  { %v691_v52 = vmul.f32 %v6588_v62, %v690_v16  ;;  %v697_v14 = vmul.f32 %v6590_v49, %v7692_v19  ;;  %vm703_vm4 = vweird.f32 %v6590_v49 }
 0x24a   :  { %6591 = vrsqrt.f32 %v7705_v32  ;;  %v471_v56 = vmul.f32 %v7703_v9, %v7703_v9  ;;  %vm704_vm6 = vmor %vm702_vm5, %vm703_vm4  ;;  %vm712_vm8 = vweird.f32 %v7705_v32 }
 0x24b   :  { %v695_v21 = vsel %vm694_vm3, %v6588_v62, %v691_v52  ;;  %v698_v36 = vmul.f32 %v6590_v49, %v697_v14 }
 0x24c   :  { %518 = vadd.xlane.f32.xlu0 %v471_v56  ;;  %370 = vadd.xlane.f32.xlu1 %v7708_v37  ;;  %v943_v39 = vmul.f32 %v695_v21, %v7317_v47  ;;  %v7725_v47 = vadd.f32 %v298_v11, %v7245_v28  ;;  %v196_v56 = vld [vmem:[#allocation2 + $0xf8] sm:$0xff] }
 0x24d   :  { %v699_v54 = vmul.f32 0.5, %v698_v36  ;;  %v509_v8 = vpop.xlane.xlu2 %508  ;;  %v361_v42 = vpop.xlane.xlu0 %360  ;;  %324 = vmatmul.f32.gmra.mxu0 %v196_v56 }
 0x24e   :  { %v562_v13 = vmul.f32 0.0078125, %v509_v8  ;;  %v408_v57 = vmul.f32 0.0078125, %v361_v42  ;;  %v976_v43 = vmul.f32 %v7334_v10, %v943_v39 }
 0x24f   :  { %v700_v55 = vsub.f32 1.5, %v699_v54 }
 0x250   :  { %v7717_v12 = vpop.eup %6591  ;;  %v7719_v30 = vadd.f32 1e-05, %v562_v13  ;;  %v7722_v33 = vsub.f32 %v7387_v6, %v408_v57  ;;  %v7728_v34 = vadd.f32 %v7342_v17, %v976_v43 }
 0x251   :  { %v701_v35 = vmul.f32 %v6590_v49, %v700_v55  ;;  %v707_v63 = vmul.f32 %v7717_v12, %v7705_v32  ;;  %vm713_vm7 = vweird.f32 %v7717_v12 }
 0x252   :  { %6593 = vrsqrt.f32 %v7719_v30  ;;  %v472_v62 = vmul.f32 %v7722_v33, %v7722_v33  ;;  %v7738_v2 = vmul.f32 0.70710677, %v7728_v34  ;;  %vm7770_vm9 = vmor %vm712_vm8, %vm713_vm7  ;;  %vm722_vm11 = vweird.f32 %v7719_v30 }
 0x253   :  { %v705_v6 = vsel %vm704_vm6, %v6590_v49, %v701_v35  ;;  %v708_v20 = vmul.f32 %v7717_v12, %v707_v63 }
 0x254   :  { %372 = vadd.xlane.f32.xlu0 %v7725_v47  ;;  %520 = vadd.xlane.f32.xlu2 %v472_v62  ;;  %v944_v19 = vmul.f32 %v705_v6, %v7325_v0  ;;  %v1378_v40 = vmul.f32 %v7738_v2, %v7738_v2 }
 0x255   :  { %v709_v38 = vmul.f32 0.5, %v708_v20  ;;  %v511_v58 = vpop.xlane.xlu1 %510  ;;  %v363_v24 = vpop.xlane.xlu2 %362 }
 0x256   :  { %v563_v11 = vmul.f32 0.0078125, %v511_v58  ;;  %v409_v44 = vmul.f32 0.0078125, %v363_v24  ;;  %v977_v3 = vmul.f32 %v7334_v10, %v944_v19  ;;  %v7748_v27 = vmin.f32 %v1378_v40, 16.0 }
 0x257   :  { %v710_v53 = vsub.f32 1.5, %v709_v38 }
 0x258   :  { %v7750_v7 = vpop.eup %6593  ;;  %v7753_v0 = vadd.f32 1e-05, %v563_v11  ;;  %v7756_v45 = vsub.f32 %v7416_v1, %v409_v44  ;;  %v7759_v15 = vadd.f32 %v7342_v17, %v977_v3  ;;  %v1380_v25 = vmul.f32 2.1237322e-06, %v7748_v27 }
 0x259   :  { %v711_v16 = vmul.f32 %v7717_v12, %v710_v53  ;;  %v717_v49 = vmul.f32 %v7750_v7, %v7719_v30  ;;  %v1391_v1 = vmul.f32 3.8918573e-05, %v7748_v27  ;;  %vm723_vm10 = vweird.f32 %v7750_v7  ;;  %v310_v30 = vpop.f32.mrf.mxu0 }
 0x25a   :  { %6595 = vrsqrt.f32 %v7753_v0  ;;  %v473_v29 = vmul.f32 %v7756_v45, %v7756_v45  ;;  %v1381_v21 = vadd.f32 0.00028619796, %v1380_v25  ;;  %v7780_v46 = vmul.f32 0.70710677, %v7759_v15  ;;  %vm7812_vm12 = vmor %vm722_vm11, %vm723_vm10 }
 0x25b   :  { %v718_v14 = vmul.f32 %v7750_v7, %v717_v49  ;;  %v715_v32 = vsel %vm7770_vm9, %v7717_v12, %v711_v16  ;;  %v1392_v36 = vadd.f32 0.001143296, %v1391_v1  ;;  %v7787_v12 = vadd.f32 %v304_v41, %v7245_v28 }
 0x25c   :  { %522 = vadd.xlane.f32.xlu1 %v473_v29  ;;  %374 = vadd.xlane.f32.xlu2 %v7746_v50  ;;  %v1382_v8 = vmul.f32 %v1381_v21, %v7748_v27  ;;  %v1418_v43 = vmul.f32 %v7780_v46, %v7780_v46  ;;  %v945_v63 = vmul.f32 %v715_v32, %v7348_v26  ;;  %v7860_v3 = vmul.f32 0.5, %v7728_v34 }
 0x25d   :  { %v719_v60 = vmul.f32 0.5, %v718_v14  ;;  %v365_v39 = vpop.xlane.xlu1 %364  ;;  %v513_v54 = vpop.xlane.xlu0 %512  ;;  %v1393_v57 = vmul.f32 %v1392_v36, %v7748_v27  ;;  %vm732_vm14 = vweird.f32 %v7753_v0 }
 0x25e   :  { %v410_v42 = vmul.f32 0.0078125, %v365_v39  ;;  %v564_v13 = vmul.f32 0.0078125, %v513_v54  ;;  %v1383_v35 = vadd.f32 0.0036580483, %v1382_v8  ;;  %v7797_v19 = vmin.f32 %v1418_v43, 16.0 }
 0x25f   :  { %v720_v55 = vsub.f32 1.5, %v719_v60  ;;  %v1394_v61 = vadd.f32 0.014752088, %v1393_v57  ;;  %v978_v44 = vmul.f32 %v7334_v10, %v945_v63  ;;  %v7824_v60 = vadd.f32 %v307_v4, %v7245_v28 }
 0x260   :  { %v7790_v62 = vpop.eup %6595  ;;  %v7793_v6 = vsub.f32 %v7456_v23, %v410_v42  ;;  %v7795_v20 = vadd.f32 1e-05, %v564_v13  ;;  %v1384_v58 = vmul.f32 %v1383_v35, %v7748_v27  ;;  %v1420_v11 = vmul.f32 2.1237322e-06, %v7797_v19 }
 0x261   :  { %v721_v38 = vmul.f32 %v7750_v7, %v720_v55  ;;  %v727_v41 = vmul.f32 %v7790_v62, %v7753_v0  ;;  %v1395_v23 = vmul.f32 %v1394_v61, %v7748_v27  ;;  %v1431_v16 = vmul.f32 3.8918573e-05, %v7797_v19 }
 0x262   :  { %6597 = vrsqrt.f32 %v7795_v20  ;;  %v474_v26 = vmul.f32 %v7793_v6, %v7793_v6  ;;  %v1385_v40 = vadd.f32 0.05243302, %v1384_v58  ;;  %v1421_v14 = vadd.f32 0.00028619796, %v1420_v11 }
 0x263   :  { %v728_v24 = vmul.f32 %v7790_v62, %v727_v41  ;;  %v1396_v53 = vadd.f32 0.112945676, %v1395_v23  ;;  %v725_v49 = vsel %vm7812_vm12, %v7750_v7, %v721_v38  ;;  %v1432_v36 = vadd.f32 0.001143296, %v1431_v16 }
 0x264   :  { %524 = vadd.xlane.f32.xlu0 %v474_v26  ;;  %376 = vadd.xlane.f32.xlu1 %v7787_v12  ;;  %v1386_v52 = vmul.f32 %v1385_v40, %v7748_v27  ;;  %v1422_v54 = vmul.f32 %v1421_v14, %v7797_v19  ;;  %v7828_v8 = vadd.f32 %v7342_v17, %v978_v44  ;;  %vm733_vm13 = vweird.f32 %v7790_v62  ;;  %v313_v44 = vpop.f32.mrf.mxu0 }
 0x265   :  { %v729_v25 = vmul.f32 0.5, %v728_v24  ;;  %v515_v29 = vpop.xlane.xlu2 %514  ;;  %v367_v1 = vpop.xlane.xlu0 %366  ;;  %v1397_v32 = vmul.f32 %v1396_v53, %v7748_v27  ;;  %v1433_v43 = vmul.f32 %v1432_v36, %v7797_v19  ;;  %v946_v35 = vmul.f32 %v725_v49, %v7383_v5  ;;  %vm7870_vm15 = vmor %vm732_vm14, %vm733_vm13 }
 0x266   :  { %v565_v56 = vmul.f32 0.0078125, %v515_v29  ;;  %v411_v21 = vmul.f32 0.0078125, %v367_v1  ;;  %v1387_v39 = vadd.f32 0.18741608, %v1386_v52  ;;  %v1423_v41 = vadd.f32 0.0036580483, %v1422_v54 }
 0x267   :  { %v1398_v57 = vadd.f32 0.4994258, %v1397_v32  ;;  %v730_v55 = vsub.f32 1.5, %v729_v25  ;;  %v1434_v26 = vadd.f32 0.014752088, %v1433_v43  ;;  %v979_v40 = vmul.f32 %v7334_v10, %v946_v35 }
 0x268   :  { %v7830_v7 = vpop.eup %6597  ;;  %v7832_v42 = vadd.f32 1e-05, %v565_v56  ;;  %v7835_v13 = vsub.f32 %v7500_v18, %v411_v21  ;;  %v1388_v61 = vmul.f32 %v1387_v39, %v7748_v27  ;;  %v7851_v5 = vmul.f32 0.70710677, %v7828_v8 }
 0x269   :  { %v737_v4 = vmul.f32 %v7830_v7, %v7795_v20  ;;  %v1399_v38 = vmul.f32 %v1398_v57, %v7748_v27  ;;  %v7854_v23 = vmul.f32 %v7790_v62, %v730_v55  ;;  %v1424_v27 = vmul.f32 %v1423_v41, %v7797_v19 }
 0x26a   :  { %6599 = vrsqrt.f32 %v7832_v42  ;;  %v475_v63 = vmul.f32 %v7835_v13, %v7835_v13  ;;  %v1389_v53 = vadd.f32 1.1283791, %v1388_v61  ;;  %v7865_v49 = vadd.f32 %v310_v30, %v7245_v28 }
 0x26b   :  { %v738_v18 = vmul.f32 %v7830_v7, %v737_v4  ;;  %v7848_v58 = vadd.f32 1.0, %v1399_v38  ;;  %v1435_v25 = vmul.f32 %v1434_v26, %v7797_v19  ;;  %v1425_v52 = vadd.f32 0.05243302, %v1424_v27 }
 0x26c   :  { %378 = vadd.xlane.f32.xlu0 %v7824_v60  ;;  %526 = vadd.xlane.f32.xlu2 %v475_v63  ;;  %v1458_v14 = vmul.f32 %v7851_v5, %v7851_v5  ;;  %v7880_v0 = vadd.f32 %v7342_v17, %v979_v40  ;;  %v735_v30 = vsel %vm7870_vm15, %v7790_v62, %v7854_v23  ;;  %vm743_vm0 = vweird.f32 %v7830_v7 }
 0x26d   :  { %v369_v24 = vpop.xlane.xlu2 %368  ;;  %6601 = vrcp.f32 %v7848_v58  ;;  %v739_v16 = vmul.f32 0.5, %v738_v18  ;;  %vm742_vm1 = vweird.f32 %v7795_v20  ;;  %v1390_v32 = vmul.f32 %v1389_v53, %v7738_v2 }
 0x26e   :  { %v412_v11 = vmul.f32 0.0078125, %v369_v24  ;;  %v1436_v36 = vadd.f32 0.112945676, %v1435_v25  ;;  %v7896_v39 = vmin.f32 %v1458_v14, 16.0  ;;  %v1410_v57 = vand.u32 2147483647, %v7848_v58  ;;  %vm7931_vm5 = vmor %vm742_vm1, %vm743_vm0 }
 0x26f   :  { %v740_v54 = vsub.f32 1.5, %v739_v16  ;;  %v7901_v43 = vmul.f32 0.70710677, %v7880_v0  ;;  %v1426_v4 = vmul.f32 %v1425_v52, %v7797_v19  ;;  %v1412_v18 = vand.u32 2147483648, %v7848_v58 }
 0x270   :  { %v7868_v29 = vpop.eup %6599  ;;  %v7875_v34 = vsub.f32 %v7520_v59, %v412_v11  ;;  %v7890_v59 = vadd.f32 %v313_v44, %v7245_v28  ;;  %v1437_v35 = vmul.f32 %v1436_v36, %v7797_v19  ;;  %v1460_v2 = vmul.f32 2.1237322e-06, %v7896_v39 }
 0x271   :  { %v747_v56 = vmul.f32 %v7868_v29, %v7832_v42  ;;  %v1471_v63 = vmul.f32 3.8918573e-05, %v7896_v39  ;;  %v1498_v41 = vmul.f32 %v7901_v43, %v7901_v43  ;;  %vm1406_vm2 = vweird.f32 %v7848_v58 }
 0x272   :  { %v476_v21 = vmul.f32 %v7875_v34, %v7875_v34  ;;  %v1438_v26 = vadd.f32 0.4994258, %v1437_v35  ;;  %v1461_v23 = vadd.f32 0.00028619796, %v1460_v2  ;;  %v741_v27 = vmul.f32 %v7830_v7, %v740_v54 }
 0x273   :  { %v748_v62 = vmul.f32 %v7868_v29, %v747_v56  ;;  %v6602_v55 = vpop.eup %6601  ;;  %v1472_v24 = vadd.f32 0.001143296, %v1471_v63  ;;  %vm7914_vm3 = vcmp.eq.f32.partialorder %v1410_v57, 8.507059e+37  ;;  %v7918_v44 = vmin.f32 %v1498_v41, 16.0 }
 0x274   :  { %528 = vadd.xlane.f32.xlu1 %v476_v21  ;;  %380 = vadd.xlane.f32.xlu2 %v7865_v49  ;;  %v1402_v38 = vmul.f32 %v6602_v55, %v7848_v58  ;;  %v1427_v53 = vadd.f32 0.18741608, %v1426_v4  ;;  %v1439_v16 = vmul.f32 %v1438_v26, %v7797_v19  ;;  %v1462_v25 = vmul.f32 %v1461_v23, %v7896_v39 }
 0x275   :  { %v749_v61 = vmul.f32 0.5, %v748_v62  ;;  %v1473_v1 = vmul.f32 %v1472_v24, %v7896_v39  ;;  %vm1407_vm4 = vweird.f32 %v6602_v55  ;;  %v1500_v14 = vmul.f32 2.1237322e-06, %v7918_v44 }
 0x276   :  { %v1403_v40 = vsub.f32 1.0, %v1402_v38  ;;  %v1511_v56 = vmul.f32 3.8918573e-05, %v7918_v44  ;;  %v7925_v36 = vadd.f32 1.0, %v1439_v16  ;;  %v1463_v54 = vadd.f32 0.0036580483, %v1462_v25  ;;  %vm1408_vm7 = vmor %vm1406_vm2, %vm1407_vm4 }
 0x277   :  { %v750_v21 = vsub.f32 1.5, %v749_v61  ;;  %v1474_v62 = vadd.f32 0.014752088, %v1473_v1  ;;  %vm753_vm6 = vweird.f32 %v7868_v29  ;;  %v1501_v35 = vadd.f32 0.00028619796, %v1500_v14 }
 0x278   :  { %v1404_v52 = vmul.f32 %v6602_v55, %v1403_v40  ;;  %v1512_v2 = vadd.f32 0.001143296, %v1511_v56  ;;  %v745_v63 = vsel %vm7931_vm5, %v7830_v7, %v741_v27  ;;  %v1413_v61 = vor.u32 1.1754944e-38, %v1412_v18 }
 0x279   :  { %6603 = vrcp.f32 %v7925_v36  ;;  %v947_v20 = vmul.f32 %v735_v30, %v7424_v51  ;;  %v1464_v41 = vmul.f32 %v1463_v54, %v7896_v39  ;;  %v1475_v26 = vmul.f32 %v1474_v62, %v7896_v39 }
 0x27a   :  { %v1405_v4 = vadd.f32 %v6602_v55, %v1404_v52  ;;  %v1502_v23 = vmul.f32 %v1501_v35, %v7918_v44  ;;  %v751_v24 = vmul.f32 %v7868_v29, %v750_v21  ;;  %v1428_v58 = vmul.f32 %v1427_v53, %v7797_v19 }
 0x27b   :  { %v1513_v18 = vmul.f32 %v1512_v2, %v7918_v44  ;;  %v1465_v40 = vadd.f32 0.05243302, %v1464_v41  ;;  %v1476_v16 = vadd.f32 0.112945676, %v1475_v26  ;;  %vm752_vm8 = vweird.f32 %v7832_v42 }
 0x27c   :  { %382 = vadd.xlane.f32.xlu1 %v7890_v59  ;;  %v1409_v38 = vsel %vm1408_vm7, %v6602_v55, %v1405_v4  ;;  %v1503_v51 = vadd.f32 0.0036580483, %v1502_v23  ;;  %v980_v55 = vmul.f32 %v7334_v10, %v947_v20  ;;  %v948_v25 = vmul.f32 %v745_v63, %v7465_v22  ;;  %vm7960_vm9 = vmor %vm752_vm8, %vm753_vm6 }
 0x27d   :  { %v1414_v7 = vsel %vm7914_vm3, %v1413_v61, %v1409_v38  ;;  %v1514_v30 = vadd.f32 0.014752088, %v1513_v18  ;;  %v1466_v52 = vmul.f32 %v1465_v40, %v7896_v39  ;;  %v1477_v11 = vmul.f32 %v1476_v16, %v7896_v39 }
 0x27e   :  { %v1415_v27 = vmul.f32 %v1414_v7, %v1390_v32  ;;  %v1504_v19 = vmul.f32 %v1503_v51, %v7918_v44  ;;  %v1429_v42 = vadd.f32 1.1283791, %v1428_v58  ;;  %v7966_v56 = vadd.f32 %v7342_v17, %v980_v55 }
 0x27f   :  { %v6604_v53 = vpop.eup %6603  ;;  %v1515_v14 = vmul.f32 %v1514_v30, %v7918_v44  ;;  %v981_v22 = vmul.f32 %v7334_v10, %v948_v25  ;;  %v755_v21 = vsel %vm7960_vm9, %v7868_v29, %v751_v24  ;;  %v1450_v57 = vand.u32 2147483647, %v7925_v36 }
 0x280   :  { %v6456_v1 = vclamps-f32 %v1415_v27, 1.0  ;;  %v1442_v62 = vmul.f32 %v6604_v53, %v7925_v36  ;;  %v1478_v4 = vadd.f32 0.4994258, %v1477_v11  ;;  %v1505_v35 = vadd.f32 0.05243302, %v1504_v19 }
 0x281   :  { %v1516_v2 = vadd.f32 0.112945676, %v1515_v14  ;;  %v7975_v63 = vadd.f32 %v7342_v17, %v981_v22  ;;  %v1452_v38 = vand.u32 2147483648, %v7925_v36  ;;  %v1467_v41 = vadd.f32 0.18741608, %v1466_v52 }
 0x282   :  { %v2385_v54 = vadd.f32 1.0, %v6456_v1  ;;  %v1443_v20 = vsub.f32 1.0, %v1442_v62  ;;  %v1479_v26 = vmul.f32 %v1478_v4, %v7896_v39  ;;  %v1506_v29 = vmul.f32 %v1505_v35, %v7918_v44 }
 0x283   :  { %v1517_v23 = vmul.f32 %v1516_v2, %v7918_v44  ;;  %v7983_v24 = vmul.f32 0.70710677, %v7966_v56  ;;  %vm1447_vm10 = vweird.f32 %v6604_v53  ;;  %v7986_v58 = vmul.f32 0.70710677, %v7975_v63 }
 0x284   :  { %v2417_v61 = vmul.f32 %v2385_v54, %v7860_v3  ;;  %v1444_v7 = vmul.f32 %v6604_v53, %v1443_v20  ;;  %v949_v3 = vmul.f32 %v755_v21, %v7507_v31  ;;  %v7989_v18 = vadd.f32 1.0, %v1479_v26 }
 0x285   :  { %v1507_v27 = vadd.f32 0.18741608, %v1506_v29  ;;  %v1518_v40 = vadd.f32 0.4994258, %v1517_v23  ;;  %v1538_v16 = vmul.f32 %v7983_v24, %v7983_v24  ;;  %vm1446_vm11 = vweird.f32 %v7925_v36 }
 0x286   :  { %2497 = vmatmul.f32.gmra.mxu1 %v2417_v61  ;;  %v1445_v51 = vadd.f32 %v6604_v53, %v1444_v7  ;;  %v1468_v30 = vmul.f32 %v1467_v41, %v7896_v39  ;;  %v1578_v55 = vmul.f32 %v7986_v58, %v7986_v58  ;;  %v1042_v25 = vmul.f32 0.5, %v7759_v15  ;;  %vm1448_vm12 = vmor %vm1446_vm11, %vm1447_vm10 }
 0x287   :  { %v1430_v1 = vmul.f32 %v1429_v42, %v7780_v46  ;;  %v1453_v31 = vor.u32 1.1754944e-38, %v1452_v38  ;;  %6605 = vrcp.f32 %v7989_v18  ;;  %vm1451_vm13 = vcmp.eq.f32.partialorder %v1450_v57, 8.507059e+37 }
 0x288   :  { %v1449_v52 = vsel %vm1448_vm12, %v6604_v53, %v1445_v51  ;;  %v1519_v11 = vmul.f32 %v1518_v40, %v7918_v44  ;;  %v8001_v19 = vmin.f32 %v1538_v16, 16.0  ;;  %v1508_v39 = vmul.f32 %v1507_v27, %v7918_v44 }
 0x289   :  { %v1454_v36 = vsel %vm1451_vm13, %v1453_v31, %v1449_v52  ;;  %v8004_v32 = vmin.f32 %v1578_v55, 16.0  ;;  %v982_v14 = vmul.f32 %v7334_v10, %v949_v3  ;;  %v1469_v22 = vadd.f32 1.1283791, %v1468_v30 }
 0x28a   :  { %v1455_v15 = vmul.f32 %v1454_v36, %v1430_v1  ;;  %v8007_v46 = vadd.f32 1.0, %v1519_v11  ;;  %v1540_v42 = vmul.f32 2.1237322e-06, %v8001_v19  ;;  %v1490_v53 = vand.u32 2147483647, %v7989_v18 }
 0x28b   :  { %v1551_v21 = vmul.f32 3.8918573e-05, %v8001_v19  ;;  %v1580_v54 = vmul.f32 2.1237322e-06, %v8004_v32  ;;  %v8014_v57 = vmul.f32 0.5, %v7828_v8  ;;  %v1492_v35 = vand.u32 2147483648, %v7989_v18 }
 0x28c   :  { %v6457_v62 = vclamps-f32 %v1455_v15, 1.0  ;;  %6607 = vrcp.f32 %v8007_v46  ;;  %v1591_v44 = vmul.f32 3.8918573e-05, %v8004_v32  ;;  %v1509_v2 = vadd.f32 1.1283791, %v1508_v39 }
 0x28d   :  { %v6606_v4 = vpop.eup %6605  ;;  %v1541_v61 = vadd.f32 0.00028619796, %v1540_v42  ;;  %v8020_v20 = vadd.f32 %v7342_v17, %v982_v14  ;;  %v1470_v41 = vmul.f32 %v1469_v22, %v7851_v5  ;;  %v1552_v29 = vadd.f32 0.001143296, %v1551_v21 }
 0x28e   :  { %v2386_v38 = vadd.f32 1.0, %v6457_v62  ;;  %v1482_v26 = vmul.f32 %v6606_v4, %v7989_v18  ;;  %vm1486_vm14 = vweird.f32 %v7989_v18  ;;  %vm8025_vm15 = vcmp.eq.f32.partialorder %v1490_v53, 8.507059e+37 }
 0x28f   :  { %v1542_v23 = vmul.f32 %v1541_v61, %v8001_v19  ;;  %v1581_v7 = vadd.f32 0.00028619796, %v1580_v54  ;;  %v1553_v40 = vmul.f32 %v1552_v29, %v8001_v19  ;;  %v1592_v16 = vadd.f32 0.001143296, %v1591_v44 }
 0x290   :  { %v2418_v3 = vmul.f32 %v2386_v38, %v1042_v25  ;;  %v1483_v27 = vsub.f32 1.0, %v1482_v26  ;;  %v1493_v51 = vor.u32 1.1754944e-38, %v1492_v35  ;;  %v1510_v5 = vmul.f32 %v1509_v2, %v7901_v43 }
 0x291   :  { %v1582_v30 = vmul.f32 %v1581_v7, %v8004_v32  ;;  %v8034_v55 = vmul.f32 0.70710677, %v8020_v20  ;;  %vm1487_vm0 = vweird.f32 %v6606_v4  ;;  %v1554_v52 = vadd.f32 0.014752088, %v1553_v40 }
 0x292   :  { %v6608_v1 = vpop.eup %6607  ;;  %2500 = vmatmul.f32.gmra.mxu1 %v2418_v3  ;;  %v1484_v31 = vmul.f32 %v6606_v4, %v1483_v27  ;;  %v1593_v11 = vmul.f32 %v1592_v16, %v8004_v32  ;;  %vm1526_vm1 = vweird.f32 %v8007_v46  ;;  %v1543_v36 = vadd.f32 0.0036580483, %v1542_v23  ;;  %vm1488_vm2 = vmor %vm1486_vm14, %vm1487_vm0 }
 0x293   :  { %v1522_v25 = vmul.f32 %v6608_v1, %v8007_v46  ;;  %v1583_v39 = vadd.f32 0.0036580483, %v1582_v30  ;;  %v1555_v43 = vmul.f32 %v1554_v52, %v8001_v19  ;;  %v1618_v22 = vmul.f32 %v8034_v55, %v8034_v55 }
 0x294   :  { %v1485_v14 = vadd.f32 %v6606_v4, %v1484_v31  ;;  %v1594_v15 = vadd.f32 0.014752088, %v1593_v11  ;;  %vm1527_vm3 = vweird.f32 %v6608_v1  ;;  %v1530_v53 = vand.u32 2147483647, %v8007_v46 }
 0x295   :  { %v1523_v42 = vsub.f32 1.0, %v1522_v25  ;;  %v1532_v21 = vand.u32 2147483648, %v8007_v46  ;;  %v1556_v62 = vadd.f32 0.112945676, %v1555_v43  ;;  %v8047_v35 = vmin.f32 %v1618_v22, 16.0  ;;  %vm1528_vm5 = vmor %vm1526_vm1, %vm1527_vm3 }
 0x296   :  { %v1489_v54 = vsel %vm1488_vm2, %v6606_v4, %v1485_v14  ;;  %v1595_v44 = vmul.f32 %v1594_v15, %v8004_v32  ;;  %v1544_v38 = vmul.f32 %v1543_v36, %v8001_v19  ;;  %v1584_v18 = vmul.f32 %v1583_v39, %v8004_v32 }
 0x297   :  { %v1494_v2 = vsel %vm8025_vm15, %v1493_v51, %v1489_v54  ;;  %v1524_v61 = vmul.f32 %v6608_v1, %v1523_v42  ;;  %v1557_v29 = vmul.f32 %v1556_v62, %v8001_v19  ;;  %v1620_v7 = vmul.f32 2.1237322e-06, %v8047_v35 }
 0x298   :  { %v1495_v26 = vmul.f32 %v1494_v2, %v1470_v41  ;;  %v1596_v23 = vadd.f32 0.112945676, %v1595_v44  ;;  %vm1531_vm4 = vcmp.eq.f32.partialorder %v1530_v53, 8.507059e+37  ;;  %v1533_v3 = vor.u32 1.1754944e-38, %v1532_v21 }
 0x299   :  { %v1525_v4 = vadd.f32 %v6608_v1, %v1524_v61  ;;  %v1631_v27 = vmul.f32 3.8918573e-05, %v8047_v35  ;;  %v1558_v8 = vadd.f32 0.4994258, %v1557_v29  ;;  %v1621_v51 = vadd.f32 0.00028619796, %v1620_v7 }
 0x29a   :  { %v6458_v40 = vclamps-f32 %v1495_v26, 1.0  ;;  %v1597_v16 = vmul.f32 %v1596_v23, %v8004_v32  ;;  %v1545_v30 = vadd.f32 0.05243302, %v1544_v38  ;;  %v1585_v31 = vadd.f32 0.05243302, %v1584_v18 }
 0x29b   :  { %v1529_v41 = vsel %vm1528_vm5, %v6608_v1, %v1525_v4  ;;  %v1632_v52 = vadd.f32 0.001143296, %v1631_v27  ;;  %v1559_v36 = vmul.f32 %v1558_v8, %v8001_v19  ;;  %v1622_v43 = vmul.f32 %v1621_v51, %v8047_v35 }
 0x29c   :  { %v2387_v11 = vadd.f32 1.0, %v6458_v40  ;;  %v1534_v25 = vsel %vm1531_vm4, %v1533_v3, %v1529_v41  ;;  %v1598_v39 = vadd.f32 0.4994258, %v1597_v16  ;;  %v1546_v1 = vmul.f32 %v1545_v30, %v8001_v19 }
 0x29d   :  { %v1535_v14 = vmul.f32 %v1534_v25, %v1510_v5  ;;  %v1560_v46 = vadd.f32 1.0, %v1559_v36  ;;  %v1633_v42 = vmul.f32 %v1632_v52, %v8047_v35  ;;  %v1586_v21 = vmul.f32 %v1585_v31, %v8004_v32 }
 0x29e   :  { %v2419_v15 = vmul.f32 %v2387_v11, %v8014_v57  ;;  %v1599_v22 = vmul.f32 %v1598_v39, %v8004_v32  ;;  %v1044_v5 = vmul.f32 0.5, %v7880_v0  ;;  %v1623_v44 = vadd.f32 0.0036580483, %v1622_v43 }
 0x29f   :  { %v6459_v53 = vclamps-f32 %v1535_v14, 1.0  ;;  %6609 = vrcp.f32 %v1560_v46  ;;  %v1634_v2 = vadd.f32 0.014752088, %v1633_v42  ;;  %v1547_v61 = vadd.f32 0.18741608, %v1546_v1 }
 0x2a0   :  { %2503 = vmatmul.f32.gmra.mxu1 %v2419_v15  ;;  %v1600_v62 = vadd.f32 1.0, %v1599_v22  ;;  %v1587_v38 = vadd.f32 0.18741608, %v1586_v21  ;;  %v1624_v29 = vmul.f32 %v1623_v44, %v8047_v35  ;;  %v1572_v8 = vand.u32 2147483648, %v1560_v46 }
 0x2a1   :  { %v2388_v54 = vadd.f32 1.0, %v6459_v53  ;;  %v1635_v18 = vmul.f32 %v1634_v2, %v8047_v35  ;;  %v1548_v7 = vmul.f32 %v1547_v61, %v8001_v19  ;;  %v1570_v52 = vand.u32 2147483647, %v1560_v46 }
 0x2a2   :  { %6611 = vrcp.f32 %v1600_v62  ;;  %v1588_v3 = vmul.f32 %v1587_v38, %v8004_v32  ;;  %v1625_v51 = vadd.f32 0.05243302, %v1624_v29  ;;  %vm1566_vm7 = vweird.f32 %v1560_v46 }
 0x2a3   :  { %v2420_v57 = vmul.f32 %v2388_v54, %v1044_v5  ;;  %v1636_v23 = vadd.f32 0.112945676, %v1635_v18  ;;  %v1549_v30 = vadd.f32 1.1283791, %v1548_v7  ;;  %v1573_v39 = vor.u32 1.1754944e-38, %v1572_v8 }
 0x2a4   :  { %v1589_v11 = vadd.f32 1.1283791, %v1588_v3  ;;  %v1610_v32 = vand.u32 2147483647, %v1600_v62  ;;  %v1612_v14 = vand.u32 2147483648, %v1600_v62  ;;  %v1626_v15 = vmul.f32 %v1625_v51, %v8047_v35 }
 0x2a5   :  { %v6610_v26 = vpop.eup %6609  ;;  %v1637_v0 = vmul.f32 %v1636_v23, %v8047_v35  ;;  %v1550_v42 = vmul.f32 %v1549_v30, %v7983_v24  ;;  %vm1571_vm10 = vcmp.eq.f32.partialorder %v1570_v52, 8.507059e+37  ;;  %vm1606_vm11 = vweird.f32 %v1600_v62 }
 0x2a6   :  { %v1562_v4 = vmul.f32 %v6610_v26, %v1560_v46  ;;  %vm1567_vm6 = vweird.f32 %v6610_v26  ;;  %v1613_v54 = vor.u32 1.1754944e-38, %v1612_v14  ;;  %v1590_v5 = vmul.f32 %v1589_v11, %v7986_v58 }
 0x2a7   :  { %v1638_v41 = vadd.f32 0.4994258, %v1637_v0  ;;  %vm1568_vm8 = vmor %vm1566_vm7, %vm1567_vm6  ;;  %vm1611_vm13 = vcmp.eq.f32.partialorder %v1610_v32, 8.507059e+37  ;;  %v1627_v2 = vadd.f32 0.18741608, %v1626_v15  ;;  %v1045_v24 = vmul.f32 0.5, %v7966_v56 }
 0x2a8   :  { %2506 = vmatmul.f32.gmra.mxu1 %v2420_v57  ;;  %v6612_v27 = vpop.eup %6611  ;;  %v1563_v40 = vsub.f32 1.0, %v1562_v4 }
 0x2a9   :  { %v1602_v16 = vmul.f32 %v6612_v27, %v1600_v62  ;;  %v1639_v19 = vmul.f32 %v1638_v41, %v8047_v35  ;;  %vm1607_vm9 = vweird.f32 %v6612_v27  ;;  %v1628_v62 = vmul.f32 %v1627_v2, %v8047_v35 }
 0x2aa   :  { %v1564_v31 = vmul.f32 %v6610_v26, %v1563_v40  ;;  %vm1608_vm12 = vmor %vm1606_vm11, %vm1607_vm9 }
 0x2ab   :  { %v1603_v25 = vsub.f32 1.0, %v1602_v16  ;;  %v1640_v22 = vadd.f32 1.0, %v1639_v19  ;;  %v1629_v40 = vadd.f32 1.1283791, %v1628_v62  ;;  %v1046_v16 = vmul.f32 0.5, %v7975_v63 }
 0x2ac   :  { %v1565_v36 = vadd.f32 %v6610_v26, %v1564_v31 }
 0x2ad   :  { %v1604_v43 = vmul.f32 %v6612_v27, %v1603_v25  ;;  %6613 = vrcp.f32 %v1640_v22  ;;  %v1652_v8 = vand.u32 2147483648, %v1640_v22  ;;  %v1650_v56 = vand.u32 2147483647, %v1640_v22 }
 0x2ae   :  { %v1569_v53 = vsel %vm1568_vm8, %v6610_v26, %v1565_v36  ;;  %vm1646_vm15 = vweird.f32 %v1640_v22  ;;  %v1630_v25 = vmul.f32 %v1629_v40, %v8034_v55  ;;  %v316_v36 = vpop.f32.mrf.mxu0 }
 0x2af   :  { %v1574_v1 = vsel %vm1571_vm10, %v1573_v39, %v1569_v53  ;;  %v1605_v46 = vadd.f32 %v6612_v27, %v1604_v43  ;;  %v1653_v19 = vor.u32 1.1754944e-38, %v1652_v8  ;;  %vm1651_vm1 = vcmp.eq.f32.partialorder %v1650_v56, 8.507059e+37 }
 0x2b0   :  { %v1575_v21 = vmul.f32 %v1574_v1, %v1550_v42 }
 0x2b1   :  { %v1609_v44 = vsel %vm1608_vm12, %v6612_v27, %v1605_v46 }
 0x2b2   :  { %v6460_v61 = vclamps-f32 %v1575_v21, 1.0  ;;  %v1614_v57 = vsel %vm1611_vm13, %v1613_v54, %v1609_v44  ;;  %v1047_v54 = vmul.f32 0.5, %v8020_v20 }
 0x2b3   :  { %v1615_v38 = vmul.f32 %v1614_v57, %v1590_v5  ;;  %v6614_v23 = vpop.eup %6613 }
 0x2b4   :  { %v2389_v26 = vadd.f32 1.0, %v6460_v61  ;;  %v1642_v3 = vmul.f32 %v6614_v23, %v1640_v22  ;;  %vm1647_vm14 = vweird.f32 %v6614_v23 }
 0x2b5   :  { %v6461_v7 = vclamps-f32 %v1615_v38, 1.0  ;;  %vm1648_vm0 = vmor %vm1646_vm15, %vm1647_vm14 }
 0x2b6   :  { %v2421_v4 = vmul.f32 %v2389_v26, %v1045_v24  ;;  %v1643_v27 = vsub.f32 1.0, %v1642_v3  ;;  %v8093_v24 = vadd.f32 %v316_v36, %v7245_v28  ;;  %v319_v26 = vpop.f32.mrf.mxu0 }
 0x2b7   :  { %v517_v18 = vpop.xlane.xlu1 %516  ;;  %v2390_v58 = vadd.f32 1.0, %v6461_v7 }
 0x2b8   :  { %v566_v29 = vmul.f32 0.0078125, %v517_v18  ;;  %2509 = vmatmul.f32.gmra.mxu1 %v2421_v4  ;;  %v1644_v51 = vmul.f32 %v6614_v23, %v1643_v27 }
 0x2b9   :  { %v2422_v31 = vmul.f32 %v2390_v58, %v1046_v16 }
 0x2ba   :  { %v598_v0 = vadd.f32 1e-05, %v566_v29  ;;  %v1645_v52 = vadd.f32 %v6614_v23, %v1644_v51 }
 0x2bc   :  { %6615 = vrsqrt.f32 %v598_v0  ;;  %v1649_v32 = vsel %vm1648_vm0, %v6614_v23, %v1645_v52  ;;  %vm762_vm3 = vweird.f32 %v598_v0 }
 0x2bd   :  { %v1654_v43 = vsel %vm1651_vm1, %v1653_v19, %v1649_v32 }
 0x2be   :  { %v1655_v22 = vmul.f32 %v1654_v43, %v1630_v25 }
 0x2bf   :  { %v371_v41 = vpop.xlane.xlu1 %370  ;;  %v519_v30 = vpop.xlane.xlu0 %518 }
 0x2c0   :  { %v413_v35 = vmul.f32 0.0078125, %v371_v41  ;;  %v567_v11 = vmul.f32 0.0078125, %v519_v30  ;;  %2512 = vmatmul.f32.gmra.mxu1 %v2422_v31  ;;  %v6462_v55 = vclamps-f32 %v1655_v22, 1.0  ;;  %v8107_v41 = vadd.f32 %v319_v26, %v7245_v28 }
 0x2c2   :  { %v6616_v39 = vpop.eup %6615  ;;  %v8082_v63 = vsub.f32 %v7708_v37, %v413_v35  ;;  %v599_v14 = vadd.f32 1e-05, %v567_v11  ;;  %v2391_v5 = vadd.f32 1.0, %v6462_v55  ;;  %v322_v35 = vpop.f32.mrf.mxu0 }
 0x2c3   :  { %v757_v15 = vmul.f32 %v6616_v39, %v598_v0  ;;  %vm763_vm2 = vweird.f32 %v6616_v39 }
 0x2c4   :  { %6617 = vrsqrt.f32 %v599_v14  ;;  %v477_v42 = vmul.f32 %v8082_v63, %v8082_v63  ;;  %v2423_v57 = vmul.f32 %v2391_v5, %v1047_v54  ;;  %vm764_vm4 = vmor %vm762_vm3, %vm763_vm2  ;;  %vm772_vm6 = vweird.f32 %v599_v14 }
 0x2c5   :  { %v758_v53 = vmul.f32 %v6616_v39, %v757_v15 }
 0x2c6   :  { %530 = vadd.xlane.f32.xlu0 %v477_v42 }
 0x2c7   :  { %v759_v1 = vmul.f32 0.5, %v758_v53  ;;  %v521_v46 = vpop.xlane.xlu2 %520  ;;  %v373_v21 = vpop.xlane.xlu0 %372 }
 0x2c8   :  { %v568_v37 = vmul.f32 0.0078125, %v521_v46  ;;  %v414_v44 = vmul.f32 0.0078125, %v373_v21  ;;  %2515 = vmatmul.f32.gmra.mxu1 %v2423_v57  ;;  %v8134_v46 = vadd.f32 %v322_v35, %v7245_v28 }
 0x2c9   :  { %v760_v2 = vsub.f32 1.5, %v759_v1 }
 0x2ca   :  { %v6618_v61 = vpop.eup %6617  ;;  %v8087_v38 = vadd.f32 1e-05, %v568_v37  ;;  %v8090_v18 = vsub.f32 %v7725_v47, %v414_v44 }
 0x2cb   :  { %v761_v29 = vmul.f32 %v6616_v39, %v760_v2  ;;  %v767_v23 = vmul.f32 %v6618_v61, %v599_v14  ;;  %vm773_vm5 = vweird.f32 %v6618_v61 }
 0x2cc   :  { %6619 = vrsqrt.f32 %v8087_v38  ;;  %v478_v20 = vmul.f32 %v8090_v18, %v8090_v18  ;;  %vm774_vm7 = vmor %vm772_vm6, %vm773_vm5  ;;  %vm782_vm9 = vweird.f32 %v8087_v38 }
 0x2cd   :  { %v765_v7 = vsel %vm764_vm4, %v6616_v39, %v761_v29  ;;  %v768_v62 = vmul.f32 %v6618_v61, %v767_v23 }
 0x2ce   :  { %384 = vadd.xlane.f32.xlu0 %v8093_v24  ;;  %532 = vadd.xlane.f32.xlu2 %v478_v20  ;;  %v950_v47 = vmul.f32 %v765_v7, %v7695_v48 }
 0x2cf   :  { %v769_v4 = vmul.f32 0.5, %v768_v62  ;;  %v523_v3 = vpop.xlane.xlu1 %522  ;;  %v375_v58 = vpop.xlane.xlu2 %374 }
 0x2d0   :  { %v569_v27 = vmul.f32 0.0078125, %v523_v3  ;;  %v415_v0 = vmul.f32 0.0078125, %v375_v58  ;;  %v983_v40 = vmul.f32 %v7334_v10, %v950_v47 }
 0x2d1   :  { %v770_v8 = vsub.f32 1.5, %v769_v4 }
 0x2d2   :  { %v6620_v16 = vpop.eup %6619  ;;  %v8101_v51 = vadd.f32 1e-05, %v569_v27  ;;  %v8104_v56 = vsub.f32 %v7746_v50, %v415_v0  ;;  %v8110_v48 = vadd.f32 %v7342_v17, %v983_v40 }
 0x2d3   :  { %v771_v30 = vmul.f32 %v6618_v61, %v770_v8  ;;  %v777_v31 = vmul.f32 %v6620_v16, %v8087_v38  ;;  %vm783_vm8 = vweird.f32 %v6620_v16  ;;  %v325_v38 = vpop.f32.mrf.mxu0 }
 0x2d4   :  { %6621 = vrsqrt.f32 %v8101_v51  ;;  %v479_v52 = vmul.f32 %v8104_v56, %v8104_v56  ;;  %v8117_v25 = vmul.f32 0.70710677, %v8110_v48  ;;  %vm8146_vm10 = vmor %vm782_vm9, %vm783_vm8  ;;  %v8162_v0 = vadd.f32 %v325_v38, %v7245_v28 }
 0x2d5   :  { %v775_v11 = vsel %vm774_vm7, %v6618_v61, %v771_v30  ;;  %v778_v50 = vmul.f32 %v6620_v16, %v777_v31  ;;  %vm792_vm12 = vweird.f32 %v8101_v51 }
 0x2d6   :  { %534 = vadd.xlane.f32.xlu1 %v479_v52  ;;  %386 = vadd.xlane.f32.xlu2 %v8107_v41  ;;  %v951_v19 = vmul.f32 %v775_v11, %v7703_v9  ;;  %v1658_v14 = vmul.f32 %v8117_v25, %v8117_v25 }
 0x2d7   :  { %v779_v36 = vmul.f32 0.5, %v778_v50  ;;  %v377_v39 = vpop.xlane.xlu1 %376  ;;  %v525_v32 = vpop.xlane.xlu0 %524 }
 0x2d8   :  { %v416_v43 = vmul.f32 0.0078125, %v377_v39  ;;  %v570_v15 = vmul.f32 0.0078125, %v525_v32  ;;  %v984_v22 = vmul.f32 %v7334_v10, %v951_v19  ;;  %v8124_v53 = vmin.f32 %v1658_v14, 16.0 }
 0x2d9   :  { %v780_v42 = vsub.f32 1.5, %v779_v36 }
 0x2da   :  { %v8126_v55 = vpop.eup %6621  ;;  %v8129_v1 = vsub.f32 %v7787_v12, %v416_v43  ;;  %v8131_v9 = vadd.f32 1e-05, %v570_v15  ;;  %v8137_v21 = vadd.f32 %v7342_v17, %v984_v22  ;;  %v1660_v37 = vmul.f32 2.1237322e-06, %v8124_v53 }
 0x2db   :  { %v781_v54 = vmul.f32 %v6620_v16, %v780_v42  ;;  %v787_v5 = vmul.f32 %v8126_v55, %v8101_v51  ;;  %v1671_v61 = vmul.f32 3.8918573e-05, %v8124_v53  ;;  %vm793_vm11 = vweird.f32 %v8126_v55 }
 0x2dc   :  { %6623 = vrsqrt.f32 %v8131_v9  ;;  %v480_v12 = vmul.f32 %v8129_v1, %v8129_v1  ;;  %v1661_v26 = vadd.f32 0.00028619796, %v1660_v37  ;;  %v8156_v29 = vmul.f32 0.70710677, %v8137_v21  ;;  %vm8188_vm13 = vmor %vm792_vm12, %vm793_vm11 }
 0x2dd   :  { %v788_v2 = vmul.f32 %v8126_v55, %v787_v5  ;;  %v785_v57 = vsel %vm8146_vm10, %v6620_v16, %v781_v54  ;;  %v1672_v62 = vadd.f32 0.001143296, %v1671_v61  ;;  %vm802_vm15 = vweird.f32 %v8131_v9 }
 0x2de   :  { %536 = vadd.xlane.f32.xlu0 %v480_v12  ;;  %388 = vadd.xlane.f32.xlu1 %v8134_v46  ;;  %v1662_v3 = vmul.f32 %v1661_v26, %v8124_v53  ;;  %v1698_v58 = vmul.f32 %v8156_v29, %v8156_v29  ;;  %v952_v8 = vmul.f32 %v785_v57, %v7722_v33 }
 0x2df   :  { %v789_v23 = vmul.f32 0.5, %v788_v2  ;;  %v527_v20 = vpop.xlane.xlu2 %526  ;;  %v379_v7 = vpop.xlane.xlu0 %378  ;;  %v1673_v40 = vmul.f32 %v1672_v62, %v8124_v53 }
 0x2e0   :  { %v571_v47 = vmul.f32 0.0078125, %v527_v20  ;;  %v417_v4 = vmul.f32 0.0078125, %v379_v7  ;;  %v1663_v52 = vadd.f32 0.0036580483, %v1662_v3  ;;  %v8173_v35 = vmin.f32 %v1698_v58, 16.0 }
 0x2e1   :  { %v790_v27 = vsub.f32 1.5, %v789_v23  ;;  %v1674_v50 = vadd.f32 0.014752088, %v1673_v40  ;;  %v985_v32 = vmul.f32 %v7334_v10, %v952_v8 }
 0x2e2   :  { %v8166_v16 = vpop.eup %6623  ;;  %v8168_v30 = vadd.f32 1e-05, %v571_v47  ;;  %v8171_v31 = vsub.f32 %v7824_v60, %v417_v4  ;;  %v1664_v60 = vmul.f32 %v1663_v52, %v8124_v53  ;;  %v1700_v39 = vmul.f32 2.1237322e-06, %v8173_v35 }
 0x2e3   :  { %v791_v11 = vmul.f32 %v8126_v55, %v790_v27  ;;  %v797_v28 = vmul.f32 %v8166_v16, %v8131_v9  ;;  %v1675_v36 = vmul.f32 %v1674_v50, %v8124_v53  ;;  %v1711_v43 = vmul.f32 3.8918573e-05, %v8173_v35 }
 0x2e4   :  { %6625 = vrsqrt.f32 %v8168_v30  ;;  %v481_v33 = vmul.f32 %v8171_v31, %v8171_v31  ;;  %v1665_v51 = vadd.f32 0.05243302, %v1664_v60  ;;  %v1701_v12 = vadd.f32 0.00028619796, %v1700_v39 }
 0x2e5   :  { %v798_v19 = vmul.f32 %v8166_v16, %v797_v28  ;;  %v795_v15 = vsel %vm8188_vm13, %v8126_v55, %v791_v11  ;;  %v1676_v5 = vadd.f32 0.112945676, %v1675_v36  ;;  %v1712_v61 = vadd.f32 0.001143296, %v1711_v43 }
 0x2e6   :  { %390 = vadd.xlane.f32.xlu0 %v8162_v0  ;;  %538 = vadd.xlane.f32.xlu2 %v481_v33  ;;  %v1666_v2 = vmul.f32 %v1665_v51, %v8124_v53  ;;  %v1702_v26 = vmul.f32 %v1701_v12, %v8173_v35  ;;  %v8201_v23 = vadd.f32 %v7342_v17, %v985_v32  ;;  %vm803_vm14 = vweird.f32 %v8166_v16 }
 0x2e7   :  { %v799_v22 = vmul.f32 0.5, %v798_v19  ;;  %v529_v42 = vpop.xlane.xlu1 %528  ;;  %v381_v54 = vpop.xlane.xlu2 %380  ;;  %v1677_v38 = vmul.f32 %v1676_v5, %v8124_v53  ;;  %v1713_v47 = vmul.f32 %v1712_v61, %v8173_v35  ;;  %v953_v52 = vmul.f32 %v795_v15, %v7756_v45  ;;  %vm8222_vm0 = vmor %vm802_vm15, %vm803_vm14 }
 0x2e8   :  { %v572_v37 = vmul.f32 0.0078125, %v529_v42  ;;  %v418_v44 = vmul.f32 0.0078125, %v381_v54  ;;  %v1667_v62 = vadd.f32 0.18741608, %v1666_v2  ;;  %v1703_v8 = vadd.f32 0.0036580483, %v1702_v26 }
 0x2e9   :  { %v800_v57 = vsub.f32 1.5, %v799_v22  ;;  %v1678_v58 = vadd.f32 0.4994258, %v1677_v38  ;;  %v1714_v9 = vadd.f32 0.014752088, %v1713_v47  ;;  %v986_v51 = vmul.f32 %v7334_v10, %v953_v52 }
 0x2ea   :  { %v8203_v20 = vpop.eup %6625  ;;  %v8205_v55 = vadd.f32 1e-05, %v572_v37  ;;  %v8208_v7 = vsub.f32 %v7865_v49, %v418_v44  ;;  %v1668_v28 = vmul.f32 %v1667_v62, %v8124_v53  ;;  %v8228_v50 = vmul.f32 0.70710677, %v8201_v23 }
 0x2eb   :  { %v801_v4 = vmul.f32 %v8166_v16, %v800_v57  ;;  %v807_v3 = vmul.f32 %v8203_v20, %v8168_v30  ;;  %v1679_v40 = vmul.f32 %v1678_v58, %v8124_v53  ;;  %v1704_v45 = vmul.f32 %v1703_v8, %v8173_v35 }
 0x2ec   :  { %6627 = vrsqrt.f32 %v8205_v55  ;;  %v482_v27 = vmul.f32 %v8208_v7, %v8208_v7  ;;  %v1715_v32 = vmul.f32 %v1714_v9, %v8173_v35  ;;  %v1738_v53 = vmul.f32 %v8228_v50, %v8228_v50 }
 0x2ed   :  { %v808_v49 = vmul.f32 %v8203_v20, %v807_v3  ;;  %v805_v33 = vsel %vm8222_vm0, %v8166_v16, %v801_v4  ;;  %v8233_v36 = vadd.f32 1.0, %v1679_v40  ;;  %v1705_v15 = vadd.f32 0.05243302, %v1704_v45 }
 0x2ee   :  { %540 = vadd.xlane.f32.xlu1 %v482_v27  ;;  %v1716_v22 = vadd.f32 0.112945676, %v1715_v32  ;;  %v954_v42 = vmul.f32 %v805_v33, %v7793_v6  ;;  %v8250_v5 = vmul.f32 0.5, %v8110_v48  ;;  %v1669_v12 = vadd.f32 1.1283791, %v1668_v28 }
 0x2ef   :  { %v809_v60 = vmul.f32 0.5, %v808_v49  ;;  %v383_v19 = vpop.xlane.xlu1 %382  ;;  %6629 = vrcp.f32 %v8233_v36  ;;  %vm812_vm1 = vweird.f32 %v8168_v30  ;;  %v1706_v44 = vmul.f32 %v1705_v15, %v8173_v35 }
 0x2f0   :  { %v419_v39 = vmul.f32 0.0078125, %v383_v19  ;;  %vm813_vm2 = vweird.f32 %v8203_v20  ;;  %v8260_v61 = vmin.f32 %v1738_v53, 16.0  ;;  %v8263_v38 = vadd.f32 %v7342_v17, %v986_v51 }
 0x2f1   :  { %v810_v14 = vsub.f32 1.5, %v809_v60  ;;  %v1707_v48 = vadd.f32 0.18741608, %v1706_v44  ;;  %v987_v26 = vmul.f32 %v7334_v10, %v954_v42  ;;  %v1670_v4 = vmul.f32 %v1669_v12, %v8117_v25  ;;  %vm8271_vm3 = vmor %vm812_vm1, %vm813_vm2 }
 0x2f2   :  { %v8241_v43 = vpop.eup %6627  ;;  %v8244_v16 = vsub.f32 %v7890_v59, %v419_v39  ;;  %v1717_v59 = vmul.f32 %v1716_v22, %v8173_v35  ;;  %v1740_v3 = vmul.f32 2.1237322e-06, %v8260_v61  ;;  %v1751_v58 = vmul.f32 3.8918573e-05, %v8260_v61 }
 0x2f3   :  { %v817_v54 = vmul.f32 %v8241_v43, %v8205_v55  ;;  %v811_v2 = vmul.f32 %v8203_v20, %v810_v14  ;;  %v1690_v40 = vand.u32 2147483647, %v8233_v36  ;;  %v1708_v8 = vmul.f32 %v1707_v48, %v8173_v35 }
 0x2f4   :  { %v483_v37 = vmul.f32 %v8244_v16, %v8244_v16  ;;  %v1718_v57 = vadd.f32 0.4994258, %v1717_v59  ;;  %v1692_v11 = vand.u32 2147483648, %v8233_v36  ;;  %v1741_v28 = vadd.f32 0.00028619796, %v1740_v3 }
 0x2f5   :  { %v818_v6 = vmul.f32 %v8241_v43, %v817_v54  ;;  %v6630_v62 = vpop.eup %6629  ;;  %v815_v25 = vsel %vm8271_vm3, %v8203_v20, %v811_v2  ;;  %v1752_v30 = vadd.f32 0.001143296, %v1751_v58  ;;  %v8286_v60 = vmul.f32 0.70710677, %v8263_v38 }
 0x2f6   :  { %542 = vadd.xlane.f32.xlu2 %v483_v37  ;;  %v1682_v49 = vmul.f32 %v6630_v62, %v8233_v36  ;;  %v1719_v52 = vmul.f32 %v1718_v57, %v8173_v35  ;;  %v8289_v19 = vadd.f32 %v7342_v17, %v987_v26  ;;  %v1709_v39 = vadd.f32 1.1283791, %v1708_v8 }
 0x2f7   :  { %v819_v47 = vmul.f32 0.5, %v818_v6  ;;  %v1742_v35 = vmul.f32 %v1741_v28, %v8260_v61  ;;  %v1753_v32 = vmul.f32 %v1752_v30, %v8260_v61  ;;  %vm1686_vm4 = vweird.f32 %v8233_v36 }
 0x2f8   :  { %v1683_v9 = vsub.f32 1.0, %v1682_v49  ;;  %v8283_v33 = vadd.f32 1.0, %v1719_v52  ;;  %vm1687_vm5 = vweird.f32 %v6630_v62  ;;  %vm8295_vm6 = vcmp.eq.f32.partialorder %v1690_v40, 8.507059e+37 }
 0x2f9   :  { %v820_v45 = vsub.f32 1.5, %v819_v47  ;;  %v1693_v53 = vor.u32 1.1754944e-38, %v1692_v11  ;;  %v1743_v51 = vadd.f32 0.0036580483, %v1742_v35  ;;  %v955_v15 = vmul.f32 %v815_v25, %v7835_v13  ;;  %vm1688_vm7 = vmor %vm1686_vm4, %vm1687_vm5 }
 0x2fa   :  { %v1684_v20 = vmul.f32 %v6630_v62, %v1683_v9  ;;  %6631 = vrcp.f32 %v8283_v33  ;;  %v1754_v42 = vadd.f32 0.014752088, %v1753_v32  ;;  %v1778_v54 = vmul.f32 %v8286_v60, %v8286_v60 }
 0x2fb   :  { %v8303_v12 = vmul.f32 0.70710677, %v8289_v19  ;;  %v8306_v36 = vmul.f32 %v8241_v43, %v820_v45  ;;  %v1710_v37 = vmul.f32 %v1709_v39, %v8156_v29  ;;  %v1730_v44 = vand.u32 2147483647, %v8283_v33 }
 0x2fc   :  { %v1685_v22 = vadd.f32 %v6630_v62, %v1684_v20  ;;  %v1744_v59 = vmul.f32 %v1743_v51, %v8260_v61  ;;  %v1755_v13 = vmul.f32 %v1754_v42, %v8260_v61  ;;  %v8312_v6 = vmin.f32 %v1778_v54, 16.0 }
 0x2fd   :  { %v1818_v48 = vmul.f32 %v8303_v12, %v8303_v12  ;;  %vm823_vm8 = vweird.f32 %v8241_v43  ;;  %vm1726_vm9 = vweird.f32 %v8283_v33  ;;  %v1732_v29 = vand.u32 2147483648, %v8283_v33 }
 0x2fe   :  { %v1689_v2 = vsel %vm1688_vm7, %v6630_v62, %v1685_v22  ;;  %v988_v26 = vmul.f32 %v7334_v10, %v955_v15  ;;  %v1756_v3 = vadd.f32 0.112945676, %v1755_v13  ;;  %v1780_v58 = vmul.f32 2.1237322e-06, %v8312_v6 }
 0x2ff   :  { %v1694_v57 = vsel %vm8295_vm6, %v1693_v53, %v1689_v2  ;;  %v1791_v27 = vmul.f32 3.8918573e-05, %v8312_v6  ;;  %vm822_vm10 = vweird.f32 %v8205_v55  ;;  %vm8326_vm11 = vcmp.eq.f32.partialorder %v1730_v44, 8.507059e+37 }
 0x300   :  { %v6632_v47 = vpop.eup %6631  ;;  %v1695_v62 = vmul.f32 %v1694_v57, %v1670_v4  ;;  %v1745_v8 = vadd.f32 0.05243302, %v1744_v59  ;;  %v8330_v52 = vmin.f32 %v1818_v48, 16.0  ;;  %v1757_v11 = vmul.f32 %v1756_v3, %v8260_v61  ;;  %vm8359_vm14 = vmor %vm822_vm10, %vm823_vm8 }
 0x301   :  { %v1722_v49 = vmul.f32 %v6632_v47, %v8283_v33  ;;  %v1781_v4 = vadd.f32 0.00028619796, %v1780_v58  ;;  %v1792_v28 = vadd.f32 0.001143296, %v1791_v27  ;;  %vm1727_vm12 = vweird.f32 %v6632_v47 }
 0x302   :  { %v6463_v25 = vclamps-f32 %v1695_v62, 1.0  ;;  %v1820_v9 = vmul.f32 2.1237322e-06, %v8330_v52  ;;  %v8335_v45 = vadd.f32 %v7342_v17, %v988_v26  ;;  %v1758_v35 = vadd.f32 0.4994258, %v1757_v11  ;;  %vm1728_vm13 = vmor %vm1726_vm9, %vm1727_vm12 }
 0x303   :  { %v1723_v30 = vsub.f32 1.0, %v1722_v49  ;;  %v1782_v32 = vmul.f32 %v1781_v4, %v8312_v6  ;;  %v1793_v20 = vmul.f32 %v1792_v28, %v8312_v6  ;;  %v1746_v53 = vmul.f32 %v1745_v8, %v8260_v61 }
 0x304   :  { %v2392_v39 = vadd.f32 1.0, %v6463_v25  ;;  %v1821_v51 = vadd.f32 0.00028619796, %v1820_v9  ;;  %v1831_v15 = vmul.f32 3.8918573e-05, %v8330_v52  ;;  %v1759_v42 = vmul.f32 %v1758_v35, %v8260_v61 }
 0x305   :  { %v1724_v14 = vmul.f32 %v6632_v47, %v1723_v30  ;;  %v1783_v54 = vadd.f32 0.0036580483, %v1782_v32  ;;  %v1794_v44 = vadd.f32 0.014752088, %v1793_v20  ;;  %v1733_v2 = vor.u32 1.1754944e-38, %v1732_v29 }
 0x306   :  { %v2424_v22 = vmul.f32 %v2392_v39, %v8250_v5  ;;  %v1822_v13 = vmul.f32 %v1821_v51, %v8330_v52  ;;  %v1832_v48 = vadd.f32 0.001143296, %v1831_v15  ;;  %v8347_v57 = vadd.f32 1.0, %v1759_v42 }
 0x307   :  { %v1725_v59 = vadd.f32 %v6632_v47, %v1724_v14  ;;  %v1784_v26 = vmul.f32 %v1783_v54, %v8312_v6  ;;  %v1795_v5 = vmul.f32 %v1794_v44, %v8312_v6  ;;  %v8352_v62 = vmul.f32 0.70710677, %v8335_v45 }
 0x308   :  { %2518 = vmatmul.f32.gmra.mxu1 %v2424_v22  ;;  %v1747_v58 = vadd.f32 0.18741608, %v1746_v53  ;;  %v1823_v29 = vadd.f32 0.0036580483, %v1822_v13  ;;  %v1833_v27 = vmul.f32 %v1832_v48, %v8330_v52  ;;  %6633 = vrcp.f32 %v8347_v57 }
 0x309   :  { %v1729_v3 = vsel %vm1728_vm13, %v6632_v47, %v1725_v59  ;;  %v825_v47 = vsel %vm8359_vm14, %v8241_v43, %v8306_v36  ;;  %v1785_v25 = vadd.f32 0.05243302, %v1784_v26  ;;  %v1796_v11 = vadd.f32 0.112945676, %v1795_v5 }
 0x30a   :  { %v1734_v49 = vsel %vm8326_vm11, %v1733_v2, %v1729_v3  ;;  %v1834_v4 = vadd.f32 0.014752088, %v1833_v27  ;;  %v1858_v55 = vmul.f32 %v8352_v62, %v8352_v62  ;;  %v1748_v30 = vmul.f32 %v1747_v58, %v8260_v61 }
 0x30b   :  { %v1735_v8 = vmul.f32 %v1734_v49, %v1710_v37  ;;  %v1797_v40 = vmul.f32 %v1796_v11, %v8312_v6  ;;  %v1824_v9 = vmul.f32 %v1823_v29, %v8330_v52  ;;  %v1786_v39 = vmul.f32 %v1785_v25, %v8312_v6 }
 0x30c   :  { %v1835_v35 = vmul.f32 %v1834_v4, %v8330_v52  ;;  %v8377_v32 = vmin.f32 %v1858_v55, 16.0  ;;  %v956_v43 = vmul.f32 %v825_v47, %v7875_v34  ;;  %v1049_v36 = vmul.f32 0.5, %v8137_v21 }
 0x30d   :  { %v6464_v28 = vclamps-f32 %v1735_v8, 1.0  ;;  %v1798_v20 = vadd.f32 0.4994258, %v1797_v40  ;;  %v1749_v22 = vadd.f32 1.1283791, %v1748_v30  ;;  %v1772_v5 = vand.u32 2147483648, %v8347_v57 }
 0x30e   :  { %v6634_v14 = vpop.eup %6633  ;;  %v1836_v53 = vadd.f32 0.112945676, %v1835_v35  ;;  %v1860_v61 = vmul.f32 2.1237322e-06, %v8377_v32  ;;  %v1871_v51 = vmul.f32 3.8918573e-05, %v8377_v32  ;;  %v989_v21 = vmul.f32 %v7334_v10, %v956_v43 }
 0x30f   :  { %v2393_v37 = vadd.f32 1.0, %v6464_v28  ;;  %v1762_v42 = vmul.f32 %v6634_v14, %v8347_v57  ;;  %v1825_v54 = vadd.f32 0.05243302, %v1824_v9  ;;  %v1787_v44 = vadd.f32 0.18741608, %v1786_v39 }
 0x310   :  { %v1799_v59 = vmul.f32 %v1798_v20, %v8312_v6  ;;  %v1837_v34 = vmul.f32 %v1836_v53, %v8330_v52  ;;  %v1861_v13 = vadd.f32 0.00028619796, %v1860_v61  ;;  %v1872_v48 = vadd.f32 0.001143296, %v1871_v51 }
 0x311   :  { %v2425_v15 = vmul.f32 %v2393_v37, %v1049_v36  ;;  %v1763_v2 = vsub.f32 1.0, %v1762_v42  ;;  %v1770_v26 = vand.u32 2147483647, %v8347_v57  ;;  %vm1767_vm15 = vweird.f32 %v6634_v14 }
 0x312   :  { %v1800_v3 = vadd.f32 1.0, %v1799_v59  ;;  %v1838_v58 = vadd.f32 0.4994258, %v1837_v34  ;;  %v1862_v27 = vmul.f32 %v1861_v13, %v8377_v32  ;;  %v1873_v33 = vmul.f32 %v1872_v48, %v8377_v32 }
 0x313   :  { %2521 = vmatmul.f32.gmra.mxu1 %v2425_v15  ;;  %v1764_v29 = vmul.f32 %v6634_v14, %v1763_v2  ;;  %v1826_v49 = vmul.f32 %v1825_v54, %v8330_v52  ;;  %v8393_v47 = vadd.f32 %v7342_v17, %v989_v21  ;;  %vm1766_vm0 = vweird.f32 %v8347_v57 }
 0x314   :  { %6635 = vrcp.f32 %v1800_v3  ;;  %v1788_v25 = vmul.f32 %v1787_v44, %v8312_v6  ;;  %v1839_v11 = vmul.f32 %v1838_v58, %v8330_v52  ;;  %vm1768_vm1 = vmor %vm1766_vm0, %vm1767_vm15  ;;  %v1773_v4 = vor.u32 1.1754944e-38, %v1772_v5 }
 0x315   :  { %v1765_v8 = vadd.f32 %v6634_v14, %v1764_v29  ;;  %v1863_v55 = vadd.f32 0.0036580483, %v1862_v27  ;;  %v1874_v28 = vadd.f32 0.014752088, %v1873_v33  ;;  %v1750_v30 = vmul.f32 %v1749_v22, %v8228_v50 }
 0x316   :  { %vm1771_vm2 = vcmp.eq.f32.partialorder %v1770_v26, 8.507059e+37  ;;  %v8399_v9 = vadd.f32 1.0, %v1839_v11  ;;  %v1827_v35 = vadd.f32 0.18741608, %v1826_v49  ;;  %v8403_v57 = vmul.f32 0.70710677, %v8393_v47 }
 0x317   :  { %v1769_v40 = vsel %vm1768_vm1, %v6634_v14, %v1765_v8  ;;  %v1875_v43 = vmul.f32 %v1874_v28, %v8377_v32  ;;  %v1789_v36 = vadd.f32 1.1283791, %v1788_v25  ;;  %v1864_v20 = vmul.f32 %v1863_v55, %v8377_v32 }
 0x318   :  { %v1774_v39 = vsel %vm1771_vm2, %v1773_v4, %v1769_v40  ;;  %6637 = vrcp.f32 %v8399_v9  ;;  %v1898_v50 = vmul.f32 %v8403_v57, %v8403_v57  ;;  %v1050_v14 = vmul.f32 0.5, %v8201_v23 }
 0x319   :  { %v1775_v6 = vmul.f32 %v1774_v39, %v1750_v30  ;;  %v1876_v53 = vadd.f32 0.112945676, %v1875_v43  ;;  %v1810_v15 = vand.u32 2147483647, %v1800_v3  ;;  %v1828_v22 = vmul.f32 %v1827_v35, %v8330_v52 }
 0x31a   :  { %v6636_v37 = vpop.eup %6635  ;;  %v8412_v54 = vmin.f32 %v1898_v50, 16.0  ;;  %v1790_v59 = vmul.f32 %v1789_v36, %v8286_v60  ;;  %v1812_v21 = vand.u32 2147483648, %v1800_v3  ;;  %vm1806_vm3 = vweird.f32 %v1800_v3  ;;  %v8431_v36 = vpop.f32.mrf.mxu1 }
 0x31b   :  { %v6465_v61 = vclamps-f32 %v1775_v6, 1.0  ;;  %v1802_v51 = vmul.f32 %v6636_v37, %v1800_v3  ;;  %v1877_v42 = vmul.f32 %v1876_v53, %v8377_v32  ;;  %v1865_v2 = vadd.f32 0.05243302, %v1864_v20 }
 0x31c   :  { %v1900_v48 = vmul.f32 2.1237322e-06, %v8412_v54  ;;  %vm1807_vm4 = vweird.f32 %v6636_v37  ;;  %v1911_v52 = vmul.f32 3.8918573e-05, %v8412_v54  ;;  %vm8417_vm5 = vcmp.eq.f32.partialorder %v1810_v15, 8.507059e+37 }
 0x31d   :  { %v2394_v44 = vadd.f32 1.0, %v6465_v61  ;;  %v1803_v34 = vsub.f32 1.0, %v1802_v51  ;;  %v1878_v13 = vadd.f32 0.4994258, %v1877_v42  ;;  %v1829_v29 = vadd.f32 1.1283791, %v1828_v22  ;;  %vm1808_vm6 = vmor %vm1806_vm3, %vm1807_vm4 }
 0x31e   :  { %v6638_v23 = vpop.eup %6637  ;;  %v1813_v49 = vor.u32 1.1754944e-38, %v1812_v21  ;;  %v1901_v8 = vadd.f32 0.00028619796, %v1900_v48  ;;  %v1912_v25 = vadd.f32 0.001143296, %v1911_v52  ;;  %v1852_v55 = vand.u32 2147483648, %v8399_v9 }
 0x31f   :  { %v2426_v26 = vmul.f32 %v2394_v44, %v1050_v14  ;;  %v1804_v5 = vmul.f32 %v6636_v37, %v1803_v34  ;;  %v1842_v60 = vmul.f32 %v6638_v23, %v8399_v9  ;;  %v1879_v27 = vmul.f32 %v1878_v13, %v8377_v32 }
 0x320   :  { %v1850_v4 = vand.u32 2147483647, %v8399_v9  ;;  %v1866_v40 = vmul.f32 %v1865_v2, %v8377_v32  ;;  %v1902_v39 = vmul.f32 %v1901_v8, %v8412_v54  ;;  %v1913_v35 = vmul.f32 %v1912_v25, %v8412_v54 }
 0x321   :  { %2524 = vmatmul.f32.gmra.mxu1 %v2426_v26  ;;  %v1805_v33 = vadd.f32 %v6636_v37, %v1804_v5  ;;  %v1843_v11 = vsub.f32 1.0, %v1842_v60  ;;  %v1880_v28 = vadd.f32 1.0, %v1879_v27  ;;  %vm1847_vm7 = vweird.f32 %v6638_v23 }
 0x322   :  { %vm1846_vm8 = vweird.f32 %v8399_v9  ;;  %v1903_v53 = vadd.f32 0.0036580483, %v1902_v39  ;;  %v1853_v14 = vor.u32 1.1754944e-38, %v1852_v55  ;;  %v1867_v61 = vadd.f32 0.18741608, %v1866_v40  ;;  %v8441_v8 = vpop.f32.mrf.mxu1 }
 0x323   :  { %v1809_v30 = vsel %vm1808_vm6, %v6636_v37, %v1805_v33  ;;  %v1844_v6 = vmul.f32 %v6638_v23, %v1843_v11  ;;  %6639 = vrcp.f32 %v1880_v28  ;;  %v1914_v37 = vadd.f32 0.014752088, %v1913_v35  ;;  %vm1848_vm9 = vmor %vm1846_vm8, %vm1847_vm7 }
 0x324   :  { %v1814_v43 = vsel %vm8417_vm5, %v1813_v49, %v1809_v30  ;;  %v1830_v51 = vmul.f32 %v1829_v29, %v8303_v12  ;;  %vm1851_vm10 = vcmp.eq.f32.partialorder %v1850_v4, 8.507059e+37  ;;  %v1051_v42 = vmul.f32 0.5, %v8263_v38 }
 0x325   :  { %v1815_v3 = vmul.f32 %v1814_v43, %v1790_v59  ;;  %v1845_v20 = vadd.f32 %v6638_v23, %v1844_v6  ;;  %v1915_v22 = vmul.f32 %v1914_v37, %v8412_v54  ;;  %v1904_v9 = vmul.f32 %v1903_v53, %v8412_v54 }
 0x326   :  { %v1868_v48 = vmul.f32 %v1867_v61, %v8377_v32  ;;  %v1892_v38 = vand.u32 2147483648, %v1880_v28  ;;  %v1890_v49 = vand.u32 2147483647, %v1880_v28  ;;  %vm1886_vm12 = vweird.f32 %v1880_v28 }
 0x327   :  { %v6466_v50 = vclamps-f32 %v1815_v3, 1.0  ;;  %v1849_v15 = vsel %vm1848_vm9, %v6638_v23, %v1845_v20  ;;  %v1916_v2 = vadd.f32 0.112945676, %v1915_v22  ;;  %v1052_v23 = vmul.f32 0.5, %v8289_v19 }
 0x328   :  { %v1854_v59 = vsel %vm1851_vm10, %v1853_v14, %v1849_v15  ;;  %v1905_v29 = vadd.f32 0.05243302, %v1904_v9  ;;  %v1869_v27 = vadd.f32 1.1283791, %v1868_v48  ;;  %v1893_v4 = vor.u32 1.1754944e-38, %v1892_v38 }
 0x329   :  { %v2395_v44 = vadd.f32 1.0, %v6466_v50  ;;  %v6640_v34 = vpop.eup %6639  ;;  %v1855_v21 = vmul.f32 %v1854_v59, %v1830_v51  ;;  %v1917_v12 = vmul.f32 %v1916_v2, %v8412_v54  ;;  %vm1891_vm14 = vcmp.eq.f32.partialorder %v1890_v49, 8.507059e+37 }
 0x32a   :  { %v1882_v26 = vmul.f32 %v6640_v34, %v1880_v28  ;;  %vm1887_vm11 = vweird.f32 %v6640_v34  ;;  %v1906_v19 = vmul.f32 %v1905_v29, %v8412_v54  ;;  %v1870_v30 = vmul.f32 %v1869_v27, %v8352_v62  ;;  %v8447_v14 = vpop.f32.mrf.mxu1 }
 0x32b   :  { %v2427_v13 = vmul.f32 %v2395_v44, %v1051_v42  ;;  %v6467_v5 = vclamps-f32 %v1855_v21, 1.0  ;;  %v1918_v60 = vadd.f32 0.4994258, %v1917_v12  ;;  %vm1888_vm13 = vmor %vm1886_vm12, %vm1887_vm11  ;;  %v1053_v28 = vmul.f32 0.5, %v8335_v45 }
 0x32c   :  { %v1883_v52 = vsub.f32 1.0, %v1882_v26  ;;  %v1907_v6 = vadd.f32 0.18741608, %v1906_v19 }
 0x32d   :  { %2527 = vmatmul.f32.gmra.mxu1 %v2427_v13  ;;  %v2396_v58 = vadd.f32 1.0, %v6467_v5  ;;  %v1919_v32 = vmul.f32 %v1918_v60, %v8412_v54 }
 0x32e   :  { %v1884_v33 = vmul.f32 %v6640_v34, %v1883_v52  ;;  %v1908_v61 = vmul.f32 %v1907_v6, %v8412_v54 }
 0x32f   :  { %v2428_v25 = vmul.f32 %v2396_v58, %v1052_v23  ;;  %v1920_v55 = vadd.f32 1.0, %v1919_v32  ;;  %v2442_v23 = vld [vmem:[#allocation10] sm:$0xff] }
 0x330   :  { %v1885_v11 = vadd.f32 %v6640_v34, %v1884_v33  ;;  %v1909_v42 = vadd.f32 1.1283791, %v1908_v61  ;;  %v8458_v49 = vperm.slane %v2442_v23, 0 }
 0x331   :  { %6641 = vrcp.f32 %v1920_v55  ;;  %v1932_v44 = vand.u32 2147483648, %v1920_v55  ;;  %v1930_v9 = vand.u32 2147483647, %v1920_v55  ;;  %vm1926_vm0 = vweird.f32 %v1920_v55 }
 0x332   :  { %v1889_v40 = vsel %vm1888_vm13, %v6640_v34, %v1885_v11  ;;  %v1910_v5 = vmul.f32 %v1909_v42, %v8403_v57  ;;  %v8456_v29 = vpop.f32.mrf.mxu1 }
 0x333   :  { %v1894_v39 = vsel %vm1891_vm14, %v1893_v4, %v1889_v40  ;;  %v1933_v12 = vor.u32 1.1754944e-38, %v1932_v44  ;;  %vm1931_vm2 = vcmp.eq.f32.partialorder %v1930_v9, 8.507059e+37 }
 0x334   :  { %v1895_v35 = vmul.f32 %v1894_v39, %v1870_v30 }
 0x335   :  { %2530 = vmatmul.f32.gmra.mxu1 %v2428_v25 }
 0x336   :  { %v6468_v20 = vclamps-f32 %v1895_v35, 1.0 }
 0x337   :  { %v6642_v50 = vpop.eup %6641 }
 0x338   :  { %v2397_v37 = vadd.f32 1.0, %v6468_v20  ;;  %v1922_v51 = vmul.f32 %v6642_v50, %v1920_v55  ;;  %vm1927_vm15 = vweird.f32 %v6642_v50  ;;  %v1054_v55 = vmul.f32 0.5, %v8393_v47 }
 0x339   :  { %v531_v43 = vpop.xlane.xlu0 %530  ;;  %vm1928_vm1 = vmor %vm1926_vm0, %vm1927_vm15 }
 0x33a   :  { %v573_v3 = vmul.f32 0.0078125, %v531_v43  ;;  %v2429_v62 = vmul.f32 %v2397_v37, %v1053_v28  ;;  %v1923_v15 = vsub.f32 1.0, %v1922_v51  ;;  %v8466_v28 = vadd.f32 %v8431_v36, %v8458_v49 }
 0x33c   :  { %v605_v53 = vadd.f32 1e-05, %v573_v3  ;;  %v1924_v21 = vmul.f32 %v6642_v50, %v1923_v15 }
 0x33d   :  { %2533 = vmatmul.f32.gmra.mxu1 %v2429_v62 }
 0x33e   :  { %6643 = vrsqrt.f32 %v605_v53  ;;  %v1925_v48 = vadd.f32 %v6642_v50, %v1924_v21  ;;  %vm832_vm4 = vweird.f32 %v605_v53 }
 0x340   :  { %v1929_v52 = vsel %vm1928_vm1, %v6642_v50, %v1925_v48 }
 0x341   :  { %v533_v22 = vpop.xlane.xlu2 %532  ;;  %v385_v34 = vpop.xlane.xlu0 %384  ;;  %v1934_v60 = vsel %vm1931_vm2, %v1933_v12, %v1929_v52 }
 0x342   :  { %v574_v59 = vmul.f32 0.0078125, %v533_v22  ;;  %v420_v45 = vmul.f32 0.0078125, %v385_v34  ;;  %v1935_v27 = vmul.f32 %v1934_v60, %v1910_v5 }
 0x344   :  { %v6644_v2 = vpop.eup %6643  ;;  %v606_v13 = vadd.f32 1e-05, %v574_v59  ;;  %v8451_v54 = vsub.f32 %v8093_v24, %v420_v45  ;;  %v6469_v25 = vclamps-f32 %v1935_v27, 1.0 }
 0x345   :  { %v827_v26 = vmul.f32 %v6644_v2, %v605_v53  ;;  %vm833_vm3 = vweird.f32 %v6644_v2 }
 0x346   :  { %6645 = vrsqrt.f32 %v606_v13  ;;  %v484_v38 = vmul.f32 %v8451_v54, %v8451_v54  ;;  %v2398_v40 = vadd.f32 1.0, %v6469_v25  ;;  %vm834_vm5 = vmor %vm832_vm4, %vm833_vm3  ;;  %vm842_vm7 = vweird.f32 %v606_v13 }
 0x347   :  { %v828_v58 = vmul.f32 %v6644_v2, %v827_v26 }
 0x348   :  { %544 = vadd.xlane.f32.xlu0 %v484_v38  ;;  %v2430_v6 = vmul.f32 %v2398_v40, %v1054_v55 }
 0x349   :  { %v829_v33 = vmul.f32 0.5, %v828_v58  ;;  %v535_v24 = vpop.xlane.xlu1 %534  ;;  %v387_v32 = vpop.xlane.xlu2 %386 }
 0x34a   :  { %v575_v57 = vmul.f32 0.0078125, %v535_v24  ;;  %v421_v4 = vmul.f32 0.0078125, %v387_v32  ;;  %2536 = vmatmul.f32.gmra.mxu1 %v2430_v6 }
 0x34b   :  { %v830_v11 = vsub.f32 1.5, %v829_v33 }
 0x34c   :  { %v6646_v19 = vpop.eup %6645  ;;  %v607_v30 = vadd.f32 1e-05, %v575_v57  ;;  %v8462_v43 = vsub.f32 %v8107_v41, %v421_v4  ;;  %v8472_v41 = vpop.f32.mrf.mxu1 }
 0x34d   :  { %v831_v39 = vmul.f32 %v6644_v2, %v830_v11  ;;  %v837_v35 = vmul.f32 %v6646_v19, %v606_v13  ;;  %vm843_vm6 = vweird.f32 %v6646_v19  ;;  %v8513_v11 = vadd.f32 %v8441_v8, %v8458_v49 }
 0x34e   :  { %6647 = vrsqrt.f32 %v607_v30  ;;  %v485_v47 = vmul.f32 %v8462_v43, %v8462_v43  ;;  %vm844_vm8 = vmor %vm842_vm7, %vm843_vm6  ;;  %vm852_vm10 = vweird.f32 %v607_v30 }
 0x34f   :  { %v835_v3 = vsel %vm834_vm5, %v6644_v2, %v831_v39  ;;  %v838_v20 = vmul.f32 %v6646_v19, %v837_v35 }
 0x350   :  { %v957_v37 = vmul.f32 %v835_v3, %v8082_v63  ;;  %2573 = vadd.xlane.f32.xlu0 %v8466_v28  ;;  %546 = vadd.xlane.f32.xlu1 %v485_v47 }
 0x351   :  { %v839_v53 = vmul.f32 0.5, %v838_v20  ;;  %v389_v50 = vpop.xlane.xlu1 %388  ;;  %v537_v61 = vpop.xlane.xlu0 %536 }
 0x352   :  { %v422_v62 = vmul.f32 0.0078125, %v389_v50  ;;  %v576_v51 = vmul.f32 0.0078125, %v537_v61  ;;  %v990_v15 = vmul.f32 %v7334_v10, %v957_v37 }
 0x353   :  { %v840_v36 = vsub.f32 1.5, %v839_v53 }
 0x354   :  { %v6648_v22 = vpop.eup %6647  ;;  %v8476_v42 = vsub.f32 %v8134_v46, %v422_v62  ;;  %v8478_v63 = vadd.f32 1e-05, %v576_v51  ;;  %v8481_v44 = vadd.f32 %v7342_v17, %v990_v15  ;;  %v8488_v46 = vadd.f32 %v8447_v14, %v8458_v49  ;;  %v2492_v27 = vpop.f32.mrf.mxu1 }
 0x355   :  { %v841_v59 = vmul.f32 %v6646_v19, %v840_v36  ;;  %v847_v34 = vmul.f32 %v6648_v22, %v607_v30  ;;  %vm853_vm9 = vweird.f32 %v6648_v22  ;;  %v8519_v30 = vadd.f32 %v2492_v27, %v8458_v49 }
 0x356   :  { %6649 = vrsqrt.f32 %v8478_v63  ;;  %v486_v21 = vmul.f32 %v8476_v42, %v8476_v42  ;;  %v8491_v2 = vmul.f32 0.70710677, %v8481_v44  ;;  %vm854_vm11 = vmor %vm852_vm10, %vm853_vm9  ;;  %v8534_v62 = vadd.f32 %v8456_v29, %v8458_v49 }
 0x357   :  { %v845_v9 = vsel %vm844_vm8, %v6646_v19, %v841_v59  ;;  %v848_v45 = vmul.f32 %v6648_v22, %v847_v34  ;;  %vm862_vm13 = vweird.f32 %v8478_v63  ;;  %v8552_v29 = vadd.f32 %v8472_v41, %v8458_v49 }
 0x358   :  { %548 = vadd.xlane.f32.xlu2 %v486_v21  ;;  %v958_v48 = vmul.f32 %v845_v9, %v8090_v18  ;;  %2577 = vadd.xlane.f32.xlu0 %v8488_v46  ;;  %v1938_v12 = vmul.f32 %v8491_v2, %v8491_v2 }
 0x359   :  { %v849_v13 = vmul.f32 0.5, %v848_v45  ;;  %v539_v26 = vpop.xlane.xlu2 %538  ;;  %v391_v5 = vpop.xlane.xlu0 %390 }
 0x35a   :  { %v577_v23 = vmul.f32 0.0078125, %v539_v26  ;;  %v423_v52 = vmul.f32 0.0078125, %v391_v5  ;;  %v991_v58 = vmul.f32 %v7334_v10, %v958_v48  ;;  %v8498_v38 = vmin.f32 %v1938_v12, 16.0 }
 0x35b   :  { %v850_v14 = vsub.f32 1.5, %v849_v13 }
 0x35c   :  { %v6650_v60 = vpop.eup %6649  ;;  %v8500_v33 = vadd.f32 1e-05, %v577_v23  ;;  %v8503_v18 = vsub.f32 %v8162_v0, %v423_v52  ;;  %v8506_v24 = vadd.f32 %v7342_v17, %v991_v58  ;;  %v1940_v25 = vmul.f32 2.1237322e-06, %v8498_v38 }
 0x35d   :  { %v851_v57 = vmul.f32 %v6648_v22, %v850_v14  ;;  %v857_v32 = vmul.f32 %v6650_v60, %v8478_v63  ;;  %v1951_v4 = vmul.f32 3.8918573e-05, %v8498_v38  ;;  %vm863_vm12 = vweird.f32 %v6650_v60 }
 0x35e   :  { %6651 = vrsqrt.f32 %v8500_v33  ;;  %v487_v0 = vmul.f32 %v8503_v18, %v8503_v18  ;;  %v1941_v40 = vadd.f32 0.00028619796, %v1940_v25  ;;  %v8523_v35 = vmul.f32 0.70710677, %v8506_v24  ;;  %vm864_vm14 = vmor %vm862_vm13, %vm863_vm12 }
 0x35f   :  { %v855_v19 = vsel %vm854_vm11, %v6648_v22, %v851_v57  ;;  %v858_v55 = vmul.f32 %v6650_v60, %v857_v32  ;;  %v1952_v39 = vadd.f32 0.001143296, %v1951_v4  ;;  %v2495_v57 = vpop.f32.mrf.mxu1  ;;  %vm872_vm0 = vweird.f32 %v8500_v33 }
 0x360   :  { %2575 = vadd.xlane.f32.xlu2 %v8513_v11  ;;  %550 = vadd.xlane.f32.xlu1 %v487_v0  ;;  %v959_v8 = vmul.f32 %v855_v19, %v8104_v56  ;;  %v1942_v20 = vmul.f32 %v1941_v40, %v8498_v38  ;;  %v1978_v53 = vmul.f32 %v8523_v35, %v8523_v35 }
 0x361   :  { %v859_v6 = vmul.f32 0.5, %v858_v55  ;;  %2583 = vadd.xlane.f32.xlu0 %v8519_v30  ;;  %v541_v3 = vpop.xlane.xlu1 %540  ;;  %v1953_v37 = vmul.f32 %v1952_v39, %v8498_v38 }
 0x362   :  { %v578_v47 = vmul.f32 0.0078125, %v541_v3  ;;  %v992_v50 = vmul.f32 %v7334_v10, %v959_v8  ;;  %v1943_v56 = vadd.f32 0.0036580483, %v1942_v20  ;;  %v8541_v22 = vmin.f32 %v1978_v53, 16.0 }
 0x363   :  { %v860_v61 = vsub.f32 1.5, %v859_v6  ;;  %v1954_v36 = vadd.f32 0.014752088, %v1953_v37 }
 0x364   :  { %v8536_v51 = vpop.eup %6651  ;;  %v8539_v15 = vadd.f32 1e-05, %v578_v47  ;;  %v1944_v21 = vmul.f32 %v1943_v56, %v8498_v38  ;;  %v8547_v9 = vadd.f32 %v7342_v17, %v992_v50  ;;  %v1980_v45 = vmul.f32 2.1237322e-06, %v8541_v22 }
 0x365   :  { %v861_v59 = vmul.f32 %v6650_v60, %v860_v61  ;;  %v867_v34 = vmul.f32 %v8536_v51, %v8500_v33  ;;  %v1955_v63 = vmul.f32 %v1954_v36, %v8498_v38  ;;  %v1991_v5 = vmul.f32 3.8918573e-05, %v8541_v22 }
 0x366   :  { %6653 = vrsqrt.f32 %v8539_v15  ;;  %v1945_v26 = vadd.f32 0.05243302, %v1944_v21  ;;  %v1981_v52 = vadd.f32 0.00028619796, %v1980_v45  ;;  %vm873_vm15 = vweird.f32 %v8536_v51 }
 0x367   :  { %v865_v48 = vsel %vm864_vm14, %v6650_v60, %v861_v59  ;;  %v868_v13 = vmul.f32 %v8536_v51, %v867_v34  ;;  %v1956_v23 = vadd.f32 0.112945676, %v1955_v63  ;;  %v1992_v27 = vadd.f32 0.001143296, %v1991_v5  ;;  %vm874_vm1 = vmor %vm872_vm0, %vm873_vm15 }
 0x368   :  { %v960_v12 = vmul.f32 %v865_v48, %v8129_v1  ;;  %2581 = vadd.xlane.f32.xlu2 %v8552_v29  ;;  %2579 = vadd.xlane.f32.xlu1 %v8534_v62  ;;  %v1946_v14 = vmul.f32 %v1945_v26, %v8498_v38  ;;  %v8563_v60 = vmul.f32 0.70710677, %v8547_v9  ;;  %v1982_v1 = vmul.f32 %v1981_v52, %v8541_v22 }
 0x369   :  { %v869_v41 = vmul.f32 0.5, %v868_v13  ;;  %v543_v58 = vpop.xlane.xlu2 %542  ;;  %v1957_v25 = vmul.f32 %v1956_v23, %v8498_v38  ;;  %v1993_v19 = vmul.f32 %v1992_v27, %v8541_v22  ;;  %v8579_v47 = vadd.f32 %v2495_v57, %v8458_v49 }
 0x36a   :  { %v579_v32 = vmul.f32 0.0078125, %v543_v58  ;;  %v1947_v4 = vadd.f32 0.18741608, %v1946_v14  ;;  %v993_v55 = vmul.f32 %v7334_v10, %v960_v12  ;;  %v1983_v6 = vadd.f32 0.0036580483, %v1982_v1 }
 0x36b   :  { %v870_v0 = vsub.f32 1.5, %v869_v41  ;;  %v1958_v8 = vadd.f32 0.4994258, %v1957_v25  ;;  %v2018_v3 = vmul.f32 %v8563_v60, %v8563_v60  ;;  %v1994_v36 = vadd.f32 0.014752088, %v1993_v19 }
 0x36c   :  { %v8569_v40 = vpop.eup %6653  ;;  %v8571_v39 = vadd.f32 1e-05, %v579_v32  ;;  %v1948_v53 = vmul.f32 %v1947_v4, %v8498_v38  ;;  %v1984_v56 = vmul.f32 %v1983_v6, %v8541_v22  ;;  %v8594_v21 = vadd.f32 %v7342_v17, %v993_v55 }
 0x36d   :  { %v877_v20 = vmul.f32 %v8569_v40, %v8539_v15  ;;  %v871_v37 = vmul.f32 %v8536_v51, %v870_v0  ;;  %v1959_v50 = vmul.f32 %v1958_v8, %v8498_v38  ;;  %v8591_v34 = vmin.f32 %v2018_v3, 16.0 }
 0x36e   :  { %6655 = vrsqrt.f32 %v8571_v39  ;;  %v1995_v63 = vmul.f32 %v1994_v36, %v8541_v22  ;;  %v1949_v48 = vadd.f32 1.1283791, %v1948_v53  ;;  %v1985_v33 = vadd.f32 0.05243302, %v1984_v56 }
 0x36f   :  { %v878_v61 = vmul.f32 %v8569_v40, %v877_v20  ;;  %v8589_v59 = vadd.f32 1.0, %v1959_v50  ;;  %v875_v45 = vsel %vm874_vm1, %v8536_v51, %v871_v37  ;;  %v2020_v26 = vmul.f32 2.1237322e-06, %v8591_v34 }
 0x370   :  { %2585 = vadd.xlane.f32.xlu2 %v8579_v47  ;;  %v1996_v13 = vadd.f32 0.112945676, %v1995_v63  ;;  %v2031_v12 = vmul.f32 3.8918573e-05, %v8591_v34  ;;  %v8606_v23 = vmul.f32 0.70710677, %v8594_v21  ;;  %v961_v52 = vmul.f32 %v875_v45, %v8171_v31 }
 0x371   :  { %v879_v38 = vmul.f32 0.5, %v878_v61  ;;  %6657 = vrcp.f32 %v8589_v59  ;;  %vm882_vm2 = vweird.f32 %v8539_v15  ;;  %v2021_v14 = vadd.f32 0.00028619796, %v2020_v26 }
 0x372   :  { %v1997_v58 = vmul.f32 %v1996_v13, %v8541_v22  ;;  %v2032_v27 = vadd.f32 0.001143296, %v2031_v12  ;;  %v2058_v57 = vmul.f32 %v8606_v23, %v8606_v23  ;;  %vm883_vm3 = vweird.f32 %v8569_v40 }
 0x373   :  { %v880_v41 = vsub.f32 1.5, %v879_v38  ;;  %v1950_v25 = vmul.f32 %v1949_v48, %v8491_v2  ;;  %v1986_v31 = vmul.f32 %v1985_v33, %v8541_v22  ;;  %v1970_v0 = vand.u32 2147483647, %v8589_v59  ;;  %vm8634_vm5 = vmor %vm882_vm2, %vm883_vm3 }
 0x374   :  { %v8602_v5 = vpop.eup %6655  ;;  %v1998_v4 = vadd.f32 0.4994258, %v1997_v58  ;;  %v2022_v19 = vmul.f32 %v2021_v14, %v8591_v34  ;;  %v2033_v55 = vmul.f32 %v2032_v27, %v8591_v34  ;;  %vm892_vm4 = vweird.f32 %v8571_v39 }
 0x375   :  { %v887_v51 = vmul.f32 %v8602_v5, %v8571_v39  ;;  %v881_v8 = vmul.f32 %v8569_v40, %v880_v41  ;;  %v994_v20 = vmul.f32 %v7334_v10, %v961_v52  ;;  %v8627_v50 = vmin.f32 %v2058_v57, 16.0 }
 0x376   :  { %v1999_v2 = vmul.f32 %v1998_v4, %v8541_v22  ;;  %v2023_v37 = vadd.f32 0.0036580483, %v2022_v19  ;;  %v2034_v53 = vadd.f32 0.014752088, %v2033_v55  ;;  %v1972_v36 = vand.u32 2147483648, %v8589_v59 }
 0x377   :  { %v888_v32 = vmul.f32 %v8602_v5, %v887_v51  ;;  %v6658_v1 = vpop.eup %6657  ;;  %v1987_v38 = vadd.f32 0.18741608, %v1986_v31  ;;  %v2060_v13 = vmul.f32 2.1237322e-06, %v8627_v50  ;;  %v885_v26 = vsel %vm8634_vm5, %v8569_v40, %v881_v8 }
 0x378   :  { %v1962_v3 = vmul.f32 %v6658_v1, %v8589_v59  ;;  %v8638_v45 = vadd.f32 1.0, %v1999_v2  ;;  %v2024_v48 = vmul.f32 %v2023_v37, %v8591_v34  ;;  %v2035_v33 = vmul.f32 %v2034_v53, %v8591_v34 }
 0x379   :  { %v889_v6 = vmul.f32 0.5, %v888_v32  ;;  %vm1967_vm6 = vweird.f32 %v6658_v1  ;;  %v2071_v15 = vmul.f32 3.8918573e-05, %v8627_v50  ;;  %vm1966_vm7 = vweird.f32 %v8589_v59 }
 0x37a   :  { %v1963_v56 = vsub.f32 1.0, %v1962_v3  ;;  %vm8648_vm8 = vcmp.eq.f32.partialorder %v1970_v0, 8.507059e+37  ;;  %6659 = vrcp.f32 %v8638_v45  ;;  %v8654_v41 = vadd.f32 %v7342_v17, %v994_v20  ;;  %vm1968_vm10 = vmor %vm1966_vm7, %vm1967_vm6 }
 0x37b   :  { %v890_v61 = vsub.f32 1.5, %v889_v6  ;;  %vm893_vm9 = vweird.f32 %v8602_v5  ;;  %v2036_v58 = vadd.f32 0.112945676, %v2035_v33  ;;  %v962_v14 = vmul.f32 %v885_v26, %v8208_v7 }
 0x37c   :  { %v1964_v12 = vmul.f32 %v6658_v1, %v1963_v56  ;;  %v1973_v27 = vor.u32 1.1754944e-38, %v1972_v36  ;;  %v2025_v59 = vadd.f32 0.05243302, %v2024_v48  ;;  %v2061_v57 = vadd.f32 0.00028619796, %v2060_v13  ;;  %vm8663_vm11 = vmor %vm892_vm4, %vm893_vm9 }
 0x37d   :  { %v891_v51 = vmul.f32 %v8602_v5, %v890_v61  ;;  %v1988_v31 = vmul.f32 %v1987_v38, %v8541_v22  ;;  %v2037_v0 = vmul.f32 %v2036_v58, %v8591_v34  ;;  %v2072_v4 = vadd.f32 0.001143296, %v2071_v15 }
 0x37e   :  { %v1965_v40 = vadd.f32 %v6658_v1, %v1964_v12  ;;  %v1055_v55 = vmul.f32 0.5, %v8481_v44  ;;  %v2062_v8 = vmul.f32 %v2061_v57, %v8627_v50  ;;  %v2026_v2 = vmul.f32 %v2025_v59, %v8591_v34 }
 0x37f   :  { %v895_v22 = vsel %vm8663_vm11, %v8602_v5, %v891_v51  ;;  %v2038_v39 = vadd.f32 0.4994258, %v2037_v0  ;;  %v2073_v3 = vmul.f32 %v2072_v4, %v8627_v50  ;;  %v995_v53 = vmul.f32 %v7334_v10, %v962_v14 }
 0x380   :  { %v1969_v32 = vsel %vm1968_vm10, %v6658_v1, %v1965_v40  ;;  %v8672_v1 = vmul.f32 0.70710677, %v8654_v41  ;;  %v6660_v20 = vpop.eup %6659  ;;  %v2063_v44 = vadd.f32 0.0036580483, %v2062_v8  ;;  %v1989_v56 = vadd.f32 1.1283791, %v1988_v31 }
 0x381   :  { %v1974_v7 = vsel %vm8648_vm8, %v1973_v27, %v1969_v32  ;;  %v2002_v36 = vmul.f32 %v6660_v20, %v8638_v45  ;;  %v2010_v38 = vand.u32 2147483647, %v8638_v45  ;;  %v963_v5 = vmul.f32 %v895_v22, %v8244_v16 }
 0x382   :  { %v1975_v6 = vmul.f32 %v1974_v7, %v1950_v25  ;;  %v2098_v37 = vmul.f32 %v8672_v1, %v8672_v1  ;;  %v2039_v25 = vmul.f32 %v2038_v39, %v8591_v34  ;;  %v2074_v63 = vadd.f32 0.014752088, %v2073_v3 }
 0x383   :  { %v2003_v13 = vsub.f32 1.0, %v2002_v36  ;;  %v2012_v26 = vand.u32 2147483648, %v8638_v45  ;;  %v2064_v12 = vmul.f32 %v2063_v44, %v8627_v50  ;;  %v2027_v15 = vadd.f32 0.18741608, %v2026_v2 }
 0x384   :  { %v6470_v61 = vclamps-f32 %v1975_v6, 1.0  ;;  %v8686_v48 = vmin.f32 %v2098_v37, 16.0  ;;  %v8690_v52 = vadd.f32 1.0, %v2039_v25  ;;  %v2075_v51 = vmul.f32 %v2074_v63, %v8627_v50 }
 0x385   :  { %v8694_v40 = vadd.f32 %v7342_v17, %v995_v53  ;;  %v2004_v58 = vmul.f32 %v6660_v20, %v2003_v13  ;;  %vm2007_vm12 = vweird.f32 %v6660_v20  ;;  %vm2006_vm13 = vweird.f32 %v8638_v45 }
 0x386   :  { %v2399_v33 = vadd.f32 1.0, %v6470_v61  ;;  %v2100_v14 = vmul.f32 2.1237322e-06, %v8686_v48  ;;  %6661 = vrcp.f32 %v8690_v52  ;;  %v996_v27 = vmul.f32 %v7334_v10, %v963_v5  ;;  %vm2008_vm14 = vmor %vm2006_vm13, %vm2007_vm12 }
 0x387   :  { %v2005_v59 = vadd.f32 %v6660_v20, %v2004_v58  ;;  %v2065_v57 = vadd.f32 0.05243302, %v2064_v12  ;;  %v2076_v32 = vadd.f32 0.112945676, %v2075_v51  ;;  %v2013_v0 = vor.u32 1.1754944e-38, %v2012_v26 }
 0x388   :  { %v2431_v16 = vmul.f32 %v2399_v33, %v1055_v55  ;;  %v2101_v31 = vadd.f32 0.00028619796, %v2100_v14  ;;  %v2028_v4 = vmul.f32 %v2027_v15, %v8591_v34  ;;  %v2111_v19 = vmul.f32 3.8918573e-05, %v8686_v48 }
 0x389   :  { %v8703_v55 = vmul.f32 0.70710677, %v8694_v40  ;;  %v1990_v45 = vmul.f32 %v1989_v56, %v8523_v35  ;;  %v2009_v7 = vsel %vm2008_vm14, %v6660_v20, %v2005_v59  ;;  %vm2011_vm15 = vcmp.eq.f32.partialorder %v2010_v38, 8.507059e+37 }
 0x38a   :  { %2539 = vmatmul.f32.gmra.mxu1 %v2431_v16  ;;  %v2077_v8 = vmul.f32 %v2076_v32, %v8627_v50  ;;  %v2014_v22 = vsel %vm2011_vm15, %v2013_v0, %v2009_v7  ;;  %v2112_v6 = vadd.f32 0.001143296, %v2111_v19  ;;  %v8710_v3 = vadd.f32 %v7342_v17, %v996_v27 }
 0x38b   :  { %v2138_v39 = vmul.f32 %v8703_v55, %v8703_v55  ;;  %v2015_v34 = vmul.f32 %v2014_v22, %v1990_v45  ;;  %v2066_v2 = vmul.f32 %v2065_v57, %v8627_v50  ;;  %v2102_v37 = vmul.f32 %v2101_v31, %v8686_v48 }
 0x38c   :  { %v2078_v44 = vadd.f32 0.4994258, %v2077_v8  ;;  %v6662_v53 = vpop.eup %6661  ;;  %v1056_v35 = vmul.f32 0.5, %v8506_v24  ;;  %v2029_v20 = vadd.f32 1.1283791, %v2028_v4  ;;  %v2113_v61 = vmul.f32 %v2112_v6, %v8686_v48 }
 0x38d   :  { %v8716_v56 = vmin.f32 %v2138_v39, 16.0  ;;  %v6471_v36 = vclamps-f32 %v2015_v34, 1.0  ;;  %v2042_v38 = vmul.f32 %v6662_v53, %v8690_v52  ;;  %v2050_v5 = vand.u32 2147483647, %v8690_v52 }
 0x38e   :  { %v8721_v25 = vmul.f32 0.70710677, %v8710_v3  ;;  %v2052_v63 = vand.u32 2147483648, %v8690_v52  ;;  %v2079_v33 = vmul.f32 %v2078_v44, %v8627_v50  ;;  %v2114_v13 = vadd.f32 0.014752088, %v2113_v61 }
 0x38f   :  { %v2140_v24 = vmul.f32 2.1237322e-06, %v8716_v56  ;;  %v2400_v26 = vadd.f32 1.0, %v6471_v36  ;;  %v2043_v12 = vsub.f32 1.0, %v2042_v38  ;;  %v2067_v15 = vadd.f32 0.18741608, %v2066_v2 }
 0x390   :  { %v2103_v51 = vadd.f32 0.0036580483, %v2102_v37  ;;  %vm2047_vm0 = vweird.f32 %v6662_v53  ;;  %v8726_v16 = vadd.f32 1.0, %v2079_v33  ;;  %v2115_v58 = vmul.f32 %v2114_v13, %v8686_v48 }
 0x391   :  { %v2141_v14 = vadd.f32 0.00028619796, %v2140_v24  ;;  %v2432_v27 = vmul.f32 %v2400_v26, %v1056_v35  ;;  %v2044_v59 = vmul.f32 %v6662_v53, %v2043_v12  ;;  %v2151_v57 = vmul.f32 3.8918573e-05, %v8716_v56 }
 0x392   :  { %v2178_v32 = vmul.f32 %v8721_v25, %v8721_v25  ;;  %v2030_v31 = vmul.f32 %v2029_v20, %v8563_v60  ;;  %6663 = vrcp.f32 %v8726_v16  ;;  %vm2046_vm1 = vweird.f32 %v8690_v52 }
 0x393   :  { %2542 = vmatmul.f32.gmra.mxu1 %v2432_v27  ;;  %v2045_v0 = vadd.f32 %v6662_v53, %v2044_v59  ;;  %v2104_v4 = vmul.f32 %v2103_v51, %v8686_v48  ;;  %v2116_v19 = vadd.f32 0.112945676, %v2115_v58  ;;  %vm2048_vm2 = vmor %vm2046_vm1, %vm2047_vm0  ;;  %vm2051_vm3 = vcmp.eq.f32.partialorder %v2050_v5, 8.507059e+37 }
 0x394   :  { %v2053_v45 = vor.u32 1.1754944e-38, %v2052_v63  ;;  %v2152_v7 = vadd.f32 0.001143296, %v2151_v57  ;;  %v8737_v8 = vmin.f32 %v2178_v32, 16.0  ;;  %v2068_v6 = vmul.f32 %v2067_v15, %v8627_v50 }
 0x395   :  { %v2049_v22 = vsel %vm2048_vm2, %v6662_v53, %v2045_v0  ;;  %v2117_v60 = vmul.f32 %v2116_v19, %v8686_v48  ;;  %v2142_v39 = vmul.f32 %v2141_v14, %v8716_v56  ;;  %v2105_v35 = vadd.f32 0.05243302, %v2104_v4 }
 0x396   :  { %v2054_v34 = vsel %vm2051_vm3, %v2053_v45, %v2049_v22  ;;  %v2153_v52 = vmul.f32 %v2152_v7, %v8716_v56  ;;  %v2180_v2 = vmul.f32 2.1237322e-06, %v8737_v8  ;;  %v2191_v44 = vmul.f32 3.8918573e-05, %v8737_v8 }
 0x397   :  { %v2055_v37 = vmul.f32 %v2054_v34, %v2030_v31  ;;  %v2118_v20 = vadd.f32 0.4994258, %v2117_v60  ;;  %v1057_v50 = vmul.f32 0.5, %v8547_v9  ;;  %v2069_v63 = vadd.f32 1.1283791, %v2068_v6 }
 0x398   :  { %v6664_v61 = vpop.eup %6663  ;;  %v2154_v36 = vadd.f32 0.014752088, %v2153_v52  ;;  %v2181_v38 = vadd.f32 0.00028619796, %v2180_v2  ;;  %v2192_v53 = vadd.f32 0.001143296, %v2191_v44  ;;  %v2106_v9 = vmul.f32 %v2105_v35, %v8686_v48 }
 0x399   :  { %v6472_v5 = vclamps-f32 %v2055_v37, 1.0  ;;  %v2082_v33 = vmul.f32 %v6664_v61, %v8726_v16  ;;  %v2090_v13 = vand.u32 2147483647, %v8726_v16  ;;  %v2119_v24 = vmul.f32 %v2118_v20, %v8686_v48 }
 0x39a   :  { %v2143_v26 = vadd.f32 0.0036580483, %v2142_v39  ;;  %v2155_v12 = vmul.f32 %v2154_v36, %v8716_v56  ;;  %v2182_v58 = vmul.f32 %v2181_v38, %v8737_v8  ;;  %v2193_v14 = vmul.f32 %v2192_v53, %v8737_v8 }
 0x39b   :  { %v2401_v15 = vadd.f32 1.0, %v6472_v5  ;;  %v2083_v51 = vsub.f32 1.0, %v2082_v33  ;;  %v2092_v27 = vand.u32 2147483648, %v8726_v16  ;;  %v2120_v59 = vadd.f32 1.0, %v2119_v24 }
 0x39c   :  { %v2156_v57 = vadd.f32 0.112945676, %v2155_v12  ;;  %vm2087_vm4 = vweird.f32 %v6664_v61  ;;  %v2194_v0 = vadd.f32 0.014752088, %v2193_v14  ;;  %v2144_v4 = vmul.f32 %v2143_v26, %v8716_v56 }
 0x39d   :  { %v2433_v32 = vmul.f32 %v2401_v15, %v1057_v50  ;;  %v2084_v31 = vmul.f32 %v6664_v61, %v2083_v51  ;;  %6665 = vrcp.f32 %v2120_v59  ;;  %vm2086_vm5 = vweird.f32 %v8726_v16 }
 0x39e   :  { %v2157_v45 = vmul.f32 %v2156_v57, %v8716_v56  ;;  %v2183_v7 = vadd.f32 0.0036580483, %v2182_v58  ;;  %vm2088_vm6 = vmor %vm2086_vm5, %vm2087_vm4  ;;  %v2093_v22 = vor.u32 1.1754944e-38, %v2092_v27  ;;  %v2107_v6 = vadd.f32 0.18741608, %v2106_v9 }
 0x39f   :  { %2545 = vmatmul.f32.gmra.mxu1 %v2433_v32  ;;  %v2085_v19 = vadd.f32 %v6664_v61, %v2084_v31  ;;  %v2195_v60 = vmul.f32 %v2194_v0, %v8737_v8  ;;  %v2070_v39 = vmul.f32 %v2069_v63, %v8606_v23  ;;  %vm2091_vm7 = vcmp.eq.f32.partialorder %v2090_v13, 8.507059e+37 }
 0x3a0   :  { %v2158_v52 = vadd.f32 0.4994258, %v2157_v45  ;;  %v2145_v44 = vadd.f32 0.05243302, %v2144_v4  ;;  %v2184_v16 = vmul.f32 %v2183_v7, %v8737_v8  ;;  %v2108_v38 = vmul.f32 %v2107_v6, %v8686_v48 }
 0x3a1   :  { %v2089_v34 = vsel %vm2088_vm6, %v6664_v61, %v2085_v19  ;;  %v2196_v37 = vadd.f32 0.112945676, %v2195_v60  ;;  %v1058_v33 = vmul.f32 0.5, %v8594_v21  ;;  %v2130_v15 = vand.u32 2147483647, %v2120_v59  ;;  %v8768_v19 = vpop.f32.mrf.mxu1 }
 0x3a2   :  { %v2094_v2 = vsel %vm2091_vm7, %v2093_v22, %v2089_v34  ;;  %v2159_v20 = vmul.f32 %v2158_v52, %v8716_v56  ;;  %v2146_v23 = vmul.f32 %v2145_v44, %v8716_v56  ;;  %v2185_v26 = vadd.f32 0.05243302, %v2184_v16 }
 0x3a3   :  { %v2095_v35 = vmul.f32 %v2094_v2, %v2070_v39  ;;  %v6666_v36 = vpop.eup %6665  ;;  %v2197_v53 = vmul.f32 %v2196_v37, %v8737_v8  ;;  %v2109_v12 = vadd.f32 1.1283791, %v2108_v38  ;;  %v2132_v51 = vand.u32 2147483648, %v2120_v59 }
 0x3a4   :  { %v2122_v5 = vmul.f32 %v6666_v36, %v2120_v59  ;;  %v2160_v61 = vadd.f32 1.0, %v2159_v20  ;;  %vm2127_vm8 = vweird.f32 %v6666_v36  ;;  %v2147_v27 = vadd.f32 0.18741608, %v2146_v23 }
 0x3a5   :  { %v6473_v50 = vclamps-f32 %v2095_v35, 1.0  ;;  %v2198_v63 = vadd.f32 0.4994258, %v2197_v53  ;;  %vm2126_vm9 = vweird.f32 %v2120_v59  ;;  %v2186_v57 = vmul.f32 %v2185_v26, %v8737_v8 }
 0x3a6   :  { %v2123_v24 = vsub.f32 1.0, %v2122_v5  ;;  %6667 = vrcp.f32 %v2160_v61  ;;  %vm2128_vm10 = vmor %vm2126_vm9, %vm2127_vm8  ;;  %v2133_v21 = vor.u32 1.1754944e-38, %v2132_v51  ;;  %v2110_v31 = vmul.f32 %v2109_v12, %v8672_v1 }
 0x3a7   :  { %v2402_v13 = vadd.f32 1.0, %v6473_v50  ;;  %v2199_v48 = vmul.f32 %v2198_v63, %v8737_v8  ;;  %vm2131_vm11 = vcmp.eq.f32.partialorder %v2130_v15, 8.507059e+37  ;;  %v2148_v7 = vmul.f32 %v2147_v27, %v8716_v56 }
 0x3a8   :  { %v2124_v14 = vmul.f32 %v6666_v36, %v2123_v24  ;;  %v2187_v60 = vadd.f32 0.18741608, %v2186_v57  ;;  %v1059_v34 = vmul.f32 0.5, %v8654_v41  ;;  %v2170_v2 = vand.u32 2147483647, %v2160_v61 }
 0x3a9   :  { %v2434_v58 = vmul.f32 %v2402_v13, %v1058_v33  ;;  %v2200_v32 = vadd.f32 1.0, %v2199_v48  ;;  %v2149_v52 = vadd.f32 1.1283791, %v2148_v7  ;;  %v2172_v44 = vand.u32 2147483648, %v2160_v61  ;;  %v8774_v63 = vpop.f32.mrf.mxu1 }
 0x3aa   :  { %v2125_v9 = vadd.f32 %v6666_v36, %v2124_v14  ;;  %v2188_v20 = vmul.f32 %v2187_v60, %v8737_v8  ;;  %vm2166_vm13 = vweird.f32 %v2160_v61  ;;  %vm2171_vm15 = vcmp.eq.f32.partialorder %v2170_v2, 8.507059e+37 }
 0x3ab   :  { %2548 = vmatmul.f32.gmra.mxu1 %v2434_v58  ;;  %6669 = vrcp.f32 %v2200_v32  ;;  %v2150_v56 = vmul.f32 %v2149_v52, %v8703_v55  ;;  %v2173_v53 = vor.u32 1.1754944e-38, %v2172_v44  ;;  %v2212_v23 = vand.u32 2147483648, %v2200_v32 }
 0x3ac   :  { %v2129_v0 = vsel %vm2128_vm10, %v6666_v36, %v2125_v9  ;;  %v6668_v4 = vpop.eup %6667  ;;  %v2189_v5 = vadd.f32 1.1283791, %v2188_v20  ;;  %v2210_v8 = vand.u32 2147483647, %v2200_v32  ;;  %vm2206_vm1 = vweird.f32 %v2200_v32 }
 0x3ad   :  { %v2134_v45 = vsel %vm2131_vm11, %v2133_v21, %v2129_v0  ;;  %v2162_v6 = vmul.f32 %v6668_v4, %v2160_v61  ;;  %vm2167_vm12 = vweird.f32 %v6668_v4  ;;  %v2213_v15 = vor.u32 1.1754944e-38, %v2212_v23 }
 0x3ae   :  { %v2135_v22 = vmul.f32 %v2134_v45, %v2110_v31  ;;  %vm2168_vm14 = vmor %vm2166_vm13, %vm2167_vm12  ;;  %v2190_v58 = vmul.f32 %v2189_v5, %v8721_v25  ;;  %vm2211_vm3 = vcmp.eq.f32.partialorder %v2210_v8, 8.507059e+37  ;;  %v1060_v48 = vmul.f32 0.5, %v8694_v40 }
 0x3af   :  { %v2163_v39 = vsub.f32 1.0, %v2162_v6  ;;  %v2701_v21 = vlaneseq  ;;  %v1061_v40 = vmul.f32 0.5, %v8710_v3 }
 0x3b0   :  { %v6474_v59 = vclamps-f32 %v2135_v22, 1.0 }
 0x3b1   :  { %v6670_v1 = vpop.eup %6669  ;;  %v2164_v35 = vmul.f32 %v6668_v4, %v2163_v39  ;;  %v8778_v45 = vand.u32 127, %v2701_v21  ;;  %v2504_v22 = vpop.f32.mrf.mxu1 }
 0x3b2   :  { %v2403_v37 = vadd.f32 1.0, %v6474_v59  ;;  %v2202_v16 = vmul.f32 %v6670_v1, %v2200_v32  ;;  %vm2207_vm0 = vweird.f32 %v6670_v1 }
 0x3b3   :  { %v2165_v38 = vadd.f32 %v6668_v4, %v2164_v35  ;;  %vm2208_vm2 = vmor %vm2206_vm1, %vm2207_vm0  ;;  %vm2703_vm4 = vcmp.lt.s32.totalorder %v8778_v45, 64 }
 0x3b4   :  { %v2435_v36 = vmul.f32 %v2403_v37, %v1059_v34  ;;  %v2203_v50 = vsub.f32 1.0, %v2202_v16 }
 0x3b5   :  { %v2169_v41 = vsel %vm2168_vm14, %v6668_v4, %v2165_v38 }
 0x3b6   :  { %2551 = vmatmul.f32.gmra.mxu1 %v2435_v36  ;;  %v2174_v33 = vsel %vm2171_vm15, %v2173_v53, %v2169_v41  ;;  %v2204_v13 = vmul.f32 %v6670_v1, %v2203_v50 }
 0x3b7   :  { %v2175_v26 = vmul.f32 %v2174_v33, %v2150_v56  ;;  %v8801_v33 = vadd.f32 %v8768_v19, %v8458_v49 }
 0x3b8   :  { %v2205_v61 = vadd.f32 %v6670_v1, %v2204_v13 }
 0x3b9   :  { %v6475_v55 = vclamps-f32 %v2175_v26, 1.0  ;;  %v8792_v53 = vpop.f32.mrf.mxu1 }
 0x3ba   :  { %v2209_v14 = vsel %vm2208_vm2, %v6670_v1, %v2205_v61 }
 0x3bb   :  { %v545_v24 = vpop.xlane.xlu0 %544  ;;  %v2404_v27 = vadd.f32 1.0, %v6475_v55  ;;  %v2214_v9 = vsel %vm2211_vm3, %v2213_v15, %v2209_v14 }
 0x3bc   :  { %v580_v12 = vmul.f32 0.0078125, %v545_v24  ;;  %v2215_v57 = vmul.f32 %v2214_v9, %v2190_v58 }
 0x3bd   :  { %v2436_v31 = vmul.f32 %v2404_v27, %v1060_v48 }
 0x3be   :  { %v612_v51 = vadd.f32 1e-05, %v580_v12  ;;  %v6476_v0 = vclamps-f32 %v2215_v57, 1.0 }
 0x3bf   :  { %2554 = vmatmul.f32.gmra.mxu1 %v2436_v31 }
 0x3c0   :  { %6671 = vrsqrt.f32 %v612_v51  ;;  %v2405_v6 = vadd.f32 1.0, %v6476_v0  ;;  %vm902_vm6 = vweird.f32 %v612_v51 }
 0x3c2   :  { %v2437_v52 = vmul.f32 %v2405_v6, %v1061_v40 }
 0x3c3   :  { %v2574_v4 = vpop.xlane.xlu0 %2573  ;;  %v547_v32 = vpop.xlane.xlu1 %546 }
 0x3c4   :  { %v2637_v7 = vmul.f32 0.015625, %v2574_v4  ;;  %v581_v25 = vmul.f32 0.0078125, %v547_v32  ;;  %v8824_v4 = vadd.f32 %v2504_v22, %v8458_v49  ;;  %v8826_v32 = vpop.f32.mrf.mxu1 }
 0x3c6   :  { %v6672_v60 = vpop.eup %6671  ;;  %v2669_v59 = vsub.f32 %v8466_v28, %v2637_v7  ;;  %v613_v34 = vadd.f32 1e-05, %v581_v25 }
 0x3c7   :  { %v897_v39 = vmul.f32 %v6672_v60, %v612_v51  ;;  %2557 = vmatmul.f32.gmra.mxu1 %v2437_v52  ;;  %vm903_vm5 = vweird.f32 %v6672_v60 }
 0x3c8   :  { %v8785_v2 = vsel %vm2703_vm4, %v2669_v59, 0.0  ;;  %6673 = vrsqrt.f32 %v613_v34  ;;  %vm904_vm7 = vmor %vm902_vm6, %vm903_vm5  ;;  %vm912_vm9 = vweird.f32 %v613_v34 }
 0x3c9   :  { %v898_v44 = vmul.f32 %v6672_v60, %v897_v39  ;;  %v2738_v1 = vmul.f32 %v8785_v2, %v8785_v2 }
 0x3cb   :  { %v549_v37 = vpop.xlane.xlu2 %548  ;;  %v899_v35 = vmul.f32 0.5, %v898_v44  ;;  %2770 = vadd.xlane.f32.xlu1 %v2738_v1  ;;  %v2578_v16 = vpop.xlane.xlu0 %2577 }
 0x3cc   :  { %v582_v20 = vmul.f32 0.0078125, %v549_v37  ;;  %v2639_v3 = vmul.f32 0.015625, %v2578_v16 }
 0x3cd   :  { %v900_v28 = vsub.f32 1.5, %v899_v35  ;;  %v8845_v35 = vadd.f32 %v8774_v63, %v8458_v49 }
 0x3ce   :  { %v8789_v36 = vadd.f32 1e-05, %v582_v20  ;;  %v2671_v38 = vsub.f32 %v8488_v46, %v2639_v3  ;;  %v6674_v56 = vpop.eup %6673 }
 0x3cf   :  { %v901_v50 = vmul.f32 %v6672_v60, %v900_v28  ;;  %v907_v41 = vmul.f32 %v6674_v56, %v613_v34  ;;  %vm913_vm8 = vweird.f32 %v6674_v56 }
 0x3d0   :  { %6675 = vrsqrt.f32 %v8789_v36  ;;  %v8797_v5 = vsel %vm2703_vm4, %v2671_v38, 0.0  ;;  %vm914_vm10 = vmor %vm912_vm9, %vm913_vm8  ;;  %vm922_vm12 = vweird.f32 %v8789_v36 }
 0x3d1   :  { %v905_v23 = vsel %vm904_vm7, %v6672_v60, %v901_v50  ;;  %v2740_v46 = vmul.f32 %v8797_v5, %v8797_v5  ;;  %v908_v8 = vmul.f32 %v6674_v56, %v907_v41 }
 0x3d2   :  { %v964_v13 = vmul.f32 %v905_v23, %v8451_v54 }
 0x3d3   :  { %v2576_v24 = vpop.xlane.xlu2 %2575  ;;  %v551_v26 = vpop.xlane.xlu1 %550  ;;  %2587 = vadd.xlane.f32.xlu1 %v8801_v33  ;;  %2774 = vadd.xlane.f32.xlu2 %v2740_v46  ;;  %v909_v15 = vmul.f32 0.5, %v908_v8 }
 0x3d4   :  { %v2638_v12 = vmul.f32 0.015625, %v2576_v24  ;;  %v583_v61 = vmul.f32 0.0078125, %v551_v26  ;;  %v2584_v55 = vpop.xlane.xlu0 %2583  ;;  %v997_v58 = vmul.f32 %v7334_v10, %v964_v13 }
 0x3d5   :  { %v2642_v51 = vmul.f32 0.015625, %v2584_v55  ;;  %v910_v27 = vsub.f32 1.5, %v909_v15 }
 0x3d6   :  { %v6676_v19 = vpop.eup %6675  ;;  %v2670_v14 = vsub.f32 %v8513_v11, %v2638_v12  ;;  %v8809_v48 = vadd.f32 1e-05, %v583_v61  ;;  %v8818_v57 = vadd.f32 %v7342_v17, %v997_v58  ;;  %v2513_v12 = vpop.f32.mrf.mxu1 }
 0x3d7   :  { %v917_v54 = vmul.f32 %v6676_v19, %v8789_v36  ;;  %v911_v21 = vmul.f32 %v6674_v56, %v910_v27  ;;  %v2674_v11 = vsub.f32 %v8519_v30, %v2642_v51  ;;  %vm923_vm11 = vweird.f32 %v6676_v19 }
 0x3d8   :  { %6677 = vrsqrt.f32 %v8809_v48  ;;  %v8815_v9 = vsel %vm2703_vm4, %v2670_v14, 0.0  ;;  %v8829_v7 = vmul.f32 0.70710677, %v8818_v57  ;;  %vm924_vm13 = vmor %vm922_vm12, %vm923_vm11  ;;  %vm932_vm15 = vweird.f32 %v8809_v48 }
 0x3d9   :  { %v918_v31 = vmul.f32 %v6676_v19, %v917_v54  ;;  %v2739_v0 = vmul.f32 %v8815_v9, %v8815_v9  ;;  %v915_v6 = vsel %vm914_vm10, %v6674_v56, %v911_v21  ;;  %v8837_v52 = vsel %vm2703_vm4, %v2674_v11, 0.0 }
 0x3da   :  { %v965_v59 = vmul.f32 %v915_v6, %v8462_v43  ;;  %v2218_v22 = vmul.f32 %v8829_v7, %v8829_v7  ;;  %v8883_v21 = vadd.f32 %v8792_v53, %v8458_v49 }
 0x3db   :  { %v919_v25 = vmul.f32 0.5, %v918_v31  ;;  %v2582_v60 = vpop.xlane.xlu2 %2581  ;;  %2772 = vadd.xlane.f32.xlu0 %v2739_v0  ;;  %v2580_v40 = vpop.xlane.xlu1 %2579  ;;  %2591 = vadd.xlane.f32.xlu2 %v8824_v4  ;;  %v8886_v31 = vadd.f32 %v2513_v12, %v8458_v49 }
 0x3dc   :  { %v2640_v30 = vmul.f32 0.015625, %v2580_v40  ;;  %v2641_v34 = vmul.f32 0.015625, %v2582_v60  ;;  %v8840_v37 = vmin.f32 %v2218_v22, 16.0  ;;  %v998_v43 = vmul.f32 %v7334_v10, %v965_v59 }
 0x3dd   :  { %v920_v39 = vsub.f32 1.5, %v919_v25 }
 0x3de   :  { %v6678_v44 = vpop.eup %6677  ;;  %v2672_v1 = vsub.f32 %v8534_v62, %v2640_v30  ;;  %v2743_v62 = vmul.f32 %v8837_v52, %v8837_v52  ;;  %v2220_v28 = vmul.f32 2.1237322e-06, %v8840_v37  ;;  %v2231_v38 = vmul.f32 3.8918573e-05, %v8840_v37 }
 0x3df   :  { %v921_v20 = vmul.f32 %v6676_v19, %v920_v39  ;;  %v927_v16 = vmul.f32 %v6678_v44, %v8809_v48  ;;  %v2673_v50 = vsub.f32 %v8552_v29, %v2641_v34  ;;  %v8862_v13 = vadd.f32 %v7342_v17, %v998_v43 }
 0x3e0   :  { %v8851_v3 = vsel %vm2703_vm4, %v2672_v1, 0.0  ;;  %v2221_v23 = vadd.f32 0.00028619796, %v2220_v28  ;;  %v2232_v46 = vadd.f32 0.001143296, %v2231_v38  ;;  %vm933_vm14 = vweird.f32 %v6678_v44 }
 0x3e1   :  { %v925_v56 = vsel %vm924_vm13, %v6676_v19, %v921_v20  ;;  %v928_v63 = vmul.f32 %v6678_v44, %v927_v16  ;;  %v2741_v36 = vmul.f32 %v8851_v3, %v8851_v3  ;;  %v8873_v51 = vsel %vm2703_vm4, %v2673_v50, 0.0  ;;  %vm934_vm0 = vmor %vm932_vm15, %vm933_vm14 }
 0x3e2   :  { %v966_v41 = vmul.f32 %v925_v56, %v8476_v42  ;;  %v2222_v26 = vmul.f32 %v2221_v23, %v8840_v37  ;;  %v2233_v29 = vmul.f32 %v2232_v46, %v8840_v37  ;;  %v8868_v42 = vmul.f32 0.70710677, %v8862_v13 }
 0x3e3   :  { %v929_v8 = vmul.f32 0.5, %v928_v63  ;;  %v2586_v24 = vpop.xlane.xlu2 %2585  ;;  %2589 = vadd.xlane.f32.xlu0 %v8845_v35  ;;  %2776 = vadd.xlane.f32.xlu1 %v2741_v36  ;;  %v2742_v6 = vmul.f32 %v8873_v51, %v8873_v51  ;;  %v8924_v50 = vadd.f32 %v8826_v32, %v8458_v49 }
 0x3e4   :  { %2780 = vadd.xlane.f32.xlu2 %v2743_v62  ;;  %v2643_v55 = vmul.f32 0.015625, %v2586_v24  ;;  %v999_v15 = vmul.f32 %v7334_v10, %v966_v41  ;;  %v2223_v58 = vadd.f32 0.0036580483, %v2222_v26  ;;  %v2234_v19 = vadd.f32 0.014752088, %v2233_v29 }
 0x3e5   :  { %v930_v61 = vsub.f32 1.5, %v929_v8  ;;  %v2258_v27 = vmul.f32 %v8868_v42, %v8868_v42 }
 0x3e6   :  { %v8879_v54 = vadd.f32 %v7342_v17, %v999_v15  ;;  %v2235_v11 = vmul.f32 %v2234_v19, %v8840_v37  ;;  %v2675_v48 = vsub.f32 %v8579_v47, %v2643_v55  ;;  %v2224_v53 = vmul.f32 %v2223_v58, %v8840_v37  ;;  %v2516_v55 = vpop.f32.mrf.mxu1 }
 0x3e7   :  { %v931_v14 = vmul.f32 %v6678_v44, %v930_v61  ;;  %v8893_v25 = vmin.f32 %v2258_v27, 16.0 }
 0x3e8   :  { %v2236_v40 = vadd.f32 0.112945676, %v2235_v11  ;;  %v8898_v59 = vmul.f32 0.70710677, %v8879_v54  ;;  %v8910_v1 = vsel %vm2703_vm4, %v2675_v48, 0.0  ;;  %v8943_v48 = vadd.f32 %v2516_v55, %v8458_v49 }
 0x3e9   :  { %v935_v0 = vsel %vm934_vm0, %v6678_v44, %v931_v14  ;;  %v2260_v30 = vmul.f32 2.1237322e-06, %v8893_v25  ;;  %v2271_v47 = vmul.f32 3.8918573e-05, %v8893_v25  ;;  %v2225_v43 = vadd.f32 0.05243302, %v2224_v53 }
 0x3ea   :  { %v967_v60 = vmul.f32 %v935_v0, %v8503_v18  ;;  %v2237_v22 = vmul.f32 %v2236_v40, %v8840_v37  ;;  %v2298_v18 = vmul.f32 %v8898_v59, %v8898_v59  ;;  %v2744_v36 = vmul.f32 %v8910_v1, %v8910_v1 }
 0x3eb   :  { %2778 = vadd.xlane.f32.xlu0 %v2742_v6  ;;  %2593 = vadd.xlane.f32.xlu1 %v8883_v21  ;;  %v2261_v34 = vadd.f32 0.00028619796, %v2260_v30  ;;  %v2272_v44 = vadd.f32 0.001143296, %v2271_v47  ;;  %v2226_v46 = vmul.f32 %v2225_v43, %v8840_v37 }
 0x3ec   :  { %2597 = vadd.xlane.f32.xlu2 %v8886_v31  ;;  %v1000_v39 = vmul.f32 %v7334_v10, %v967_v60  ;;  %v2238_v20 = vadd.f32 0.4994258, %v2237_v22  ;;  %v8912_v16 = vmin.f32 %v2298_v18, 16.0 }
 0x3ed   :  { %v2262_v62 = vmul.f32 %v2261_v34, %v8893_v25  ;;  %v2273_v28 = vmul.f32 %v2272_v44, %v8893_v25  ;;  %v2227_v15 = vadd.f32 0.18741608, %v2226_v46 }
 0x3ee   :  { %v8917_v38 = vadd.f32 %v7342_v17, %v1000_v39  ;;  %v2239_v56 = vmul.f32 %v2238_v20, %v8840_v37  ;;  %v2300_v10 = vmul.f32 2.1237322e-06, %v8912_v16  ;;  %v2311_v63 = vmul.f32 3.8918573e-05, %v8912_v16 }
 0x3ef   :  { %v2263_v41 = vadd.f32 0.0036580483, %v2262_v62  ;;  %v2274_v23 = vadd.f32 0.014752088, %v2273_v28  ;;  %v2228_v40 = vmul.f32 %v2227_v15, %v8840_v37 }
 0x3f0   :  { %v2240_v8 = vadd.f32 1.0, %v2239_v56  ;;  %v2301_v17 = vadd.f32 0.00028619796, %v2300_v10  ;;  %v2312_v26 = vadd.f32 0.001143296, %v2311_v63 }
 0x3f1   :  { %v2275_v24 = vmul.f32 %v2274_v23, %v8893_v25  ;;  %v8932_v29 = vmul.f32 0.70710677, %v8917_v38  ;;  %v2264_v32 = vmul.f32 %v2263_v41, %v8893_v25  ;;  %v2229_v56 = vadd.f32 1.1283791, %v2228_v40 }
 0x3f2   :  { %6679 = vrcp.f32 %v2240_v8  ;;  %v2302_v61 = vmul.f32 %v2301_v17, %v8912_v16  ;;  %v2313_v58 = vmul.f32 %v2312_v26, %v8912_v16  ;;  %v2250_v10 = vand.u32 2147483647, %v2240_v8 }
 0x3f3   :  { %2595 = vadd.xlane.f32.xlu0 %v8924_v50  ;;  %2782 = vadd.xlane.f32.xlu1 %v2744_v36  ;;  %v2276_v12 = vadd.f32 0.112945676, %v2275_v24  ;;  %v2338_v19 = vmul.f32 %v8932_v29, %v8932_v29  ;;  %v2265_v27 = vadd.f32 0.05243302, %v2264_v32  ;;  %v2252_v63 = vand.u32 2147483648, %v2240_v8 }
 0x3f4   :  { %v2314_v11 = vadd.f32 0.014752088, %v2313_v58  ;;  %v2303_v60 = vadd.f32 0.0036580483, %v2302_v61  ;;  %vm2246_vm2 = vweird.f32 %v2240_v8  ;;  %vm2251_vm5 = vcmp.eq.f32.partialorder %v2250_v10, 8.507059e+37 }
 0x3f5   :  { %v2277_v14 = vmul.f32 %v2276_v12, %v8893_v25  ;;  %v8940_v0 = vmin.f32 %v2338_v19, 16.0  ;;  %v2266_v34 = vmul.f32 %v2265_v27, %v8893_v25  ;;  %v2230_v12 = vmul.f32 %v2229_v56, %v8829_v7 }
 0x3f6   :  { %v2315_v30 = vmul.f32 %v2314_v11, %v8912_v16  ;;  %v2304_v28 = vmul.f32 %v2303_v60, %v8912_v16  ;;  %v2253_v61 = vor.u32 1.1754944e-38, %v2252_v63 }
 0x3f7   :  { %v2278_v6 = vadd.f32 0.4994258, %v2277_v14  ;;  %v2340_v47 = vmul.f32 2.1237322e-06, %v8940_v0  ;;  %v2351_v22 = vmul.f32 3.8918573e-05, %v8940_v0 }
 0x3f8   :  { %v6680_v53 = vpop.eup %6679  ;;  %v2316_v44 = vadd.f32 0.112945676, %v2315_v30  ;;  %v2267_v24 = vadd.f32 0.18741608, %v2266_v34  ;;  %v2305_v26 = vadd.f32 0.05243302, %v2304_v28 }
 0x3f9   :  { %v2242_v18 = vmul.f32 %v6680_v53, %v2240_v8  ;;  %v2279_v39 = vmul.f32 %v2278_v6, %v8893_v25  ;;  %v2341_v43 = vadd.f32 0.00028619796, %v2340_v47  ;;  %v2352_v37 = vadd.f32 0.001143296, %v2351_v22 }
 0x3fa   :  { %v2317_v36 = vmul.f32 %v2316_v44, %v8912_v16  ;;  %vm2247_vm1 = vweird.f32 %v6680_v53  ;;  %v2268_v6 = vmul.f32 %v2267_v24, %v8893_v25  ;;  %v2306_v60 = vmul.f32 %v2305_v26, %v8912_v16 }
 0x3fb   :  { %2599 = vadd.xlane.f32.xlu1 %v8943_v48  ;;  %v2243_v20 = vsub.f32 1.0, %v2242_v18  ;;  %v2280_v62 = vadd.f32 1.0, %v2279_v39  ;;  %v2342_v23 = vmul.f32 %v2341_v43, %v8940_v0  ;;  %v2353_v46 = vmul.f32 %v2352_v37, %v8940_v0  ;;  %vm2248_vm3 = vmor %vm2246_vm2, %vm2247_vm1 }
 0x3fc   :  { %v2318_v32 = vadd.f32 0.4994258, %v2317_v36  ;;  %v1062_v22 = vmul.f32 0.5, %v8818_v57  ;;  %v2269_v44 = vadd.f32 1.1283791, %v2268_v6 }
 0x3fd   :  { %v2244_v41 = vmul.f32 %v6680_v53, %v2243_v20  ;;  %6681 = vrcp.f32 %v2280_v62  ;;  %v2354_v55 = vadd.f32 0.014752088, %v2353_v46  ;;  %v2343_v19 = vadd.f32 0.0036580483, %v2342_v23 }
 0x3fe   :  { %v2319_v58 = vmul.f32 %v2318_v32, %v8912_v16  ;;  %v2292_v43 = vand.u32 2147483648, %v2280_v62  ;;  %v2307_v20 = vadd.f32 0.18741608, %v2306_v60  ;;  %v2290_v25 = vand.u32 2147483647, %v2280_v62 }
 0x3ff   :  { %v2245_v17 = vadd.f32 %v6680_v53, %v2244_v41  ;;  %v2355_v27 = vmul.f32 %v2354_v55, %v8940_v0  ;;  %vm2286_vm7 = vweird.f32 %v2280_v62  ;;  %v2270_v46 = vmul.f32 %v2269_v44, %v8868_v42 }
 0x400   :  { %v2320_v40 = vadd.f32 1.0, %v2319_v58  ;;  %v2293_v57 = vor.u32 1.1754944e-38, %v2292_v43  ;;  %v2308_v23 = vmul.f32 %v2307_v20, %v8912_v16  ;;  %vm2291_vm9 = vcmp.eq.f32.partialorder %v2290_v25, 8.507059e+37 }
 0x401   :  { %v2249_v15 = vsel %vm2248_vm3, %v6680_v53, %v2245_v17  ;;  %v2356_v7 = vadd.f32 0.112945676, %v2355_v27  ;;  %v2344_v53 = vmul.f32 %v2343_v19, %v8940_v0  ;;  %v1063_v16 = vmul.f32 0.5, %v8862_v13 }
 0x402   :  { %v2254_v14 = vsel %vm2251_vm5, %v2253_v61, %v2249_v15  ;;  %6683 = vrcp.f32 %v2320_v40  ;;  %v2332_v15 = vand.u32 2147483648, %v2320_v40  ;;  %vm2326_vm11 = vweird.f32 %v2320_v40 }
 0x403   :  { %v6682_v8 = vpop.eup %6681  ;;  %v2255_v11 = vmul.f32 %v2254_v14, %v2230_v12  ;;  %v2357_v39 = vmul.f32 %v2356_v7, %v8940_v0  ;;  %v2345_v10 = vadd.f32 0.05243302, %v2344_v53  ;;  %v2330_v14 = vand.u32 2147483647, %v2320_v40 }
 0x404   :  { %v2282_v30 = vmul.f32 %v6682_v8, %v2280_v62  ;;  %vm2287_vm6 = vweird.f32 %v6682_v8  ;;  %v2309_v62 = vadd.f32 1.1283791, %v2308_v23  ;;  %v1064_v13 = vmul.f32 0.5, %v8879_v54  ;;  %v2519_v23 = vpop.f32.mrf.mxu1 }
 0x405   :  { %v6477_v47 = vclamps-f32 %v2255_v11, 1.0  ;;  %v2358_v37 = vadd.f32 0.4994258, %v2357_v39  ;;  %vm2288_vm8 = vmor %vm2286_vm7, %vm2287_vm6  ;;  %v2346_v32 = vmul.f32 %v2345_v10, %v8940_v0  ;;  %v2333_v11 = vor.u32 1.1754944e-38, %v2332_v15 }
 0x406   :  { %v2283_v18 = vsub.f32 1.0, %v2282_v30  ;;  %v2310_v60 = vmul.f32 %v2309_v62, %v8898_v59  ;;  %vm2331_vm13 = vcmp.eq.f32.partialorder %v2330_v14, 8.507059e+37  ;;  %v1065_v54 = vmul.f32 0.5, %v8917_v38 }
 0x407   :  { %v2406_v34 = vadd.f32 1.0, %v6477_v47  ;;  %v2359_v36 = vmul.f32 %v2358_v37, %v8940_v0  ;;  %v2347_v27 = vadd.f32 0.18741608, %v2346_v32 }
 0x408   :  { %v2284_v28 = vmul.f32 %v6682_v8, %v2283_v18  ;;  %v6684_v41 = vpop.eup %6683 }
 0x409   :  { %v2438_v56 = vmul.f32 %v2406_v34, %v1062_v22  ;;  %v2322_v24 = vmul.f32 %v6684_v41, %v2320_v40  ;;  %v2360_v12 = vadd.f32 1.0, %v2359_v36  ;;  %vm2327_vm10 = vweird.f32 %v6684_v41 }
 0x40a   :  { %v2285_v63 = vadd.f32 %v6682_v8, %v2284_v28  ;;  %vm2328_vm12 = vmor %vm2326_vm11, %vm2327_vm10  ;;  %v2348_v53 = vmul.f32 %v2347_v27, %v8940_v0 }
 0x40b   :  { %2560 = vmatmul.f32.gmra.mxu1 %v2438_v56  ;;  %v2323_v55 = vsub.f32 1.0, %v2322_v24  ;;  %6685 = vrcp.f32 %v2360_v12  ;;  %v2372_v40 = vand.u32 2147483648, %v2360_v12  ;;  %v2370_v28 = vand.u32 2147483647, %v2360_v12 }
 0x40c   :  { %v2289_v17 = vsel %vm2288_vm8, %v6682_v8, %v2285_v63  ;;  %v2349_v44 = vadd.f32 1.1283791, %v2348_v53  ;;  %vm2366_vm15 = vweird.f32 %v2360_v12  ;;  %v8974_v24 = vpop.f32.mrf.mxu1 }
 0x40d   :  { %v2294_v26 = vsel %vm2291_vm9, %v2293_v57, %v2289_v17  ;;  %v2324_v19 = vmul.f32 %v6684_v41, %v2323_v55  ;;  %v2373_v37 = vor.u32 1.1754944e-38, %v2372_v40  ;;  %vm2371_vm1 = vcmp.eq.f32.partialorder %v2370_v28, 8.507059e+37 }
 0x40e   :  { %v2295_v61 = vmul.f32 %v2294_v26, %v2270_v46  ;;  %v2350_v0 = vmul.f32 %v2349_v44, %v8932_v29 }
 0x40f   :  { %v2325_v8 = vadd.f32 %v6684_v41, %v2324_v19 }
 0x410   :  { %v6478_v58 = vclamps-f32 %v2295_v61, 1.0 }
 0x411   :  { %v2329_v30 = vsel %vm2328_vm12, %v6684_v41, %v2325_v8  ;;  %v6686_v7 = vpop.eup %6685 }
 0x412   :  { %v2407_v42 = vadd.f32 1.0, %v6478_v58  ;;  %v2334_v47 = vsel %vm2331_vm13, %v2333_v11, %v2329_v30  ;;  %v2362_v18 = vmul.f32 %v6686_v7, %v2360_v12  ;;  %vm2367_vm14 = vweird.f32 %v6686_v7 }
 0x413   :  { %v2335_v22 = vmul.f32 %v2334_v47, %v2310_v60  ;;  %vm2368_vm0 = vmor %vm2366_vm15, %vm2367_vm14 }
 0x414   :  { %v2439_v6 = vmul.f32 %v2407_v42, %v1063_v16  ;;  %v2363_v34 = vsub.f32 1.0, %v2362_v18  ;;  %v2525_v58 = vpop.f32.mrf.mxu1 }
 0x415   :  { %v6479_v39 = vclamps-f32 %v2335_v22, 1.0  ;;  %v6879_v22 = vld [vmem:[#allocation10] sm:$0xff] }
 0x416   :  { %2563 = vmatmul.f32.gmra.mxu1 %v2439_v6  ;;  %v2364_v20 = vmul.f32 %v6686_v7, %v2363_v34  ;;  %v8987_v18 = vperm.slane %v6879_v22, 1  ;;  %v8994_v34 = vadd.f32 %v2519_v23, %v8458_v49 }
 0x417   :  { %v2408_v43 = vadd.f32 1.0, %v6479_v39 }
 0x418   :  { %v2365_v25 = vadd.f32 %v6686_v7, %v2364_v20 }
 0x419   :  { %v2440_v59 = vmul.f32 %v2408_v43, %v1064_v13 }
 0x41a   :  { %v2369_v56 = vsel %vm2368_vm0, %v6686_v7, %v2365_v25 }
 0x41b   :  { %v2374_v10 = vsel %vm2371_vm1, %v2373_v37, %v2369_v56 }
 0x41c   :  { %v2375_v63 = vmul.f32 %v2374_v10, %v2350_v0  ;;  %v8996_v13 = vpop.f32.mrf.mxu1 }
 0x41e   :  { %2566 = vmatmul.f32.gmra.mxu1 %v2440_v59  ;;  %v6480_v36 = vclamps-f32 %v2375_v63, 1.0  ;;  %v9001_v59 = vperm.slane %v6879_v22, 2 }
 0x420   :  { %v2409_v41 = vadd.f32 1.0, %v6480_v36 }
 0x422   :  { %v2441_v57 = vmul.f32 %v2409_v41, %v1065_v54 }
 0x426   :  { %2569 = vmatmul.f32.gmra.mxu1 %v2441_v57 }
 0x43e   :  { %v2771_v46 = vpop.xlane.xlu1 %2770 }
 0x43f   :  { %v2834_v17 = vmul.f32 0.015625, %v2771_v46 }
 0x441   :  { %v2866_v26 = vadd.f32 1e-05, %v2834_v17 }
 0x443   :  { %6687 = vrsqrt.f32 %v2866_v26  ;;  %vm2904_vm3 = vweird.f32 %v2866_v26 }
 0x446   :  { %v2588_v32 = vpop.xlane.xlu1 %2587  ;;  %v2775_v12 = vpop.xlane.xlu2 %2774 }
 0x447   :  { %v2644_v29 = vmul.f32 0.015625, %v2588_v32  ;;  %v2836_v61 = vmul.f32 0.015625, %v2775_v12 }
 0x449   :  { %v6688_v55 = vpop.eup %6687  ;;  %v2676_v62 = vsub.f32 %v8801_v33, %v2644_v29  ;;  %v2868_v15 = vadd.f32 1e-05, %v2836_v61  ;;  %v4739_v29 = vld [vmem:[#allocation11 + $0x78] sm:$0xff]  ;;  %v4738_v61 = vld [vmem:[#allocation11 + $0x70] sm:$0xff] }
 0x44a   :  { %v2899_v38 = vmul.f32 %v6688_v55, %v2866_v26  ;;  %vm2905_vm2 = vweird.f32 %v6688_v55  ;;  %4742 = vmatpush.msra.mxu2 %v4739_v29 }
 0x44b   :  { %6689 = vrsqrt.f32 %v2868_v15  ;;  %v8979_v19 = vsel %vm2703_vm4, %v2676_v62, 0.0  ;;  %vm2906_vm5 = vmor %vm2904_vm3, %vm2905_vm2  ;;  %vm2924_vm7 = vweird.f32 %v2868_v15 }
 0x44c   :  { %v2900_v14 = vmul.f32 %v6688_v55, %v2899_v38  ;;  %v2745_v27 = vmul.f32 %v8979_v19, %v8979_v19  ;;  %4743 = vmatpush.msra.mxu2 %v4738_v61  ;;  %v4733_v61 = vld [vmem:[#allocation11 + $0x48] sm:$0xff] }
 0x44e   :  { %v2773_v16 = vpop.xlane.xlu0 %2772  ;;  %v2901_v42 = vmul.f32 0.5, %v2900_v14  ;;  %2784 = vadd.xlane.f32.xlu0 %v2745_v27  ;;  %v2592_v8 = vpop.xlane.xlu2 %2591 }
 0x44f   :  { %v2835_v11 = vmul.f32 0.015625, %v2773_v16  ;;  %v2646_v6 = vmul.f32 0.015625, %v2592_v8  ;;  %v4737_v16 = vld [vmem:[#allocation11 + $0x68] sm:$0xff] }
 0x450   :  { %v2902_v60 = vsub.f32 1.5, %v2901_v42  ;;  %4744 = vmatpush.msra.mxu2 %v4737_v16 }
 0x451   :  { %v8983_v33 = vadd.f32 1e-05, %v2835_v11  ;;  %v6690_v30 = vpop.eup %6689  ;;  %v2678_v7 = vsub.f32 %v8824_v4, %v2646_v6 }
 0x452   :  { %v2903_v47 = vmul.f32 %v6688_v55, %v2902_v60  ;;  %v2919_v53 = vmul.f32 %v6690_v30, %v2868_v15  ;;  %vm2925_vm6 = vweird.f32 %v6690_v30  ;;  %v9042_v60 = vpop.f32.mrf.mxu1 }
 0x453   :  { %6691 = vrsqrt.f32 %v8983_v33  ;;  %v8991_v39 = vsel %vm2703_vm4, %v2678_v7, 0.0  ;;  %vm9022_vm8 = vmor %vm2924_vm7, %vm2925_vm6  ;;  %vm2914_vm10 = vweird.f32 %v8983_v33 }
 0x454   :  { %v2907_v44 = vsel %vm2906_vm5, %v6688_v55, %v2903_v47  ;;  %v2920_v4 = vmul.f32 %v6690_v30, %v2919_v53  ;;  %v2747_v40 = vmul.f32 %v8991_v39, %v8991_v39  ;;  %v9030_v55 = vadd.f32 %v2525_v58, %v8458_v49  ;;  %v4736_v47 = vld [vmem:[#allocation11 + $0x60] sm:$0xff] }
 0x455   :  { %v3218_v28 = vmul.f32 %v2907_v44, %v8785_v2  ;;  %4745 = vmatpush.msra.mxu2 %v4736_v47 }
 0x456   :  { %v2777_v43 = vpop.xlane.xlu1 %2776  ;;  %v2590_v20 = vpop.xlane.xlu0 %2589  ;;  %v2921_v25 = vmul.f32 0.5, %v2920_v4  ;;  %2601 = vadd.xlane.f32.xlu0 %v8994_v34  ;;  %2788 = vadd.xlane.f32.xlu1 %v2747_v40 }
 0x457   :  { %v2837_v37 = vmul.f32 0.015625, %v2777_v43  ;;  %v2781_v0 = vpop.xlane.xlu2 %2780  ;;  %v2645_v56 = vmul.f32 0.015625, %v2590_v20  ;;  %v3251_v63 = vmul.f32 %v8987_v18, %v3218_v28  ;;  %v4735_v20 = vld [vmem:[#allocation11 + $0x58] sm:$0xff]  ;;  %v9059_v28 = vadd.f32 %v8974_v24, %v8458_v49 }
 0x458   :  { %v2839_v10 = vmul.f32 0.015625, %v2781_v0  ;;  %v2922_v54 = vsub.f32 1.5, %v2921_v25  ;;  %4746 = vmatpush.msra.mxu2 %v4735_v20 }
 0x459   :  { %v9005_v36 = vpop.eup %6691  ;;  %v9007_v41 = vadd.f32 1e-05, %v2837_v37  ;;  %v2677_v2 = vsub.f32 %v8845_v35, %v2645_v56  ;;  %v9015_v46 = vadd.f32 %v9001_v59, %v3251_v63  ;;  %v4734_v63 = vld [vmem:[#allocation11 + $0x50] sm:$0xff] }
 0x45a   :  { %v2909_v57 = vmul.f32 %v9005_v36, %v8983_v33  ;;  %v9012_v23 = vadd.f32 1e-05, %v2839_v10  ;;  %v2923_v17 = vmul.f32 %v6690_v30, %v2922_v54  ;;  %vm2915_vm9 = vweird.f32 %v9005_v36  ;;  %4747 = vmatpush.msra.mxu2 %v4734_v63 }
 0x45b   :  { %6693 = vrsqrt.f32 %v9007_v41  ;;  %v9020_v26 = vsel %vm2703_vm4, %v2677_v2, 0.0  ;;  %v9035_v15 = vmul.f32 0.70710677, %v9015_v46  ;;  %vm9061_vm11 = vmor %vm2914_vm10, %vm2915_vm9  ;;  %vm2934_vm13 = vweird.f32 %v9007_v41 }
 0x45c   :  { %v2910_v35 = vmul.f32 %v9005_v36, %v2909_v57  ;;  %v2746_v12 = vmul.f32 %v9020_v26, %v9020_v26  ;;  %v2927_v62 = vsel %vm9022_vm8, %v6690_v30, %v2923_v17  ;;  %6695 = vrsqrt.f32 %v9012_v23  ;;  %4748 = vmatpush.msra.mxu2 %v4733_v61 }
 0x45d   :  { %v3380_v11 = vmul.f32 %v9035_v15, %v9035_v15  ;;  %v3220_v6 = vmul.f32 %v2927_v62, %v8797_v5  ;;  %vm2954_vm3 = vweird.f32 %v9012_v23 }
 0x45e   :  { %v2911_v38 = vmul.f32 0.5, %v2910_v35  ;;  %v2594_v14 = vpop.xlane.xlu1 %2593  ;;  %2786 = vadd.xlane.f32.xlu2 %v2746_v12  ;;  %v2779_v27 = vpop.xlane.xlu0 %2778  ;;  %2605 = vadd.xlane.f32.xlu1 %v9030_v55 }
 0x45f   :  { %v2647_v42 = vmul.f32 0.015625, %v2594_v14  ;;  %v2598_v8 = vpop.xlane.xlu2 %2597  ;;  %v2838_v58 = vmul.f32 0.015625, %v2779_v27  ;;  %v9050_v4 = vmin.f32 %v3380_v11, 16.0  ;;  %v3253_v25 = vmul.f32 %v8987_v18, %v3220_v6  ;;  %v2534_v6 = vpop.f32.mrf.mxu1 }
 0x460   :  { %v2912_v30 = vsub.f32 1.5, %v2911_v38  ;;  %v2649_v7 = vmul.f32 0.015625, %v2598_v8  ;;  %v4732_v8 = vld [vmem:[#allocation11 + $0x40] sm:$0xff] }
 0x461   :  { %v9045_v53 = vpop.eup %6693  ;;  %v2679_v22 = vsub.f32 %v8883_v21, %v2647_v42  ;;  %v9048_v44 = vadd.f32 1e-05, %v2838_v58  ;;  %v3393_v17 = vmul.f32 3.8918573e-05, %v9050_v4  ;;  %v9093_v27 = vadd.f32 %v9001_v59, %v3253_v25  ;;  %4749 = vmatpush.msra.mxu2 %v4732_v8 }
 0x462   :  { %v2913_v40 = vmul.f32 %v9005_v36, %v2912_v30  ;;  %v2929_v5 = vmul.f32 %v9045_v53, %v9007_v41  ;;  %v2681_v43 = vsub.f32 %v8886_v31, %v2649_v7  ;;  %v9067_v33 = vpop.eup %6695  ;;  %vm2935_vm12 = vweird.f32 %v9045_v53 }
 0x463   :  { %6697 = vrsqrt.f32 %v9048_v44  ;;  %v9075_v24 = vsel %vm2703_vm4, %v2679_v22, 0.0  ;;  %v2949_v35 = vmul.f32 %v9067_v33, %v9012_v23  ;;  %v3394_v14 = vadd.f32 0.001143296, %v3393_v17  ;;  %vm9113_vm14 = vmor %vm2934_vm13, %vm2935_vm12 }
 0x464   :  { %v2917_v31 = vsel %vm9061_vm11, %v9005_v36, %v2913_v40  ;;  %v2930_v37 = vmul.f32 %v9045_v53, %v2929_v5  ;;  %v9079_v0 = vsel %vm2703_vm4, %v2681_v43, 0.0  ;;  %v2748_v56 = vmul.f32 %v9075_v24, %v9075_v24  ;;  %v4731_v5 = vld [vmem:[#allocation11 + $0x38] sm:$0xff] }
 0x465   :  { %v2750_v10 = vmul.f32 %v9079_v0, %v9079_v0  ;;  %v3382_v36 = vmul.f32 2.1237322e-06, %v9050_v4  ;;  %v3219_v32 = vmul.f32 %v2917_v31, %v8815_v9  ;;  %v3395_v47 = vmul.f32 %v3394_v14, %v9050_v4  ;;  %v4730_v31 = vld [vmem:[#allocation11 + $0x30] sm:$0xff]  ;;  %4750 = vmatpush.msra.mxu2 %v4731_v5 }
 0x466   :  { %v2931_v54 = vmul.f32 0.5, %v2930_v37  ;;  %v2783_v2 = vpop.xlane.xlu1 %2782  ;;  %2603 = vadd.xlane.f32.xlu2 %v9059_v28  ;;  %v2596_v57 = vpop.xlane.xlu0 %2595  ;;  %2790 = vadd.xlane.f32.xlu0 %v2748_v56  ;;  %v9109_v22 = vadd.f32 %v8996_v13, %v8458_v49  ;;  %v2950_v40 = vmul.f32 %v9067_v33, %v2949_v35  ;;  %v9130_v25 = vadd.f32 %v2534_v6, %v8458_v49 }
 0x467   :  { %v2840_v12 = vmul.f32 0.015625, %v2783_v2  ;;  %2794 = vadd.xlane.f32.xlu1 %v2750_v10  ;;  %v2648_v29 = vmul.f32 0.015625, %v2596_v57  ;;  %v3383_v62 = vadd.f32 0.00028619796, %v3382_v36  ;;  %v3252_v11 = vmul.f32 %v8987_v18, %v3219_v32  ;;  %v4729_v57 = vld [vmem:[#allocation11 + $0x28] sm:$0xff]  ;;  %4751 = vmatpush.msra.mxu2 %v4730_v31 }
 0x468   :  { %v2932_v38 = vsub.f32 1.5, %v2931_v54  ;;  %v3396_v37 = vadd.f32 0.014752088, %v3395_v47  ;;  %v9136_v10 = vmul.f32 0.70710677, %v9093_v27  ;;  %vm2944_vm15 = vweird.f32 %v9048_v44 }
 0x469   :  { %v9095_v16 = vpop.eup %6697  ;;  %v9097_v9 = vadd.f32 1e-05, %v2840_v12  ;;  %v2680_v42 = vsub.f32 %v8924_v50, %v2648_v29  ;;  %v3384_v58 = vmul.f32 %v3383_v62, %v9050_v4  ;;  %v9133_v56 = vadd.f32 %v9001_v59, %v3252_v11  ;;  %4752 = vmatpush.msra.mxu2 %v4729_v57 }
 0x46a   :  { %v2933_v30 = vmul.f32 %v9045_v53, %v2932_v38  ;;  %v2939_v7 = vmul.f32 %v9095_v16, %v9048_v44  ;;  %v3397_v17 = vmul.f32 %v3396_v37, %v9050_v4  ;;  %v2951_v35 = vmul.f32 0.5, %v2950_v40  ;;  %v4728_v38 = vld [vmem:[#allocation11 + $0x20] sm:$0xff] }
 0x46b   :  { %6699 = vrsqrt.f32 %v9097_v9  ;;  %v9121_v41 = vsel %vm2703_vm4, %v2680_v42, 0.0  ;;  %v3385_v21 = vadd.f32 0.0036580483, %v3384_v58  ;;  %v9145_v32 = vmul.f32 0.70710677, %v9133_v56  ;;  %4753 = vmatpush.msra.mxu2 %v4728_v38 }
 0x46c   :  { %v2937_v13 = vsel %vm9113_vm14, %v9045_v53, %v2933_v30  ;;  %v2940_v43 = vmul.f32 %v9095_v16, %v2939_v7  ;;  %v2749_v20 = vmul.f32 %v9121_v41, %v9121_v41  ;;  %vm2945_vm0 = vweird.f32 %v9095_v16 }
 0x46d   :  { %v3386_v36 = vmul.f32 %v3385_v21, %v9050_v4  ;;  %v3221_v54 = vmul.f32 %v2937_v13, %v8851_v3  ;;  %v3460_v3 = vmul.f32 %v9136_v10, %v9136_v10  ;;  %v3398_v14 = vadd.f32 0.112945676, %v3397_v17  ;;  %vm9177_vm1 = vmor %vm2944_vm15, %vm2945_vm0 }
 0x46e   :  { %v2941_v63 = vmul.f32 0.5, %v2940_v43  ;;  %v2600_v53 = vpop.xlane.xlu1 %2599  ;;  %2792 = vadd.xlane.f32.xlu2 %v2749_v20  ;;  %2607 = vadd.xlane.f32.xlu0 %v9109_v22  ;;  %v3420_v42 = vmul.f32 %v9145_v32, %v9145_v32  ;;  %v9171_v40 = vadd.f32 %v9042_v60, %v8458_v49  ;;  %v2952_v5 = vsub.f32 1.5, %v2951_v35  ;;  %v4726_v20 = vld [vmem:[#allocation11 + $0x10] sm:$0xff] }
 0x46f   :  { %v2650_v2 = vmul.f32 0.015625, %v2600_v53  ;;  %2611 = vadd.xlane.f32.xlu1 %v9130_v25  ;;  %v3387_v29 = vadd.f32 0.05243302, %v3386_v36  ;;  %v3254_v6 = vmul.f32 %v8987_v18, %v3221_v54  ;;  %v3399_v7 = vmul.f32 %v3398_v14, %v9050_v4 }
 0x470   :  { %v2942_v12 = vsub.f32 1.5, %v2941_v63  ;;  %v9165_v47 = vmin.f32 %v3420_v42, 16.0  ;;  %v9167_v50 = vmin.f32 %v3460_v3, 16.0  ;;  %v4725_v63 = vld [vmem:[#allocation11 + $0x8] sm:$0xff]  ;;  %v2953_v35 = vmul.f32 %v9067_v33, %v2952_v5  ;;  %v2537_v42 = vpop.f32.mrf.mxu1 }
 0x471   :  { %v9149_v61 = vpop.eup %6699  ;;  %v2682_v62 = vsub.f32 %v8943_v48, %v2650_v2  ;;  %v3388_v11 = vmul.f32 %v3387_v29, %v9050_v4  ;;  %v4727_v48 = vld [vmem:[#allocation11 + $0x18] sm:$0xff]  ;;  %v3400_v60 = vadd.f32 0.4994258, %v3399_v7  ;;  %v9193_v54 = vadd.f32 %v9001_v59, %v3254_v6  ;;  %v4724_v29 = vld [vmem:[#allocation11] sm:$0xff] }
 0x472   :  { %v2943_v8 = vmul.f32 %v9095_v16, %v2942_v12  ;;  %v2959_v58 = vmul.f32 %v9149_v61, %v9097_v9  ;;  %v3422_v31 = vmul.f32 2.1237322e-06, %v9165_v47  ;;  %v3433_v37 = vmul.f32 3.8918573e-05, %v9165_v47  ;;  %4754 = vmatpush.msra.mxu2 %v4727_v48 }
 0x473   :  { %v9162_v30 = vsel %vm2703_vm4, %v2682_v62, 0.0  ;;  %v3462_v53 = vmul.f32 2.1237322e-06, %v9167_v50  ;;  %v3473_v36 = vmul.f32 3.8918573e-05, %v9167_v50  ;;  %v3401_v2 = vmul.f32 %v3400_v60, %v9050_v4 }
 0x474   :  { %v2751_v43 = vmul.f32 %v9162_v30, %v9162_v30  ;;  %v2947_v21 = vsel %vm9177_vm1, %v9095_v16, %v2943_v8  ;;  %v2960_v44 = vmul.f32 %v9149_v61, %v2959_v58  ;;  %v3389_v16 = vadd.f32 0.18741608, %v3388_v11  ;;  %4755 = vmatpush.msra.mxu2 %v4726_v20 }
 0x475   :  { %v3423_v57 = vadd.f32 0.00028619796, %v3422_v31  ;;  %v3434_v17 = vadd.f32 0.001143296, %v3433_v37  ;;  %vm2955_vm2 = vweird.f32 %v9067_v33  ;;  %v3463_v12 = vadd.f32 0.00028619796, %v3462_v53 }
 0x476   :  { %2609 = vadd.xlane.f32.xlu2 %v9171_v40  ;;  %2796 = vadd.xlane.f32.xlu0 %v2751_v43  ;;  %v9198_v3 = vadd.f32 1.0, %v3401_v2  ;;  %v3474_v14 = vadd.f32 0.001143296, %v3473_v36  ;;  %v9204_v58 = vmul.f32 0.70710677, %v9193_v54  ;;  %v3222_v11 = vmul.f32 %v2947_v21, %v8873_v51  ;;  %vm9214_vm5 = vmor %vm2954_vm3, %vm2955_vm2 }
 0x477   :  { %v3424_v62 = vmul.f32 %v3423_v57, %v9165_v47  ;;  %v3435_v38 = vmul.f32 %v3434_v17, %v9165_v47  ;;  %4756 = vmatpush.msra.mxu2 %v4725_v63  ;;  %v3464_v8 = vmul.f32 %v3463_v12, %v9167_v50  ;;  %v9208_v6 = vmul.f32 0.5, %v2960_v44 }
 0x478   :  { %v3390_v48 = vmul.f32 %v3389_v16, %v9050_v4  ;;  %6701 = vrcp.f32 %v9198_v3  ;;  %v9219_v51 = vadd.f32 %v2537_v42, %v8458_v49  ;;  %v2957_v23 = vsel %vm9214_vm5, %v9067_v33, %v2953_v35 }
 0x479   :  { %4757 = vmatpush.msra.mxu2 %v4724_v29  ;;  %v3425_v5 = vadd.f32 0.0036580483, %v3424_v62  ;;  %v3436_v13 = vadd.f32 0.014752088, %v3435_v38  ;;  %v3465_v43 = vadd.f32 0.0036580483, %v3464_v8  ;;  %v3475_v4 = vmul.f32 %v3474_v14, %v9167_v50 }
 0x47a   :  { %v3500_v20 = vmul.f32 %v9204_v58, %v9204_v58  ;;  %v3255_v37 = vmul.f32 %v8987_v18, %v3222_v11  ;;  %v2962_v44 = vsub.f32 1.5, %v9208_v6  ;;  %v3391_v63 = vadd.f32 1.1283791, %v3390_v48 }
 0x47b   :  { %v3426_v21 = vmul.f32 %v3425_v5, %v9165_v47  ;;  %v3437_v60 = vmul.f32 %v3436_v13, %v9165_v47  ;;  %v3466_v31 = vmul.f32 %v3465_v43, %v9167_v50  ;;  %v3476_v53 = vadd.f32 0.014752088, %v3475_v4 }
 0x47c   :  { %v9233_v33 = vmin.f32 %v3500_v20, 16.0  ;;  %v3223_v57 = vmul.f32 %v2957_v23, %v8837_v52  ;;  %v3412_v35 = vand.u32 2147483647, %v9198_v3  ;;  %v9244_v8 = vadd.f32 %v9001_v59, %v3255_v37 }
 0x47d   :  { %v3427_v36 = vadd.f32 0.05243302, %v3426_v21  ;;  %v3438_v16 = vadd.f32 0.112945676, %v3437_v60  ;;  %v3467_v2 = vadd.f32 0.05243302, %v3466_v31  ;;  %v3477_v12 = vmul.f32 %v3476_v53, %v9167_v50 }
 0x47e   :  { %2613 = vadd.xlane.f32.xlu0 %v9219_v51  ;;  %v6702_v17 = vpop.eup %6701  ;;  %v3502_v29 = vmul.f32 2.1237322e-06, %v9233_v33  ;;  %v3513_v62 = vmul.f32 3.8918573e-05, %v9233_v33  ;;  %v3414_v5 = vand.u32 2147483648, %v9198_v3  ;;  %vm3408_vm7 = vweird.f32 %v9198_v3 }
 0x47f   :  { %v3404_v38 = vmul.f32 %v6702_v17, %v9198_v3  ;;  %v3428_v14 = vmul.f32 %v3427_v36, %v9165_v47  ;;  %v3439_v42 = vmul.f32 %v3438_v16, %v9165_v47  ;;  %v3468_v52 = vmul.f32 %v3467_v2, %v9167_v50 }
 0x480   :  { %v3478_v11 = vadd.f32 0.112945676, %v3477_v12  ;;  %v3503_v6 = vadd.f32 0.00028619796, %v3502_v29  ;;  %v3514_v48 = vadd.f32 0.001143296, %v3513_v62  ;;  %vm3409_vm6 = vweird.f32 %v6702_v17 }
 0x481   :  { %v3405_v7 = vsub.f32 1.0, %v3404_v38  ;;  %v3440_v13 = vadd.f32 0.4994258, %v3439_v42  ;;  %v3429_v43 = vadd.f32 0.18741608, %v3428_v14  ;;  %v3256_v2 = vmul.f32 %v8987_v18, %v3223_v57  ;;  %vm3410_vm8 = vmor %vm3408_vm7, %vm3409_vm6 }
 0x482   :  { %v3479_v23 = vmul.f32 %v3478_v11, %v9167_v50  ;;  %v3504_v4 = vmul.f32 %v3503_v6, %v9233_v33  ;;  %v3515_v20 = vmul.f32 %v3514_v48, %v9233_v33  ;;  %v3469_v31 = vadd.f32 0.18741608, %v3468_v52 }
 0x483   :  { %v3406_v21 = vmul.f32 %v6702_v17, %v3405_v7  ;;  %v3441_v60 = vmul.f32 %v3440_v13, %v9165_v47  ;;  %v9253_v37 = vmul.f32 0.70710677, %v9244_v8  ;;  %v3415_v29 = vor.u32 1.1754944e-38, %v3414_v5 }
 0x484   :  { %v3480_v53 = vadd.f32 0.4994258, %v3479_v23  ;;  %v3505_v36 = vadd.f32 0.0036580483, %v3504_v4  ;;  %v3516_v16 = vadd.f32 0.014752088, %v3515_v20  ;;  %v3430_v38 = vmul.f32 %v3429_v43, %v9165_v47 }
 0x485   :  { %v3407_v12 = vadd.f32 %v6702_v17, %v3406_v21  ;;  %v9257_v62 = vadd.f32 1.0, %v3441_v60  ;;  %v3540_v52 = vmul.f32 %v9253_v37, %v9253_v37  ;;  %v3392_v11 = vmul.f32 %v3391_v63, %v9035_v15 }
 0x486   :  { %v3481_v14 = vmul.f32 %v3480_v53, %v9167_v50  ;;  %v3517_v42 = vmul.f32 %v3516_v16, %v9233_v33  ;;  %vm3413_vm9 = vcmp.eq.f32.partialorder %v3412_v35, 8.507059e+37  ;;  %vm2965_vm10 = vweird.f32 %v9149_v61 }
 0x487   :  { %v3411_v57 = vsel %vm3410_vm8, %v6702_v17, %v3407_v12  ;;  %6703 = vrcp.f32 %v9257_v62  ;;  %v3470_v6 = vmul.f32 %v3469_v31, %v9167_v50  ;;  %v3506_v47 = vmul.f32 %v3505_v36, %v9233_v33 }
 0x488   :  { %v3416_v3 = vsel %vm3413_vm9, %v3415_v29, %v3411_v57  ;;  %v2963_v48 = vmul.f32 %v9149_v61, %v2962_v44  ;;  %v9271_v5 = vadd.f32 1.0, %v3481_v14  ;;  %v9274_v13 = vadd.f32 %v9001_v59, %v3256_v2 }
 0x489   :  { %v3417_v7 = vmul.f32 %v3416_v3, %v3392_v11  ;;  %v3431_v15 = vadd.f32 1.1283791, %v3430_v38  ;;  %v3518_v63 = vadd.f32 0.112945676, %v3517_v42  ;;  %v9276_v17 = vmin.f32 %v3540_v52, 16.0 }
 0x48a   :  { %vm2964_vm11 = vweird.f32 %v9097_v9  ;;  %v3316_v35 = vmul.f32 0.5, %v9015_v46  ;;  %6705 = vrcp.f32 %v9271_v5  ;;  %v3471_v44 = vadd.f32 1.1283791, %v3470_v6 }
 0x48b   :  { %v6481_v43 = vclamps-f32 %v3417_v7, 1.0  ;;  %vm9283_vm12 = vmor %vm2964_vm11, %vm2965_vm10  ;;  %v3507_v23 = vadd.f32 0.05243302, %v3506_v47  ;;  %v3519_v4 = vmul.f32 %v3518_v63, %v9233_v33  ;;  %v3542_v20 = vmul.f32 2.1237322e-06, %v9276_v17 }
 0x48c   :  { %v2967_v46 = vsel %vm9283_vm12, %v9149_v61, %v2963_v48  ;;  %v3553_v60 = vmul.f32 3.8918573e-05, %v9276_v17  ;;  %v9294_v31 = vmul.f32 0.70710677, %v9274_v13  ;;  %v3432_v53 = vmul.f32 %v3431_v15, %v9145_v32 }
 0x48d   :  { %v6704_v21 = vpop.eup %6703  ;;  %v4660_v9 = vadd.f32 1.0, %v6481_v43  ;;  %v3452_v16 = vand.u32 2147483647, %v9257_v62  ;;  %v3454_v2 = vand.u32 2147483648, %v9257_v62  ;;  %v3520_v29 = vadd.f32 0.4994258, %v3519_v4 }
 0x48e   :  { %v3444_v36 = vmul.f32 %v6704_v21, %v9257_v62  ;;  %v3543_v38 = vadd.f32 0.00028619796, %v3542_v20  ;;  %v3554_v14 = vadd.f32 0.001143296, %v3553_v60  ;;  %vm3448_vm13 = vweird.f32 %v9257_v62 }
 0x48f   :  { %v4692_v12 = vmul.f32 %v4660_v9, %v3316_v35  ;;  %v3472_v61 = vmul.f32 %v3471_v44, %v9136_v10  ;;  %v3580_v52 = vmul.f32 %v9294_v31, %v9294_v31  ;;  %v3508_v32 = vmul.f32 %v3507_v23, %v9233_v33 }
 0x490   :  { %v3445_v42 = vsub.f32 1.0, %v3444_v36  ;;  %v6706_v11 = vpop.eup %6705  ;;  %v3521_v57 = vmul.f32 %v3520_v29, %v9233_v33  ;;  %v3544_v3 = vmul.f32 %v3543_v38, %v9276_v17  ;;  %v3555_v6 = vmul.f32 %v3554_v14, %v9276_v17 }
 0x491   :  { %4758 = vmatmul.f32.vlgmr.msra.gmra.mxu2 %v4692_v12  ;;  %vm3449_vm14 = vweird.f32 %v6704_v21  ;;  %vm9308_vm15 = vcmp.eq.f32.partialorder %v3452_v16, 8.507059e+37  ;;  %v3484_v10 = vmul.f32 %v6706_v11, %v9271_v5  ;;  %v3455_v7 = vor.u32 1.1754944e-38, %v3454_v2 }
 0x492   :  { %v3446_v47 = vmul.f32 %v6704_v21, %v3445_v42  ;;  %v3492_v15 = vand.u32 2147483647, %v9271_v5  ;;  %v9314_v63 = vadd.f32 1.0, %v3521_v57  ;;  %v3556_v35 = vadd.f32 0.014752088, %v3555_v6  ;;  %vm3450_vm0 = vmor %vm3448_vm13, %vm3449_vm14 }
 0x493   :  { %v3485_v50 = vsub.f32 1.0, %v3484_v10  ;;  %v3545_v44 = vadd.f32 0.0036580483, %v3544_v3  ;;  %v9316_v23 = vmin.f32 %v3580_v52, 16.0  ;;  %v3494_v4 = vand.u32 2147483648, %v9271_v5 }
 0x494   :  { %v3447_v43 = vadd.f32 %v6704_v21, %v3446_v47  ;;  %v3509_v20 = vadd.f32 0.18741608, %v3508_v32  ;;  %6707 = vrcp.f32 %v9314_v63  ;;  %v3224_v9 = vmul.f32 %v2967_v46, %v8910_v1 }
 0x495   :  { %v3486_v36 = vmul.f32 %v6706_v11, %v3485_v50  ;;  %vm3489_vm1 = vweird.f32 %v6706_v11  ;;  %v3557_v16 = vmul.f32 %v3556_v35, %v9276_v17  ;;  %vm3488_vm2 = vweird.f32 %v9271_v5 }
 0x496   :  { %v3451_v60 = vsel %vm3450_vm0, %v6704_v21, %v3447_v43  ;;  %vm9327_vm3 = vcmp.eq.f32.partialorder %v3492_v15, 8.507059e+37  ;;  %v3582_v12 = vmul.f32 2.1237322e-06, %v9316_v23  ;;  %v3546_v1 = vmul.f32 %v3545_v44, %v9276_v17  ;;  %vm3490_vm5 = vmor %vm3488_vm2, %vm3489_vm1 }
 0x497   :  { %v3456_v2 = vsel %vm9308_vm15, %v3455_v7, %v3451_v60  ;;  %v3487_v38 = vadd.f32 %v6706_v11, %v3486_v36  ;;  %v3558_v21 = vadd.f32 0.112945676, %v3557_v16  ;;  %v3495_v46 = vor.u32 1.1754944e-38, %v3494_v4 }
 0x498   :  { %v3457_v29 = vmul.f32 %v3456_v2, %v3432_v53  ;;  %v3510_v14 = vmul.f32 %v3509_v20, %v9233_v33  ;;  %v3583_v42 = vadd.f32 0.00028619796, %v3582_v12  ;;  %v3593_v52 = vmul.f32 3.8918573e-05, %v9316_v23 }
 0x499   :  { %v3491_v5 = vsel %vm3490_vm5, %v6706_v11, %v3487_v38  ;;  %v3559_v57 = vmul.f32 %v3558_v21, %v9276_v17  ;;  %v3257_v3 = vmul.f32 %v8987_v18, %v3224_v9  ;;  %v3317_v53 = vmul.f32 0.5, %v9133_v56 }
 0x49a   :  { %v6482_v32 = vclamps-f32 %v3457_v29, 1.0  ;;  %v6708_v6 = vpop.eup %6707  ;;  %v3496_v47 = vsel %vm9327_vm3, %v3495_v46, %v3491_v5  ;;  %v3594_v48 = vadd.f32 0.001143296, %v3593_v52  ;;  %v3547_v15 = vadd.f32 0.05243302, %v3546_v1 }
 0x49b   :  { %v3497_v7 = vmul.f32 %v3496_v47, %v3472_v61  ;;  %v3524_v33 = vmul.f32 %v6708_v6, %v9314_v63  ;;  %v3511_v35 = vadd.f32 1.1283791, %v3510_v14  ;;  %v3560_v43 = vadd.f32 0.4994258, %v3559_v57 }
 0x49c   :  { %v4661_v10 = vadd.f32 1.0, %v6482_v32  ;;  %v3584_v11 = vmul.f32 %v3583_v42, %v9316_v23  ;;  %v3595_v50 = vmul.f32 %v3594_v48, %v9316_v23  ;;  %v9344_v56 = vadd.f32 %v9001_v59, %v3257_v3 }
 0x49d   :  { %v6483_v4 = vclamps-f32 %v3497_v7, 1.0  ;;  %v3525_v20 = vsub.f32 1.0, %v3524_v33  ;;  %v3532_v9 = vand.u32 2147483647, %v9314_v63  ;;  %v3534_v60 = vand.u32 2147483648, %v9314_v63 }
 0x49e   :  { %v4693_v44 = vmul.f32 %v4661_v10, %v3317_v53  ;;  %v3561_v61 = vmul.f32 %v3560_v43, %v9276_v17  ;;  %v3596_v36 = vadd.f32 0.014752088, %v3595_v50  ;;  %vm3529_vm6 = vweird.f32 %v6708_v6 }
 0x49f   :  { %v3526_v16 = vmul.f32 %v6708_v6, %v3525_v20  ;;  %v3548_v2 = vmul.f32 %v3547_v15, %v9276_v17  ;;  %v9351_v62 = vmul.f32 0.70710677, %v9344_v56  ;;  %v3585_v29 = vadd.f32 0.0036580483, %v3584_v11 }
 0x4a0   :  { %4761 = vmatmul.f32.gmra.mxu2 %v4693_v44  ;;  %v3562_v12 = vadd.f32 1.0, %v3561_v61  ;;  %v3597_v38 = vmul.f32 %v3596_v36, %v9316_v23  ;;  %v4662_v1 = vadd.f32 1.0, %v6483_v4  ;;  %vm3528_vm7 = vweird.f32 %v9314_v63 }
 0x4a1   :  { %v3527_v21 = vadd.f32 %v6708_v6, %v3526_v16  ;;  %v3620_v46 = vmul.f32 %v9351_v62, %v9351_v62  ;;  %v3318_v14 = vmul.f32 0.5, %v9093_v27  ;;  %v3512_v42 = vmul.f32 %v3511_v35, %v9204_v58  ;;  %vm3530_vm8 = vmor %vm3528_vm7, %vm3529_vm6 }
 0x4a2   :  { %v3535_v52 = vor.u32 1.1754944e-38, %v3534_v60  ;;  %6709 = vrcp.f32 %v3562_v12  ;;  %vm3533_vm9 = vcmp.eq.f32.partialorder %v3532_v9, 8.507059e+37  ;;  %v3549_v5 = vadd.f32 0.18741608, %v3548_v2 }
 0x4a3   :  { %v3531_v32 = vsel %vm3530_vm8, %v6708_v6, %v3527_v21  ;;  %v3598_v57 = vadd.f32 0.112945676, %v3597_v38  ;;  %v3586_v53 = vmul.f32 %v3585_v29, %v9316_v23  ;;  %v9360_v47 = vmin.f32 %v3620_v46, 16.0 }
 0x4a4   :  { %v3536_v3 = vsel %vm3533_vm9, %v3535_v52, %v3531_v32  ;;  %v4694_v63 = vmul.f32 %v4662_v1, %v3318_v14  ;;  %v3550_v6 = vmul.f32 %v3549_v5, %v9276_v17  ;;  %v3319_v60 = vmul.f32 0.5, %v9193_v54 }
 0x4a5   :  { %v3537_v48 = vmul.f32 %v3536_v3, %v3512_v42  ;;  %v3599_v10 = vmul.f32 %v3598_v57, %v9316_v23  ;;  %v3622_v27 = vmul.f32 2.1237322e-06, %v9360_v47  ;;  %v3633_v58 = vmul.f32 3.8918573e-05, %v9360_v47 }
 0x4a6   :  { %v3587_v35 = vadd.f32 0.05243302, %v3586_v53  ;;  %v3551_v61 = vadd.f32 1.1283791, %v3550_v6  ;;  %v3574_v16 = vand.u32 2147483648, %v3562_v12  ;;  %vm3568_vm11 = vweird.f32 %v3562_v12 }
 0x4a7   :  { %v6484_v7 = vclamps-f32 %v3537_v48, 1.0  ;;  %v3600_v33 = vadd.f32 0.4994258, %v3599_v10  ;;  %v3623_v43 = vadd.f32 0.00028619796, %v3622_v27 }
 0x4a8   :  { %4764 = vmatmul.f32.gmra.mxu2 %v4694_v63  ;;  %v6710_v15 = vpop.eup %6709  ;;  %v3634_v11 = vadd.f32 0.001143296, %v3633_v58  ;;  %v3588_v17 = vmul.f32 %v3587_v35, %v9316_v23  ;;  %v3572_v21 = vand.u32 2147483647, %v3562_v12  ;;  %v3575_v54 = vor.u32 1.1754944e-38, %v3574_v16 }
 0x4a9   :  { %v4663_v50 = vadd.f32 1.0, %v6484_v7  ;;  %v3564_v44 = vmul.f32 %v6710_v15, %v3562_v12  ;;  %v3601_v4 = vmul.f32 %v3600_v33, %v9316_v23  ;;  %v3624_v20 = vmul.f32 %v3623_v43, %v9360_v47  ;;  %v9376_v12 = vpop.f32.mrf.mxu1 }
 0x4aa   :  { %v3635_v9 = vmul.f32 %v3634_v11, %v9360_v47  ;;  %vm3569_vm10 = vweird.f32 %v6710_v15  ;;  %v3589_v52 = vadd.f32 0.18741608, %v3588_v17  ;;  %v3552_v32 = vmul.f32 %v3551_v61, %v9253_v37 }
 0x4ab   :  { %v3565_v36 = vsub.f32 1.0, %v3564_v44  ;;  %v3602_v2 = vadd.f32 1.0, %v3601_v4  ;;  %v4695_v38 = vmul.f32 %v4663_v50, %v3319_v60  ;;  %v3625_v46 = vadd.f32 0.0036580483, %v3624_v20  ;;  %vm3570_vm12 = vmor %vm3568_vm11, %vm3569_vm10 }
 0x4ac   :  { %v3636_v29 = vadd.f32 0.014752088, %v3635_v9  ;;  %vm3573_vm13 = vcmp.eq.f32.partialorder %v3572_v21, 8.507059e+37  ;;  %v3590_v27 = vmul.f32 %v3589_v52, %v9316_v23  ;;  %v3320_v37 = vmul.f32 0.5, %v9244_v8 }
 0x4ad   :  { %v3566_v1 = vmul.f32 %v6710_v15, %v3565_v36  ;;  %6711 = vrcp.f32 %v3602_v2  ;;  %v3626_v53 = vmul.f32 %v3625_v46, %v9360_v47  ;;  %v3614_v11 = vand.u32 2147483648, %v3602_v2 }
 0x4ae   :  { %v3637_v42 = vmul.f32 %v3636_v29, %v9360_v47  ;;  %v3591_v43 = vadd.f32 1.1283791, %v3590_v27  ;;  %v3612_v20 = vand.u32 2147483647, %v3602_v2  ;;  %vm3608_vm15 = vweird.f32 %v3602_v2 }
 0x4af   :  { %v3567_v14 = vadd.f32 %v6710_v15, %v3566_v1  ;;  %v3627_v6 = vadd.f32 0.05243302, %v3626_v53  ;;  %v3615_v61 = vor.u32 1.1754944e-38, %v3614_v11 }
 0x4b0   :  { %4767 = vmatmul.f32.gmra.mxu2 %v4695_v38  ;;  %v3638_v57 = vadd.f32 0.112945676, %v3637_v42  ;;  %v3592_v8 = vmul.f32 %v3591_v43, %v9294_v31  ;;  %vm3613_vm1 = vcmp.eq.f32.partialorder %v3612_v20, 8.507059e+37 }
 0x4b1   :  { %v3571_v5 = vsel %vm3570_vm12, %v6710_v15, %v3567_v14  ;;  %v3628_v23 = vmul.f32 %v3627_v6, %v9360_v47  ;;  %v9382_v38 = vpop.f32.mrf.mxu1 }
 0x4b2   :  { %v3576_v3 = vsel %vm3573_vm13, %v3575_v54, %v3571_v5  ;;  %v3639_v48 = vmul.f32 %v3638_v57, %v9360_v47  ;;  %v3321_v54 = vmul.f32 0.5, %v9274_v13 }
 0x4b3   :  { %v3577_v63 = vmul.f32 %v3576_v3, %v3552_v32  ;;  %v6712_v10 = vpop.eup %6711  ;;  %v3629_v29 = vadd.f32 0.18741608, %v3628_v23 }
 0x4b4   :  { %v3604_v7 = vmul.f32 %v6712_v10, %v3602_v2  ;;  %v3640_v33 = vadd.f32 0.4994258, %v3639_v48  ;;  %vm3609_vm14 = vweird.f32 %v6712_v10 }
 0x4b5   :  { %v6485_v58 = vclamps-f32 %v3577_v63, 1.0  ;;  %vm3610_vm0 = vmor %vm3608_vm15, %vm3609_vm14  ;;  %v3630_v2 = vmul.f32 %v3629_v29, %v9360_v47 }
 0x4b6   :  { %v3605_v35 = vsub.f32 1.0, %v3604_v7  ;;  %v3641_v50 = vmul.f32 %v3640_v33, %v9360_v47 }
 0x4b7   :  { %v4664_v15 = vadd.f32 1.0, %v6485_v58  ;;  %v3631_v57 = vadd.f32 1.1283791, %v3630_v2 }
 0x4b8   :  { %v3606_v4 = vmul.f32 %v6712_v10, %v3605_v35  ;;  %v3642_v9 = vadd.f32 1.0, %v3641_v50 }
 0x4b9   :  { %v4696_v44 = vmul.f32 %v4664_v15, %v3320_v37  ;;  %v9389_v47 = vpop.f32.mrf.mxu1  ;;  %v3632_v15 = vmul.f32 %v3631_v57, %v9351_v62 }
 0x4ba   :  { %v3607_v60 = vadd.f32 %v6712_v10, %v3606_v4  ;;  %6713 = vrcp.f32 %v3642_v9  ;;  %v3652_v3 = vand.u32 2147483647, %v3642_v9  ;;  %v3654_v53 = vand.u32 2147483648, %v3642_v9 }
 0x4bb   :  { %4770 = vmatmul.f32.gmra.mxu2 %v4696_v44  ;;  %vm3648_vm3 = vweird.f32 %v3642_v9 }
 0x4bc   :  { %v3611_v36 = vsel %vm3610_vm0, %v6712_v10, %v3607_v60  ;;  %v3655_v35 = vor.u32 1.1754944e-38, %v3654_v53  ;;  %vm3653_vm6 = vcmp.eq.f32.partialorder %v3652_v3, 8.507059e+37 }
 0x4bd   :  { %v3616_v16 = vsel %vm3613_vm1, %v3615_v61, %v3611_v36 }
 0x4be   :  { %v3617_v1 = vmul.f32 %v3616_v16, %v3592_v8 }
 0x4c0   :  { %v6486_v46 = vclamps-f32 %v3617_v1, 1.0  ;;  %v6714_v42 = vpop.eup %6713 }
 0x4c1   :  { %v2785_v17 = vpop.xlane.xlu0 %2784  ;;  %v3644_v31 = vmul.f32 %v6714_v42, %v3642_v9  ;;  %vm3649_vm2 = vweird.f32 %v6714_v42 }
 0x4c2   :  { %v2841_v21 = vmul.f32 0.015625, %v2785_v17  ;;  %v4665_v52 = vadd.f32 1.0, %v6486_v46  ;;  %vm3650_vm5 = vmor %vm3648_vm3, %vm3649_vm2  ;;  %v3322_v17 = vmul.f32 0.5, %v9344_v56  ;;  %v9412_v46 = vpop.f32.mrf.mxu1  ;;  %v9420_v56 = vadd.f32 %v9376_v12, %v8458_v49 }
 0x4c3   :  { %v3645_v5 = vsub.f32 1.0, %v3644_v31 }
 0x4c4   :  { %v9384_v14 = vadd.f32 1e-05, %v2841_v21  ;;  %v4697_v32 = vmul.f32 %v4665_v52, %v3321_v54 }
 0x4c5   :  { %v3646_v10 = vmul.f32 %v6714_v42, %v3645_v5 }
 0x4c6   :  { %6715 = vrsqrt.f32 %v9384_v14  ;;  %4773 = vmatmul.f32.gmra.mxu2 %v4697_v32  ;;  %vm2974_vm8 = vweird.f32 %v9384_v14 }
 0x4c7   :  { %v3647_v13 = vadd.f32 %v6714_v42, %v3646_v10 }
 0x4c9   :  { %v2789_v63 = vpop.xlane.xlu1 %2788  ;;  %v2602_v48 = vpop.xlane.xlu0 %2601  ;;  %v3651_v43 = vsel %vm3650_vm5, %v6714_v42, %v3647_v13 }
 0x4ca   :  { %v2843_v27 = vmul.f32 0.015625, %v2789_v63  ;;  %v2651_v58 = vmul.f32 0.015625, %v2602_v48  ;;  %v3656_v44 = vsel %vm3653_vm6, %v3655_v35, %v3651_v43 }
 0x4cc   :  { %v6716_v7 = vpop.eup %6715  ;;  %v9391_v6 = vadd.f32 1e-05, %v2843_v27  ;;  %v2683_v33 = vsub.f32 %v8994_v34, %v2651_v58  ;;  %v3657_v34 = vmul.f32 %v3656_v44, %v3632_v15 }
 0x4cd   :  { %v2969_v37 = vmul.f32 %v6716_v7, %v9384_v14  ;;  %vm2975_vm7 = vweird.f32 %v6716_v7 }
 0x4ce   :  { %6717 = vrsqrt.f32 %v9391_v6  ;;  %v9399_v11 = vsel %vm2703_vm4, %v2683_v33, 0.0  ;;  %v6487_v60 = vclamps-f32 %v3657_v34, 1.0  ;;  %vm9426_vm9 = vmor %vm2974_vm8, %vm2975_vm7  ;;  %vm2994_vm11 = vweird.f32 %v9391_v6 }
 0x4cf   :  { %v2970_v50 = vmul.f32 %v6716_v7, %v2969_v37  ;;  %v2752_v4 = vmul.f32 %v9399_v11, %v9399_v11 }
 0x4d0   :  { %v4666_v29 = vadd.f32 1.0, %v6487_v60 }
 0x4d1   :  { %v2787_v20 = vpop.xlane.xlu2 %2786  ;;  %v2971_v23 = vmul.f32 0.5, %v2970_v50  ;;  %v2606_v9 = vpop.xlane.xlu1 %2605  ;;  %2798 = vadd.xlane.f32.xlu2 %v2752_v4 }
 0x4d2   :  { %v2842_v62 = vmul.f32 0.015625, %v2787_v20  ;;  %v2653_v61 = vmul.f32 0.015625, %v2606_v9  ;;  %v4698_v2 = vmul.f32 %v4666_v29, %v3322_v17 }
 0x4d3   :  { %v2972_v8 = vsub.f32 1.5, %v2971_v23 }
 0x4d4   :  { %v9403_v36 = vadd.f32 1e-05, %v2842_v62  ;;  %v9405_v16 = vpop.eup %6717  ;;  %v2685_v1 = vsub.f32 %v9030_v55, %v2653_v61  ;;  %4776 = vmatmul.f32.gmra.mxu2 %v4698_v2  ;;  %v9488_v2 = vadd.f32 %v9382_v38, %v8458_v49 }
 0x4d5   :  { %v2989_v21 = vmul.f32 %v9405_v16, %v9391_v6  ;;  %v2973_v42 = vmul.f32 %v6716_v7, %v2972_v8  ;;  %vm2995_vm10 = vweird.f32 %v9405_v16 }
 0x4d6   :  { %6719 = vrsqrt.f32 %v9403_v36  ;;  %v9416_v54 = vsel %vm2703_vm4, %v2685_v1, 0.0  ;;  %vm9462_vm12 = vmor %vm2994_vm11, %vm2995_vm10  ;;  %vm2984_vm14 = vweird.f32 %v9403_v36 }
 0x4d7   :  { %12237 = vst [vmem:[#allocation24_spill] sm:$0xff] %v9416_v54  ;;  %v2990_v55 = vmul.f32 %v9405_v16, %v2989_v21  ;;  %v2754_v52 = vmul.f32 %v9416_v54, %v9416_v54  ;;  %v2977_v53 = vsel %vm9426_vm9, %v6716_v7, %v2973_v42 }
 0x4d8   :  { %v3225_v7 = vmul.f32 %v2977_v53, %v8979_v19  ;;  %v9459_v19 = vpop.f32.mrf.mxu1 }
 0x4d9   :  { %v2604_v31 = vpop.xlane.xlu2 %2603  ;;  %v2991_v5 = vmul.f32 0.5, %v2990_v55  ;;  %2802 = vadd.xlane.f32.xlu0 %v2754_v52  ;;  %2615 = vadd.xlane.f32.xlu2 %v9420_v56  ;;  %v2791_v12 = vpop.xlane.xlu0 %2790 }
 0x4da   :  { %v2795_v57 = vpop.xlane.xlu1 %2794  ;;  %v2652_v3 = vmul.f32 0.015625, %v2604_v31  ;;  %v2844_v48 = vmul.f32 0.015625, %v2791_v12  ;;  %v3258_v50 = vmul.f32 %v8987_v18, %v3225_v7 }
 0x4db   :  { %v2846_v63 = vmul.f32 0.015625, %v2795_v57  ;;  %v2992_v14 = vsub.f32 1.5, %v2991_v5 }
 0x4dc   :  { %v9433_v10 = vpop.eup %6719  ;;  %v2684_v27 = vsub.f32 %v9059_v28, %v2652_v3  ;;  %v9440_v33 = vadd.f32 1e-05, %v2844_v48  ;;  %v9453_v28 = vadd.f32 %v9389_v47, %v8458_v49  ;;  %v9468_v9 = vadd.f32 %v9001_v59, %v3258_v50 }
 0x4dd   :  { %v2979_v58 = vmul.f32 %v9433_v10, %v9403_v36  ;;  %v9438_v13 = vadd.f32 1e-05, %v2846_v63  ;;  %v2993_v15 = vmul.f32 %v9405_v16, %v2992_v14  ;;  %vm2985_vm13 = vweird.f32 %v9433_v10 }
 0x4de   :  { %v9444_v37 = vsel %vm2703_vm4, %v2684_v27, 0.0  ;;  %v9476_v17 = vmul.f32 0.70710677, %v9468_v9  ;;  %v9518_v48 = vadd.f32 %v9412_v46, %v8458_v49  ;;  %vm9522_vm15 = vmor %vm2984_vm14, %vm2985_vm13  ;;  %vm3004_vm1 = vweird.f32 %v9440_v33 }
 0x4df   :  { %v2980_v35 = vmul.f32 %v9433_v10, %v2979_v58  ;;  %6721 = vrsqrt.f32 %v9438_v13  ;;  %v2753_v43 = vmul.f32 %v9444_v37, %v9444_v37  ;;  %v2997_v62 = vsel %vm9462_vm12, %v9405_v16, %v2993_v15 }
 0x4e0   :  { %6723 = vrsqrt.f32 %v9440_v33  ;;  %v3227_v16 = vmul.f32 %v2997_v62, %v8991_v39  ;;  %v3660_v38 = vmul.f32 %v9476_v17, %v9476_v17  ;;  %v2555_v7 = vpop.f32.mrf.mxu1  ;;  %vm3024_vm7 = vweird.f32 %v9438_v13 }
 0x4e1   :  { %v2981_v44 = vmul.f32 0.5, %v2980_v35  ;;  %v2793_v4 = vpop.xlane.xlu2 %2792  ;;  %2619 = vadd.xlane.f32.xlu0 %v9453_v28  ;;  %2800 = vadd.xlane.f32.xlu1 %v2753_v43  ;;  %v2608_v23 = vpop.xlane.xlu0 %2607 }
 0x4e2   :  { %v2612_v47 = vpop.xlane.xlu1 %2611  ;;  %v2845_v20 = vmul.f32 0.015625, %v2793_v4  ;;  %v2654_v60 = vmul.f32 0.015625, %v2608_v23  ;;  %v9513_v53 = vmin.f32 %v3660_v38, 16.0  ;;  %v3260_v63 = vmul.f32 %v8987_v18, %v3227_v16 }
 0x4e3   :  { %v2656_v6 = vmul.f32 0.015625, %v2612_v47  ;;  %v2982_v61 = vsub.f32 1.5, %v2981_v44  ;;  %v9547_v23 = vadd.f32 %v2555_v7, %v8458_v49 }
 0x4e4   :  { %v9473_v8 = vadd.f32 1e-05, %v2845_v20  ;;  %v2686_v21 = vsub.f32 %v9109_v22, %v2654_v60  ;;  %v3662_v46 = vmul.f32 2.1237322e-06, %v9513_v53  ;;  %v3673_v43 = vmul.f32 3.8918573e-05, %v9513_v53 }
 0x4e5   :  { %v9478_v29 = vpop.eup %6721  ;;  %v2688_v1 = vsub.f32 %v9130_v25, %v2656_v6  ;;  %v2983_v22 = vmul.f32 %v9433_v10, %v2982_v61 }
 0x4e6   :  { %v9482_v42 = vpop.eup %6723  ;;  %6725 = vrsqrt.f32 %v9473_v8  ;;  %v9502_v39 = vsel %vm2703_vm4, %v2686_v21, 0.0  ;;  %v3019_v31 = vmul.f32 %v9478_v29, %v9438_v13  ;;  %v3663_v20 = vadd.f32 0.00028619796, %v3662_v46 }
 0x4e7   :  { %v2999_v55 = vmul.f32 %v9482_v42, %v9440_v33  ;;  %v9495_v25 = vsel %vm2703_vm4, %v2688_v1, 0.0  ;;  %12243 = vst [vmem:[#allocation26_spill] sm:$0xff] %v9502_v39  ;;  %v2755_v57 = vmul.f32 %v9502_v39, %v9502_v39  ;;  %v2987_v15 = vsel %vm9522_vm15, %v9433_v10, %v2983_v22 }
 0x4e8   :  { %12242 = vst [vmem:[#allocation25_spill] sm:$0xff] %v9495_v25  ;;  %v2757_v52 = vmul.f32 %v9495_v25, %v9495_v25  ;;  %v3020_v50 = vmul.f32 %v9478_v29, %v3019_v31  ;;  %v3674_v10 = vadd.f32 0.001143296, %v3673_v43  ;;  %vm3005_vm0 = vweird.f32 %v9482_v42 }
 0x4e9   :  { %v3000_v32 = vmul.f32 %v9482_v42, %v2999_v55  ;;  %v2610_v5 = vpop.xlane.xlu2 %2609  ;;  %2617 = vadd.xlane.f32.xlu1 %v9488_v2  ;;  %v2797_v12 = vpop.xlane.xlu0 %2796  ;;  %2804 = vadd.xlane.f32.xlu2 %v2755_v57  ;;  %v3664_v61 = vmul.f32 %v3663_v20, %v9513_v53  ;;  %v3226_v55 = vmul.f32 %v2987_v15, %v9020_v26  ;;  %vm9559_vm2 = vmor %vm3004_vm1, %vm3005_vm0  ;;  %vm3025_vm5 = vweird.f32 %v9478_v29 }
 0x4ea   :  { %2808 = vadd.xlane.f32.xlu0 %v2757_v52  ;;  %v2655_v3 = vmul.f32 0.015625, %v2610_v5  ;;  %v2847_v27 = vmul.f32 0.015625, %v2797_v12  ;;  %v3675_v1 = vmul.f32 %v3674_v10, %v9513_v53  ;;  %v3021_v21 = vmul.f32 0.5, %v3020_v50  ;;  %vm9625_vm9 = vmor %vm3024_vm7, %vm3025_vm5 }
 0x4eb   :  { %v3001_v36 = vmul.f32 0.5, %v3000_v32  ;;  %v3665_v52 = vadd.f32 0.0036580483, %v3664_v61  ;;  %v3259_v57 = vmul.f32 %v8987_v18, %v3226_v55  ;;  %vm3014_vm6 = vweird.f32 %v9473_v8 }
 0x4ec   :  { %v9526_v58 = vpop.eup %6725  ;;  %v2687_v35 = vsub.f32 %v9171_v40, %v2655_v3  ;;  %v9537_v34 = vadd.f32 1e-05, %v2847_v27  ;;  %v9544_v40 = vadd.f32 %v9001_v59, %v3260_v63  ;;  %v3676_v38 = vadd.f32 0.014752088, %v3675_v1 }
 0x4ed   :  { %v3002_v44 = vsub.f32 1.5, %v3001_v36  ;;  %v3009_v4 = vmul.f32 %v9526_v58, %v9473_v8  ;;  %v3666_v3 = vmul.f32 %v3665_v52, %v9513_v53  ;;  %v3022_v63 = vsub.f32 1.5, %v3021_v21 }
 0x4ee   :  { %v9541_v47 = vsel %vm2703_vm4, %v2687_v35, 0.0  ;;  %6727 = vrsqrt.f32 %v9537_v34  ;;  %v9565_v31 = vmul.f32 0.70710677, %v9544_v40  ;;  %v3677_v12 = vmul.f32 %v3676_v38, %v9513_v53 }
 0x4ef   :  { %12246 = vst [vmem:[#allocation27_spill] sm:$0xff] %v9541_v47  ;;  %v3003_v62 = vmul.f32 %v9482_v42, %v3002_v44  ;;  %v3010_v6 = vmul.f32 %v9526_v58, %v3009_v4  ;;  %v2756_v60 = vmul.f32 %v9541_v47, %v9541_v47  ;;  %v9576_v36 = vadd.f32 %v9001_v59, %v3259_v57 }
 0x4f0   :  { %v3740_v27 = vmul.f32 %v9565_v31, %v9565_v31  ;;  %v3667_v7 = vadd.f32 0.05243302, %v3666_v3  ;;  %v3678_v15 = vadd.f32 0.112945676, %v3677_v12  ;;  %vm3015_vm3 = vweird.f32 %v9526_v58 }
 0x4f1   :  { %v3011_v16 = vmul.f32 0.5, %v3010_v6  ;;  %2806 = vadd.xlane.f32.xlu1 %v2756_v60  ;;  %v2614_v33 = vpop.xlane.xlu0 %2613  ;;  %v3007_v32 = vsel %vm9559_vm2, %v9482_v42, %v3003_v62  ;;  %2621 = vadd.xlane.f32.xlu2 %v9518_v48  ;;  %v9582_v42 = vadd.f32 %v9459_v19, %v8458_v49  ;;  %v9594_v50 = vmul.f32 0.70710677, %v9576_v36  ;;  %vm9608_vm8 = vmor %vm3014_vm6, %vm3015_vm3 }
 0x4f2   :  { %2625 = vadd.xlane.f32.xlu0 %v9547_v23  ;;  %v2657_v26 = vmul.f32 0.015625, %v2614_v33  ;;  %v3228_v35 = vmul.f32 %v3007_v32, %v9075_v24  ;;  %v3668_v24 = vmul.f32 %v3667_v7, %v9513_v53  ;;  %v3679_v44 = vmul.f32 %v3678_v15, %v9513_v53  ;;  %v2558_v32 = vpop.f32.mrf.mxu1 }
 0x4f3   :  { %v3012_v5 = vsub.f32 1.5, %v3011_v16  ;;  %v3023_v4 = vmul.f32 %v9478_v29, %v3022_v63  ;;  %v3700_v20 = vmul.f32 %v9594_v50, %v9594_v50  ;;  %v9605_v10 = vmin.f32 %v3740_v27, 16.0 }
 0x4f4   :  { %v2689_v14 = vsub.f32 %v9219_v51, %v2657_v26  ;;  %v9585_v46 = vpop.eup %6727  ;;  %v3680_v60 = vadd.f32 0.4994258, %v3679_v44  ;;  %v3261_v61 = vmul.f32 %v8987_v18, %v3228_v35  ;;  %v3669_v55 = vadd.f32 0.18741608, %v3668_v24 }
 0x4f5   :  { %v3013_v43 = vmul.f32 %v9526_v58, %v3012_v5  ;;  %v3029_v6 = vmul.f32 %v9585_v46, %v9537_v34  ;;  %v9619_v1 = vmin.f32 %v3700_v20, 16.0  ;;  %v3742_v13 = vmul.f32 2.1237322e-06, %v9605_v10 }
 0x4f6   :  { %v9591_v51 = vsel %vm2703_vm4, %v2689_v14, 0.0  ;;  %v3753_v21 = vmul.f32 3.8918573e-05, %v9605_v10  ;;  %v3681_v22 = vmul.f32 %v3680_v60, %v9513_v53  ;;  %v9638_v57 = vadd.f32 %v9001_v59, %v3261_v61 }
 0x4f7   :  { %12249 = vst [vmem:[#allocation28_spill] sm:$0xff] %v9591_v51  ;;  %v2758_v19 = vmul.f32 %v9591_v51, %v9591_v51  ;;  %v3017_v8 = vsel %vm9608_vm8, %v9526_v58, %v3013_v43  ;;  %v3027_v58 = vsel %vm9625_vm9, %v9478_v29, %v3023_v4  ;;  %v3702_v33 = vmul.f32 2.1237322e-06, %v9619_v1 }
 0x4f8   :  { %v3713_v52 = vmul.f32 3.8918573e-05, %v9619_v1  ;;  %v3743_v38 = vadd.f32 0.00028619796, %v3742_v13  ;;  %v9635_v5 = vadd.f32 1.0, %v3681_v22  ;;  %v3229_v3 = vmul.f32 %v3017_v8, %v9121_v41 }
 0x4f9   :  { %2623 = vadd.xlane.f32.xlu1 %v9582_v42  ;;  %2810 = vadd.xlane.f32.xlu2 %v2758_v19  ;;  %v3754_v26 = vadd.f32 0.001143296, %v3753_v21  ;;  %v3030_v12 = vmul.f32 %v9585_v46, %v3029_v6  ;;  %v3703_v63 = vadd.f32 0.00028619796, %v3702_v33  ;;  %v3230_v27 = vmul.f32 %v3027_v58, %v9079_v0 }
 0x4fa   :  { %v3714_v14 = vadd.f32 0.001143296, %v3713_v52  ;;  %v3744_v29 = vmul.f32 %v3743_v38, %v9605_v10  ;;  %6729 = vrcp.f32 %v9635_v5  ;;  %v9646_v7 = vadd.f32 %v2558_v32, %v8458_v49 }
 0x4fb   :  { %v3670_v15 = vmul.f32 %v3669_v55, %v9513_v53  ;;  %v3704_v35 = vmul.f32 %v3703_v63, %v9619_v1  ;;  %v3755_v19 = vmul.f32 %v3754_v26, %v9605_v10  ;;  %v9653_v24 = vmul.f32 0.70710677, %v9638_v57 }
 0x4fc   :  { %v3715_v43 = vmul.f32 %v3714_v14, %v9619_v1  ;;  %v3745_v41 = vadd.f32 0.0036580483, %v3744_v29  ;;  %v3262_v44 = vmul.f32 %v8987_v18, %v3229_v3  ;;  %v9656_v4 = vmul.f32 0.5, %v3030_v12 }
 0x4fd   :  { %v3705_v0 = vadd.f32 0.0036580483, %v3704_v35  ;;  %v3756_v62 = vadd.f32 0.014752088, %v3755_v19  ;;  %v3780_v6 = vmul.f32 %v9653_v24, %v9653_v24  ;;  %v3263_v60 = vmul.f32 %v8987_v18, %v3230_v27 }
 0x4fe   :  { %v3716_v20 = vadd.f32 0.014752088, %v3715_v43  ;;  %v3746_v53 = vmul.f32 %v3745_v41, %v9605_v10  ;;  %v3671_v61 = vadd.f32 1.1283791, %v3670_v15  ;;  %v9666_v21 = vadd.f32 %v9001_v59, %v3262_v44 }
 0x4ff   :  { %v3706_v8 = vmul.f32 %v3705_v0, %v9619_v1  ;;  %v3692_v55 = vand.u32 2147483647, %v9635_v5  ;;  %v3757_v58 = vmul.f32 %v3756_v62, %v9605_v10  ;;  %v9670_v33 = vmin.f32 %v3780_v6, 16.0 }
 0x500   :  { %v3717_v13 = vmul.f32 %v3716_v20, %v9619_v1  ;;  %v6730_v16 = vpop.eup %6729  ;;  %v3747_v22 = vadd.f32 0.05243302, %v3746_v53  ;;  %v3694_v38 = vand.u32 2147483648, %v9635_v5  ;;  %v9680_v35 = vmul.f32 0.70710677, %v9666_v21 }
 0x501   :  { %2627 = vadd.xlane.f32.xlu2 %v9646_v7  ;;  %v3684_v52 = vmul.f32 %v6730_v16, %v9635_v5  ;;  %v3707_v32 = vadd.f32 0.05243302, %v3706_v8  ;;  %v3758_v12 = vadd.f32 0.112945676, %v3757_v58  ;;  %v3782_v63 = vmul.f32 2.1237322e-06, %v9670_v33 }
 0x502   :  { %v3718_v26 = vadd.f32 0.112945676, %v3717_v13  ;;  %v3748_v3 = vmul.f32 %v3747_v22, %v9605_v10  ;;  %v3793_v14 = vmul.f32 3.8918573e-05, %v9670_v33  ;;  %vm3689_vm10 = vweird.f32 %v6730_v16 }
 0x503   :  { %v3685_v29 = vsub.f32 1.0, %v3684_v52  ;;  %v3708_v27 = vmul.f32 %v3707_v32, %v9619_v1  ;;  %v3759_v43 = vmul.f32 %v3758_v12, %v9605_v10  ;;  %v3783_v41 = vadd.f32 0.00028619796, %v3782_v63 }
 0x504   :  { %v3719_v15 = vmul.f32 %v3718_v26, %v9619_v1  ;;  %v3794_v19 = vadd.f32 0.001143296, %v3793_v14  ;;  %v3820_v53 = vmul.f32 %v9680_v35, %v9680_v35  ;;  %v3672_v62 = vmul.f32 %v3671_v61, %v9476_v17 }
 0x505   :  { %v3686_v44 = vmul.f32 %v6730_v16, %v3685_v29  ;;  %v3709_v0 = vadd.f32 0.18741608, %v3708_v27  ;;  %v3760_v6 = vadd.f32 0.4994258, %v3759_v43  ;;  %v3784_v8 = vmul.f32 %v3783_v41, %v9670_v33 }
 0x506   :  { %v3720_v20 = vadd.f32 0.4994258, %v3719_v15  ;;  %v3795_v13 = vmul.f32 %v3794_v19, %v9670_v33  ;;  %vm3688_vm11 = vweird.f32 %v9635_v5  ;;  %v3749_v52 = vadd.f32 0.18741608, %v3748_v3 }
 0x507   :  { %v3687_v22 = vadd.f32 %v6730_v16, %v3686_v44  ;;  %vm3690_vm12 = vmor %vm3688_vm11, %vm3689_vm10  ;;  %v3695_v32 = vor.u32 1.1754944e-38, %v3694_v38  ;;  %v3710_v26 = vmul.f32 %v3709_v0, %v9619_v1  ;;  %v3761_v12 = vmul.f32 %v3760_v6, %v9605_v10  ;;  %v9712_v44 = vld [vmem:[#allocation13] ss:$0 sm:$0xff] }
 0x508   :  { %v3721_v58 = vmul.f32 %v3720_v20, %v9619_v1  ;;  %v3785_v63 = vadd.f32 0.0036580483, %v3784_v8  ;;  %vm3693_vm13 = vcmp.eq.f32.partialorder %v3692_v55, 8.507059e+37  ;;  %v9695_v14 = vmin.f32 %v3820_v53, 16.0 }
 0x509   :  { %v3691_v17 = vsel %vm3690_vm12, %v6730_v16, %v3687_v22  ;;  %v9697_v27 = vadd.f32 1.0, %v3761_v12  ;;  %v3796_v5 = vadd.f32 0.014752088, %v3795_v13  ;;  %v3032_v3 = vsub.f32 1.5, %v9656_v4 }
 0x50a   :  { %v9693_v61 = vadd.f32 1.0, %v3721_v58  ;;  %v3696_v29 = vsel %vm3693_vm13, %v3695_v32, %v3691_v17  ;;  %v3750_v1 = vmul.f32 %v3749_v52, %v9605_v10  ;;  %v3711_v38 = vadd.f32 1.1283791, %v3710_v26 }
 0x50b   :  { %v3697_v15 = vmul.f32 %v3696_v29, %v3672_v62  ;;  %v3786_v16 = vmul.f32 %v3785_v63, %v9670_v33  ;;  %v3822_v43 = vmul.f32 2.1237322e-06, %v9695_v14  ;;  %v9706_v41 = vadd.f32 %v9001_v59, %v3263_v60 }
 0x50c   :  { %6731 = vrcp.f32 %v9693_v61  ;;  %v3797_v19 = vmul.f32 %v3796_v5, %v9670_v33  ;;  %v9710_v4 = vmul.f32 %v9585_v46, %v3032_v3  ;;  %v3323_v10 = vmul.f32 0.5, %v9468_v9 }
 0x50d   :  { %6733 = vrcp.f32 %v9697_v27  ;;  %v6488_v55 = vclamps-f32 %v3697_v15, 1.0  ;;  %v3751_v20 = vadd.f32 1.1283791, %v3750_v1  ;;  %v3712_v53 = vmul.f32 %v3711_v38, %v9594_v50 }
 0x50e   :  { %vm3728_vm14 = vweird.f32 %v9693_v61  ;;  %v3787_v62 = vadd.f32 0.05243302, %v3786_v16  ;;  %v3798_v6 = vadd.f32 0.112945676, %v3797_v19  ;;  %v3823_v22 = vadd.f32 0.00028619796, %v3822_v43 }
 0x50f   :  { %v4667_v0 = vadd.f32 1.0, %v6488_v55  ;;  %v3833_v58 = vmul.f32 3.8918573e-05, %v9695_v14  ;;  %v9719_v52 = vmul.f32 0.70710677, %v9706_v41  ;;  %vm3035_vm15 = vweird.f32 %v9585_v46 }
 0x510   :  { %v3732_v50 = vand.u32 2147483647, %v9693_v61  ;;  %v3734_v26 = vand.u32 2147483648, %v9693_v61  ;;  %v3799_v12 = vmul.f32 %v3798_v6, %v9670_v33  ;;  %vm3768_vm0 = vweird.f32 %v9697_v27 }
 0x511   :  { %v4699_v13 = vmul.f32 %v4667_v0, %v3323_v10  ;;  %v3772_v29 = vand.u32 2147483647, %v9697_v27  ;;  %vm3034_vm1 = vweird.f32 %v9537_v34  ;;  %v3774_v3 = vand.u32 2147483648, %v9697_v27 }
 0x512   :  { %v6732_v8 = vpop.eup %6731  ;;  %v3800_v15 = vadd.f32 0.4994258, %v3799_v12  ;;  %v3860_v1 = vmul.f32 %v9719_v52, %v9719_v52  ;;  %v3788_v16 = vmul.f32 %v3787_v62, %v9670_v33  ;;  %v3824_v55 = vmul.f32 %v3823_v22, %v9695_v14  ;;  %vm9762_vm9 = vmor %vm3034_vm1, %vm3035_vm15 }
 0x513   :  { %v6734_v32 = vpop.eup %6733  ;;  %v3724_v9 = vmul.f32 %v6732_v8, %v9693_v61  ;;  %4779 = vmatmul.f32.gmra.mxu2 %v4699_v13  ;;  %v3834_v43 = vadd.f32 0.001143296, %v3833_v58  ;;  %vm3729_vm2 = vweird.f32 %v6732_v8  ;;  %vm3733_vm5 = vcmp.eq.f32.partialorder %v3732_v50, 8.507059e+37 }
 0x514   :  { %v4759_v60 = vpop.f32.mrf.mxu2  ;;  %v3764_v17 = vmul.f32 %v6734_v32, %v9697_v27  ;;  %vm3769_vm3 = vweird.f32 %v6734_v32  ;;  %v3801_v10 = vmul.f32 %v3800_v15, %v9670_v33  ;;  %v9743_v13 = vmin.f32 %v3860_v1, 16.0  ;;  %vm3730_vm6 = vmor %vm3728_vm14, %vm3729_vm2 }
 0x515   :  { %v9727_v63 = vadd.f32 %v9712_v44, %v4759_v60  ;;  %v3725_v5 = vsub.f32 1.0, %v3724_v9  ;;  %v3835_v60 = vmul.f32 %v3834_v43, %v9695_v14  ;;  %v3735_v12 = vor.u32 1.1754944e-38, %v3734_v26  ;;  %vm3770_vm8 = vmor %vm3768_vm0, %vm3769_vm3 }
 0x516   :  { %v3765_v38 = vsub.f32 1.0, %v3764_v17  ;;  %v9745_v62 = vadd.f32 1.0, %v3801_v10  ;;  %vm3773_vm7 = vcmp.eq.f32.partialorder %v3772_v29, 8.507059e+37  ;;  %v3825_v58 = vadd.f32 0.0036580483, %v3824_v55 }
 0x517   :  { %v3726_v19 = vmul.f32 %v6732_v8, %v3725_v5  ;;  %v9740_v0 = vmul.f32 0.70710677, %v9727_v63  ;;  %v3836_v17 = vadd.f32 0.014752088, %v3835_v60  ;;  %v3775_v15 = vor.u32 1.1754944e-38, %v3774_v3  ;;  %v6278_v3 = vld [vmem:[#allocation14 + $0x78] sm:$0xff] }
 0x518   :  { %v3766_v6 = vmul.f32 %v6734_v32, %v3765_v38  ;;  %v3789_v1 = vadd.f32 0.18741608, %v3788_v16  ;;  %6735 = vrcp.f32 %v9745_v62  ;;  %v3862_v61 = vmul.f32 2.1237322e-06, %v9743_v13  ;;  %6281 = vmatpush.msra.mxu3 %v6278_v3 }
 0x519   :  { %v3727_v9 = vadd.f32 %v6732_v8, %v3726_v19  ;;  %v4919_v50 = vmul.f32 %v9740_v0, %v9740_v0  ;;  %v3752_v29 = vmul.f32 %v3751_v20, %v9565_v31  ;;  %v3826_v16 = vmul.f32 %v3825_v58, %v9695_v14 }
 0x51a   :  { %v3767_v22 = vadd.f32 %v6734_v32, %v3766_v6  ;;  %v3037_v31 = vsel %vm9762_vm9, %v9585_v46, %v9710_v4  ;;  %v3790_v19 = vmul.f32 %v3789_v1, %v9670_v33  ;;  %v3863_v6 = vadd.f32 0.00028619796, %v3862_v61 }
 0x51b   :  { %v3731_v5 = vsel %vm3730_vm6, %v6732_v8, %v3727_v9  ;;  %v3873_v8 = vmul.f32 3.8918573e-05, %v9743_v13  ;;  %v9773_v34 = vmin.f32 %v4919_v50, 16.0  ;;  %v3827_v46 = vadd.f32 0.05243302, %v3826_v16 }
 0x51c   :  { %v3736_v26 = vsel %vm3733_vm5, %v3735_v12, %v3731_v5  ;;  %v3771_v38 = vsel %vm3770_vm8, %v6734_v32, %v3767_v22  ;;  %v3837_v32 = vmul.f32 %v3836_v17, %v9695_v14  ;;  %v3324_v12 = vmul.f32 0.5, %v9576_v36 }
 0x51d   :  { %v3737_v43 = vmul.f32 %v3736_v26, %v3712_v53  ;;  %v3776_v55 = vsel %vm3773_vm7, %v3775_v15, %v3771_v38  ;;  %v3874_v58 = vadd.f32 0.001143296, %v3873_v8  ;;  %v3325_v17 = vmul.f32 0.5, %v9544_v40  ;;  %v6276_v8 = vld [vmem:[#allocation14 + $0x68] sm:$0xff] }
 0x51e   :  { %v3777_v53 = vmul.f32 %v3776_v55, %v3752_v29  ;;  %v3838_v10 = vadd.f32 0.112945676, %v3837_v32  ;;  %v6736_v60 = vpop.eup %6735  ;;  %v3231_v4 = vmul.f32 %v3037_v31, %v9162_v30  ;;  %v3791_v33 = vadd.f32 1.1283791, %v3790_v19  ;;  %v6277_v55 = vld [vmem:[#allocation14 + $0x70] sm:$0xff] }
 0x51f   :  { %v6489_v20 = vclamps-f32 %v3737_v43, 1.0  ;;  %v3804_v5 = vmul.f32 %v6736_v60, %v9745_v62  ;;  %v4921_v50 = vmul.f32 2.1237322e-06, %v9773_v34  ;;  %v3814_v61 = vand.u32 2147483648, %v9745_v62  ;;  %6282 = vmatpush.msra.mxu3 %v6277_v55  ;;  %v6273_v55 = vld [vmem:[#allocation14 + $0x50] sm:$0xff] }
 0x520   :  { %v6490_v26 = vclamps-f32 %v3777_v53, 1.0  ;;  %v3839_v1 = vmul.f32 %v3838_v10, %v9695_v14  ;;  %v3864_v36 = vmul.f32 %v3863_v6, %v9743_v13  ;;  %v3875_v29 = vmul.f32 %v3874_v58, %v9743_v13  ;;  %v6275_v10 = vld [vmem:[#allocation14 + $0x60] sm:$0xff] }
 0x521   :  { %v4668_v22 = vadd.f32 1.0, %v6489_v20  ;;  %v3805_v38 = vsub.f32 1.0, %v3804_v5  ;;  %v4932_v30 = vmul.f32 3.8918573e-05, %v9773_v34  ;;  %vm3809_vm10 = vweird.f32 %v6736_v60  ;;  %6283 = vmatpush.msra.mxu3 %v6276_v8  ;;  %v6272_v8 = vld [vmem:[#allocation14 + $0x48] sm:$0xff] }
 0x522   :  { %v3840_v40 = vadd.f32 0.4994258, %v3839_v1  ;;  %v3812_v3 = vand.u32 2147483647, %v9745_v62  ;;  %v3828_v16 = vmul.f32 %v3827_v46, %v9695_v14  ;;  %v4669_v32 = vadd.f32 1.0, %v6490_v26 }
 0x523   :  { %v4762_v9 = vpop.f32.mrf.mxu2  ;;  %v4700_v15 = vmul.f32 %v4668_v22, %v3324_v12  ;;  %v3806_v27 = vmul.f32 %v6736_v60, %v3805_v38  ;;  %v3792_v31 = vmul.f32 %v3791_v33, %v9653_v24  ;;  %v3876_v53 = vadd.f32 0.014752088, %v3875_v29  ;;  %6284 = vmatpush.msra.mxu3 %v6275_v10 }
 0x524   :  { %v9784_v43 = vadd.f32 %v9712_v44, %v4762_v9  ;;  %v3841_v20 = vmul.f32 %v3840_v40, %v9695_v14  ;;  %v4922_v19 = vadd.f32 0.00028619796, %v4921_v50  ;;  %vm3808_vm11 = vweird.f32 %v9745_v62 }
 0x525   :  { %4782 = vmatmul.f32.gmra.mxu2 %v4700_v15  ;;  %v3807_v6 = vadd.f32 %v6736_v60, %v3806_v27  ;;  %v4933_v9 = vadd.f32 0.001143296, %v4932_v30  ;;  %vm3810_vm12 = vmor %vm3808_vm11, %vm3809_vm10  ;;  %v3815_v58 = vor.u32 1.1754944e-38, %v3814_v61  ;;  %v3865_v24 = vadd.f32 0.0036580483, %v3864_v36  ;;  %v6274_v15 = vld [vmem:[#allocation14 + $0x58] sm:$0xff] }
 0x526   :  { %v9794_v12 = vmul.f32 0.70710677, %v9784_v43  ;;  %v9797_v5 = vadd.f32 1.0, %v3841_v20  ;;  %vm3813_vm13 = vcmp.eq.f32.partialorder %v3812_v3, 8.507059e+37  ;;  %v3829_v33 = vadd.f32 0.18741608, %v3828_v16  ;;  %6285 = vmatpush.msra.mxu3 %v6274_v15 }
 0x527   :  { %v3811_v26 = vsel %vm3810_vm12, %v6736_v60, %v3807_v6  ;;  %v4701_v62 = vmul.f32 %v4669_v32, %v3325_v17  ;;  %v3877_v50 = vmul.f32 %v3876_v53, %v9743_v13  ;;  %v4923_v38 = vmul.f32 %v4922_v19, %v9773_v34 }
 0x528   :  { %v3816_v1 = vsel %vm3813_vm13, %v3815_v58, %v3811_v26  ;;  %6737 = vrcp.f32 %v9797_v5  ;;  %v4934_v40 = vmul.f32 %v4933_v9, %v9773_v34  ;;  %v3264_v36 = vmul.f32 %v8987_v18, %v3231_v4  ;;  %6286 = vmatpush.msra.mxu3 %v6273_v55  ;;  %v6271_v4 = vld [vmem:[#allocation14 + $0x40] sm:$0xff] }
 0x529   :  { %v3817_v61 = vmul.f32 %v3816_v1, %v3792_v31  ;;  %v4959_v29 = vmul.f32 %v9794_v12, %v9794_v12  ;;  %v3866_v60 = vmul.f32 %v3865_v24, %v9743_v13  ;;  %v3830_v27 = vmul.f32 %v3829_v33, %v9695_v14 }
 0x52a   :  { %v3878_v3 = vadd.f32 0.112945676, %v3877_v50  ;;  %v4924_v16 = vadd.f32 0.0036580483, %v4923_v38  ;;  %v4935_v31 = vadd.f32 0.014752088, %v4934_v40  ;;  %v9815_v20 = vadd.f32 %v9001_v59, %v3264_v36  ;;  %6287 = vmatpush.msra.mxu3 %v6272_v8 }
 0x52b   :  { %v4765_v22 = vpop.f32.mrf.mxu2  ;;  %v6491_v30 = vclamps-f32 %v3817_v61, 1.0  ;;  %v9817_v19 = vmin.f32 %v4959_v29, 16.0  ;;  %v3326_v10 = vmul.f32 0.5, %v9638_v57  ;;  %v3867_v6 = vadd.f32 0.05243302, %v3866_v60 }
 0x52c   :  { %v9800_v46 = vadd.f32 %v9712_v44, %v4765_v22  ;;  %v3879_v9 = vmul.f32 %v3878_v3, %v9743_v13  ;;  %v6270_v22 = vld [vmem:[#allocation14 + $0x38] sm:$0xff]  ;;  %6288 = vmatpush.msra.mxu3 %v6271_v4  ;;  %v4925_v33 = vmul.f32 %v4924_v16, %v9773_v34  ;;  %v4936_v1 = vmul.f32 %v4935_v31, %v9773_v34 }
 0x52d   :  { %4785 = vmatmul.f32.gmra.mxu2 %v4701_v62  ;;  %v4670_v32 = vadd.f32 1.0, %v6491_v30  ;;  %v3831_v62 = vadd.f32 1.1283791, %v3830_v27  ;;  %v9827_v57 = vmul.f32 0.70710677, %v9815_v20  ;;  %v3868_v61 = vmul.f32 %v3867_v6, %v9743_v13 }
 0x52e   :  { %v9811_v17 = vmul.f32 0.70710677, %v9800_v46  ;;  %v6738_v53 = vpop.eup %6737  ;;  %v3880_v26 = vadd.f32 0.4994258, %v3879_v9  ;;  %v4961_v50 = vmul.f32 2.1237322e-06, %v9817_v19  ;;  %6289 = vmatpush.msra.mxu3 %v6270_v22  ;;  %vm3848_vm15 = vweird.f32 %v9797_v5 }
 0x52f   :  { %v4702_v24 = vmul.f32 %v4670_v32, %v3326_v10  ;;  %v3844_v15 = vmul.f32 %v6738_v53, %v9797_v5  ;;  %v3854_v60 = vand.u32 2147483648, %v9797_v5  ;;  %v4937_v30 = vadd.f32 0.112945676, %v4936_v1  ;;  %v6269_v10 = vld [vmem:[#allocation14 + $0x30] sm:$0xff] }
 0x530   :  { %v4999_v14 = vmul.f32 %v9811_v17, %v9811_v17  ;;  %v3881_v40 = vmul.f32 %v3880_v26, %v9743_v13  ;;  %vm3849_vm14 = vweird.f32 %v6738_v53  ;;  %v3852_v8 = vand.u32 2147483647, %v9797_v5  ;;  %6290 = vmatpush.msra.mxu3 %v6269_v10 }
 0x531   :  { %v3845_v38 = vsub.f32 1.0, %v3844_v15  ;;  %v4926_v3 = vadd.f32 0.05243302, %v4925_v33  ;;  %v4938_v16 = vmul.f32 %v4937_v30, %v9773_v34  ;;  %v3900_v32 = vmul.f32 %v9827_v57, %v9827_v57  ;;  %vm3850_vm0 = vmor %vm3848_vm15, %vm3849_vm14  ;;  %v6267_v15 = vld [vmem:[#allocation14 + $0x20] sm:$0xff]  ;;  %v6266_v30 = vld [vmem:[#allocation14 + $0x18] sm:$0xff] }
 0x532   :  { %v9832_v36 = vmin.f32 %v4999_v14, 16.0  ;;  %v9839_v27 = vadd.f32 1.0, %v3881_v40  ;;  %v4962_v4 = vadd.f32 0.00028619796, %v4961_v50  ;;  %v3832_v14 = vmul.f32 %v3831_v62, %v9680_v35 }
 0x533   :  { %v4768_v58 = vpop.f32.mrf.mxu2  ;;  %v3846_v55 = vmul.f32 %v6738_v53, %v3845_v38  ;;  %v3855_v22 = vor.u32 1.1754944e-38, %v3854_v60  ;;  %vm3853_vm1 = vcmp.eq.f32.partialorder %v3852_v8, 8.507059e+37  ;;  %v3869_v26 = vadd.f32 0.18741608, %v3868_v61  ;;  %v9861_v8 = vpop.f32.mrf.mxu1 }
 0x534   :  { %v9835_v29 = vadd.f32 %v9712_v44, %v4768_v58  ;;  %6739 = vrcp.f32 %v9839_v27  ;;  %v5001_v6 = vmul.f32 2.1237322e-06, %v9832_v36  ;;  %v6268_v58 = vld [vmem:[#allocation14 + $0x28] sm:$0xff]  ;;  %v4939_v33 = vadd.f32 0.4994258, %v4938_v16 }
 0x535   :  { %4788 = vmatmul.f32.gmra.mxu2 %v4702_v24  ;;  %v3847_v31 = vadd.f32 %v6738_v53, %v3846_v55  ;;  %6291 = vmatpush.msra.mxu3 %v6268_v58  ;;  %v9851_v1 = vmin.f32 %v3900_v32, 16.0  ;;  %v4927_v50 = vmul.f32 %v4926_v3, %v9773_v34  ;;  %v4963_v62 = vmul.f32 %v4962_v4, %v9817_v19 }
 0x536   :  { %v9848_v9 = vmul.f32 0.70710677, %v9835_v29  ;;  %v4940_v35 = vmul.f32 %v4939_v33, %v9773_v34  ;;  %v5002_v60 = vadd.f32 0.00028619796, %v5001_v6  ;;  %v3870_v3 = vmul.f32 %v3869_v26, %v9743_v13 }
 0x537   :  { %v3851_v24 = vsel %vm3850_vm0, %v6738_v53, %v3847_v31  ;;  %6292 = vmatpush.msra.mxu3 %v6267_v15  ;;  %v3327_v4 = vmul.f32 0.5, %v9666_v21  ;;  %v3902_v6 = vmul.f32 2.1237322e-06, %v9851_v1  ;;  %v3913_v58 = vmul.f32 3.8918573e-05, %v9851_v1 }
 0x538   :  { %v3856_v5 = vsel %vm3853_vm1, %v3855_v22, %v3851_v24  ;;  %v5039_v53 = vmul.f32 %v9848_v9, %v9848_v9  ;;  %v9864_v32 = vadd.f32 1.0, %v4940_v35  ;;  %v4964_v24 = vadd.f32 0.0036580483, %v4963_v62 }
 0x539   :  { %v3857_v40 = vmul.f32 %v3856_v5, %v3832_v14  ;;  %6293 = vmatpush.msra.mxu3 %v6266_v30  ;;  %v4928_v14 = vadd.f32 0.18741608, %v4927_v50  ;;  %v5003_v13 = vmul.f32 %v5002_v60, %v9832_v36  ;;  %v3871_v5 = vadd.f32 1.1283791, %v3870_v3  ;;  %v6265_v3 = vld [vmem:[#allocation14 + $0x10] sm:$0xff] }
 0x53a   :  { %v6740_v55 = vpop.eup %6739  ;;  %6741 = vrcp.f32 %v9864_v32  ;;  %v9875_v15 = vmin.f32 %v5039_v53, 16.0  ;;  %v3892_v21 = vand.u32 2147483647, %v9839_v27  ;;  %v3903_v30 = vadd.f32 0.00028619796, %v3902_v6 }
 0x53b   :  { %v6492_v16 = vclamps-f32 %v3857_v40, 1.0  ;;  %v3884_v10 = vmul.f32 %v6740_v55, %v9839_v27  ;;  %vm3889_vm2 = vweird.f32 %v6740_v55  ;;  %v4929_v35 = vmul.f32 %v4928_v14, %v9773_v34  ;;  %6294 = vmatpush.msra.mxu3 %v6265_v3 }
 0x53c   :  { %v3914_v62 = vadd.f32 0.001143296, %v3913_v58  ;;  %v5004_v60 = vadd.f32 0.0036580483, %v5003_v13  ;;  %v5041_v53 = vmul.f32 2.1237322e-06, %v9875_v15  ;;  %vm3888_vm3 = vweird.f32 %v9839_v27 }
 0x53d   :  { %v4671_v22 = vadd.f32 1.0, %v6492_v16  ;;  %v3885_v26 = vsub.f32 1.0, %v3884_v10  ;;  %v3872_v51 = vmul.f32 %v3871_v5, %v9719_v52  ;;  %vm3890_vm5 = vmor %vm3888_vm3, %vm3889_vm2  ;;  %vm3893_vm6 = vcmp.eq.f32.partialorder %v3892_v21, 8.507059e+37  ;;  %v6263_v58 = vld [vmem:[#allocation14] sm:$0xff] }
 0x53e   :  { %v4771_v38 = vpop.f32.mrf.mxu2  ;;  %v3915_v52 = vmul.f32 %v3914_v62, %v9851_v1  ;;  %v5005_v5 = vmul.f32 %v5004_v60, %v9832_v36  ;;  %v5042_v21 = vadd.f32 0.00028619796, %v5041_v53  ;;  %v4953_v25 = vand.u32 2147483648, %v9864_v32 }
 0x53f   :  { %v9859_v61 = vadd.f32 %v9712_v44, %v4771_v38  ;;  %v4703_v33 = vmul.f32 %v4671_v22, %v3327_v4  ;;  %v3894_v38 = vand.u32 2147483648, %v9839_v27  ;;  %v3886_v40 = vmul.f32 %v6740_v55, %v3885_v26  ;;  %v6264_v4 = vld [vmem:[#allocation14 + $0x8] sm:$0xff]  ;;  %v9890_v27 = vpop.f32.mrf.mxu1 }
 0x540   :  { %v6742_v10 = vpop.eup %6741  ;;  %v4965_v22 = vmul.f32 %v4964_v24, %v9817_v19  ;;  %v3904_v26 = vmul.f32 %v3903_v30, %v9851_v1  ;;  %6295 = vmatpush.msra.mxu3 %v6264_v4  ;;  %v3916_v53 = vadd.f32 0.014752088, %v3915_v52  ;;  %vm4947_vm8 = vweird.f32 %v9864_v32 }
 0x541   :  { %v9867_v31 = vmul.f32 0.70710677, %v9859_v61  ;;  %4791 = vmatmul.f32.gmra.mxu2 %v4703_v33  ;;  %v3887_v16 = vadd.f32 %v6740_v55, %v3886_v40  ;;  %v3895_v6 = vor.u32 1.1754944e-38, %v3894_v38  ;;  %v4943_v13 = vmul.f32 %v6742_v10, %v9864_v32 }
 0x542   :  { %v3328_v40 = vmul.f32 0.5, %v9706_v41  ;;  %6296 = vmatpush.msra.mxu3 %v6263_v58  ;;  %v3905_v62 = vadd.f32 0.0036580483, %v3904_v26  ;;  %vm4948_vm7 = vweird.f32 %v6742_v10  ;;  %v4954_v26 = vor.u32 1.1754944e-38, %v4953_v25 }
 0x543   :  { %v5079_v50 = vmul.f32 %v9867_v31, %v9867_v31  ;;  %v3891_v14 = vsel %vm3890_vm5, %v6740_v55, %v3887_v16  ;;  %v4966_v16 = vadd.f32 0.05243302, %v4965_v22  ;;  %v4944_v30 = vsub.f32 1.0, %v4943_v13  ;;  %vm4949_vm9 = vmor %vm4947_vm8, %vm4948_vm7 }
 0x544   :  { %v3896_v24 = vsel %vm3893_vm6, %v3895_v6, %v3891_v14  ;;  %v2799_v3 = vpop.xlane.xlu2 %2798  ;;  %v5006_v14 = vadd.f32 0.05243302, %v5005_v5  ;;  %v4951_v22 = vand.u32 2147483647, %v9864_v32  ;;  %v3906_v52 = vmul.f32 %v3905_v62, %v9851_v1 }
 0x545   :  { %v9886_v34 = vmin.f32 %v5079_v50, 16.0  ;;  %v3897_v55 = vmul.f32 %v3896_v24, %v3872_v51  ;;  %v4930_v50 = vadd.f32 1.1283791, %v4929_v35  ;;  %v4945_v60 = vmul.f32 %v6742_v10, %v4944_v30 }
 0x546   :  { %v5043_v51 = vmul.f32 %v5042_v21, %v9875_v15  ;;  %v4972_v5 = vmul.f32 3.8918573e-05, %v9817_v19  ;;  %vm4952_vm10 = vcmp.eq.f32.partialorder %v4951_v22, 8.507059e+37  ;;  %v4967_v25 = vmul.f32 %v4966_v16, %v9817_v19 }
 0x547   :  { %v5081_v41 = vmul.f32 2.1237322e-06, %v9886_v34  ;;  %v6493_v6 = vclamps-f32 %v3897_v55, 1.0  ;;  %v4946_v13 = vadd.f32 %v6742_v10, %v4945_v60  ;;  %v4931_v39 = vmul.f32 %v4930_v50, %v9740_v0  ;;  %v2567_v60 = vpop.f32.mrf.mxu1 }
 0x548   :  { %v5007_v62 = vmul.f32 %v5006_v14, %v9832_v36  ;;  %v4855_v16 = vmul.f32 0.5, %v9727_v63 }
 0x549   :  { %v4774_v33 = vpop.f32.mrf.mxu2  ;;  %v4672_v58 = vadd.f32 1.0, %v6493_v6  ;;  %v5082_v21 = vadd.f32 0.00028619796, %v5081_v41  ;;  %v4950_v30 = vsel %vm4949_vm9, %v6742_v10, %v4946_v13  ;;  %v5044_v6 = vadd.f32 0.0036580483, %v5043_v51 }
 0x54a   :  { %v9896_v38 = vadd.f32 %v9712_v44, %v4774_v33  ;;  %v3917_v33 = vmul.f32 %v3916_v53, %v9851_v1  ;;  %v4955_v53 = vsel %vm4952_vm10, %v4954_v26, %v4950_v30  ;;  %v4973_v41 = vadd.f32 0.001143296, %v4972_v5 }
 0x54b   :  { %v4704_v55 = vmul.f32 %v4672_v58, %v3328_v40  ;;  %v4956_v54 = vmul.f32 %v4955_v53, %v4931_v39  ;;  %v5083_v10 = vmul.f32 %v5082_v21, %v9886_v34  ;;  %v3907_v40 = vadd.f32 0.05243302, %v3906_v52 }
 0x54c   :  { %v9901_v4 = vmul.f32 0.70710677, %v9896_v38  ;;  %v3918_v47 = vadd.f32 0.112945676, %v3917_v33  ;;  %v2616_v0 = vpop.xlane.xlu2 %2615  ;;  %v2803_v50 = vpop.xlane.xlu0 %2802  ;;  %v9921_v51 = vadd.f32 %v9861_v8, %v8458_v49  ;;  %v5045_v22 = vmul.f32 %v5044_v6, %v9875_v15 }
 0x54d   :  { %4794 = vmatmul.f32.gmra.mxu2 %v4704_v55  ;;  %v2848_v13 = vmul.f32 0.015625, %v2799_v3  ;;  %v2658_v26 = vmul.f32 0.015625, %v2616_v0  ;;  %v4968_v5 = vadd.f32 0.18741608, %v4967_v25  ;;  %v5008_v52 = vadd.f32 0.18741608, %v5007_v62 }
 0x54e   :  { %v5119_v35 = vmul.f32 %v9901_v4, %v9901_v4  ;;  %v4974_v55 = vmul.f32 %v4973_v41, %v9817_v19  ;;  %v5084_v30 = vadd.f32 0.0036580483, %v5083_v10  ;;  %v3908_v6 = vmul.f32 %v3907_v40, %v9851_v1 }
 0x54f   :  { %v2690_v53 = vsub.f32 %v9420_v56, %v2658_v26  ;;  %v9944_v41 = vadd.f32 %v9890_v27, %v8458_v49  ;;  %v9947_v10 = vadd.f32 %v2567_v60, %v8458_v49  ;;  %v2850_v40 = vmul.f32 0.015625, %v2803_v50 }
 0x550   :  { %v9909_v24 = vmin.f32 %v5119_v35, 16.0  ;;  %v3919_v35 = vmul.f32 %v3918_v47, %v9851_v1  ;;  %v6513_v47 = vclamps-f32 %v4956_v54, 1.0  ;;  %v5046_v54 = vadd.f32 0.05243302, %v5045_v22 }
 0x551   :  { %v4975_v56 = vadd.f32 0.014752088, %v4974_v55  ;;  %v4969_v0 = vmul.f32 %v4968_v5, %v9817_v19  ;;  %v5009_v22 = vmul.f32 %v5008_v52, %v9832_v36  ;;  %v9957_v60 = vsel %vm2703_vm4, %v2690_v53, 0.0 }
 0x552   :  { %v5121_v32 = vmul.f32 2.1237322e-06, %v9909_v24  ;;  %v3920_v58 = vadd.f32 0.4994258, %v3919_v35  ;;  %v6199_v21 = vadd.f32 1.0, %v6513_v47  ;;  %12257 = vst [vmem:[#allocation30_spill] sm:$0xff] %v9957_v60  ;;  %v5047_v50 = vmul.f32 %v5046_v54, %v9875_v15 }
 0x553   :  { %v3909_v47 = vadd.f32 0.18741608, %v3908_v6  ;;  %v9965_v52 = vadd.f32 1e-05, %v2850_v40  ;;  %v4976_v55 = vmul.f32 %v4975_v56, %v9817_v19  ;;  %v4970_v6 = vadd.f32 1.1283791, %v4969_v0 }
 0x554   :  { %v5122_v33 = vadd.f32 0.00028619796, %v5121_v32  ;;  %v3921_v39 = vmul.f32 %v3920_v58, %v9851_v1  ;;  %v9933_v32 = vadd.f32 1e-05, %v2848_v13  ;;  %v6231_v63 = vmul.f32 %v6199_v21, %v4855_v16  ;;  %v2801_v62 = vpop.xlane.xlu1 %2800  ;;  %v2570_v58 = vpop.f32.mrf.mxu1 }
 0x555   :  { %v5085_v13 = vmul.f32 %v5084_v30, %v9886_v34  ;;  %v2849_v16 = vmul.f32 0.015625, %v2801_v62  ;;  %v9963_v5 = vadd.f32 %v2570_v58, %v8458_v49  ;;  %v9969_v53 = vmul.f32 0.5, %v9815_v20 }
 0x556   :  { %v9931_v3 = vadd.f32 1.0, %v3921_v39  ;;  %v5123_v35 = vmul.f32 %v5122_v33, %v9909_v24  ;;  %6297 = vmatmul.f32.vlgmr.msra.gmra.mxu3 %v6231_v63  ;;  %v2620_v33 = vpop.xlane.xlu0 %2619  ;;  %v2759_v39 = vmul.f32 %v9957_v60, %v9957_v60  ;;  %v3910_v54 = vmul.f32 %v3909_v47, %v9851_v1 }
 0x557   :  { %v4777_v14 = vpop.f32.mrf.mxu2  ;;  %v2660_v21 = vmul.f32 0.015625, %v2620_v33  ;;  %v5086_v63 = vadd.f32 0.05243302, %v5085_v13  ;;  %v9975_v49 = vadd.f32 1e-05, %v2849_v16  ;;  %vm3044_vm15 = vweird.f32 %v9933_v32 }
 0x558   :  { %v9928_v8 = vadd.f32 %v9712_v44, %v4777_v14  ;;  %6743 = vrcp.f32 %v9931_v3  ;;  %v5012_v44 = vmul.f32 3.8918573e-05, %v9832_v36  ;;  %v5124_v14 = vadd.f32 0.0036580483, %v5123_v35  ;;  %2812 = vadd.xlane.f32.xlu1 %v2759_v39 }
 0x559   :  { %6745 = vrsqrt.f32 %v9933_v32  ;;  %v5010_v40 = vadd.f32 1.1283791, %v5009_v22  ;;  %v5048_v58 = vadd.f32 0.18741608, %v5047_v50  ;;  %v2692_v1 = vsub.f32 %v9453_v28, %v2660_v21 }
 0x55a   :  { %12256 = vst [vmem:[#allocation29_spill] sm:$0xff] %v9928_v8  ;;  %v9938_v25 = vmul.f32 0.70710677, %v9928_v8  ;;  %v5013_v26 = vadd.f32 0.001143296, %v5012_v44  ;;  %v5125_v56 = vmul.f32 %v5124_v14, %v9909_v24  ;;  %6747 = vrsqrt.f32 %v9965_v52 }
 0x55b   :  { %v4977_v44 = vadd.f32 0.112945676, %v4976_v55  ;;  %v5087_v33 = vmul.f32 %v5086_v63, %v9886_v34  ;;  %v3932_v16 = vand.u32 2147483647, %v9931_v3  ;;  %v3934_v22 = vand.u32 2147483648, %v9931_v3 }
 0x55c   :  { %v5159_v27 = vmul.f32 %v9938_v25, %v9938_v25  ;;  %v5014_v0 = vmul.f32 %v5013_v26, %v9832_v36  ;;  %6749 = vrsqrt.f32 %v9975_v49  ;;  %vm3928_vm12 = vweird.f32 %v9931_v3 }
 0x55d   :  { %v4978_v47 = vmul.f32 %v4977_v44, %v9817_v19  ;;  %v5126_v21 = vadd.f32 0.05243302, %v5125_v56  ;;  %v9994_v63 = vsel %vm2703_vm4, %v2692_v1, 0.0  ;;  %vm3933_vm14 = vcmp.eq.f32.partialorder %v3932_v16, 8.507059e+37 }
 0x55e   :  { %v6744_v30 = vpop.eup %6743  ;;  %v9972_v35 = vmin.f32 %v5159_v27, 16.0  ;;  %v3911_v27 = vadd.f32 1.1283791, %v3910_v54  ;;  %v5015_v26 = vadd.f32 0.014752088, %v5014_v0  ;;  %v2761_v1 = vmul.f32 %v9994_v63, %v9994_v63 }
 0x55f   :  { %v3924_v62 = vmul.f32 %v6744_v30, %v9931_v3  ;;  %v9979_v13 = vpop.eup %6745  ;;  %vm3929_vm11 = vweird.f32 %v6744_v30  ;;  %v4979_v28 = vadd.f32 0.4994258, %v4978_v47  ;;  %v5052_v54 = vmul.f32 3.8918573e-05, %v9875_v15  ;;  %v2618_v47 = vpop.xlane.xlu1 %2617 }
 0x560   :  { %v5161_v50 = vmul.f32 2.1237322e-06, %v9972_v35  ;;  %v3039_v39 = vmul.f32 %v9979_v13, %v9933_v32  ;;  %v3912_v44 = vmul.f32 %v3911_v27, %v9827_v57  ;;  %vm3930_vm13 = vmor %vm3928_vm12, %vm3929_vm11  ;;  %2629 = vadd.xlane.f32.xlu1 %v9921_v51  ;;  %v10001_v3 = vpop.eup %6747  ;;  %v5016_v57 = vmul.f32 %v5015_v26, %v9832_v36  ;;  %2816 = vadd.xlane.f32.xlu2 %v2761_v1  ;;  %v10025_v1 = vpop.xlane.xlu0 %2808 }
 0x561   :  { %v3925_v20 = vsub.f32 1.0, %v3924_v62  ;;  %v5049_v62 = vmul.f32 %v5048_v58, %v9875_v15  ;;  %v4980_v60 = vmul.f32 %v4979_v28, %v9817_v19  ;;  %v5127_v19 = vmul.f32 %v5126_v21, %v9909_v24 }
 0x562   :  { %v5162_v56 = vadd.f32 0.00028619796, %v5161_v50  ;;  %v10008_v27 = vpop.eup %6749  ;;  %v2805_v50 = vpop.xlane.xlu2 %2804  ;;  %v10013_v16 = vmul.f32 %v4970_v6, %v9794_v12  ;;  %v10019_v26 = vmul.f32 %v5010_v40, %v9811_v17  ;;  %v5017_v6 = vadd.f32 0.112945676, %v5016_v57 }
 0x563   :  { %v3926_v14 = vmul.f32 %v6744_v30, %v3925_v20  ;;  %v3935_v20 = vor.u32 1.1754944e-38, %v3934_v22  ;;  %v10005_v58 = vadd.f32 1.0, %v4980_v60  ;;  %v3040_v22 = vmul.f32 %v9979_v13, %v3039_v39 }
 0x564   :  { %v2659_v60 = vmul.f32 0.015625, %v2618_v47  ;;  %v5163_v21 = vmul.f32 %v5162_v56, %v9972_v35  ;;  %v2851_v12 = vmul.f32 0.015625, %v2805_v50  ;;  %v5092_v56 = vmul.f32 3.8918573e-05, %v9886_v34 }
 0x565   :  { %v3927_v55 = vadd.f32 %v6744_v30, %v3926_v14  ;;  %v5088_v14 = vadd.f32 0.18741608, %v5087_v33  ;;  %v3059_v33 = vmul.f32 %v10001_v3, %v9965_v52  ;;  %6751 = vrcp.f32 %v10005_v58 }
 0x566   :  { %v2691_v40 = vsub.f32 %v9488_v2, %v2659_v60  ;;  %v10041_v2 = vadd.f32 1e-05, %v2851_v12  ;;  %vm3045_vm1 = vweird.f32 %v9979_v13  ;;  %vm4987_vm2 = vweird.f32 %v10005_v58 }
 0x567   :  { %v3931_v0 = vsel %vm3930_vm13, %v6744_v30, %v3927_v55  ;;  %v5053_v30 = vadd.f32 0.001143296, %v5052_v54  ;;  %v5050_v55 = vadd.f32 1.1283791, %v5049_v62  ;;  %v3049_v54 = vmul.f32 %v10008_v27, %v9975_v49  ;;  %vm10078_vm5 = vmor %vm3044_vm15, %vm3045_vm1 }
 0x568   :  { %v3936_v8 = vsel %vm3933_vm14, %v3935_v20, %v3931_v0  ;;  %v3041_v20 = vmul.f32 0.5, %v3040_v22  ;;  %v3060_v17 = vmul.f32 %v10001_v3, %v3059_v33  ;;  %v5018_v62 = vmul.f32 %v5017_v6, %v9832_v36  ;;  %2633 = vadd.xlane.f32.xlu2 %v9947_v10 }
 0x569   :  { %v3937_v28 = vmul.f32 %v3936_v8, %v3912_v44  ;;  %v5089_v8 = vmul.f32 %v5088_v14, %v9886_v34  ;;  %v5128_v44 = vadd.f32 0.18741608, %v5127_v19  ;;  %v5054_v47 = vmul.f32 %v5053_v30, %v9875_v15 }
 0x56a   :  { %v10033_v14 = vmul.f32 %v5050_v55, %v9848_v9  ;;  %v10037_v19 = vmul.f32 0.5, %v9784_v43  ;;  %v3050_v30 = vmul.f32 %v10008_v27, %v3049_v54  ;;  %v10044_v33 = vmul.f32 0.5, %v9800_v46 }
 0x56b   :  { %v6494_v39 = vclamps-f32 %v3937_v28, 1.0  ;;  %v5164_v28 = vadd.f32 0.0036580483, %v5163_v21  ;;  %v6752_v22 = vpop.eup %6751  ;;  %v5090_v50 = vadd.f32 1.1283791, %v5089_v8  ;;  %v3042_v60 = vsub.f32 1.5, %v3041_v20  ;;  %v10057_v20 = vpop.xlane.xlu1 %2806 }
 0x56c   :  { %v4983_v9 = vmul.f32 %v6752_v22, %v10005_v58  ;;  %v5019_v55 = vadd.f32 0.4994258, %v5018_v62  ;;  %v5055_v43 = vadd.f32 0.014752088, %v5054_v47  ;;  %v3061_v21 = vmul.f32 0.5, %v3060_v17 }
 0x56d   :  { %v4673_v0 = vadd.f32 1.0, %v6494_v39  ;;  %v10051_v39 = vsel %vm2703_vm4, %v2691_v40, 0.0  ;;  %v5093_v8 = vadd.f32 0.001143296, %v5092_v56  ;;  %v5165_v54 = vmul.f32 %v5164_v28, %v9972_v35 }
 0x56e   :  { %v4984_v46 = vsub.f32 1.0, %v4983_v9  ;;  %v5020_v12 = vmul.f32 %v5019_v55, %v9832_v36  ;;  %v2760_v6 = vmul.f32 %v10051_v39, %v10051_v39  ;;  %v3051_v47 = vmul.f32 0.5, %v3050_v30  ;;  %v2626_v55 = vpop.xlane.xlu0 %2625 }
 0x56f   :  { %v4705_v57 = vmul.f32 %v4673_v0, %v9969_v53  ;;  %v5129_v53 = vmul.f32 %v5128_v44, %v9909_v24  ;;  %v2622_v0 = vpop.xlane.xlu2 %2621  ;;  %v4991_v44 = vand.u32 2147483647, %v10005_v58  ;;  %v4993_v17 = vand.u32 2147483648, %v10005_v58 }
 0x570   :  { %6753 = vrsqrt.f32 %v10041_v2  ;;  %v4985_v40 = vmul.f32 %v6752_v22, %v4984_v46  ;;  %vm4988_vm0 = vweird.f32 %v6752_v22  ;;  %v10062_v62 = vadd.f32 1.0, %v5020_v12  ;;  %2814 = vadd.xlane.f32.xlu0 %v2760_v6 }
 0x571   :  { %4797 = vmatmul.f32.gmra.mxu2 %v4705_v57  ;;  %v5056_v36 = vmul.f32 %v5055_v43, %v9875_v15  ;;  %v10066_v56 = vmul.f32 %v5090_v50, %v9867_v31  ;;  %v10069_v28 = vmul.f32 %v9979_v13, %v3042_v60  ;;  %v5094_v57 = vmul.f32 %v5093_v8, %v9886_v34  ;;  %vm4989_vm3 = vmor %vm4987_vm2, %vm4988_vm0 }
 0x572   :  { %v4986_v30 = vadd.f32 %v6752_v22, %v4985_v40  ;;  %6755 = vrcp.f32 %v10062_v62  ;;  %v2661_v9 = vmul.f32 0.015625, %v2622_v0  ;;  %v5130_v46 = vadd.f32 1.1283791, %v5129_v53 }
 0x573   :  { %v5166_v12 = vadd.f32 0.05243302, %v5165_v54  ;;  %v3062_v43 = vsub.f32 1.5, %v3061_v21  ;;  %v4994_v31 = vor.u32 1.1754944e-38, %v4993_v17  ;;  %v3052_v60 = vsub.f32 1.5, %v3051_v47 }
 0x574   :  { %v4990_v8 = vsel %vm4989_vm3, %v6752_v22, %v4986_v30  ;;  %vm4992_vm6 = vcmp.eq.f32.partialorder %v4991_v44, 8.507059e+37  ;;  %v5057_v58 = vadd.f32 0.112945676, %v5056_v36  ;;  %v3047_v53 = vsel %vm10078_vm5, %v9979_v13, %v10069_v28  ;;  %v2624_v30 = vpop.xlane.xlu1 %2623 }
 0x575   :  { %v4995_v21 = vsel %vm4992_vm6, %v4994_v31, %v4990_v8  ;;  %v2663_v54 = vmul.f32 0.015625, %v2626_v55  ;;  %v5095_v0 = vadd.f32 0.014752088, %v5094_v57  ;;  %v2693_v17 = vsub.f32 %v9518_v48, %v2661_v9 }
 0x576   :  { %v10082_v6 = vpop.eup %6753  ;;  %v4996_v32 = vmul.f32 %v4995_v21, %v10013_v16  ;;  %v5058_v40 = vmul.f32 %v5057_v58, %v9875_v15  ;;  %v5132_v22 = vmul.f32 3.8918573e-05, %v9909_v24  ;;  %v10093_v47 = vmul.f32 %v5130_v46, %v9901_v4 }
 0x577   :  { %v10096_v44 = vmul.f32 %v10001_v3, %v3062_v43  ;;  %v10099_v36 = vmul.f32 0.5, %v9835_v29  ;;  %v10102_v13 = vmul.f32 0.5, %v9859_v61  ;;  %v5167_v16 = vmul.f32 %v5166_v12, %v9972_v35  ;;  %v10112_v29 = vpop.xlane.xlu2 %2810 }
 0x578   :  { %v6756_v28 = vpop.eup %6755  ;;  %v10106_v48 = vmul.f32 %v10008_v27, %v3052_v60  ;;  %vm3055_vm7 = vweird.f32 %v10008_v27  ;;  %v6514_v57 = vclamps-f32 %v4996_v32, 1.0  ;;  %v3069_v4 = vmul.f32 %v10082_v6, %v10041_v2  ;;  %2631 = vadd.xlane.f32.xlu0 %v9944_v41 }
 0x579   :  { %v5023_v61 = vmul.f32 %v6756_v28, %v10062_v62  ;;  %v2695_v9 = vsub.f32 %v9547_v23, %v2663_v54  ;;  %v5059_v55 = vadd.f32 0.4994258, %v5058_v40  ;;  %v5096_v46 = vmul.f32 %v5095_v0, %v9886_v34 }
 0x57a   :  { %vm3054_vm8 = vweird.f32 %v9975_v49  ;;  %v6200_v12 = vadd.f32 1.0, %v6514_v57  ;;  %v2662_v43 = vmul.f32 0.015625, %v2624_v30  ;;  %v10120_v31 = vsel %vm2703_vm4, %v2693_v17, 0.0 }
 0x57b   :  { %v5133_v50 = vadd.f32 0.001143296, %v5132_v22  ;;  %v2853_v60 = vmul.f32 0.015625, %v10025_v1  ;;  %v5024_v8 = vsub.f32 1.0, %v5023_v61  ;;  %v5060_v58 = vmul.f32 %v5059_v55, %v9875_v15  ;;  %vm10159_vm15 = vmor %vm3054_vm8, %vm3055_vm7 }
 0x57c   :  { %v2762_v23 = vmul.f32 %v10120_v31, %v10120_v31  ;;  %v6232_v21 = vmul.f32 %v6200_v12, %v10037_v19  ;;  %vm5028_vm9 = vweird.f32 %v6756_v28  ;;  %v5031_v54 = vand.u32 2147483647, %v10062_v62 }
 0x57d   :  { %v5033_v0 = vand.u32 2147483648, %v10062_v62  ;;  %v5025_v32 = vmul.f32 %v6756_v28, %v5024_v8  ;;  %v10129_v40 = vadd.f32 1.0, %v5060_v58  ;;  %v10133_v1 = vsel %vm2703_vm4, %v2695_v9, 0.0 }
 0x57e   :  { %2818 = vadd.xlane.f32.xlu1 %v2762_v23  ;;  %12260 = vst [vmem:[#allocation31_spill] sm:$0xff] %v10133_v1  ;;  %v5097_v17 = vadd.f32 0.112945676, %v5096_v46  ;;  %6300 = vmatmul.f32.gmra.mxu3 %v6232_v21  ;;  %v3070_v15 = vmul.f32 %v10082_v6, %v3069_v4  ;;  %v2694_v22 = vsub.f32 %v9582_v42, %v2662_v43  ;;  %v5168_v30 = vadd.f32 0.18741608, %v5167_v16 }
 0x57f   :  { %v2764_v19 = vmul.f32 %v10133_v1, %v10133_v1  ;;  %v5134_v57 = vmul.f32 %v5133_v50, %v9909_v24  ;;  %v5026_v61 = vadd.f32 %v6756_v28, %v5025_v32  ;;  %vm5027_vm10 = vweird.f32 %v10062_v62 }
 0x580   :  { %6757 = vrcp.f32 %v10129_v40  ;;  %vm5029_vm11 = vmor %vm5027_vm10, %vm5028_vm9  ;;  %vm5032_vm12 = vcmp.eq.f32.partialorder %v5031_v54, 8.507059e+37  ;;  %v5034_v9 = vor.u32 1.1754944e-38, %v5033_v0  ;;  %v2852_v55 = vmul.f32 0.015625, %v10057_v20  ;;  %v2628_v20 = vpop.xlane.xlu2 %2627 }
 0x581   :  { %2822 = vadd.xlane.f32.xlu2 %v2764_v19  ;;  %v5172_v42 = vmul.f32 3.8918573e-05, %v9972_v35  ;;  %vm3065_vm13 = vweird.f32 %v10001_v3  ;;  %v5030_v4 = vsel %vm5029_vm11, %v6756_v28, %v5026_v61  ;;  %v5098_v46 = vmul.f32 %v5097_v17, %v9886_v34  ;;  %v12269_v28 = vld [vmem:[#allocation24_spill] sm:$0xff] }
 0x582   :  { %v5135_v16 = vadd.f32 0.014752088, %v5134_v57  ;;  %v3232_v12 = vmul.f32 %v3047_v53, %v9399_v11  ;;  %v3071_v62 = vmul.f32 0.5, %v3070_v15  ;;  %v10148_v43 = vadd.f32 1e-05, %v2853_v60 }
 0x583   :  { %v5035_v50 = vsel %vm5032_vm12, %v5034_v9, %v5030_v4  ;;  %v10152_v8 = vsel %vm2703_vm4, %v2694_v22, 0.0  ;;  %vm3064_vm14 = vweird.f32 %v9965_v52  ;;  %v5099_v53 = vadd.f32 0.4994258, %v5098_v46 }
 0x584   :  { %12261 = vst [vmem:[#allocation32_spill] sm:$0xff] %v10152_v8  ;;  %v5036_v11 = vmul.f32 %v5035_v50, %v10019_v26  ;;  %v2763_v60 = vmul.f32 %v10152_v8, %v10152_v8  ;;  %v2664_v58 = vmul.f32 0.015625, %v2628_v20  ;;  %v3057_v23 = vsel %vm10159_vm15, %v10008_v27, %v10106_v48  ;;  %vm10205_vm3 = vmor %vm3064_vm14, %vm3065_vm13 }
 0x585   :  { %v10170_v21 = vadd.f32 1e-05, %v2852_v55  ;;  %v5136_v49 = vmul.f32 %v5135_v16, %v9909_v24  ;;  %v5173_v54 = vadd.f32 0.001143296, %v5172_v42  ;;  %v5169_v32 = vmul.f32 %v5168_v30, %v9972_v35 }
 0x586   :  { %v6758_v0 = vpop.eup %6757  ;;  %v6515_v17 = vclamps-f32 %v5036_v11, 1.0  ;;  %v5100_v26 = vmul.f32 %v5099_v53, %v9886_v34  ;;  %2820 = vadd.xlane.f32.xlu0 %v2763_v60  ;;  %2635 = vadd.xlane.f32.xlu1 %v9963_v5  ;;  %v3265_v15 = vmul.f32 %v8987_v18, %v3232_v12  ;;  %6759 = vrsqrt.f32 %v10148_v43 }
 0x587   :  { %v5063_v27 = vmul.f32 %v6758_v0, %v10129_v40  ;;  %v5137_v48 = vadd.f32 0.112945676, %v5136_v49  ;;  %v5174_v22 = vmul.f32 %v5173_v54, %v9972_v35  ;;  %v3072_v19 = vsub.f32 1.5, %v3071_v62 }
 0x588   :  { %vm3074_vm0 = vweird.f32 %v10041_v2  ;;  %v6201_v57 = vadd.f32 1.0, %v6515_v17  ;;  %v10181_v30 = vadd.f32 1.0, %v5100_v26  ;;  %v2696_v34 = vsub.f32 %v9646_v7, %v2664_v58 }
 0x589   :  { %6761 = vrsqrt.f32 %v10170_v21  ;;  %v5064_v61 = vsub.f32 1.0, %v5063_v27  ;;  %v5138_v9 = vmul.f32 %v5137_v48, %v9909_v24  ;;  %v5175_v55 = vadd.f32 0.014752088, %v5174_v22 }
 0x58a   :  { %v6233_v42 = vmul.f32 %v6201_v57, %v10044_v33  ;;  %v5073_v4 = vand.u32 2147483648, %v10129_v40  ;;  %6763 = vrcp.f32 %v10181_v30  ;;  %v10190_v46 = vadd.f32 %v9001_v59, %v3265_v15 }
 0x58b   :  { %v5065_v16 = vmul.f32 %v6758_v0, %v5064_v61  ;;  %vm5068_vm1 = vweird.f32 %v6758_v0  ;;  %v5071_v12 = vand.u32 2147483647, %v10129_v40  ;;  %v5139_v7 = vadd.f32 0.4994258, %v5138_v9 }
 0x58c   :  { %v5170_v62 = vadd.f32 1.1283791, %v5169_v32  ;;  %vm3075_vm2 = vweird.f32 %v10082_v6  ;;  %6303 = vmatmul.f32.gmra.mxu3 %v6233_v42  ;;  %v10196_v50 = vsel %vm2703_vm4, %v2696_v34, 0.0  ;;  %v5176_v33 = vmul.f32 %v5175_v55, %v9972_v35  ;;  %v10199_v20 = vpop.eup %6759 }
 0x58d   :  { %12264 = vst [vmem:[#allocation33_spill] sm:$0xff] %v10196_v50  ;;  %v10210_v11 = vmul.f32 %v10082_v6, %v3072_v19  ;;  %v5066_v53 = vadd.f32 %v6758_v0, %v5065_v16  ;;  %vm5067_vm5 = vweird.f32 %v10129_v40  ;;  %v5140_v60 = vmul.f32 %v5139_v7, %v9909_v24  ;;  %vm10235_vm8 = vmor %vm3074_vm0, %vm3075_vm2 }
 0x58e   :  { %vm5069_vm6 = vmor %vm5067_vm5, %vm5068_vm1  ;;  %v5074_v58 = vor.u32 1.1754944e-38, %v5073_v4  ;;  %v2765_v49 = vmul.f32 %v10196_v50, %v10196_v50  ;;  %v5177_v54 = vadd.f32 0.112945676, %v5176_v33  ;;  %v10217_v52 = vmul.f32 0.70710677, %v10190_v46 }
 0x58f   :  { %v10219_v32 = vpop.eup %6761  ;;  %v3067_v17 = vsel %vm10205_vm3, %v10001_v3, %v10096_v44  ;;  %v5070_v26 = vsel %vm5069_vm6, %v6758_v0, %v5066_v53  ;;  %vm5072_vm7 = vcmp.eq.f32.partialorder %v5071_v12, 8.507059e+37  ;;  %v10225_v40 = vadd.f32 1.0, %v5140_v60 }
 0x590   :  { %v6764_v24 = vpop.eup %6763  ;;  %v5075_v15 = vsel %vm5072_vm7, %v5074_v58, %v5070_v26  ;;  %2824 = vadd.xlane.f32.xlu0 %v2765_v49  ;;  %v5178_v27 = vmul.f32 %v5177_v54, %v9972_v35  ;;  %v3940_v48 = vmul.f32 %v10217_v52, %v10217_v52  ;;  %v3233_v22 = vmul.f32 %v3057_v23, %v9444_v37 }
 0x591   :  { %v5076_v44 = vmul.f32 %v5075_v15, %v10033_v14  ;;  %v5103_v0 = vmul.f32 %v6764_v24, %v10181_v30  ;;  %v10242_v19 = vmul.f32 0.5, %v9896_v38  ;;  %6765 = vrcp.f32 %v10225_v40  ;;  %v10273_v15 = vld [vmem:[#allocation13] ss:$0 sm:$0xff] }
 0x592   :  { %v10246_v57 = vmul.f32 %v5170_v62, %v9938_v25  ;;  %v3077_v37 = vsel %vm10235_vm8, %v10082_v6, %v10210_v11  ;;  %v10254_v2 = vmul.f32 %v10199_v20, %v10148_v43  ;;  %v5113_v14 = vand.u32 2147483648, %v10181_v30 }
 0x593   :  { %v6516_v23 = vclamps-f32 %v5076_v44, 1.0  ;;  %v5104_v34 = vsub.f32 1.0, %v5103_v0  ;;  %v5179_v38 = vadd.f32 0.4994258, %v5178_v27  ;;  %v10257_v61 = vmin.f32 %v3940_v48, 16.0 }
 0x594   :  { %v3079_v25 = vmul.f32 %v10219_v32, %v10170_v21  ;;  %vm5108_vm9 = vweird.f32 %v6764_v24  ;;  %v5111_v9 = vand.u32 2147483647, %v10181_v30  ;;  %v3266_v55 = vmul.f32 %v8987_v18, %v3233_v22 }
 0x595   :  { %v6202_v42 = vadd.f32 1.0, %v6516_v23  ;;  %v5105_v4 = vmul.f32 %v6764_v24, %v5104_v34  ;;  %v5180_v16 = vmul.f32 %v5179_v38, %v9972_v35  ;;  %v3942_v7 = vmul.f32 2.1237322e-06, %v10257_v61 }
 0x596   :  { %v4780_v12 = vpop.f32.mrf.mxu2  ;;  %vm5107_vm10 = vweird.f32 %v10181_v30  ;;  %v5114_v62 = vor.u32 1.1754944e-38, %v5113_v14  ;;  %v3953_v33 = vmul.f32 3.8918573e-05, %v10257_v61  ;;  %v3234_v53 = vmul.f32 %v3067_v17, %v12269_v28 }
 0x597   :  { %v6766_v60 = vpop.eup %6765  ;;  %v6234_v58 = vmul.f32 %v6202_v42, %v10099_v36  ;;  %v5106_v49 = vadd.f32 %v6764_v24, %v5105_v4  ;;  %v10269_v54 = vadd.f32 1.0, %v5180_v16  ;;  %v3943_v26 = vadd.f32 0.00028619796, %v3942_v7  ;;  %vm5109_vm11 = vmor %vm5107_vm10, %vm5108_vm9 }
 0x598   :  { %v5143_v35 = vmul.f32 %v6766_v60, %v10225_v40  ;;  %v10276_v30 = vadd.f32 %v10273_v15, %v4780_v12  ;;  %v3954_v27 = vadd.f32 0.001143296, %v3953_v33  ;;  %v10279_v48 = vadd.f32 %v9001_v59, %v3266_v55 }
 0x599   :  { %v3080_v17 = vmul.f32 %v10219_v32, %v3079_v25  ;;  %6306 = vmatmul.f32.gmra.mxu3 %v6234_v58  ;;  %v5110_v36 = vsel %vm5109_vm11, %v6764_v24, %v5106_v49  ;;  %vm5112_vm12 = vcmp.eq.f32.partialorder %v5111_v9, 8.507059e+37  ;;  %6767 = vrcp.f32 %v10269_v54 }
 0x59a   :  { %v5115_v22 = vsel %vm5112_vm12, %v5114_v62, %v5110_v36  ;;  %v5144_v44 = vsub.f32 1.0, %v5143_v35  ;;  %v5151_v0 = vand.u32 2147483647, %v10225_v40  ;;  %v3267_v14 = vmul.f32 %v8987_v18, %v3234_v53 }
 0x59b   :  { %v5116_v23 = vmul.f32 %v5115_v22, %v10066_v56  ;;  %v5153_v34 = vand.u32 2147483648, %v10225_v40  ;;  %v3944_v38 = vmul.f32 %v3943_v26, %v10257_v61  ;;  %v3955_v55 = vmul.f32 %v3954_v27, %v10257_v61 }
 0x59c   :  { %v5145_v25 = vmul.f32 %v6766_v60, %v5144_v44  ;;  %vm5148_vm13 = vweird.f32 %v6766_v60  ;;  %v10290_v24 = vmul.f32 0.70710677, %v10276_v30  ;;  %v10293_v9 = vmul.f32 0.70710677, %v10279_v48 }
 0x59d   :  { %v10295_v42 = vmul.f32 0.5, %v3080_v17  ;;  %v6517_v4 = vclamps-f32 %v5116_v23, 1.0  ;;  %v3945_v16 = vadd.f32 0.0036580483, %v3944_v38  ;;  %v3956_v12 = vadd.f32 0.014752088, %v3955_v55 }
 0x59e   :  { %v2854_v56 = vmul.f32 0.015625, %v10112_v29  ;;  %v5146_v7 = vadd.f32 %v6766_v60, %v5145_v25  ;;  %vm5147_vm14 = vweird.f32 %v10225_v40  ;;  %v3980_v62 = vmul.f32 %v10293_v9, %v10293_v9 }
 0x59f   :  { %v6768_v33 = vpop.eup %6767  ;;  %v6203_v28 = vadd.f32 1.0, %v6517_v4  ;;  %vm5149_vm15 = vmor %vm5147_vm14, %vm5148_vm13  ;;  %v5154_v53 = vor.u32 1.1754944e-38, %v5153_v34  ;;  %v3946_v58 = vmul.f32 %v3945_v16, %v10257_v61  ;;  %v3957_v49 = vmul.f32 %v3956_v12, %v10257_v61 }
 0x5a0   :  { %v5150_v26 = vsel %vm5149_vm15, %v6766_v60, %v5146_v7  ;;  %vm5152_vm0 = vcmp.eq.f32.partialorder %v5151_v0, 8.507059e+37  ;;  %v5183_v35 = vmul.f32 %v6768_v33, %v10269_v54  ;;  %v10305_v29 = vadd.f32 %v9001_v59, %v3267_v14 }
 0x5a1   :  { %v6235_v40 = vmul.f32 %v6203_v28, %v10102_v13  ;;  %v5155_v27 = vsel %vm5152_vm0, %v5154_v53, %v5150_v26  ;;  %v5199_v17 = vmul.f32 %v10290_v24, %v10290_v24  ;;  %v3958_v36 = vadd.f32 0.112945676, %v3957_v49 }
 0x5a2   :  { %v5156_v22 = vmul.f32 %v5155_v27, %v10093_v47  ;;  %v5184_v44 = vsub.f32 1.0, %v5183_v35  ;;  %vm5187_vm1 = vweird.f32 %v10269_v54  ;;  %v10312_v23 = vmin.f32 %v3980_v62, 16.0  ;;  %v12270_v35 = vld [vmem:[#allocation26_spill] sm:$0xff] }
 0x5a3   :  { %6309 = vmatmul.f32.gmra.mxu3 %v6235_v40  ;;  %v5191_v60 = vand.u32 2147483647, %v10269_v54  ;;  %v5193_v0 = vand.u32 2147483648, %v10269_v54  ;;  %v3947_v14 = vadd.f32 0.05243302, %v3946_v58  ;;  %v3959_v13 = vmul.f32 %v3958_v36, %v10257_v61 }
 0x5a4   :  { %v6518_v34 = vclamps-f32 %v5156_v22, 1.0  ;;  %v5185_v38 = vmul.f32 %v6768_v33, %v5184_v44  ;;  %vm5188_vm2 = vweird.f32 %v6768_v33  ;;  %v3982_v25 = vmul.f32 2.1237322e-06, %v10312_v23 }
 0x5a5   :  { %v10318_v47 = vmin.f32 %v5199_v17, 16.0  ;;  %v3960_v4 = vadd.f32 0.4994258, %v3959_v13  ;;  %v10324_v12 = vmul.f32 0.70710677, %v10305_v29  ;;  %vm5189_vm3 = vmor %vm5187_vm1, %vm5188_vm2  ;;  %v5194_v58 = vor.u32 1.1754944e-38, %v5193_v0 }
 0x5a6   :  { %v6204_v7 = vadd.f32 1.0, %v6518_v34  ;;  %v5186_v62 = vadd.f32 %v6768_v33, %v5185_v38  ;;  %v3983_v28 = vadd.f32 0.00028619796, %v3982_v25  ;;  %v3993_v53 = vmul.f32 3.8918573e-05, %v10312_v23 }
 0x5a7   :  { %v3948_v49 = vmul.f32 %v3947_v14, %v10257_v61  ;;  %v3961_v26 = vmul.f32 %v3960_v4, %v10257_v61  ;;  %v3235_v40 = vmul.f32 %v3077_v37, %v12270_v35  ;;  %v10337_v27 = vadd.f32 1e-05, %v2854_v56 }
 0x5a8   :  { %v4783_v55 = vpop.f32.mrf.mxu2  ;;  %v6236_v17 = vmul.f32 %v6204_v7, %v10242_v19  ;;  %v5190_v36 = vsel %vm5189_vm3, %v6768_v33, %v5186_v62  ;;  %vm5192_vm5 = vcmp.eq.f32.partialorder %v5191_v60, 8.507059e+37  ;;  %v4020_v0 = vmul.f32 %v10324_v12, %v10324_v12  ;;  %v12271_v60 = vld [vmem:[#allocation29_spill] sm:$0xff] }
 0x5a9   :  { %v10321_v16 = vadd.f32 %v10273_v15, %v4783_v55  ;;  %v5195_v54 = vsel %vm5192_vm5, %v5194_v58, %v5190_v36  ;;  %v10340_v22 = vadd.f32 1.0, %v3961_v26  ;;  %v5201_v6 = vmul.f32 2.1237322e-06, %v10318_v47 }
 0x5aa   :  { %v5196_v3 = vmul.f32 %v5195_v54, %v10246_v57  ;;  %v3984_v11 = vmul.f32 %v3983_v28, %v10312_v23  ;;  %v3994_v37 = vadd.f32 0.001143296, %v3993_v53  ;;  %v3949_v19 = vadd.f32 0.18741608, %v3948_v49 }
 0x5ab   :  { %v10343_v44 = vmul.f32 0.70710677, %v10321_v16  ;;  %6312 = vmatmul.f32.gmra.mxu3 %v6236_v17  ;;  %6769 = vrcp.f32 %v10340_v22  ;;  %v3268_v56 = vmul.f32 %v8987_v18, %v3235_v40  ;;  %v3090_v33 = vmul.f32 %v10199_v20, %v10254_v2 }
 0x5ac   :  { %v4861_v14 = vmul.f32 0.5, %v12271_v60  ;;  %v6519_v13 = vclamps-f32 %v5196_v3, 1.0  ;;  %v3082_v34 = vsub.f32 1.5, %v10295_v42  ;;  %v3995_v38 = vmul.f32 %v3994_v37, %v10312_v23 }
 0x5ad   :  { %v5239_v57 = vmul.f32 %v10343_v44, %v10343_v44  ;;  %v10359_v55 = vmin.f32 %v4020_v0, 16.0  ;;  %6771 = vrsqrt.f32 %v10337_v27  ;;  %v5202_v4 = vadd.f32 0.00028619796, %v5201_v6 }
 0x5ae   :  { %v6205_v25 = vadd.f32 1.0, %v6519_v13  ;;  %v3985_v7 = vadd.f32 0.0036580483, %v3984_v11  ;;  %v3950_v62 = vmul.f32 %v3949_v19, %v10257_v61  ;;  %v3996_v2 = vadd.f32 0.014752088, %v3995_v38 }
 0x5af   :  { %v4022_v28 = vmul.f32 2.1237322e-06, %v10359_v55  ;;  %v10365_v53 = vadd.f32 %v9001_v59, %v3268_v56  ;;  %v10367_v42 = vmul.f32 0.5, %v3090_v33  ;;  %vm3085_vm6 = vweird.f32 %v10219_v32 }
 0x5b0   :  { %v6237_v58 = vmul.f32 %v6205_v25, %v4861_v14  ;;  %v4033_v49 = vmul.f32 3.8918573e-05, %v10359_v55  ;;  %v10372_v35 = vmul.f32 %v10219_v32, %v3082_v34  ;;  %v10374_v40 = vmin.f32 %v5239_v57, 16.0 }
 0x5b1   :  { %v6770_v26 = vpop.eup %6769  ;;  %v3997_v61 = vmul.f32 %v3996_v2, %v10312_v23  ;;  %v4023_v17 = vadd.f32 0.00028619796, %v4022_v28  ;;  %vm3084_vm7 = vweird.f32 %v10170_v21  ;;  %v5203_v36 = vmul.f32 %v5202_v4, %v10318_v47 }
 0x5b2   :  { %v3964_v54 = vmul.f32 %v6770_v26, %v10340_v22  ;;  %v3986_v0 = vmul.f32 %v3985_v7, %v10312_v23  ;;  %v4034_v3 = vadd.f32 0.001143296, %v4033_v49  ;;  %v3951_v6 = vadd.f32 1.1283791, %v3950_v62  ;;  %vm10408_vm12 = vmor %vm3084_vm7, %vm3085_vm6 }
 0x5b3   :  { %6315 = vmatmul.f32.gmra.mxu3 %v6237_v58  ;;  %v3998_v11 = vadd.f32 0.112945676, %v3997_v61  ;;  %v4024_v37 = vmul.f32 %v4023_v17, %v10359_v55  ;;  %v10383_v19 = vmul.f32 0.70710677, %v10365_v53  ;;  %v10385_v56 = vpop.eup %6771  ;;  %v3972_v60 = vand.u32 2147483647, %v10340_v22 }
 0x5b4   :  { %v3965_v33 = vsub.f32 1.0, %v3964_v54  ;;  %v3974_v14 = vand.u32 2147483648, %v10340_v22  ;;  %v4035_v13 = vmul.f32 %v4034_v3, %v10359_v55  ;;  %v5241_v34 = vmul.f32 2.1237322e-06, %v10374_v40 }
 0x5b5   :  { %v3999_v57 = vmul.f32 %v3998_v11, %v10312_v23  ;;  %v4025_v38 = vadd.f32 0.0036580483, %v4024_v37  ;;  %v4060_v25 = vmul.f32 %v10383_v19, %v10383_v19  ;;  %vm3969_vm8 = vweird.f32 %v6770_v26 }
 0x5b6   :  { %v3966_v4 = vmul.f32 %v6770_v26, %v3965_v33  ;;  %v3987_v7 = vadd.f32 0.05243302, %v3986_v0  ;;  %v4036_v62 = vadd.f32 0.014752088, %v4035_v13  ;;  %v3099_v2 = vmul.f32 %v10385_v56, %v10337_v27 }
 0x5b7   :  { %v5204_v28 = vadd.f32 0.0036580483, %v5203_v36  ;;  %v3952_v58 = vmul.f32 %v3951_v6, %v10217_v52  ;;  %v4000_v49 = vadd.f32 0.4994258, %v3999_v57  ;;  %vm3968_vm9 = vweird.f32 %v10340_v22 }
 0x5b8   :  { %v3967_v61 = vadd.f32 %v6770_v26, %v3966_v4  ;;  %vm3973_vm10 = vcmp.eq.f32.partialorder %v3972_v60, 8.507059e+37  ;;  %v4037_v17 = vmul.f32 %v4036_v62, %v10359_v55  ;;  %vm3970_vm11 = vmor %vm3968_vm9, %vm3969_vm8  ;;  %v3975_v54 = vor.u32 1.1754944e-38, %v3974_v14 }
 0x5b9   :  { %v4001_v3 = vmul.f32 %v4000_v49, %v10312_v23  ;;  %v4026_v0 = vmul.f32 %v4025_v38, %v10359_v55  ;;  %v10401_v11 = vmin.f32 %v4060_v25, 16.0  ;;  %v5242_v33 = vadd.f32 0.00028619796, %v5241_v34  ;;  %v4786_v34 = vpop.f32.mrf.mxu2 }
 0x5ba   :  { %v3971_v37 = vsel %vm3970_vm11, %v6770_v26, %v3967_v61  ;;  %v3988_v36 = vmul.f32 %v3987_v7, %v10312_v23  ;;  %v4038_v52 = vadd.f32 0.112945676, %v4037_v17  ;;  %v3092_v14 = vsub.f32 1.5, %v10367_v42 }
 0x5bb   :  { %v3976_v6 = vsel %vm3973_vm10, %v3975_v54, %v3971_v37  ;;  %v10412_v60 = vadd.f32 1.0, %v4001_v3  ;;  %v3087_v26 = vsel %vm10408_vm12, %v10219_v32, %v10372_v35  ;;  %v3100_v21 = vmul.f32 %v10385_v56, %v3099_v2  ;;  %v12274_v35 = vld [vmem:[#allocation27_spill] sm:$0xff] }
 0x5bc   :  { %v3977_v13 = vmul.f32 %v3976_v6, %v3952_v58  ;;  %v4039_v57 = vmul.f32 %v4038_v52, %v10359_v55  ;;  %v4027_v38 = vadd.f32 0.05243302, %v4026_v0  ;;  %v4062_v25 = vmul.f32 2.1237322e-06, %v10401_v11 }
 0x5bd   :  { %6773 = vrcp.f32 %v10412_v60  ;;  %v5205_v4 = vmul.f32 %v5204_v28, %v10318_v47  ;;  %v5243_v42 = vmul.f32 %v5242_v33, %v10374_v40  ;;  %v3989_v62 = vadd.f32 0.18741608, %v3988_v36 }
 0x5be   :  { %v6495_v7 = vclamps-f32 %v3977_v13, 1.0  ;;  %vm3094_vm13 = vweird.f32 %v10148_v43  ;;  %vm3095_vm14 = vweird.f32 %v10199_v20  ;;  %v4040_v32 = vadd.f32 0.4994258, %v4039_v57 }
 0x5bf   :  { %v3236_v58 = vmul.f32 %v3087_v26, %v12274_v35  ;;  %v3093_v2 = vmul.f32 %v10199_v20, %v3092_v14  ;;  %v3330_v49 = vmul.f32 0.5, %v10190_v46  ;;  %v10431_v17 = vadd.f32 %v10273_v15, %v4786_v34  ;;  %vm10442_vm15 = vmor %vm3094_vm13, %vm3095_vm14 }
 0x5c0   :  { %v4674_v61 = vadd.f32 1.0, %v6495_v7  ;;  %v10433_v28 = vmul.f32 0.5, %v3100_v21  ;;  %v4028_v54 = vmul.f32 %v4027_v38, %v10359_v55  ;;  %v4041_v3 = vmul.f32 %v4040_v32, %v10359_v55 }
 0x5c1   :  { %v4063_v0 = vadd.f32 0.00028619796, %v4062_v25  ;;  %v5206_v37 = vadd.f32 0.05243302, %v5205_v4  ;;  %v5244_v36 = vadd.f32 0.0036580483, %v5243_v42  ;;  %v3990_v52 = vmul.f32 %v3989_v62, %v10312_v23  ;;  %v4789_v42 = vpop.f32.mrf.mxu2 }
 0x5c2   :  { %v4706_v33 = vmul.f32 %v4674_v61, %v3330_v49  ;;  %v10446_v6 = vadd.f32 1.0, %v4041_v3  ;;  %v4073_v26 = vmul.f32 3.8918573e-05, %v10401_v11  ;;  %v3269_v13 = vmul.f32 %v8987_v18, %v3236_v58 }
 0x5c3   :  { %v6774_v22 = vpop.eup %6773  ;;  %v4064_v14 = vmul.f32 %v4063_v0, %v10401_v11  ;;  %v3097_v23 = vsel %vm10442_vm15, %v10199_v20, %v3093_v2  ;;  %v10456_v43 = vmul.f32 0.70710677, %v10431_v17  ;;  %v3102_v57 = vsub.f32 1.5, %v10433_v28 }
 0x5c4   :  { %4800 = vmatmul.f32.gmra.mxu2 %v4706_v33  ;;  %v4004_v34 = vmul.f32 %v6774_v22, %v10412_v60  ;;  %v10460_v21 = vmul.f32 0.5, %v10279_v48  ;;  %v4029_v38 = vadd.f32 0.18741608, %v4028_v54  ;;  %6775 = vrcp.f32 %v10446_v6 }
 0x5c5   :  { %v10464_v25 = vmul.f32 %v5206_v37, %v10318_v47  ;;  %v3991_v4 = vadd.f32 1.1283791, %v3990_v52  ;;  %v4014_v20 = vand.u32 2147483648, %v10412_v60  ;;  %v10468_v62 = vmul.f32 %v5244_v36, %v10374_v40 }
 0x5c6   :  { %v4005_v7 = vsub.f32 1.0, %v4004_v34  ;;  %v4065_v32 = vadd.f32 0.0036580483, %v4064_v14  ;;  %v4074_v35 = vadd.f32 0.001143296, %v4073_v26  ;;  %v10471_v58 = vadd.f32 %v9001_v59, %v3269_v13  ;;  %v12277_v26 = vld [vmem:[#allocation25_spill] sm:$0xff] }
 0x5c7   :  { %vm4009_vm0 = vweird.f32 %v6774_v22  ;;  %v4012_v2 = vand.u32 2147483647, %v10412_v60  ;;  %v5279_v49 = vmul.f32 %v10456_v43, %v10456_v43  ;;  %v4030_v61 = vmul.f32 %v4029_v38, %v10359_v55 }
 0x5c8   :  { %v4006_v48 = vmul.f32 %v6774_v22, %v4005_v7  ;;  %v10478_v54 = vadd.f32 %v10273_v15, %v4789_v42  ;;  %v4075_v3 = vmul.f32 %v4074_v35, %v10401_v11  ;;  %v10482_v0 = vmul.f32 0.70710677, %v10471_v58 }
 0x5c9   :  { %v3992_v37 = vmul.f32 %v3991_v4, %v10293_v9  ;;  %vm4008_vm1 = vweird.f32 %v10412_v60  ;;  %v4015_v36 = vor.u32 1.1754944e-38, %v4014_v20  ;;  %v4066_v46 = vmul.f32 %v4065_v32, %v10401_v11 }
 0x5ca   :  { %v4007_v33 = vadd.f32 %v6774_v22, %v4006_v48  ;;  %v6776_v52 = vpop.eup %6775  ;;  %vm4010_vm2 = vmor %vm4008_vm1, %vm4009_vm0  ;;  %v4076_v14 = vadd.f32 0.014752088, %v4075_v3  ;;  %v4100_v55 = vmul.f32 %v10482_v0, %v10482_v0  ;;  %v3237_v13 = vmul.f32 %v3097_v23, %v12277_v26 }
 0x5cb   :  { %vm4013_vm3 = vcmp.eq.f32.partialorder %v4012_v2, 8.507059e+37  ;;  %v10490_v38 = vmin.f32 %v5279_v49, 16.0  ;;  %v4044_v9 = vmul.f32 %v6776_v52, %v10446_v6  ;;  %v4031_v7 = vadd.f32 1.1283791, %v4030_v61 }
 0x5cc   :  { %v4011_v34 = vsel %vm4010_vm2, %v6774_v22, %v4007_v33  ;;  %v10494_v60 = vmul.f32 0.70710677, %v10478_v54  ;;  %v4077_v20 = vmul.f32 %v4076_v14, %v10401_v11  ;;  %v4052_v35 = vand.u32 2147483647, %v10446_v6 }
 0x5cd   :  { %v4016_v4 = vsel %vm4013_vm3, %v4015_v36, %v4011_v34  ;;  %v4045_v32 = vsub.f32 1.0, %v4044_v9  ;;  %v10498_v48 = vmin.f32 %v4100_v55, 16.0  ;;  %v4054_v22 = vand.u32 2147483648, %v10446_v6 }
 0x5ce   :  { %v4017_v42 = vmul.f32 %v4016_v4, %v3992_v37  ;;  %v4067_v23 = vadd.f32 0.05243302, %v4066_v46  ;;  %v4078_v2 = vadd.f32 0.112945676, %v4077_v20  ;;  %v3270_v49 = vmul.f32 %v8987_v18, %v3237_v13 }
 0x5cf   :  { %v4046_v33 = vmul.f32 %v6776_v52, %v4045_v32  ;;  %vm4049_vm5 = vweird.f32 %v6776_v52  ;;  %v4102_v61 = vmul.f32 2.1237322e-06, %v10498_v48  ;;  %v5281_v36 = vmul.f32 2.1237322e-06, %v10490_v38 }
 0x5d0   :  { %v6496_v3 = vclamps-f32 %v4017_v42, 1.0  ;;  %v4032_v37 = vmul.f32 %v4031_v7, %v10324_v12  ;;  %v5319_v14 = vmul.f32 %v10494_v60, %v10494_v60  ;;  %v4079_v55 = vmul.f32 %v4078_v2, %v10401_v11 }
 0x5d1   :  { %v4047_v34 = vadd.f32 %v6776_v52, %v4046_v33  ;;  %vm4048_vm6 = vweird.f32 %v10446_v6  ;;  %vm4053_vm7 = vcmp.eq.f32.partialorder %v4052_v35, 8.507059e+37  ;;  %v4055_v46 = vor.u32 1.1754944e-38, %v4054_v22 }
 0x5d2   :  { %v4675_v26 = vadd.f32 1.0, %v6496_v3  ;;  %vm4050_vm8 = vmor %vm4048_vm6, %vm4049_vm5  ;;  %v4068_v13 = vmul.f32 %v4067_v23, %v10401_v11  ;;  %v4080_v9 = vadd.f32 0.4994258, %v4079_v55  ;;  %v4113_v4 = vmul.f32 3.8918573e-05, %v10498_v48 }
 0x5d3   :  { %v4051_v12 = vsel %vm4050_vm8, %v6776_v52, %v4047_v34  ;;  %v4103_v7 = vadd.f32 0.00028619796, %v4102_v61  ;;  %v10513_v42 = vadd.f32 %v9001_v59, %v3270_v49  ;;  %vm3105_vm9 = vweird.f32 %v10385_v56  ;;  %v4792_v52 = vpop.f32.mrf.mxu2 }
 0x5d4   :  { %v4707_v20 = vmul.f32 %v4675_v26, %v10460_v21  ;;  %v4056_v32 = vsel %vm4053_vm7, %v4055_v46, %v4051_v12  ;;  %v4081_v6 = vmul.f32 %v4080_v9, %v10401_v11  ;;  %v3103_v35 = vmul.f32 %v10385_v56, %v3102_v57 }
 0x5d5   :  { %v5208_v22 = vadd.f32 0.18741608, %v10464_v25  ;;  %v5246_v23 = vadd.f32 0.05243302, %v10468_v62  ;;  %v4057_v21 = vmul.f32 %v4056_v32, %v4032_v37  ;;  %v5282_v2 = vadd.f32 0.00028619796, %v5281_v36 }
 0x5d6   :  { %4803 = vmatmul.f32.gmra.mxu2 %v4707_v20  ;;  %v10522_v3 = vmin.f32 %v5319_v14, 16.0  ;;  %v10524_v49 = vadd.f32 1.0, %v4081_v6  ;;  %v4114_v33 = vadd.f32 0.001143296, %v4113_v4  ;;  %v4069_v55 = vadd.f32 0.18741608, %v4068_v13 }
 0x5d7   :  { %v6497_v61 = vclamps-f32 %v4057_v21, 1.0  ;;  %v4104_v26 = vmul.f32 %v4103_v7, %v10498_v48  ;;  %v10528_v28 = vmul.f32 0.70710677, %v10513_v42  ;;  %vm3104_vm10 = vweird.f32 %v10337_v27 }
 0x5d8   :  { %6777 = vrcp.f32 %v10524_v49  ;;  %v10533_v57 = vadd.f32 %v10273_v15, %v4792_v52  ;;  %vm10537_vm11 = vmor %vm3104_vm10, %vm3105_vm9  ;;  %v5209_v62 = vmul.f32 %v5208_v22, %v10318_v47  ;;  %v5247_v36 = vmul.f32 %v5246_v23, %v10374_v40 }
 0x5d9   :  { %v3332_v37 = vmul.f32 0.5, %v10305_v29  ;;  %v4676_v14 = vadd.f32 1.0, %v6497_v61  ;;  %v3107_v27 = vsel %vm10537_vm11, %v10385_v56, %v3103_v35  ;;  %v5283_v34 = vmul.f32 %v5282_v2, %v10490_v38  ;;  %v12280_v35 = vld [vmem:[#allocation28_spill] sm:$0xff] }
 0x5da   :  { %v4115_v46 = vmul.f32 %v4114_v33, %v10498_v48  ;;  %v4140_v13 = vmul.f32 %v10528_v28, %v10528_v28  ;;  %v5321_v4 = vmul.f32 2.1237322e-06, %v10522_v3  ;;  %v4070_v20 = vmul.f32 %v4069_v55, %v10401_v11 }
 0x5db   :  { %v4708_v9 = vmul.f32 %v4676_v14, %v3332_v37  ;;  %v4105_v12 = vadd.f32 0.0036580483, %v4104_v26  ;;  %v10554_v29 = vmul.f32 0.70710677, %v10533_v57  ;;  %v5210_v56 = vadd.f32 1.1283791, %v5209_v62 }
 0x5dc   :  { %v4116_v7 = vadd.f32 0.014752088, %v4115_v46  ;;  %v10556_v32 = vmin.f32 %v4140_v13, 16.0  ;;  %v5248_v6 = vadd.f32 0.18741608, %v5247_v36  ;;  %v3238_v22 = vmul.f32 %v3107_v27, %v12280_v35 }
 0x5dd   :  { %v5284_v21 = vadd.f32 0.0036580483, %v5283_v34  ;;  %v5322_v33 = vadd.f32 0.00028619796, %v5321_v4  ;;  %v4071_v61 = vadd.f32 1.1283791, %v4070_v20  ;;  %v4106_v26 = vmul.f32 %v4105_v12, %v10498_v48 }
 0x5de   :  { %4806 = vmatmul.f32.gmra.mxu2 %v4708_v9  ;;  %v6778_v23 = vpop.eup %6777  ;;  %v4117_v52 = vmul.f32 %v4116_v7, %v10498_v48  ;;  %v4142_v2 = vmul.f32 2.1237322e-06, %v10556_v32  ;;  %v4153_v11 = vmul.f32 3.8918573e-05, %v10556_v32  ;;  %v5359_v25 = vmul.f32 %v10554_v29, %v10554_v29 }
 0x5df   :  { %v4084_v55 = vmul.f32 %v6778_v23, %v10524_v49  ;;  %v4092_v27 = vand.u32 2147483647, %v10524_v49  ;;  %v4094_v34 = vand.u32 2147483648, %v10524_v49  ;;  %v3271_v46 = vmul.f32 %v8987_v18, %v3238_v22 }
 0x5e0   :  { %v4118_v62 = vadd.f32 0.112945676, %v4117_v52  ;;  %v4143_v36 = vadd.f32 0.00028619796, %v4142_v2  ;;  %v4154_v37 = vadd.f32 0.001143296, %v4153_v11  ;;  %v5323_v12 = vmul.f32 %v5322_v33, %v10522_v3 }
 0x5e1   :  { %v4085_v14 = vsub.f32 1.0, %v4084_v55  ;;  %v5212_v20 = vmul.f32 3.8918573e-05, %v10318_v47  ;;  %vm4089_vm12 = vweird.f32 %v6778_v23  ;;  %v4107_v35 = vadd.f32 0.05243302, %v4106_v26 }
 0x5e2   :  { %v4119_v13 = vmul.f32 %v4118_v62, %v10498_v48  ;;  %v4144_v9 = vmul.f32 %v4143_v36, %v10556_v32  ;;  %v4155_v4 = vmul.f32 %v4154_v37, %v10556_v32  ;;  %v4072_v52 = vmul.f32 %v4071_v61, %v10383_v19 }
 0x5e3   :  { %v4086_v7 = vmul.f32 %v6778_v23, %v4085_v14  ;;  %vm4088_vm13 = vweird.f32 %v10524_v49  ;;  %v10576_v55 = vmin.f32 %v5359_v25, 16.0  ;;  %v5213_v36 = vadd.f32 0.001143296, %v5212_v20 }
 0x5e4   :  { %v4120_v2 = vadd.f32 0.4994258, %v4119_v13  ;;  %v4156_v11 = vadd.f32 0.014752088, %v4155_v4  ;;  %v4145_v62 = vadd.f32 0.0036580483, %v4144_v9  ;;  %vm4090_vm14 = vmor %vm4088_vm13, %vm4089_vm12  ;;  %v10580_v33 = vadd.f32 %v9001_v59, %v3271_v46  ;;  %v4795_v9 = vpop.f32.mrf.mxu2 }
 0x5e5   :  { %v4087_v22 = vadd.f32 %v6778_v23, %v4086_v7  ;;  %vm4093_vm15 = vcmp.eq.f32.partialorder %v4092_v27, 8.507059e+37  ;;  %v4095_v37 = vor.u32 1.1754944e-38, %v4094_v34  ;;  %v4108_v19 = vmul.f32 %v4107_v35, %v10498_v48 }
 0x5e6   :  { %v4121_v50 = vmul.f32 %v4120_v2, %v10498_v48  ;;  %v4157_v49 = vmul.f32 %v4156_v11, %v10556_v32  ;;  %v5214_v61 = vmul.f32 %v5213_v36, %v10318_v47  ;;  %v10586_v25 = vmul.f32 0.5, %v10321_v16 }
 0x5e7   :  { %v4091_v26 = vsel %vm4090_vm14, %v6778_v23, %v4087_v22  ;;  %v5249_v14 = vmul.f32 %v5248_v6, %v10374_v40  ;;  %v4146_v46 = vmul.f32 %v4145_v62, %v10556_v32  ;;  %v5285_v20 = vmul.f32 %v5284_v21, %v10490_v38 }
 0x5e8   :  { %v4096_v13 = vsel %vm4093_vm15, %v4095_v37, %v4091_v26  ;;  %v10589_v27 = vadd.f32 1.0, %v4121_v50  ;;  %v4158_v4 = vadd.f32 0.112945676, %v4157_v49  ;;  %v5215_v23 = vadd.f32 0.014752088, %v5214_v61 }
 0x5e9   :  { %v4097_v34 = vmul.f32 %v4096_v13, %v4072_v52  ;;  %v5324_v7 = vadd.f32 0.0036580483, %v5323_v12  ;;  %v10595_v35 = vmul.f32 0.70710677, %v10580_v33  ;;  %v10598_v16 = vmul.f32 %v5210_v56, %v10290_v24 }
 0x5ea   :  { %6779 = vrcp.f32 %v10589_v27  ;;  %v5361_v50 = vmul.f32 2.1237322e-06, %v10576_v55  ;;  %v4109_v52 = vadd.f32 0.18741608, %v4108_v19  ;;  %v5250_v2 = vadd.f32 1.1283791, %v5249_v14  ;;  %v6298_v19 = vpop.f32.mrf.mxu3 }
 0x5eb   :  { %v6498_v6 = vclamps-f32 %v4097_v34, 1.0  ;;  %v10602_v11 = vadd.f32 %v10273_v15, %v4795_v9  ;;  %v4159_v22 = vmul.f32 %v4158_v4, %v10556_v32  ;;  %v5216_v21 = vmul.f32 %v5215_v23, %v10318_v47  ;;  %v10614_v34 = vld [vmem:[#allocation16] ss:$0 sm:$0xff] }
 0x5ec   :  { %v10607_v12 = vmul.f32 0.5, %v10431_v17  ;;  %v3333_v62 = vmul.f32 0.5, %v10365_v53  ;;  %v4147_v24 = vadd.f32 0.05243302, %v4146_v46  ;;  %v5286_v56 = vadd.f32 0.05243302, %v5285_v20 }
 0x5ed   :  { %v4677_v36 = vadd.f32 1.0, %v6498_v6  ;;  %v5325_v37 = vmul.f32 %v5324_v7, %v10522_v3  ;;  %v4160_v26 = vadd.f32 0.4994258, %v4159_v22  ;;  %v4180_v49 = vmul.f32 %v10595_v35, %v10595_v35 }
 0x5ee   :  { %v5362_v14 = vadd.f32 0.00028619796, %v5361_v50  ;;  %v4110_v13 = vmul.f32 %v4109_v52, %v10498_v48  ;;  %v5217_v17 = vadd.f32 0.112945676, %v5216_v21  ;;  %v10617_v53 = vmul.f32 %v5250_v2, %v10343_v44 }
 0x5ef   :  { %v4709_v61 = vmul.f32 %v4677_v36, %v3333_v62  ;;  %v10620_v46 = vmul.f32 0.5, %v10478_v54  ;;  %v10623_v4 = vmul.f32 0.70710677, %v10602_v11  ;;  %v4161_v23 = vmul.f32 %v4160_v26, %v10556_v32 }
 0x5f0   :  { %v6780_v9 = vpop.eup %6779  ;;  %v10627_v20 = vmul.f32 0.5, %v10471_v58  ;;  %v4148_v7 = vmul.f32 %v4147_v24, %v10556_v32  ;;  %v6299_v6 = vadd.f32 %v10614_v34, %v6298_v19  ;;  %v5287_v44 = vmul.f32 %v5286_v56, %v10490_v38 }
 0x5f1   :  { %4809 = vmatmul.f32.gmra.mxu2 %v4709_v61  ;;  %v4124_v48 = vmul.f32 %v6780_v9, %v10589_v27  ;;  %v5326_v50 = vadd.f32 0.05243302, %v5325_v37  ;;  %v10633_v54 = vadd.f32 1.0, %v4161_v23  ;;  %v10635_v52 = vmin.f32 %v4180_v49, 16.0 }
 0x5f2   :  { %v5363_v2 = vmul.f32 %v5362_v14, %v10576_v55  ;;  %v4111_v22 = vadd.f32 1.1283791, %v4110_v13  ;;  %6394 = vst [vmem:[#allocation17] sm:$0xff] %v6299_v6  ;;  %v5218_v58 = vmul.f32 %v5217_v17, %v10318_v47  ;;  %v4132_v62 = vand.u32 2147483647, %v10589_v27 }
 0x5f3   :  { %v4125_v21 = vsub.f32 1.0, %v4124_v48  ;;  %v4134_v36 = vand.u32 2147483648, %v10589_v27  ;;  %v5399_v24 = vmul.f32 %v10623_v4, %v10623_v4  ;;  %6781 = vrcp.f32 %v10633_v54 }
 0x5f4   :  { %vm4129_vm0 = vweird.f32 %v6780_v9  ;;  %v4149_v37 = vadd.f32 0.18741608, %v4148_v7  ;;  %v5219_v26 = vadd.f32 0.4994258, %v5218_v58  ;;  %v4798_v19 = vpop.f32.mrf.mxu2  ;;  %v5288_v49 = vadd.f32 0.18741608, %v5287_v44  ;;  %v2813_v58 = vpop.xlane.xlu1 %2812 }
 0x5f5   :  { %v4126_v56 = vmul.f32 %v6780_v9, %v4125_v21  ;;  %v5327_v61 = vmul.f32 %v5326_v50, %v10522_v3  ;;  %v10646_v14 = vadd.f32 %v10273_v15, %v4798_v19  ;;  %v4182_v13 = vmul.f32 2.1237322e-06, %v10635_v52 }
 0x5f6   :  { %v5364_v17 = vadd.f32 0.0036580483, %v5363_v2  ;;  %vm4128_vm1 = vweird.f32 %v10589_v27  ;;  %v5220_v48 = vmul.f32 %v5219_v26, %v10318_v47  ;;  %v4135_v6 = vor.u32 1.1754944e-38, %v4134_v36 }
 0x5f7   :  { %12281 = vst [vmem:[#allocation24_spill] sm:$0xff] %v10646_v14  ;;  %v4127_v23 = vadd.f32 %v6780_v9, %v4126_v56  ;;  %vm4130_vm2 = vmor %vm4128_vm1, %vm4129_vm0  ;;  %v10651_v21 = vmin.f32 %v5399_v24, 16.0  ;;  %v10654_v7 = vmul.f32 0.70710677, %v10646_v14  ;;  %v4193_v44 = vmul.f32 3.8918573e-05, %v10635_v52 }
 0x5f8   :  { %v4112_v15 = vmul.f32 %v4111_v22, %v10482_v0  ;;  %vm4133_vm3 = vcmp.eq.f32.partialorder %v4132_v62, 8.507059e+37  ;;  %v4150_v2 = vmul.f32 %v4149_v37, %v10556_v32  ;;  %v10659_v19 = vadd.f32 1.0, %v5220_v48 }
 0x5f9   :  { %v4131_v50 = vsel %vm4130_vm2, %v6780_v9, %v4127_v23  ;;  %v6782_v56 = vpop.eup %6781  ;;  %v5439_v47 = vmul.f32 %v10654_v7, %v10654_v7  ;;  %v4183_v36 = vadd.f32 0.00028619796, %v4182_v13  ;;  %v10664_v24 = vmul.f32 %v5288_v49, %v10490_v38 }
 0x5fa   :  { %v4136_v27 = vsel %vm4133_vm3, %v4135_v6, %v4131_v50  ;;  %v10666_v26 = vadd.f32 0.18741608, %v5327_v61  ;;  %v4164_v0 = vmul.f32 %v6782_v56, %v10633_v54  ;;  %v5401_v9 = vmul.f32 2.1237322e-06, %v10651_v21 }
 0x5fb   :  { %v4137_v1 = vmul.f32 %v4136_v27, %v4112_v15  ;;  %v2855_v32 = vmul.f32 0.015625, %v2813_v58  ;;  %6783 = vrcp.f32 %v10659_v19  ;;  %v4194_v22 = vadd.f32 0.001143296, %v4193_v44 }
 0x5fc   :  { %v3335_v37 = vmul.f32 0.5, %v10513_v42  ;;  %v4165_v23 = vsub.f32 1.0, %v4164_v0  ;;  %v4174_v13 = vand.u32 2147483648, %v10633_v54  ;;  %v5365_v49 = vmul.f32 %v5364_v17, %v10576_v55 }
 0x5fd   :  { %v6499_v62 = vclamps-f32 %v4137_v1, 1.0  ;;  %v4151_v48 = vadd.f32 1.1283791, %v4150_v2  ;;  %v10674_v61 = vmin.f32 %v5439_v47, 16.0  ;;  %v4184_v6 = vmul.f32 %v4183_v36, %v10635_v52 }
 0x5fe   :  { %v4166_v50 = vmul.f32 %v6782_v56, %v4165_v23  ;;  %vm4169_vm5 = vweird.f32 %v6782_v56  ;;  %v4172_v58 = vand.u32 2147483647, %v10633_v54  ;;  %v5402_v27 = vadd.f32 0.00028619796, %v5401_v9 }
 0x5ff   :  { %v4678_v15 = vadd.f32 1.0, %v6499_v62  ;;  %vm4168_vm6 = vweird.f32 %v10633_v54  ;;  %v10679_v1 = vadd.f32 1e-05, %v2855_v32  ;;  %v4195_v42 = vmul.f32 %v4194_v22, %v10635_v52 }
 0x600   :  { %v4167_v17 = vadd.f32 %v6782_v56, %v4166_v50  ;;  %v4175_v2 = vor.u32 1.1754944e-38, %v4174_v13  ;;  %v5252_v47 = vmul.f32 3.8918573e-05, %v10374_v40  ;;  %v4152_v36 = vmul.f32 %v4151_v48, %v10528_v28  ;;  %vm4170_vm7 = vmor %vm4168_vm6, %vm4169_vm5 }
 0x601   :  { %v4710_v44 = vmul.f32 %v4678_v15, %v10627_v20  ;;  %v6784_v0 = vpop.eup %6783  ;;  %v5441_v62 = vmul.f32 2.1237322e-06, %v10674_v61  ;;  %v4185_v23 = vadd.f32 0.0036580483, %v4184_v6  ;;  %v4196_v9 = vadd.f32 0.014752088, %v4195_v42 }
 0x602   :  { %v4171_v54 = vsel %vm4170_vm7, %v6782_v56, %v4167_v17  ;;  %vm4173_vm8 = vcmp.eq.f32.partialorder %v4172_v58, 8.507059e+37  ;;  %v5223_v32 = vmul.f32 %v6784_v0, %v10659_v19  ;;  %v5253_v22 = vadd.f32 0.001143296, %v5252_v47 }
 0x603   :  { %4812 = vmatmul.f32.gmra.mxu2 %v4710_v44  ;;  %v5403_v20 = vmul.f32 %v5402_v27, %v10651_v21  ;;  %v4176_v15 = vsel %vm4173_vm8, %v4175_v2, %v4171_v54  ;;  %6785 = vrsqrt.f32 %v10679_v1  ;;  %v5231_v13 = vand.u32 2147483647, %v10659_v19 }
 0x604   :  { %v4177_v50 = vmul.f32 %v4176_v15, %v4152_v36  ;;  %v5224_v28 = vsub.f32 1.0, %v5223_v32  ;;  %v4197_v48 = vmul.f32 %v4196_v9, %v10635_v52  ;;  %v5254_v6 = vmul.f32 %v5253_v22, %v10374_v40 }
 0x605   :  { %vm5228_vm9 = vweird.f32 %v6784_v0  ;;  %v5233_v56 = vand.u32 2147483648, %v10659_v19  ;;  %v5442_v58 = vadd.f32 0.00028619796, %v5441_v62  ;;  %v4186_v42 = vmul.f32 %v4185_v23, %v10635_v52 }
 0x606   :  { %v6500_v44 = vclamps-f32 %v4177_v50, 1.0  ;;  %v5225_v17 = vmul.f32 %v6784_v0, %v5224_v28  ;;  %v4198_v27 = vadd.f32 0.112945676, %v4197_v48  ;;  %v5255_v2 = vadd.f32 0.014752088, %v5254_v6  ;;  %v2630_v50 = vpop.xlane.xlu1 %2629 }
 0x607   :  { %v5366_v47 = vadd.f32 0.05243302, %v5365_v49  ;;  %v5404_v54 = vadd.f32 0.0036580483, %v5403_v20  ;;  %vm5227_vm10 = vweird.f32 %v10659_v19  ;;  %v5292_v36 = vmul.f32 3.8918573e-05, %v10490_v38  ;;  %v2817_v19 = vpop.xlane.xlu2 %2816 }
 0x608   :  { %v4679_v32 = vadd.f32 1.0, %v6500_v44  ;;  %v5226_v9 = vadd.f32 %v6784_v0, %v5225_v17  ;;  %vm10696_vm11 = vcmp.eq.f32.partialorder %v5231_v13, 8.507059e+37  ;;  %v4199_v62 = vmul.f32 %v4198_v27, %v10635_v52  ;;  %vm5229_vm12 = vmor %vm5227_vm10, %vm5228_vm9  ;;  %v6301_v17 = vpop.f32.mrf.mxu3 }
 0x609   :  { %v10701_v15 = vpop.eup %6785  ;;  %v5234_v23 = vor.u32 1.1754944e-38, %v5233_v56  ;;  %v5443_v49 = vmul.f32 %v5442_v58, %v10674_v61  ;;  %v4187_v20 = vadd.f32 0.05243302, %v4186_v42  ;;  %v5256_v28 = vmul.f32 %v5255_v2, %v10374_v40 }
 0x60a   :  { %v4711_v48 = vmul.f32 %v4679_v32, %v3335_v37  ;;  %v5230_v6 = vsel %vm5229_vm12, %v6784_v0, %v5226_v9  ;;  %v4200_v13 = vadd.f32 0.4994258, %v4199_v62  ;;  %v2665_v44 = vmul.f32 0.015625, %v2630_v50 }
 0x60b   :  { %v5329_v27 = vmul.f32 %v10666_v26, %v10522_v3  ;;  %v5405_v8 = vmul.f32 %v5404_v54, %v10651_v21  ;;  %v5235_v56 = vsel %vm10696_vm11, %v5234_v23, %v5230_v6  ;;  %v5293_v14 = vadd.f32 0.001143296, %v5292_v36 }
 0x60c   :  { %4815 = vmatmul.f32.gmra.mxu2 %v4711_v48  ;;  %v5236_v58 = vmul.f32 %v5235_v56, %v10598_v16  ;;  %v4201_v42 = vmul.f32 %v4200_v13, %v10635_v52  ;;  %v2697_v37 = vsub.f32 %v9921_v51, %v2665_v44  ;;  %v6302_v0 = vadd.f32 %v10614_v34, %v6301_v17  ;;  %v2815_v16 = vpop.xlane.xlu0 %2814 }
 0x60d   :  { %v5290_v2 = vadd.f32 1.1283791, %v10664_v24  ;;  %v5367_v32 = vmul.f32 %v5366_v47, %v10576_v55  ;;  %v5444_v26 = vadd.f32 0.0036580483, %v5443_v49  ;;  %v4188_v54 = vmul.f32 %v4187_v20, %v10635_v52 }
 0x60e   :  { %v6520_v9 = vclamps-f32 %v5236_v58, 1.0  ;;  %v10718_v22 = vadd.f32 1.0, %v4201_v42  ;;  %v10722_v36 = vsel %vm2703_vm4, %v2697_v37, 0.0  ;;  %6395 = vst [vmem:[#allocation17 + $0x8] sm:$0xff] %v6302_v0  ;;  %v5257_v62 = vadd.f32 0.112945676, %v5256_v28 }
 0x60f   :  { %v5330_v51 = vadd.f32 1.1283791, %v5329_v27  ;;  %v5406_v23 = vadd.f32 0.05243302, %v5405_v8  ;;  %v3109_v24 = vmul.f32 %v10701_v15, %v10679_v1  ;;  %v2766_v47 = vmul.f32 %v10722_v36, %v10722_v36  ;;  %v2634_v8 = vpop.xlane.xlu2 %2633 }
 0x610   :  { %v4862_v49 = vmul.f32 0.5, %v10276_v30  ;;  %v6206_v20 = vadd.f32 1.0, %v6520_v9  ;;  %6787 = vrcp.f32 %v10718_v22  ;;  %v5294_v50 = vmul.f32 %v5293_v14, %v10490_v38  ;;  %v6304_v0 = vpop.f32.mrf.mxu3 }
 0x611   :  { %v10732_v48 = vmul.f32 %v5290_v2, %v10456_v43  ;;  %v5368_v6 = vadd.f32 0.18741608, %v5367_v32  ;;  %v4189_v28 = vadd.f32 0.18741608, %v4188_v54  ;;  %v2857_v13 = vmul.f32 0.015625, %v2817_v19  ;;  %2826 = vadd.xlane.f32.xlu1 %v2766_v47 }
 0x612   :  { %v6238_v44 = vmul.f32 %v6206_v20, %v4862_v49  ;;  %v5445_v17 = vmul.f32 %v5444_v26, %v10674_v61  ;;  %v2667_v27 = vmul.f32 0.015625, %v2634_v8  ;;  %v5258_v56 = vmul.f32 %v5257_v62, %v10374_v40  ;;  %v2819_v26 = vpop.xlane.xlu1 %2818 }
 0x613   :  { %v10737_v30 = vmul.f32 %v5330_v51, %v10494_v60  ;;  %v10740_v58 = vmul.f32 0.5, %v10533_v57  ;;  %v5407_v43 = vmul.f32 %v5406_v23, %v10651_v21  ;;  %v3110_v14 = vmul.f32 %v10701_v15, %v3109_v24 }
 0x614   :  { %6318 = vmatmul.f32.gmra.mxu3 %v6238_v44  ;;  %v10745_v19 = vmul.f32 0.5, %v10580_v33  ;;  %v2699_v42 = vsub.f32 %v9947_v10, %v2667_v27  ;;  %v5259_v37 = vadd.f32 0.4994258, %v5258_v56  ;;  %v5295_v2 = vadd.f32 0.014752088, %v5294_v50  ;;  %v2632_v20 = vpop.xlane.xlu0 %2631 }
 0x615   :  { %v10749_v32 = vmul.f32 0.5, %v10602_v11  ;;  %v10751_v60 = vadd.f32 1e-05, %v2857_v13  ;;  %v2856_v57 = vmul.f32 0.015625, %v2815_v16  ;;  %v6305_v54 = vadd.f32 %v10614_v34, %v6304_v0 }
 0x616   :  { %v6788_v9 = vpop.eup %6787  ;;  %v5369_v62 = vmul.f32 %v5368_v6, %v10576_v55  ;;  %v5446_v51 = vadd.f32 0.05243302, %v5445_v17  ;;  %v4190_v33 = vmul.f32 %v4189_v28, %v10635_v52  ;;  %v5260_v10 = vmul.f32 %v5259_v37, %v10374_v40 }
 0x617   :  { %v5408_v23 = vadd.f32 0.18741608, %v5407_v43  ;;  %v3111_v24 = vmul.f32 0.5, %v3110_v14  ;;  %v4204_v47 = vmul.f32 %v6788_v9, %v10718_v22  ;;  %v10760_v11 = vsel %vm2703_vm4, %v2699_v42, 0.0  ;;  %6396 = vst [vmem:[#allocation17 + $0x10] sm:$0xff] %v6305_v54 }
 0x618   :  { %v10762_v16 = vadd.f32 1.0, %v5260_v10  ;;  %v2858_v49 = vmul.f32 0.015625, %v2819_v26  ;;  %v5296_v50 = vmul.f32 %v5295_v2, %v10490_v38  ;;  %v5332_v6 = vmul.f32 3.8918573e-05, %v10522_v3 }
 0x619   :  { %v4205_v52 = vsub.f32 1.0, %v4204_v47  ;;  %6789 = vrsqrt.f32 %v10751_v60  ;;  %v10767_v40 = vadd.f32 1e-05, %v2856_v57  ;;  %v2768_v28 = vmul.f32 %v10760_v11, %v10760_v11 }
 0x61a   :  { %v5447_v13 = vmul.f32 %v5446_v51, %v10674_v61  ;;  %v4191_v8 = vadd.f32 1.1283791, %v4190_v33  ;;  %v4214_v44 = vand.u32 2147483648, %v10718_v22  ;;  %6791 = vrcp.f32 %v10762_v16 }
 0x61b   :  { %v4206_v17 = vmul.f32 %v6788_v9, %v4205_v52  ;;  %vm4209_vm13 = vweird.f32 %v6788_v9  ;;  %v4212_v27 = vand.u32 2147483647, %v10718_v22  ;;  %2830 = vadd.xlane.f32.xlu0 %v2768_v28  ;;  %v2666_v56 = vmul.f32 0.015625, %v2632_v20 }
 0x61c   :  { %v5409_v43 = vmul.f32 %v5408_v23, %v10651_v21  ;;  %v10776_v14 = vadd.f32 1e-05, %v2858_v49  ;;  %v5297_v42 = vadd.f32 0.112945676, %v5296_v50  ;;  %v5333_v37 = vadd.f32 0.001143296, %v5332_v6  ;;  %v6307_v52 = vpop.f32.mrf.mxu3 }
 0x61d   :  { %v3112_v0 = vsub.f32 1.5, %v3111_v24  ;;  %v4207_v2 = vadd.f32 %v6788_v9, %v4206_v17  ;;  %vm4208_vm14 = vweird.f32 %v10718_v22  ;;  %6793 = vrsqrt.f32 %v10767_v40 }
 0x61e   :  { %v10780_v57 = vadd.f32 1.1283791, %v5369_v62  ;;  %v5448_v26 = vadd.f32 0.18741608, %v5447_v13  ;;  %vm4210_vm15 = vmor %vm4208_vm14, %vm4209_vm13  ;;  %v4215_v54 = vor.u32 1.1754944e-38, %v4214_v44  ;;  %v5298_v51 = vmul.f32 %v5297_v42, %v10490_v38  ;;  %v2636_v42 = vpop.xlane.xlu1 %2635 }
 0x61f   :  { %v10783_v33 = vpop.eup %6789  ;;  %v4192_v10 = vmul.f32 %v4191_v8, %v10595_v35  ;;  %v4211_v23 = vsel %vm4210_vm15, %v6788_v9, %v4207_v2  ;;  %vm4213_vm0 = vcmp.eq.f32.partialorder %v4212_v27, 8.507059e+37  ;;  %v2698_v24 = vsub.f32 %v9944_v41, %v2666_v56 }
 0x620   :  { %v6792_v47 = vpop.eup %6791  ;;  %vm3115_vm1 = vweird.f32 %v10701_v15  ;;  %v4216_v22 = vsel %vm4213_vm0, %v4215_v54, %v4211_v23  ;;  %6795 = vrsqrt.f32 %v10776_v14  ;;  %v5334_v62 = vmul.f32 %v5333_v37, %v10522_v3  ;;  %v2823_v54 = vpop.xlane.xlu2 %2822 }
 0x621   :  { %v5410_v49 = vadd.f32 1.1283791, %v5409_v43  ;;  %v10791_v20 = vmul.f32 %v10701_v15, %v3112_v0  ;;  %v4217_v50 = vmul.f32 %v4216_v22, %v4192_v10  ;;  %v5263_v6 = vmul.f32 %v6792_v47, %v10762_v16 }
 0x622   :  { %vm3114_vm2 = vweird.f32 %v10679_v1  ;;  %v5449_v35 = vmul.f32 %v5448_v26, %v10674_v61  ;;  %v3129_v41 = vmul.f32 %v10783_v33, %v10751_v60  ;;  %v5299_v9 = vadd.f32 0.4994258, %v5298_v51 }
 0x623   :  { %v5372_v28 = vmul.f32 3.8918573e-05, %v10576_v55  ;;  %v10799_v13 = vpop.eup %6793  ;;  %v6501_v8 = vclamps-f32 %v4217_v50, 1.0  ;;  %v5264_v44 = vsub.f32 1.0, %v5263_v6  ;;  %v5271_v17 = vand.u32 2147483647, %v10762_v16  ;;  %vm10838_vm8 = vmor %vm3114_vm2, %vm3115_vm1 }
 0x624   :  { %v10804_v27 = vsel %vm2703_vm4, %v2698_v24, 0.0  ;;  %v5273_v56 = vand.u32 2147483648, %v10762_v16  ;;  %v5300_v43 = vmul.f32 %v5299_v9, %v10490_v38  ;;  %v5335_v0 = vadd.f32 0.014752088, %v5334_v62  ;;  %v2821_v38 = vpop.xlane.xlu0 %2820 }
 0x625   :  { %v2767_v37 = vmul.f32 %v10804_v27, %v10804_v27  ;;  %v4680_v2 = vadd.f32 1.0, %v6501_v8  ;;  %v5265_v26 = vmul.f32 %v6792_v47, %v5264_v44  ;;  %vm5268_vm3 = vweird.f32 %v6792_v47 }
 0x626   :  { %v6308_v51 = vadd.f32 %v10614_v34, %v6307_v52  ;;  %v10811_v10 = vpop.eup %6795  ;;  %v3130_v23 = vmul.f32 %v10783_v33, %v3129_v41  ;;  %v3119_v24 = vmul.f32 %v10799_v13, %v10767_v40  ;;  %v10816_v22 = vadd.f32 1.0, %v5300_v43 }
 0x627   :  { %2828 = vadd.xlane.f32.xlu2 %v2767_v37  ;;  %v5373_v50 = vadd.f32 0.001143296, %v5372_v28  ;;  %v4712_v62 = vmul.f32 %v4680_v2, %v10745_v19  ;;  %v5266_v6 = vadd.f32 %v6792_v47, %v5265_v26  ;;  %vm5267_vm5 = vweird.f32 %v10762_v16 }
 0x628   :  { %v2668_v9 = vmul.f32 0.015625, %v2636_v42  ;;  %6397 = vst [vmem:[#allocation17 + $0x18] sm:$0xff] %v6308_v51  ;;  %vm5269_vm6 = vmor %vm5267_vm5, %vm5268_vm3  ;;  %vm5272_vm7 = vcmp.eq.f32.partialorder %v5271_v17, 8.507059e+37  ;;  %v5274_v52 = vor.u32 1.1754944e-38, %v5273_v56  ;;  %v2860_v41 = vmul.f32 0.015625, %v2823_v54 }
 0x629   :  { %6797 = vrcp.f32 %v10816_v22  ;;  %4818 = vmatmul.f32.gmra.mxu2 %v4712_v62  ;;  %v5270_v8 = vsel %vm5269_vm6, %v6792_v47, %v5266_v6  ;;  %v3139_v44 = vmul.f32 %v10811_v10, %v10776_v14  ;;  %v2859_v28 = vmul.f32 0.015625, %v2821_v38  ;;  %v6310_v38 = vpop.f32.mrf.mxu3 }
 0x62a   :  { %v5336_v19 = vmul.f32 %v5335_v0, %v10522_v3  ;;  %v3131_v43 = vmul.f32 0.5, %v3130_v23  ;;  %v3120_v16 = vmul.f32 %v10799_v13, %v3119_v24  ;;  %v5275_v42 = vsel %vm5272_vm7, %v5274_v52, %v5270_v8 }
 0x62b   :  { %v5374_v37 = vmul.f32 %v5373_v50, %v10576_v55  ;;  %v10829_v17 = vmul.f32 %v10780_v57, %v10554_v29  ;;  %v10832_v56 = vmul.f32 %v5410_v49, %v10623_v4  ;;  %v5276_v0 = vmul.f32 %v5275_v42, %v10617_v53 }
 0x62c   :  { %v2700_v2 = vsub.f32 %v9963_v5, %v2668_v9  ;;  %v3117_v29 = vsel %vm10838_vm8, %v10701_v15, %v10791_v20  ;;  %v5450_v57 = vadd.f32 1.1283791, %v5449_v35  ;;  %v10848_v4 = vadd.f32 1e-05, %v2860_v41 }
 0x62d   :  { %v5337_v49 = vadd.f32 0.112945676, %v5336_v19  ;;  %vm3135_vm9 = vweird.f32 %v10783_v33  ;;  %v6521_v1 = vclamps-f32 %v5276_v0, 1.0  ;;  %v3140_v26 = vmul.f32 %v10811_v10, %v3139_v44 }
 0x62e   :  { %v10852_v54 = vadd.f32 1e-05, %v2859_v28  ;;  %v3132_v53 = vsub.f32 1.5, %v3131_v43  ;;  %v10854_v23 = vmul.f32 0.5, %v3120_v16  ;;  %v5375_v24 = vadd.f32 0.014752088, %v5374_v37 }
 0x62f   :  { %v6798_v51 = vpop.eup %6797  ;;  %v5338_v5 = vmul.f32 %v5337_v49, %v10522_v3  ;;  %vm3134_vm10 = vweird.f32 %v10751_v60  ;;  %v6207_v15 = vadd.f32 1.0, %v6521_v1  ;;  %v10861_v35 = vsel %vm2703_vm4, %v2700_v2, 0.0  ;;  %v12286_v49 = vld [vmem:[#allocation30_spill] sm:$0xff] }
 0x630   :  { %v5303_v20 = vmul.f32 %v6798_v51, %v10816_v22  ;;  %v5412_v50 = vmul.f32 3.8918573e-05, %v10651_v21  ;;  %6799 = vrsqrt.f32 %v10848_v4  ;;  %v2769_v6 = vmul.f32 %v10861_v35, %v10861_v35  ;;  %vm10898_vm14 = vmor %vm3134_vm10, %vm3135_vm9 }
 0x631   :  { %v5339_v62 = vadd.f32 0.4994258, %v5338_v5  ;;  %v5452_v9 = vmul.f32 3.8918573e-05, %v10674_v61  ;;  %v6239_v52 = vmul.f32 %v6207_v15, %v10586_v25  ;;  %v3141_v41 = vmul.f32 0.5, %v3140_v26 }
 0x632   :  { %v5304_v8 = vsub.f32 1.0, %v5303_v20  ;;  %6801 = vrsqrt.f32 %v10852_v54  ;;  %v5313_v45 = vand.u32 2147483648, %v10816_v22  ;;  %2832 = vadd.xlane.f32.xlu1 %v2769_v6  ;;  %v6311_v28 = vadd.f32 %v10614_v34, %v6310_v38 }
 0x633   :  { %v5340_v44 = vmul.f32 %v5339_v62, %v10522_v3  ;;  %v5376_v19 = vmul.f32 %v5375_v24, %v10576_v55  ;;  %6321 = vmatmul.f32.gmra.mxu3 %v6239_v52  ;;  %vm5308_vm4 = vweird.f32 %v6798_v51  ;;  %v5311_v16 = vand.u32 2147483647, %v10816_v22 }
 0x634   :  { %v5305_v43 = vmul.f32 %v6798_v51, %v5304_v8  ;;  %v5413_v42 = vadd.f32 0.001143296, %v5412_v50  ;;  %v10876_v25 = vmul.f32 %v10783_v33, %v3132_v53  ;;  %6398 = vst [vmem:[#allocation17 + $0x20] sm:$0xff] %v6311_v28  ;;  %v5453_v0 = vadd.f32 0.001143296, %v5452_v9 }
 0x635   :  { %v10878_v37 = vadd.f32 1.0, %v5340_v44  ;;  %v5377_v47 = vadd.f32 0.112945676, %v5376_v19  ;;  %vm5307_vm11 = vweird.f32 %v10816_v22  ;;  %v3239_v1 = vmul.f32 %v3117_v29, %v12286_v49 }
 0x636   :  { %v5306_v3 = vadd.f32 %v6798_v51, %v5305_v43  ;;  %v5414_v2 = vmul.f32 %v5413_v42, %v10651_v21  ;;  %v10883_v26 = vpop.eup %6799  ;;  %v10886_v5 = vmul.f32 %v5450_v57, %v10654_v7  ;;  %v3122_v53 = vsub.f32 1.5, %v10854_v23  ;;  %vm5309_vm12 = vmor %vm5307_vm11, %vm5308_vm4  ;;  %v6313_v23 = vpop.f32.mrf.mxu3 }
 0x637   :  { %v5314_v24 = vor.u32 1.1754944e-38, %v5313_v45  ;;  %6803 = vrcp.f32 %v10878_v37  ;;  %vm5312_vm13 = vcmp.eq.f32.partialorder %v5311_v16, 8.507059e+37  ;;  %v5378_v22 = vmul.f32 %v5377_v47, %v10576_v55 }
 0x638   :  { %v10891_v15 = vpop.eup %6801  ;;  %v5310_v20 = vsel %vm5309_vm12, %v6798_v51, %v5306_v3  ;;  %v5415_v38 = vadd.f32 0.014752088, %v5414_v2  ;;  %vm3124_vm15 = vweird.f32 %v10767_v40  ;;  %vm3125_vm0 = vweird.f32 %v10799_v13 }
 0x639   :  { %v3142_v29 = vsub.f32 1.5, %v3141_v41  ;;  %v5315_v57 = vsel %vm5312_vm13, %v5314_v24, %v5310_v20  ;;  %v5454_v51 = vmul.f32 %v5453_v0, %v10674_v61  ;;  %v3137_v50 = vsel %vm10898_vm14, %v10783_v33, %v10876_v25  ;;  %vm10942_vm5 = vmor %vm3124_vm15, %vm3125_vm0 }
 0x63a   :  { %v5316_v60 = vmul.f32 %v5315_v57, %v10732_v48  ;;  %v5379_v62 = vadd.f32 0.4994258, %v5378_v22  ;;  %v3272_v6 = vmul.f32 %v8987_v18, %v3239_v1  ;;  %vm3144_vm1 = vweird.f32 %v10776_v14  ;;  %v2825_v48 = vpop.xlane.xlu0 %2824 }
 0x63b   :  { %v3149_v9 = vmul.f32 %v10891_v15, %v10852_v54  ;;  %v6314_v52 = vadd.f32 %v10614_v34, %v6313_v23  ;;  %v5416_v41 = vmul.f32 %v5415_v38, %v10651_v21  ;;  %v5455_v8 = vadd.f32 0.014752088, %v5454_v51 }
 0x63c   :  { %v3123_v45 = vmul.f32 %v10799_v13, %v3122_v53  ;;  %v3159_v44 = vmul.f32 %v10883_v26, %v10848_v4  ;;  %v6522_v28 = vclamps-f32 %v5316_v60, 1.0  ;;  %v5380_v19 = vmul.f32 %v5379_v62, %v10576_v55 }
 0x63d   :  { %v6804_v43 = vpop.eup %6803  ;;  %v10921_v16 = vmul.f32 %v10811_v10, %v3142_v29  ;;  %vm3145_vm2 = vweird.f32 %v10811_v10  ;;  %6399 = vst [vmem:[#allocation17 + $0x28] sm:$0xff] %v6314_v52  ;;  %v5417_v42 = vadd.f32 0.112945676, %v5416_v41  ;;  %v5456_v47 = vmul.f32 %v5455_v8, %v10674_v61 }
 0x63e   :  { %v6208_v0 = vadd.f32 1.0, %v6522_v28  ;;  %v5343_v3 = vmul.f32 %v6804_v43, %v10878_v37  ;;  %v10926_v2 = vadd.f32 1.0, %v5380_v19  ;;  %v10929_v49 = vadd.f32 %v9001_v59, %v3272_v6  ;;  %v6316_v51 = vpop.f32.mrf.mxu3  ;;  %vm10963_vm6 = vmor %vm3144_vm1, %vm3145_vm2 }
 0x63f   :  { %v3150_v55 = vmul.f32 %v10891_v15, %v3149_v9  ;;  %v2861_v1 = vmul.f32 0.015625, %v2825_v48  ;;  %v5418_v53 = vmul.f32 %v5417_v42, %v10651_v21  ;;  %v5457_v24 = vadd.f32 0.112945676, %v5456_v47 }
 0x640   :  { %v3160_v20 = vmul.f32 %v10883_v26, %v3159_v44  ;;  %v6240_v22 = vmul.f32 %v6208_v0, %v10607_v12  ;;  %v5344_v38 = vsub.f32 1.0, %v5343_v3  ;;  %6805 = vrcp.f32 %v10926_v2 }
 0x641   :  { %vm5348_vm3 = vweird.f32 %v6804_v43  ;;  %v5351_v29 = vand.u32 2147483647, %v10878_v37  ;;  %v5353_v57 = vand.u32 2147483648, %v10878_v37  ;;  %v5419_v23 = vadd.f32 0.4994258, %v5418_v53 }
 0x642   :  { %6324 = vmatmul.f32.gmra.mxu3 %v6240_v22  ;;  %v5345_v12 = vmul.f32 %v6804_v43, %v5344_v38  ;;  %v6317_v62 = vadd.f32 %v10614_v34, %v6316_v51  ;;  %v5458_v6 = vmul.f32 %v5457_v24, %v10674_v61  ;;  %v10949_v9 = vmul.f32 0.70710677, %v10929_v49  ;;  %v11002_v51 = vld [vmem:[#allocation13] ss:$0 sm:$0xff] }
 0x643   :  { %v3127_v52 = vsel %vm10942_vm5, %v10799_v13, %v3123_v45  ;;  %v10954_v41 = vmul.f32 0.5, %v3150_v55  ;;  %v10956_v40 = vadd.f32 1e-05, %v2861_v1  ;;  %v5420_v8 = vmul.f32 %v5419_v23, %v10651_v21 }
 0x644   :  { %v5346_v44 = vadd.f32 %v6804_v43, %v5345_v12  ;;  %vm5347_vm7 = vweird.f32 %v10878_v37  ;;  %6400 = vst [vmem:[#allocation17 + $0x30] sm:$0xff] %v6317_v62  ;;  %v5459_v28 = vadd.f32 0.4994258, %v5458_v6  ;;  %v4220_v13 = vmul.f32 %v10949_v9, %v10949_v9 }
 0x645   :  { %v3147_v21 = vsel %vm10963_vm6, %v10811_v10, %v10921_v16  ;;  %v10974_v45 = vmul.f32 0.5, %v3160_v20  ;;  %vm5349_vm8 = vmor %vm5347_vm7, %vm5348_vm3  ;;  %v5354_v14 = vor.u32 1.1754944e-38, %v5353_v57  ;;  %v10977_v48 = vadd.f32 1.0, %v5420_v8 }
 0x646   :  { %v6806_v19 = vpop.eup %6805  ;;  %v5350_v42 = vsel %vm5349_vm8, %v6804_v43, %v5346_v44  ;;  %vm5352_vm9 = vcmp.eq.f32.partialorder %v5351_v29, 8.507059e+37  ;;  %v5460_v37 = vmul.f32 %v5459_v28, %v10674_v61  ;;  %v10980_v47 = vmin.f32 %v4220_v13, 16.0 }
 0x647   :  { %v3152_v0 = vsub.f32 1.5, %v10954_v41  ;;  %v5355_v3 = vsel %vm5352_vm9, %v5354_v14, %v5350_v42  ;;  %6807 = vrsqrt.f32 %v10956_v40  ;;  %v5383_v55 = vmul.f32 %v6806_v19, %v10926_v2  ;;  %v4801_v22 = vpop.f32.mrf.mxu2 }
 0x648   :  { %v5356_v1 = vmul.f32 %v5355_v3, %v10737_v30  ;;  %v5391_v53 = vand.u32 2147483647, %v10926_v2  ;;  %6809 = vrcp.f32 %v10977_v48  ;;  %v3240_v43 = vmul.f32 %v3127_v52, %v10051_v39 }
 0x649   :  { %v5384_v24 = vsub.f32 1.0, %v5383_v55  ;;  %v5393_v61 = vand.u32 2147483648, %v10926_v2  ;;  %v10990_v20 = vadd.f32 1.0, %v5460_v37  ;;  %v3241_v38 = vmul.f32 %v3137_v50, %v9994_v63 }
 0x64a   :  { %v6523_v30 = vclamps-f32 %v5356_v1, 1.0  ;;  %vm5388_vm10 = vweird.f32 %v6806_v19  ;;  %v4222_v29 = vmul.f32 2.1237322e-06, %v10980_v47  ;;  %v4233_v57 = vmul.f32 3.8918573e-05, %v10980_v47 }
 0x64b   :  { %v5385_v39 = vmul.f32 %v6806_v19, %v5384_v24  ;;  %v5431_v23 = vand.u32 2147483647, %v10977_v48  ;;  %6811 = vrcp.f32 %v10990_v20  ;;  %v11005_v60 = vadd.f32 %v11002_v51, %v4801_v22 }
 0x64c   :  { %v6209_v7 = vadd.f32 1.0, %v6523_v30  ;;  %vm5387_vm4 = vweird.f32 %v10926_v2  ;;  %vm11008_vm11 = vcmp.eq.f32.partialorder %v5391_v53, 8.507059e+37  ;;  %v3273_v33 = vmul.f32 %v8987_v18, %v3240_v43 }
 0x64d   :  { %v11013_v25 = vpop.eup %6807  ;;  %v5386_v50 = vadd.f32 %v6806_v19, %v5385_v39  ;;  %v5394_v12 = vor.u32 1.1754944e-38, %v5393_v61  ;;  %v5433_v62 = vand.u32 2147483648, %v10977_v48  ;;  %v4223_v6 = vadd.f32 0.00028619796, %v4222_v29  ;;  %vm5389_vm12 = vmor %vm5387_vm4, %vm5388_vm10 }
 0x64e   :  { %v6810_v52 = vpop.eup %6809  ;;  %v6241_v8 = vmul.f32 %v6209_v7, %v10620_v46  ;;  %vm5427_vm13 = vweird.f32 %v10977_v48  ;;  %v4234_v2 = vadd.f32 0.001143296, %v4233_v57  ;;  %v3274_v44 = vmul.f32 %v8987_v18, %v3241_v38 }
 0x64f   :  { %v5390_v28 = vsel %vm5389_vm12, %v6806_v19, %v5386_v50  ;;  %v5423_v13 = vmul.f32 %v6810_v52, %v10977_v48  ;;  %vm11021_vm14 = vcmp.eq.f32.partialorder %v5431_v23, 8.507059e+37  ;;  %v11026_v42 = vmul.f32 0.70710677, %v11005_v60 }
 0x650   :  { %6327 = vmatmul.f32.gmra.mxu3 %v6241_v8  ;;  %v5395_v46 = vsel %vm11008_vm11, %v5394_v12, %v5390_v28  ;;  %v4224_v37 = vmul.f32 %v4223_v6, %v10980_v47  ;;  %v4235_v3 = vmul.f32 %v4234_v2, %v10980_v47  ;;  %v11033_v55 = vadd.f32 %v9001_v59, %v3273_v33 }
 0x651   :  { %v6812_v19 = vpop.eup %6811  ;;  %v5396_v1 = vmul.f32 %v5395_v46, %v10829_v17  ;;  %v5424_v53 = vsub.f32 1.0, %v5423_v13  ;;  %v5434_v43 = vor.u32 1.1754944e-38, %v5433_v62  ;;  %vm5467_vm15 = vweird.f32 %v10990_v20 }
 0x652   :  { %vm5428_vm0 = vweird.f32 %v6810_v52  ;;  %v5463_v24 = vmul.f32 %v6812_v19, %v10990_v20  ;;  %v4225_v61 = vadd.f32 0.0036580483, %v4224_v37  ;;  %v4236_v22 = vadd.f32 0.014752088, %v4235_v3 }
 0x653   :  { %v6524_v38 = vclamps-f32 %v5396_v1, 1.0  ;;  %v5425_v30 = vmul.f32 %v6810_v52, %v5424_v53  ;;  %v5479_v29 = vmul.f32 %v11026_v42, %v11026_v42  ;;  %v11041_v57 = vadd.f32 %v9001_v59, %v3274_v44  ;;  %vm5429_vm1 = vmor %vm5427_vm13, %vm5428_vm0 }
 0x654   :  { %v5464_v39 = vsub.f32 1.0, %v5463_v24  ;;  %v5471_v17 = vand.u32 2147483647, %v10990_v20  ;;  %v4237_v23 = vmul.f32 %v4236_v22, %v10980_v47  ;;  %v11046_v7 = vmul.f32 0.70710677, %v11033_v55 }
 0x655   :  { %v6210_v63 = vadd.f32 1.0, %v6524_v38  ;;  %v5426_v33 = vadd.f32 %v6810_v52, %v5425_v30  ;;  %v5473_v50 = vand.u32 2147483648, %v10990_v20  ;;  %v4226_v12 = vmul.f32 %v4225_v61, %v10980_v47 }
 0x656   :  { %v5465_v62 = vmul.f32 %v6812_v19, %v5464_v39  ;;  %vm5468_vm2 = vweird.f32 %v6812_v19  ;;  %v4238_v6 = vadd.f32 0.112945676, %v4237_v23  ;;  %v4260_v8 = vmul.f32 %v11046_v7, %v11046_v7 }
 0x657   :  { %v6242_v2 = vmul.f32 %v6210_v63, %v10740_v58  ;;  %v5430_v44 = vsel %vm5429_vm1, %v6810_v52, %v5426_v33  ;;  %v11056_v28 = vmin.f32 %v5479_v29, 16.0  ;;  %v11059_v13 = vmul.f32 0.70710677, %v11041_v57  ;;  %vm5469_vm5 = vmor %vm5467_vm15, %vm5468_vm2 }
 0x658   :  { %v5435_v46 = vsel %vm11021_vm14, %v5434_v43, %v5430_v44  ;;  %v5466_v37 = vadd.f32 %v6812_v19, %v5465_v62  ;;  %vm5472_vm3 = vcmp.eq.f32.partialorder %v5471_v17, 8.507059e+37  ;;  %v4239_v48 = vmul.f32 %v4238_v6, %v10980_v47 }
 0x659   :  { %6330 = vmatmul.f32.gmra.mxu3 %v6242_v2  ;;  %v5436_v3 = vmul.f32 %v5435_v46, %v10832_v56  ;;  %v5474_v58 = vor.u32 1.1754944e-38, %v5473_v50  ;;  %v4227_v52 = vadd.f32 0.05243302, %v4226_v12  ;;  %v4804_v1 = vpop.f32.mrf.mxu2  ;;  %v11067_v53 = vmin.f32 %v4260_v8, 16.0 }
 0x65a   :  { %v5470_v24 = vsel %vm5469_vm5, %v6812_v19, %v5466_v37  ;;  %v4240_v61 = vadd.f32 0.4994258, %v4239_v48  ;;  %v11070_v14 = vadd.f32 %v11002_v51, %v4804_v1  ;;  %v4300_v43 = vmul.f32 %v11059_v13, %v11059_v13  ;;  %v12297_v37 = vld [vmem:[#allocation24_spill] sm:$0xff] }
 0x65b   :  { %v6525_v22 = vclamps-f32 %v5436_v3, 1.0  ;;  %v5475_v38 = vsel %vm5472_vm3, %v5474_v58, %v5470_v24  ;;  %v5481_v56 = vmul.f32 2.1237322e-06, %v11056_v28  ;;  %v4262_v20 = vmul.f32 2.1237322e-06, %v11067_v53 }
 0x65c   :  { %v3153_v30 = vmul.f32 %v10891_v15, %v3152_v0  ;;  %vm3155_vm7 = vweird.f32 %v10891_v15  ;;  %v5476_v19 = vmul.f32 %v5475_v38, %v10886_v5  ;;  %v4241_v29 = vmul.f32 %v4240_v61, %v10980_v47 }
 0x65d   :  { %v3169_v39 = vmul.f32 %v11013_v25, %v10956_v40  ;;  %v6211_v17 = vadd.f32 1.0, %v6525_v22  ;;  %v4228_v23 = vmul.f32 %v4227_v52, %v10980_v47  ;;  %v11086_v63 = vmul.f32 0.70710677, %v11070_v14 }
 0x65e   :  { %v6526_v33 = vclamps-f32 %v5476_v19, 1.0  ;;  %v11088_v50 = vadd.f32 1.0, %v4241_v29  ;;  %v4263_v41 = vadd.f32 0.00028619796, %v4262_v20  ;;  %v11090_v0 = vmin.f32 %v4300_v43, 16.0 }
 0x65f   :  { %v6243_v12 = vmul.f32 %v6211_v17, %v10749_v32  ;;  %v5482_v5 = vadd.f32 0.00028619796, %v5481_v56  ;;  %v5519_v62 = vmul.f32 %v11086_v63, %v11086_v63  ;;  %v4273_v6 = vmul.f32 3.8918573e-05, %v11067_v53  ;;  %v12300_v56 = vld [vmem:[#allocation32_spill] sm:$0xff] }
 0x660   :  { %v3242_v8 = vmul.f32 %v3147_v21, %v10120_v31  ;;  %vm3154_vm8 = vweird.f32 %v10852_v54  ;;  %6813 = vrcp.f32 %v11088_v50  ;;  %v3162_v2 = vsub.f32 1.5, %v10974_v45 }
 0x661   :  { %6333 = vmatmul.f32.gmra.mxu3 %v6243_v12  ;;  %v6212_v32 = vadd.f32 1.0, %v6526_v33  ;;  %v4229_v44 = vadd.f32 0.18741608, %v4228_v23  ;;  %v11105_v46 = vmin.f32 %v5519_v62, 16.0  ;;  %v4868_v48 = vmul.f32 0.5, %v12297_v37  ;;  %vm11110_vm9 = vmor %vm3154_vm8, %vm3155_vm7 }
 0x662   :  { %v4264_v31 = vmul.f32 %v4263_v41, %v11067_v53  ;;  %v4274_v10 = vadd.f32 0.001143296, %v4273_v6  ;;  %v4302_v54 = vmul.f32 2.1237322e-06, %v11090_v0  ;;  %v3157_v16 = vsel %vm11110_vm9, %v10891_v15, %v3153_v30 }
 0x663   :  { %v3170_v21 = vmul.f32 %v11013_v25, %v3169_v39  ;;  %v5483_v45 = vmul.f32 %v5482_v5, %v11056_v28  ;;  %v5521_v3 = vmul.f32 2.1237322e-06, %v11105_v46  ;;  %v4313_v24 = vmul.f32 3.8918573e-05, %v11090_v0 }
 0x664   :  { %v4265_v58 = vadd.f32 0.0036580483, %v4264_v31  ;;  %v4275_v52 = vmul.f32 %v4274_v10, %v11067_v53  ;;  %v4303_v1 = vadd.f32 0.00028619796, %v4302_v54  ;;  %v11125_v61 = vmul.f32 %v10883_v26, %v3162_v2 }
 0x665   :  { %v6244_v43 = vmul.f32 %v6212_v32, %v4868_v48  ;;  %v4230_v22 = vmul.f32 %v4229_v44, %v10980_v47  ;;  %v3275_v15 = vmul.f32 %v8987_v18, %v3242_v8  ;;  %vm3165_vm6 = vweird.f32 %v10883_v26 }
 0x666   :  { %v6814_v38 = vpop.eup %6813  ;;  %v3243_v20 = vmul.f32 %v3157_v16, %v12300_v56  ;;  %v4276_v30 = vadd.f32 0.014752088, %v4275_v52  ;;  %v4304_v19 = vmul.f32 %v4303_v1, %v11090_v0  ;;  %v4314_v29 = vadd.f32 0.001143296, %v4313_v24  ;;  %v4807_v52 = vpop.f32.mrf.mxu2 }
 0x667   :  { %v3171_v39 = vmul.f32 0.5, %v3170_v21  ;;  %v5484_v17 = vadd.f32 0.0036580483, %v5483_v45  ;;  %v4244_v23 = vmul.f32 %v6814_v38, %v11088_v50  ;;  %v5522_v33 = vadd.f32 0.00028619796, %v5521_v3 }
 0x668   :  { %vm3164_vm10 = vweird.f32 %v10848_v4  ;;  %v4266_v47 = vmul.f32 %v4265_v58, %v11067_v53  ;;  %v4277_v41 = vmul.f32 %v4276_v30, %v11067_v53  ;;  %v4305_v12 = vadd.f32 0.0036580483, %v4304_v19 }
 0x669   :  { %v4315_v5 = vmul.f32 %v4314_v29, %v11090_v0  ;;  %6336 = vmatmul.f32.gmra.mxu3 %v6244_v43  ;;  %v4231_v62 = vadd.f32 1.1283791, %v4230_v22  ;;  %v4245_v6 = vsub.f32 1.0, %v4244_v23  ;;  %v4252_v8 = vand.u32 2147483647, %v11088_v50  ;;  %vm11166_vm14 = vmor %vm3164_vm10, %vm3165_vm6 }
 0x66a   :  { %v11139_v2 = vadd.f32 %v9001_v59, %v3275_v15  ;;  %vm4249_vm4 = vweird.f32 %v6814_v38  ;;  %v4254_v32 = vand.u32 2147483648, %v11088_v50  ;;  %v4278_v44 = vadd.f32 0.112945676, %v4277_v41 }
 0x66b   :  { %v4316_v37 = vadd.f32 0.014752088, %v4315_v5  ;;  %v4246_v48 = vmul.f32 %v6814_v38, %v4245_v6  ;;  %v5523_v34 = vmul.f32 %v5522_v33, %v11105_v46  ;;  %v4306_v31 = vmul.f32 %v4305_v12, %v11090_v0 }
 0x66c   :  { %v11145_v10 = vmul.f32 0.70710677, %v11139_v2  ;;  %v5485_v54 = vmul.f32 %v5484_v17, %v11056_v28  ;;  %v4267_v16 = vadd.f32 0.05243302, %v4266_v47  ;;  %v4279_v21 = vmul.f32 %v4278_v44, %v11067_v53 }
 0x66d   :  { %v4317_v45 = vmul.f32 %v4316_v37, %v11090_v0  ;;  %v4232_v3 = vmul.f32 %v4231_v62, %v10949_v9  ;;  %v4247_v58 = vadd.f32 %v6814_v38, %v4246_v48  ;;  %vm4248_vm11 = vweird.f32 %v11088_v50 }
 0x66e   :  { %v4340_v1 = vmul.f32 %v11145_v10, %v11145_v10  ;;  %vm4250_vm12 = vmor %vm4248_vm11, %vm4249_vm4  ;;  %vm4253_vm13 = vcmp.eq.f32.partialorder %v4252_v8, 8.507059e+37  ;;  %v4255_v24 = vor.u32 1.1754944e-38, %v4254_v32  ;;  %v4280_v43 = vadd.f32 0.4994258, %v4279_v21 }
 0x66f   :  { %v11156_v22 = vadd.f32 %v11002_v51, %v4807_v52  ;;  %v4251_v15 = vsel %vm4250_vm12, %v6814_v38, %v4247_v58  ;;  %v5524_v56 = vadd.f32 0.0036580483, %v5523_v34  ;;  %v4307_v30 = vadd.f32 0.05243302, %v4306_v31 }
 0x670   :  { %v4318_v19 = vadd.f32 0.112945676, %v4317_v45  ;;  %v4256_v9 = vsel %vm4253_vm13, %v4255_v24, %v4251_v15  ;;  %v4268_v29 = vmul.f32 %v4267_v16, %v11067_v53  ;;  %v4281_v50 = vmul.f32 %v4280_v43, %v11067_v53  ;;  %v12305_v24 = vld [vmem:[#allocation31_spill] sm:$0xff] }
 0x671   :  { %v11160_v17 = vmin.f32 %v4340_v1, 16.0  ;;  %v3172_v33 = vsub.f32 1.5, %v3171_v39  ;;  %v4257_v38 = vmul.f32 %v4256_v9, %v4232_v3  ;;  %v11171_v47 = vmul.f32 0.70710677, %v11156_v22 }
 0x672   :  { %v3167_v41 = vsel %vm11166_vm14, %v10883_v26, %v11125_v61  ;;  %v11177_v12 = vadd.f32 1.0, %v4281_v50  ;;  %v4319_v5 = vmul.f32 %v4318_v19, %v11090_v0  ;;  %v3276_v4 = vmul.f32 %v8987_v18, %v3243_v20 }
 0x673   :  { %v5486_v62 = vadd.f32 0.05243302, %v5485_v54  ;;  %v6502_v6 = vclamps-f32 %v4257_v38, 1.0  ;;  %v5525_v8 = vmul.f32 %v5524_v56, %v11105_v46  ;;  %v4308_v39 = vmul.f32 %v4307_v30, %v11090_v0 }
 0x674   :  { %vm3175_vm15 = vweird.f32 %v11013_v25  ;;  %v4269_v32 = vadd.f32 0.18741608, %v4268_v29  ;;  %6815 = vrcp.f32 %v11177_v12  ;;  %v4342_v44 = vmul.f32 2.1237322e-06, %v11160_v17  ;;  %v4810_v48 = vpop.f32.mrf.mxu2 }
 0x675   :  { %v11187_v26 = vmul.f32 %v11013_v25, %v3172_v33  ;;  %v3337_v61 = vmul.f32 0.5, %v10929_v49  ;;  %v4681_v37 = vadd.f32 1.0, %v6502_v6  ;;  %v5559_v20 = vmul.f32 %v11171_v47, %v11171_v47 }
 0x676   :  { %vm3174_vm0 = vweird.f32 %v10956_v40  ;;  %v4320_v34 = vadd.f32 0.4994258, %v4319_v5  ;;  %v11194_v31 = vadd.f32 %v11002_v51, %v4810_v48  ;;  %v11197_v54 = vadd.f32 %v9001_v59, %v3276_v4 }
 0x677   :  { %v5487_v16 = vmul.f32 %v5486_v62, %v11056_v28  ;;  %v4713_v21 = vmul.f32 %v4681_v37, %v3337_v61  ;;  %v5526_v45 = vadd.f32 0.05243302, %v5525_v8  ;;  %v4309_v3 = vadd.f32 0.18741608, %v4308_v39  ;;  %vm11202_vm1 = vmor %vm3174_vm0, %vm3175_vm15 }
 0x678   :  { %v4270_v40 = vmul.f32 %v4269_v32, %v11067_v53  ;;  %v4321_v58 = vmul.f32 %v4320_v34, %v11090_v0  ;;  %v11209_v52 = vmul.f32 0.70710677, %v11194_v31  ;;  %v4343_v1 = vadd.f32 0.00028619796, %v4342_v44 }
 0x679   :  { %v3244_v43 = vmul.f32 %v3167_v41, %v12305_v24  ;;  %v3177_v15 = vsel %vm11202_vm1, %v11013_v25, %v11187_v26  ;;  %4821 = vmatmul.f32.gmra.mxu2 %v4713_v21  ;;  %v11216_v56 = vmin.f32 %v5559_v20, 16.0  ;;  %v4353_v30 = vmul.f32 3.8918573e-05, %v11160_v17 }
 0x67a   :  { %v6816_v19 = vpop.eup %6815  ;;  %v11219_v53 = vadd.f32 1.0, %v4321_v58  ;;  %v5599_v9 = vmul.f32 %v11209_v52, %v11209_v52  ;;  %v4344_v29 = vmul.f32 %v4343_v1, %v11160_v17  ;;  %v11225_v50 = vmul.f32 0.70710677, %v11197_v54 }
 0x67b   :  { %v11228_v23 = vmul.f32 0.5, %v11033_v55  ;;  %v4284_v33 = vmul.f32 %v6816_v19, %v11177_v12  ;;  %v4310_v38 = vmul.f32 %v4309_v3, %v11090_v0  ;;  %v4354_v41 = vadd.f32 0.001143296, %v4353_v30 }
 0x67c   :  { %v11232_v5 = vadd.f32 0.18741608, %v5487_v16  ;;  %v11235_v4 = vmul.f32 %v5526_v45, %v11105_v46  ;;  %v4271_v62 = vadd.f32 1.1283791, %v4270_v40  ;;  %6817 = vrcp.f32 %v11219_v53 }
 0x67d   :  { %v4285_v6 = vsub.f32 1.0, %v4284_v33  ;;  %v4292_v8 = vand.u32 2147483647, %v11177_v12  ;;  %v11239_v39 = vmin.f32 %v5599_v9, 16.0  ;;  %v4345_v55 = vadd.f32 0.0036580483, %v4344_v29 }
 0x67e   :  { %v4294_v32 = vand.u32 2147483648, %v11177_v12  ;;  %v5561_v44 = vmul.f32 2.1237322e-06, %v11216_v56  ;;  %v4355_v0 = vmul.f32 %v4354_v41, %v11160_v17  ;;  %v4380_v61 = vmul.f32 %v11225_v50, %v11225_v50 }
 0x67f   :  { %v4286_v37 = vmul.f32 %v6816_v19, %v4285_v6  ;;  %vm4289_vm2 = vweird.f32 %v6816_v19  ;;  %v4311_v20 = vadd.f32 1.1283791, %v4310_v38  ;;  %v4346_v48 = vmul.f32 %v4345_v55, %v11160_v17 }
 0x680   :  { %v4272_v34 = vmul.f32 %v4271_v62, %v11046_v7  ;;  %v5601_v16 = vmul.f32 2.1237322e-06, %v11239_v39  ;;  %v4356_v21 = vadd.f32 0.014752088, %v4355_v0  ;;  %v11249_v45 = vmin.f32 %v4380_v61, 16.0 }
 0x681   :  { %v4287_v3 = vadd.f32 %v6816_v19, %v4286_v37  ;;  %vm4288_vm3 = vweird.f32 %v11177_v12  ;;  %vm4293_vm5 = vcmp.eq.f32.partialorder %v4292_v8, 8.507059e+37  ;;  %v4347_v40 = vadd.f32 0.05243302, %v4346_v48 }
 0x682   :  { %v6818_v58 = vpop.eup %6817  ;;  %vm4290_vm7 = vmor %vm4288_vm3, %vm4289_vm2  ;;  %v4295_v1 = vor.u32 1.1754944e-38, %v4294_v32  ;;  %v5562_v24 = vadd.f32 0.00028619796, %v5561_v44  ;;  %v4357_v30 = vmul.f32 %v4356_v21, %v11160_v17  ;;  %v4382_v9 = vmul.f32 2.1237322e-06, %v11249_v45 }
 0x683   :  { %v4291_v29 = vsel %vm4290_vm7, %v6816_v19, %v4287_v3  ;;  %v4312_v7 = vmul.f32 %v4311_v20, %v11059_v13  ;;  %v4324_v33 = vmul.f32 %v6818_v58, %v11219_v53  ;;  %v3277_v38 = vmul.f32 %v8987_v18, %v3244_v43 }
 0x684   :  { %v4296_v41 = vsel %vm4293_vm5, %v4295_v1, %v4291_v29  ;;  %v5602_v62 = vadd.f32 0.00028619796, %v5601_v16  ;;  %v4358_v12 = vadd.f32 0.112945676, %v4357_v30  ;;  %v4393_v6 = vmul.f32 3.8918573e-05, %v11249_v45 }
 0x685   :  { %v4297_v8 = vmul.f32 %v4296_v41, %v4272_v34  ;;  %v4325_v55 = vsub.f32 1.0, %v4324_v33  ;;  %v4348_v32 = vmul.f32 %v4347_v40, %v11160_v17  ;;  %v4383_v44 = vadd.f32 0.00028619796, %v4382_v9 }
 0x686   :  { %v5563_v0 = vmul.f32 %v5562_v24, %v11216_v56  ;;  %v4332_v19 = vand.u32 2147483647, %v11219_v53  ;;  %v4334_v13 = vand.u32 2147483648, %v11219_v53  ;;  %v4359_v61 = vmul.f32 %v4358_v12, %v11160_v17  ;;  %v4813_v20 = vpop.f32.mrf.mxu2 }
 0x687   :  { %v6503_v37 = vclamps-f32 %v4297_v8, 1.0  ;;  %v4326_v43 = vmul.f32 %v6818_v58, %v4325_v55  ;;  %vm4329_vm8 = vweird.f32 %v6818_v58  ;;  %v4384_v48 = vmul.f32 %v4383_v44, %v11249_v45 }
 0x688   :  { %vm4328_vm9 = vweird.f32 %v11219_v53  ;;  %v5603_v34 = vmul.f32 %v5602_v62, %v11239_v39  ;;  %v4360_v16 = vadd.f32 0.4994258, %v4359_v61  ;;  %v11267_v21 = vadd.f32 %v11002_v51, %v4813_v20 }
 0x689   :  { %v4682_v3 = vadd.f32 1.0, %v6503_v37  ;;  %v4327_v40 = vadd.f32 %v6818_v58, %v4326_v43  ;;  %v4349_v1 = vadd.f32 0.18741608, %v4348_v32  ;;  %v4394_v24 = vadd.f32 0.001143296, %v4393_v6  ;;  %vm4330_vm6 = vmor %vm4328_vm9, %vm4329_vm8 }
 0x68a   :  { %v5564_v30 = vadd.f32 0.0036580483, %v5563_v0  ;;  %vm4333_vm10 = vcmp.eq.f32.partialorder %v4332_v19, 8.507059e+37  ;;  %v4335_v9 = vor.u32 1.1754944e-38, %v4334_v13  ;;  %v4361_v29 = vmul.f32 %v4360_v16, %v11160_v17 }
 0x68b   :  { %v4714_v33 = vmul.f32 %v4682_v3, %v11228_v23  ;;  %v4331_v41 = vsel %vm4330_vm6, %v6818_v58, %v4327_v40  ;;  %v11272_v53 = vmul.f32 0.70710677, %v11267_v21  ;;  %v4385_v62 = vadd.f32 0.0036580483, %v4384_v48  ;;  %v12306_v58 = vld [vmem:[#allocation33_spill] sm:$0xff] }
 0x68c   :  { %v4336_v12 = vsel %vm4333_vm10, %v4335_v9, %v4331_v41  ;;  %v5604_v8 = vadd.f32 0.0036580483, %v5603_v34  ;;  %v11274_v55 = vadd.f32 1.0, %v4361_v29  ;;  %v11277_v32 = vadd.f32 %v9001_v59, %v3277_v38 }
 0x68d   :  { %4824 = vmatmul.f32.gmra.mxu2 %v4714_v33  ;;  %v4337_v6 = vmul.f32 %v4336_v12, %v4312_v7  ;;  %v4350_v44 = vmul.f32 %v4349_v1, %v11160_v17  ;;  %v5639_v0 = vmul.f32 %v11272_v53, %v11272_v53  ;;  %v4395_v23 = vmul.f32 %v4394_v24, %v11249_v45 }
 0x68e   :  { %v3245_v19 = vmul.f32 %v3177_v15, %v12306_v58  ;;  %v11290_v13 = vmul.f32 0.5, %v11005_v60  ;;  %v5489_v7 = vmul.f32 %v11232_v5, %v11056_v28  ;;  %6819 = vrcp.f32 %v11274_v55 }
 0x68f   :  { %v5565_v17 = vmul.f32 %v5564_v30, %v11216_v56  ;;  %v3339_v38 = vmul.f32 0.5, %v11041_v57  ;;  %v6504_v61 = vclamps-f32 %v4337_v6, 1.0  ;;  %v4386_v37 = vmul.f32 %v4385_v62, %v11249_v45 }
 0x690   :  { %v5528_v49 = vadd.f32 0.18741608, %v11235_v4  ;;  %v5605_v25 = vmul.f32 %v5604_v8, %v11239_v39  ;;  %v4396_v26 = vadd.f32 0.014752088, %v4395_v23  ;;  %v11301_v60 = vmul.f32 0.70710677, %v11277_v32 }
 0x691   :  { %v11304_v15 = vmul.f32 0.5, %v11070_v14  ;;  %v4683_v5 = vadd.f32 1.0, %v6504_v61  ;;  %v4351_v43 = vadd.f32 1.1283791, %v4350_v44  ;;  %v11306_v20 = vmin.f32 %v5639_v0, 16.0 }
 0x692   :  { %v5490_v48 = vadd.f32 1.1283791, %v5489_v7  ;;  %v4397_v57 = vmul.f32 %v4396_v26, %v11249_v45  ;;  %v4420_v34 = vmul.f32 %v11301_v60, %v11301_v60  ;;  %v3278_v4 = vmul.f32 %v8987_v18, %v3245_v19  ;;  %v4816_v19 = vpop.f32.mrf.mxu2 }
 0x693   :  { %v5566_v16 = vadd.f32 0.05243302, %v5565_v17  ;;  %v4715_v3 = vmul.f32 %v4683_v5, %v3339_v38  ;;  %v4372_v40 = vand.u32 2147483647, %v11274_v55  ;;  %v4387_v1 = vadd.f32 0.05243302, %v4386_v37 }
 0x694   :  { %v6820_v24 = vpop.eup %6819  ;;  %v5529_v14 = vmul.f32 %v5528_v49, %v11105_v46  ;;  %v5606_v30 = vadd.f32 0.05243302, %v5605_v25  ;;  %v4398_v9 = vadd.f32 0.112945676, %v4397_v57  ;;  %v11314_v29 = vmin.f32 %v4420_v34, 16.0 }
 0x695   :  { %4827 = vmatmul.f32.gmra.mxu2 %v4715_v3  ;;  %v4352_v33 = vmul.f32 %v4351_v43, %v11145_v10  ;;  %v4364_v41 = vmul.f32 %v6820_v24, %v11274_v55  ;;  %vm4368_vm4 = vweird.f32 %v11274_v55  ;;  %v5641_v62 = vmul.f32 2.1237322e-06, %v11306_v20 }
 0x696   :  { %v4399_v12 = vmul.f32 %v4398_v9, %v11249_v45  ;;  %v4422_v8 = vmul.f32 2.1237322e-06, %v11314_v29  ;;  %v4433_v6 = vmul.f32 3.8918573e-05, %v11314_v29  ;;  %v11324_v44 = vadd.f32 %v9001_v59, %v3278_v4 }
 0x697   :  { %v4365_v0 = vsub.f32 1.0, %v4364_v41  ;;  %vm11326_vm11 = vcmp.eq.f32.partialorder %v4372_v40, 8.507059e+37  ;;  %v4374_v10 = vand.u32 2147483648, %v11274_v55  ;;  %v4388_v58 = vmul.f32 %v4387_v1, %v11249_v45 }
 0x698   :  { %v4400_v7 = vadd.f32 0.4994258, %v4399_v12  ;;  %v11333_v17 = vadd.f32 %v11002_v51, %v4816_v19  ;;  %v4423_v38 = vadd.f32 0.00028619796, %v4422_v8  ;;  %v4434_v61 = vadd.f32 0.001143296, %v4433_v6 }
 0x699   :  { %v4366_v37 = vmul.f32 %v6820_v24, %v4365_v0  ;;  %vm4369_vm12 = vweird.f32 %v6820_v24  ;;  %v5642_v49 = vadd.f32 0.00028619796, %v5641_v62  ;;  %v5492_v25 = vmul.f32 3.8918573e-05, %v11056_v28 }
 0x69a   :  { %v4401_v26 = vmul.f32 %v4400_v7, %v11249_v45  ;;  %v11338_v5 = vmul.f32 0.70710677, %v11333_v17  ;;  %v4424_v43 = vmul.f32 %v4423_v38, %v11314_v29  ;;  %v11342_v57 = vmul.f32 0.70710677, %v11324_v44  ;;  %vm4370_vm13 = vmor %vm4368_vm4, %vm4369_vm12 }
 0x69b   :  { %v4367_v34 = vadd.f32 %v6820_v24, %v4366_v37  ;;  %v4375_v4 = vor.u32 1.1754944e-38, %v4374_v10  ;;  %v4435_v3 = vmul.f32 %v4434_v61, %v11314_v29  ;;  %v5493_v40 = vadd.f32 0.001143296, %v5492_v25 }
 0x69c   :  { %v4389_v1 = vadd.f32 0.18741608, %v4388_v58  ;;  %v11347_v9 = vadd.f32 1.0, %v4401_v26  ;;  %v5679_v41 = vmul.f32 %v11338_v5, %v11338_v5  ;;  %v4425_v62 = vadd.f32 0.0036580483, %v4424_v43 }
 0x69d   :  { %v4371_v12 = vsel %vm4370_vm13, %v6820_v24, %v4367_v34  ;;  %v5643_v8 = vmul.f32 %v5642_v49, %v11306_v20  ;;  %v4436_v6 = vadd.f32 0.014752088, %v4435_v3  ;;  %v5494_v0 = vmul.f32 %v5493_v40, %v11056_v28 }
 0x69e   :  { %v11354_v10 = vmul.f32 %v5490_v48, %v11026_v42  ;;  %v4376_v55 = vsel %vm11326_vm11, %v4375_v4, %v4371_v12  ;;  %6821 = vrcp.f32 %v11347_v9  ;;  %v4460_v58 = vmul.f32 %v11342_v57, %v11342_v57 }
 0x69f   :  { %v11361_v19 = vadd.f32 1.1283791, %v5529_v14  ;;  %v5567_v24 = vmul.f32 %v5566_v16, %v11216_v56  ;;  %v4377_v7 = vmul.f32 %v4376_v55, %v4352_v33  ;;  %v11364_v38 = vmin.f32 %v5679_v41, 16.0  ;;  %v2827_v55 = vpop.xlane.xlu1 %2826 }
 0x6a0   :  { %v5607_v61 = vmul.f32 %v5606_v30, %v11239_v39  ;;  %v4426_v42 = vmul.f32 %v4425_v62, %v11314_v29  ;;  %v4437_v48 = vmul.f32 %v4436_v6, %v11314_v29  ;;  %v5495_v23 = vadd.f32 0.014752088, %v5494_v0 }
 0x6a1   :  { %v6505_v37 = vclamps-f32 %v4377_v7, 1.0  ;;  %v5644_v49 = vadd.f32 0.0036580483, %v5643_v8  ;;  %v4390_v25 = vmul.f32 %v4389_v1, %v11249_v45  ;;  %v5681_v26 = vmul.f32 2.1237322e-06, %v11364_v38 }
 0x6a2   :  { %v4427_v14 = vadd.f32 0.05243302, %v4426_v42  ;;  %v4438_v43 = vadd.f32 0.112945676, %v4437_v48  ;;  %v5496_v16 = vmul.f32 %v5495_v23, %v11056_v28  ;;  %v11372_v33 = vmin.f32 %v4460_v58, 16.0  ;;  %v6319_v58 = vpop.f32.mrf.mxu3 }
 0x6a3   :  { %v11374_v34 = vadd.f32 0.18741608, %v5567_v24  ;;  %v3340_v30 = vmul.f32 0.5, %v11139_v2  ;;  %v4684_v4 = vadd.f32 1.0, %v6505_v37  ;;  %v5682_v3 = vadd.f32 0.00028619796, %v5681_v26 }
 0x6a4   :  { %v6822_v40 = vpop.eup %6821  ;;  %v4428_v41 = vmul.f32 %v4427_v14, %v11314_v29  ;;  %v4439_v62 = vmul.f32 %v4438_v43, %v11314_v29  ;;  %v5497_v45 = vadd.f32 0.112945676, %v5496_v16  ;;  %v4462_v1 = vmul.f32 2.1237322e-06, %v11372_v33  ;;  %v11383_v37 = vld [vmem:[#allocation16] ss:$0 sm:$0xff] }
 0x6a5   :  { %v5608_v12 = vadd.f32 0.18741608, %v5607_v61  ;;  %v4716_v8 = vmul.f32 %v4684_v4, %v3340_v30  ;;  %v4391_v6 = vadd.f32 1.1283791, %v4390_v25  ;;  %v4404_v0 = vmul.f32 %v6822_v40, %v11347_v9 }
 0x6a6   :  { %v5645_v24 = vmul.f32 %v5644_v49, %v11306_v20  ;;  %v5683_v2 = vmul.f32 %v5682_v3, %v11364_v38  ;;  %v4440_v7 = vadd.f32 0.4994258, %v4439_v62  ;;  %v2862_v42 = vmul.f32 0.015625, %v2827_v55 }
 0x6a7   :  { %4830 = vmatmul.f32.gmra.mxu2 %v4716_v8  ;;  %v4405_v48 = vsub.f32 1.0, %v4404_v0  ;;  %v4429_v23 = vadd.f32 0.18741608, %v4428_v41  ;;  %v6320_v26 = vadd.f32 %v11383_v37, %v6319_v58  ;;  %v5498_v61 = vmul.f32 %v5497_v45, %v11056_v28 }
 0x6a8   :  { %v4414_v25 = vand.u32 2147483648, %v11347_v9  ;;  %v5684_v14 = vadd.f32 0.0036580483, %v5683_v2  ;;  %v4441_v43 = vmul.f32 %v4440_v7, %v11314_v29  ;;  %v4463_v16 = vadd.f32 0.00028619796, %v4462_v1 }
 0x6a9   :  { %v4406_v49 = vmul.f32 %v6822_v40, %v4405_v48  ;;  %vm4409_vm14 = vweird.f32 %v6822_v40  ;;  %v4412_v30 = vand.u32 2147483647, %v11347_v9  ;;  %6401 = vst [vmem:[#allocation17 + $0x38] sm:$0xff] %v6320_v26  ;;  %v5499_v4 = vadd.f32 0.4994258, %v5498_v61 }
 0x6aa   :  { %v5646_v3 = vadd.f32 0.05243302, %v5645_v24  ;;  %v3341_v41 = vmul.f32 0.5, %v11197_v54  ;;  %v11391_v62 = vadd.f32 1.0, %v4441_v43  ;;  %v11393_v8 = vadd.f32 1e-05, %v2862_v42 }
 0x6ab   :  { %v4407_v45 = vadd.f32 %v6822_v40, %v4406_v49  ;;  %vm4408_vm15 = vweird.f32 %v11347_v9  ;;  %v4430_v0 = vmul.f32 %v4429_v23, %v11314_v29  ;;  %v5500_v1 = vmul.f32 %v5499_v4, %v11056_v28 }
 0x6ac   :  { %vm4410_vm0 = vmor %vm4408_vm15, %vm4409_vm14  ;;  %v4415_v55 = vor.u32 1.1754944e-38, %v4414_v25  ;;  %v5685_v58 = vmul.f32 %v5684_v14, %v11364_v38  ;;  %6823 = vrcp.f32 %v11391_v62  ;;  %v4464_v24 = vmul.f32 %v4463_v16, %v11372_v33  ;;  %v4819_v42 = vpop.f32.mrf.mxu2 }
 0x6ad   :  { %v4392_v54 = vmul.f32 %v4391_v6, %v11225_v50  ;;  %v4411_v2 = vsel %vm4410_vm0, %v6822_v40, %v4407_v45  ;;  %vm4413_vm1 = vcmp.eq.f32.partialorder %v4412_v30, 8.507059e+37  ;;  %v11402_v7 = vadd.f32 1.0, %v5500_v1 }
 0x6ae   :  { %v5647_v9 = vmul.f32 %v5646_v3, %v11306_v20  ;;  %v4416_v29 = vsel %vm4413_vm1, %v4415_v55, %v4411_v2  ;;  %6825 = vrsqrt.f32 %v11393_v8  ;;  %v11407_v28 = vadd.f32 %v11002_v51, %v4819_v42 }
 0x6af   :  { %v11410_v48 = vmul.f32 0.5, %v11156_v22  ;;  %v4417_v23 = vmul.f32 %v4416_v29, %v4392_v54  ;;  %v4431_v26 = vadd.f32 1.1283791, %v4430_v0  ;;  %6827 = vrcp.f32 %v11402_v7 }
 0x6b0   :  { %12309 = vst [vmem:[#allocation26_spill] sm:$0xff] %v11407_v28  ;;  %v11415_v50 = vmul.f32 %v11361_v19, %v11086_v63  ;;  %v5686_v40 = vadd.f32 0.05243302, %v5685_v58  ;;  %v4465_v6 = vadd.f32 0.0036580483, %v4464_v24  ;;  %v11420_v25 = vmul.f32 %v11374_v34, %v11216_v56 }
 0x6b1   :  { %v4473_v61 = vmul.f32 3.8918573e-05, %v11372_v33  ;;  %v6506_v51 = vclamps-f32 %v4417_v23, 1.0  ;;  %v11423_v22 = vmul.f32 0.5, %v11277_v32  ;;  %v4452_v14 = vand.u32 2147483647, %v11391_v62 }
 0x6b2   :  { %v6824_v43 = vpop.eup %6823  ;;  %v11427_v16 = vmul.f32 %v5608_v12, %v11239_v39  ;;  %v11429_v63 = vadd.f32 0.18741608, %v5647_v9  ;;  %v4454_v19 = vand.u32 2147483648, %v11391_v62  ;;  %v11433_v49 = vmul.f32 0.70710677, %v11407_v28 }
 0x6b3   :  { %v4685_v30 = vadd.f32 1.0, %v6506_v51  ;;  %v4432_v34 = vmul.f32 %v4431_v26, %v11301_v60  ;;  %v4444_v4 = vmul.f32 %v6824_v43, %v11391_v62  ;;  %vm4448_vm2 = vweird.f32 %v11391_v62 }
 0x6b4   :  { %v11438_v32 = vpop.eup %6825  ;;  %v5687_v3 = vmul.f32 %v5686_v40, %v11364_v38  ;;  %v5719_v12 = vmul.f32 %v11433_v49, %v11433_v49  ;;  %v4466_v45 = vmul.f32 %v4465_v6, %v11372_v33  ;;  %v4474_v0 = vadd.f32 0.001143296, %v4473_v61 }
 0x6b5   :  { %v6828_v1 = vpop.eup %6827  ;;  %v4717_v55 = vmul.f32 %v4685_v30, %v3341_v41  ;;  %v4445_v58 = vsub.f32 1.0, %v4444_v4  ;;  %vm11444_vm3 = vcmp.eq.f32.partialorder %v4452_v14, 8.507059e+37  ;;  %v5532_v60 = vmul.f32 3.8918573e-05, %v11105_v46 }
 0x6b6   :  { %v4455_v54 = vor.u32 1.1754944e-38, %v4454_v19  ;;  %v5503_v2 = vmul.f32 %v6828_v1, %v11402_v7  ;;  %v5511_v42 = vand.u32 2147483647, %v11402_v7  ;;  %v11451_v9 = vmin.f32 %v5719_v12, 16.0 }
 0x6b7   :  { %4833 = vmatmul.f32.gmra.mxu2 %v4717_v55  ;;  %v4446_v29 = vmul.f32 %v6824_v43, %v4445_v58  ;;  %vm4449_vm5 = vweird.f32 %v6824_v43  ;;  %v3179_v41 = vmul.f32 %v11438_v32, %v11393_v8  ;;  %v4475_v23 = vmul.f32 %v4474_v0, %v11372_v33 }
 0x6b8   :  { %v5504_v26 = vsub.f32 1.0, %v5503_v2  ;;  %v5513_v40 = vand.u32 2147483648, %v11402_v7  ;;  %v5721_v6 = vmul.f32 2.1237322e-06, %v11451_v9  ;;  %v5533_v61 = vadd.f32 0.001143296, %v5532_v60  ;;  %vm4450_vm8 = vmor %vm4448_vm2, %vm4449_vm5 }
 0x6b9   :  { %v4447_v51 = vadd.f32 %v6824_v43, %v4446_v29  ;;  %vm5508_vm7 = vweird.f32 %v6828_v1  ;;  %v4467_v14 = vadd.f32 0.05243302, %v4466_v45  ;;  %v4476_v19 = vadd.f32 0.014752088, %v4475_v23 }
 0x6ba   :  { %v5505_v30 = vmul.f32 %v6828_v1, %v5504_v26  ;;  %v5722_v4 = vadd.f32 0.00028619796, %v5721_v6  ;;  %v5534_v12 = vmul.f32 %v5533_v61, %v11105_v46  ;;  %v5572_v55 = vmul.f32 3.8918573e-05, %v11216_v56 }
 0x6bb   :  { %v5688_v0 = vadd.f32 0.18741608, %v5687_v3  ;;  %v4451_v58 = vsel %vm4450_vm8, %v6824_v43, %v4447_v51  ;;  %v3180_v2 = vmul.f32 %v11438_v32, %v3179_v41  ;;  %v4477_v28 = vmul.f32 %v4476_v19, %v11372_v33 }
 0x6bc   :  { %v4456_v60 = vsel %vm11444_vm3, %v4455_v54, %v4451_v58  ;;  %v5506_v45 = vadd.f32 %v6828_v1, %v5505_v30  ;;  %vm5507_vm9 = vweird.f32 %v11402_v7  ;;  %v5723_v62 = vmul.f32 %v5722_v4, %v11451_v9  ;;  %v2831_v30 = vpop.xlane.xlu0 %2830 }
 0x6bd   :  { %v4457_v29 = vmul.f32 %v4456_v60, %v4432_v34  ;;  %vm5509_vm6 = vmor %vm5507_vm9, %vm5508_vm7  ;;  %v5514_v23 = vor.u32 1.1754944e-38, %v5513_v40  ;;  %v4478_v26 = vadd.f32 0.112945676, %v4477_v28  ;;  %v5535_v6 = vadd.f32 0.014752088, %v5534_v12  ;;  %v2829_v34 = vpop.xlane.xlu2 %2828 }
 0x6be   :  { %v5510_v3 = vsel %vm5509_vm6, %v6828_v1, %v5506_v45  ;;  %vm5512_vm10 = vcmp.eq.f32.partialorder %v5511_v42, 8.507059e+37  ;;  %v4468_v43 = vmul.f32 %v4467_v14, %v11372_v33  ;;  %v5573_v41 = vadd.f32 0.001143296, %v5572_v55  ;;  %v6322_v14 = vpop.f32.mrf.mxu3 }
 0x6bf   :  { %v6507_v61 = vclamps-f32 %v4457_v29, 1.0  ;;  %v3181_v51 = vmul.f32 0.5, %v3180_v2  ;;  %v5515_v24 = vsel %vm5512_vm10, %v5514_v23, %v5510_v3  ;;  %v4479_v54 = vmul.f32 %v4478_v26, %v11372_v33 }
 0x6c0   :  { %v5516_v7 = vmul.f32 %v5515_v24, %v11354_v10  ;;  %v5724_v19 = vadd.f32 0.0036580483, %v5723_v62  ;;  %v5536_v4 = vmul.f32 %v5535_v6, %v11105_v46  ;;  %v5574_v28 = vmul.f32 %v5573_v41, %v11216_v56 }
 0x6c1   :  { %v4686_v40 = vadd.f32 1.0, %v6507_v61  ;;  %v4480_v1 = vadd.f32 0.4994258, %v4479_v54  ;;  %v2864_v42 = vmul.f32 0.015625, %v2831_v30  ;;  %v2863_v12 = vmul.f32 0.015625, %v2829_v34 }
 0x6c2   :  { %v6527_v55 = vclamps-f32 %v5516_v7, 1.0  ;;  %v4469_v58 = vadd.f32 0.18741608, %v4468_v43  ;;  %v6323_v2 = vadd.f32 %v11383_v37, %v6322_v14  ;;  %v5537_v60 = vadd.f32 0.112945676, %v5536_v4 }
 0x6c3   :  { %v4718_v45 = vmul.f32 %v4686_v40, %v11423_v22  ;;  %v4481_v10 = vmul.f32 %v4480_v1, %v11372_v33  ;;  %v11477_v62 = vadd.f32 1e-05, %v2864_v42  ;;  %v11479_v29 = vadd.f32 1e-05, %v2863_v12  ;;  %v2833_v1 = vpop.xlane.xlu1 %2832 }
 0x6c4   :  { %v6213_v23 = vadd.f32 1.0, %v6527_v55  ;;  %v5725_v26 = vmul.f32 %v5724_v19, %v11451_v9  ;;  %6402 = vst [vmem:[#allocation17 + $0x40] sm:$0xff] %v6323_v2  ;;  %v5538_v6 = vmul.f32 %v5537_v60, %v11105_v46  ;;  %v5575_v3 = vadd.f32 0.014752088, %v5574_v28 }
 0x6c5   :  { %v5570_v43 = vadd.f32 1.1283791, %v11420_v25  ;;  %v5649_v41 = vmul.f32 %v11429_v63, %v11306_v20  ;;  %4836 = vmatmul.f32.gmra.mxu2 %v4718_v45  ;;  %v11486_v22 = vadd.f32 1.0, %v4481_v10  ;;  %6829 = vrsqrt.f32 %v11477_v62 }
 0x6c6   :  { %v5689_v61 = vmul.f32 %v5688_v0, %v11364_v38  ;;  %v6245_v24 = vmul.f32 %v6213_v23, %v11290_v13  ;;  %6831 = vrsqrt.f32 %v11479_v29  ;;  %v5539_v54 = vadd.f32 0.4994258, %v5538_v6 }
 0x6c7   :  { %v5610_v7 = vadd.f32 1.1283791, %v11427_v16  ;;  %v3182_v19 = vsub.f32 1.5, %v3181_v51  ;;  %v4470_v25 = vmul.f32 %v4469_v58, %v11372_v33  ;;  %6833 = vrcp.f32 %v11486_v22  ;;  %v6325_v16 = vpop.f32.mrf.mxu3 }
 0x6c8   :  { %v11496_v63 = vmul.f32 0.5, %v11194_v31  ;;  %6339 = vmatmul.f32.gmra.mxu3 %v6245_v24  ;;  %v5726_v30 = vadd.f32 0.05243302, %v5725_v26  ;;  %v5540_v34 = vmul.f32 %v5539_v54, %v11105_v46  ;;  %v5576_v0 = vmul.f32 %v5575_v3, %v11216_v56 }
 0x6c9   :  { %v11501_v13 = vmul.f32 %v5570_v43, %v11171_v47  ;;  %v11504_v4 = vmul.f32 0.5, %v11267_v21  ;;  %v5612_v33 = vmul.f32 3.8918573e-05, %v11239_v39  ;;  %v5652_v51 = vmul.f32 3.8918573e-05, %v11306_v20 }
 0x6ca   :  { %v5650_v28 = vadd.f32 1.1283791, %v5649_v41  ;;  %v5690_v31 = vadd.f32 1.1283791, %v5689_v61  ;;  %v11508_v40 = vadd.f32 1.0, %v5540_v34  ;;  %v6326_v46 = vadd.f32 %v11383_v37, %v6325_v16 }
 0x6cb   :  { %v11511_v42 = vpop.eup %6829  ;;  %v11514_v47 = vmul.f32 %v5610_v7, %v11209_v52  ;;  %v11517_v21 = vmul.f32 %v11438_v32, %v3182_v19  ;;  %vm3185_vm4 = vweird.f32 %v11438_v32  ;;  %v4471_v12 = vadd.f32 1.1283791, %v4470_v25 }
 0x6cc   :  { %v11520_v14 = vpop.eup %6831  ;;  %v5727_v55 = vmul.f32 %v5726_v30, %v11451_v9  ;;  %v11524_v58 = vmul.f32 0.5, %v11324_v44  ;;  %6835 = vrcp.f32 %v11508_v40  ;;  %6403 = vst [vmem:[#allocation17 + $0x48] sm:$0xff] %v6326_v46  ;;  %v5577_v2 = vadd.f32 0.112945676, %v5576_v0 }
 0x6cd   :  { %v6834_v60 = vpop.eup %6833  ;;  %vm3184_vm11 = vweird.f32 %v11393_v8  ;;  %v2865_v52 = vmul.f32 0.015625, %v2833_v1  ;;  %v5613_v45 = vadd.f32 0.001143296, %v5612_v33  ;;  %v5653_v10 = vadd.f32 0.001143296, %v5652_v51 }
 0x6ce   :  { %v11529_v23 = vmul.f32 %v5650_v28, %v11272_v53  ;;  %v11532_v26 = vmul.f32 0.5, %v11333_v17  ;;  %v11535_v6 = vmul.f32 %v5690_v31, %v11338_v5  ;;  %vm11539_vm12 = vmor %vm3184_vm11, %vm3185_vm4  ;;  %v4484_v8 = vmul.f32 %v6834_v60, %v11486_v22 }
 0x6cf   :  { %v3187_v53 = vsel %vm11539_vm12, %v11438_v32, %v11517_v21  ;;  %v4472_v3 = vmul.f32 %v4471_v12, %v11342_v57  ;;  %v4494_v17 = vand.u32 2147483648, %v11486_v22  ;;  %v3199_v5 = vmul.f32 %v11511_v42, %v11477_v62 }
 0x6d0   :  { %v5728_v43 = vadd.f32 0.18741608, %v5727_v55  ;;  %v4485_v41 = vsub.f32 1.0, %v4484_v8  ;;  %v3189_v61 = vmul.f32 %v11520_v14, %v11479_v29  ;;  %v5578_v24 = vmul.f32 %v5577_v2, %v11216_v56 }
 0x6d1   :  { %vm4488_vm13 = vweird.f32 %v11486_v22  ;;  %v11556_v54 = vadd.f32 1e-05, %v2865_v52  ;;  %v5614_v32 = vmul.f32 %v5613_v45, %v11239_v39  ;;  %v5654_v57 = vmul.f32 %v5653_v10, %v11306_v20 }
 0x6d2   :  { %v6836_v7 = vpop.eup %6835  ;;  %v4486_v19 = vmul.f32 %v6834_v60, %v4485_v41  ;;  %vm4489_vm14 = vweird.f32 %v6834_v60  ;;  %v4492_v25 = vand.u32 2147483647, %v11486_v22  ;;  %v5579_v30 = vadd.f32 0.4994258, %v5578_v24 }
 0x6d3   :  { %v4495_v34 = vor.u32 1.1754944e-38, %v4494_v17  ;;  %v3200_v0 = vmul.f32 %v11511_v42, %v3199_v5  ;;  %v5543_v16 = vmul.f32 %v6836_v7, %v11508_v40  ;;  %v6328_v33 = vpop.f32.mrf.mxu3  ;;  %v5615_v51 = vadd.f32 0.014752088, %v5614_v32  ;;  %vm4490_vm15 = vmor %vm4488_vm13, %vm4489_vm14 }
 0x6d4   :  { %v4487_v28 = vadd.f32 %v6834_v60, %v4486_v19  ;;  %v3190_v31 = vmul.f32 %v11520_v14, %v3189_v61  ;;  %v5580_v1 = vmul.f32 %v5579_v30, %v11216_v56  ;;  %v6329_v46 = vadd.f32 %v11383_v37, %v6328_v33 }
 0x6d5   :  { %v5544_v21 = vsub.f32 1.0, %v5543_v16  ;;  %6837 = vrsqrt.f32 %v11556_v54  ;;  %v5616_v12 = vmul.f32 %v5615_v51, %v11239_v39  ;;  %v5655_v55 = vadd.f32 0.014752088, %v5654_v57 }
 0x6d6   :  { %v4491_v2 = vsel %vm4490_vm15, %v6834_v60, %v4487_v28  ;;  %vm4493_vm0 = vcmp.eq.f32.partialorder %v4492_v25, 8.507059e+37  ;;  %v5551_v52 = vand.u32 2147483647, %v11508_v40  ;;  %v5553_v45 = vand.u32 2147483648, %v11508_v40  ;;  %6404 = vst [vmem:[#allocation17 + $0x50] sm:$0xff] %v6329_v46 }
 0x6d7   :  { %v4496_v10 = vsel %vm4493_vm0, %v4495_v34, %v4491_v2  ;;  %v5545_v56 = vmul.f32 %v6836_v7, %v5544_v21  ;;  %vm5548_vm1 = vweird.f32 %v6836_v7  ;;  %v5692_v44 = vmul.f32 3.8918573e-05, %v11364_v38 }
 0x6d8   :  { %v4497_v22 = vmul.f32 %v4496_v10, %v4472_v3  ;;  %v3201_v8 = vmul.f32 0.5, %v3200_v0  ;;  %vm5547_vm2 = vweird.f32 %v11508_v40  ;;  %v11574_v17 = vadd.f32 1.0, %v5580_v1 }
 0x6d9   :  { %v3191_v5 = vmul.f32 0.5, %v3190_v31  ;;  %v5546_v41 = vadd.f32 %v6836_v7, %v5545_v56  ;;  %v5617_v60 = vadd.f32 0.112945676, %v5616_v12  ;;  %v5656_v61 = vmul.f32 %v5655_v55, %v11306_v20  ;;  %vm5549_vm3 = vmor %vm5547_vm2, %vm5548_vm1 }
 0x6da   :  { %v3246_v24 = vmul.f32 %v3187_v53, %v10722_v36  ;;  %v6508_v32 = vclamps-f32 %v4497_v22, 1.0  ;;  %v5554_v57 = vor.u32 1.1754944e-38, %v5553_v45  ;;  %6839 = vrcp.f32 %v11574_v17 }
 0x6db   :  { %v11579_v19 = vpop.eup %6837  ;;  %v5550_v3 = vsel %vm5549_vm3, %v6836_v7, %v5546_v41  ;;  %vm5552_vm5 = vcmp.eq.f32.partialorder %v5551_v52, 8.507059e+37  ;;  %v5618_v40 = vmul.f32 %v5617_v60, %v11239_v39  ;;  %v5693_v25 = vadd.f32 0.001143296, %v5692_v44 }
 0x6dc   :  { %v5729_v30 = vmul.f32 %v5728_v43, %v11451_v9  ;;  %v4687_v34 = vadd.f32 1.0, %v6508_v32  ;;  %vm3204_vm7 = vweird.f32 %v11477_v62  ;;  %v5555_v0 = vsel %vm5552_vm5, %v5554_v57, %v5550_v3  ;;  %v6331_v28 = vpop.f32.mrf.mxu3 }
 0x6dd   :  { %v5657_v16 = vadd.f32 0.112945676, %v5656_v61  ;;  %v3202_v36 = vsub.f32 1.5, %v3201_v8  ;;  %v3192_v53 = vsub.f32 1.5, %v3191_v5  ;;  %v5556_v33 = vmul.f32 %v5555_v0, %v11415_v50 }
 0x6de   :  { %v5619_v51 = vadd.f32 0.4994258, %v5618_v40  ;;  %v4719_v31 = vmul.f32 %v4687_v34, %v11524_v58  ;;  %v3209_v7 = vmul.f32 %v11579_v19, %v11556_v54  ;;  %v6332_v1 = vadd.f32 %v11383_v37, %v6331_v28 }
 0x6df   :  { %v5658_v43 = vmul.f32 %v5657_v16, %v11306_v20  ;;  %v6528_v46 = vclamps-f32 %v5556_v33, 1.0  ;;  %v5694_v12 = vmul.f32 %v5693_v25, %v11364_v38  ;;  %v5732_v55 = vmul.f32 3.8918573e-05, %v11451_v9 }
 0x6e0   :  { %v5620_v21 = vmul.f32 %v5619_v51, %v11239_v39  ;;  %v6840_v2 = vpop.eup %6839  ;;  %v5730_v50 = vadd.f32 1.1283791, %v5729_v30  ;;  %4839 = vmatmul.f32.gmra.mxu2 %v4719_v31  ;;  %vm3205_vm8 = vweird.f32 %v11511_v42  ;;  %vm3194_vm9 = vweird.f32 %v11479_v29  ;;  %6405 = vst [vmem:[#allocation17 + $0x58] sm:$0xff] %v6332_v1 }
 0x6e1   :  { %v5659_v58 = vadd.f32 0.4994258, %v5658_v43  ;;  %v3203_v52 = vmul.f32 %v11511_v42, %v3202_v36  ;;  %vm3195_vm6 = vweird.f32 %v11520_v14  ;;  %v6214_v45 = vadd.f32 1.0, %v6528_v46  ;;  %vm11611_vm4 = vmor %vm3204_vm7, %vm3205_vm8 }
 0x6e2   :  { %v5583_v39 = vmul.f32 %v6840_v2, %v11574_v17  ;;  %v11598_v10 = vadd.f32 1.0, %v5620_v21  ;;  %v5695_v44 = vadd.f32 0.014752088, %v5694_v12  ;;  %v5733_v22 = vadd.f32 0.001143296, %v5732_v55  ;;  %vm11631_vm11 = vmor %vm3194_vm9, %vm3195_vm6 }
 0x6e3   :  { %v5660_v56 = vmul.f32 %v5659_v58, %v11306_v20  ;;  %v3193_v8 = vmul.f32 %v11520_v14, %v3192_v53  ;;  %v6246_v5 = vmul.f32 %v6214_v45, %v11304_v15  ;;  %v3210_v41 = vmul.f32 %v11579_v19, %v3209_v7 }
 0x6e4   :  { %v5584_v60 = vsub.f32 1.0, %v5583_v39  ;;  %vm5588_vm10 = vweird.f32 %v6840_v2  ;;  %v5591_v61 = vand.u32 2147483647, %v11574_v17  ;;  %v5593_v32 = vand.u32 2147483648, %v11574_v17  ;;  %v6334_v3 = vpop.f32.mrf.mxu3 }
 0x6e5   :  { %6841 = vrcp.f32 %v11598_v10  ;;  %6342 = vmatmul.f32.gmra.mxu3 %v6246_v5  ;;  %v11615_v57 = vadd.f32 1.0, %v5660_v56  ;;  %v5696_v40 = vmul.f32 %v5695_v44, %v11364_v38  ;;  %v5734_v25 = vmul.f32 %v5733_v22, %v11451_v9 }
 0x6e6   :  { %v5585_v15 = vmul.f32 %v6840_v2, %v5584_v60  ;;  %v11620_v30 = vmul.f32 %v5730_v50, %v11433_v49  ;;  %v3207_v62 = vsel %vm11611_vm4, %v11511_v42, %v3203_v52  ;;  %v6335_v34 = vadd.f32 %v11383_v37, %v6334_v3 }
 0x6e7   :  { %v3279_v0 = vmul.f32 %v8987_v18, %v3246_v24  ;;  %v11635_v36 = vmul.f32 0.5, %v3210_v41  ;;  %vm5587_vm12 = vweird.f32 %v11574_v17  ;;  %6843 = vrcp.f32 %v11615_v57 }
 0x6e8   :  { %v5586_v49 = vadd.f32 %v6840_v2, %v5585_v15  ;;  %vm5589_vm13 = vmor %vm5587_vm12, %vm5588_vm10  ;;  %v5594_v42 = vor.u32 1.1754944e-38, %v5593_v32  ;;  %6406 = vst [vmem:[#allocation17 + $0x60] sm:$0xff] %v6335_v34  ;;  %v5697_v24 = vadd.f32 0.112945676, %v5696_v40  ;;  %v5735_v53 = vadd.f32 0.014752088, %v5734_v25 }
 0x6e9   :  { %v11641_v33 = vadd.f32 %v9001_v59, %v3279_v0  ;;  %v3197_v29 = vsel %vm11631_vm11, %v11520_v14, %v3193_v8  ;;  %vm5592_vm14 = vcmp.eq.f32.partialorder %v5591_v61, 8.507059e+37  ;;  %v5631_v28 = vand.u32 2147483647, %v11598_v10 }
 0x6ea   :  { %v5590_v51 = vsel %vm5589_vm13, %v6840_v2, %v5586_v49  ;;  %v3248_v31 = vmul.f32 %v3207_v62, %v10760_v11  ;;  %v5698_v1 = vmul.f32 %v5697_v24, %v11364_v38  ;;  %v5736_v43 = vmul.f32 %v5735_v53, %v11451_v9 }
 0x6eb   :  { %v6842_v17 = vpop.eup %6841  ;;  %v5595_v7 = vsel %vm5592_vm14, %v5594_v42, %v5590_v51  ;;  %v3212_v46 = vsub.f32 1.5, %v11635_v36  ;;  %v5633_v14 = vand.u32 2147483648, %v11598_v10  ;;  %v3247_v55 = vmul.f32 %v3197_v29, %v10804_v27 }
 0x6ec   :  { %v5596_v21 = vmul.f32 %v5595_v7, %v11501_v13  ;;  %v5623_v12 = vmul.f32 %v6842_v17, %v11598_v10  ;;  %v5699_v2 = vadd.f32 0.4994258, %v5698_v1  ;;  %v5737_v50 = vadd.f32 0.112945676, %v5736_v43  ;;  %v6337_v13 = vpop.f32.mrf.mxu3 }
 0x6ed   :  { %v11656_v58 = vmul.f32 0.70710677, %v11641_v33  ;;  %v6844_v11 = vpop.eup %6843  ;;  %vm5627_vm15 = vweird.f32 %v11598_v10  ;;  %vm11659_vm0 = vcmp.eq.f32.partialorder %v5631_v28, 8.507059e+37  ;;  %vm5628_vm1 = vweird.f32 %v6842_v17 }
 0x6ee   :  { %v6529_v52 = vclamps-f32 %v5596_v21, 1.0  ;;  %v5624_v45 = vsub.f32 1.0, %v5623_v12  ;;  %v5663_v56 = vmul.f32 %v6844_v11, %v11615_v57  ;;  %v5700_v27 = vmul.f32 %v5699_v2, %v11364_v38  ;;  %vm5629_vm2 = vmor %vm5627_vm15, %vm5628_vm1 }
 0x6ef   :  { %v6338_v44 = vadd.f32 %v11383_v37, %v6337_v13  ;;  %v5738_v5 = vmul.f32 %v5737_v50, %v11451_v9  ;;  %v4500_v41 = vmul.f32 %v11656_v58, %v11656_v58  ;;  %v5634_v60 = vor.u32 1.1754944e-38, %v5633_v14 }
 0x6f0   :  { %v6215_v22 = vadd.f32 1.0, %v6529_v52  ;;  %v5625_v8 = vmul.f32 %v6842_v17, %v5624_v45  ;;  %v5664_v61 = vsub.f32 1.0, %v5663_v56  ;;  %v5673_v32 = vand.u32 2147483648, %v11615_v57 }
 0x6f1   :  { %v11670_v20 = vadd.f32 1.0, %v5700_v27  ;;  %6407 = vst [vmem:[#allocation17 + $0x68] sm:$0xff] %v6338_v44  ;;  %v5739_v38 = vadd.f32 0.4994258, %v5738_v5  ;;  %v11673_v40 = vmin.f32 %v4500_v41, 16.0  ;;  %vm5668_vm3 = vweird.f32 %v6844_v11 }
 0x6f2   :  { %v6247_v15 = vmul.f32 %v6215_v22, %v11410_v48  ;;  %v5626_v3 = vadd.f32 %v6842_v17, %v5625_v8  ;;  %v5665_v37 = vmul.f32 %v6844_v11, %v5664_v61  ;;  %v5671_v25 = vand.u32 2147483647, %v11615_v57  ;;  %v11728_v41 = vld [vmem:[#allocation13] ss:$0 sm:$0xff] }
 0x6f3   :  { %6845 = vrcp.f32 %v11670_v20  ;;  %vm5667_vm5 = vweird.f32 %v11615_v57  ;;  %v5740_v48 = vmul.f32 %v5739_v38, %v11451_v9  ;;  %v4502_v34 = vmul.f32 2.1237322e-06, %v11673_v40 }
 0x6f4   :  { %6345 = vmatmul.f32.gmra.mxu3 %v6247_v15  ;;  %v5630_v62 = vsel %vm5629_vm2, %v6842_v17, %v5626_v3  ;;  %v5666_v16 = vadd.f32 %v6844_v11, %v5665_v37  ;;  %v4513_v10 = vmul.f32 3.8918573e-05, %v11673_v40  ;;  %v3281_v36 = vmul.f32 %v8987_v18, %v3248_v31  ;;  %vm5669_vm7 = vmor %vm5667_vm5, %vm5668_vm3 }
 0x6f5   :  { %v5635_v0 = vsel %vm11659_vm0, %v5634_v60, %v5630_v62  ;;  %v5674_v42 = vor.u32 1.1754944e-38, %v5673_v32  ;;  %v11688_v24 = vadd.f32 1.0, %v5740_v48  ;;  %v4503_v53 = vadd.f32 0.00028619796, %v4502_v34 }
 0x6f6   :  { %v5636_v49 = vmul.f32 %v5635_v0, %v11514_v47  ;;  %vm3215_vm8 = vweird.f32 %v11579_v19  ;;  %v5670_v9 = vsel %vm5669_vm7, %v6844_v11, %v5666_v16  ;;  %vm5672_vm9 = vcmp.eq.f32.partialorder %v5671_v25, 8.507059e+37 }
 0x6f7   :  { %v4514_v57 = vadd.f32 0.001143296, %v4513_v10  ;;  %v3213_v29 = vmul.f32 %v11579_v19, %v3212_v46  ;;  %v5675_v28 = vsel %vm5672_vm9, %v5674_v42, %v5670_v9  ;;  %6847 = vrcp.f32 %v11688_v24 }
 0x6f8   :  { %v6530_v51 = vclamps-f32 %v5636_v49, 1.0  ;;  %v5676_v31 = vmul.f32 %v5675_v28, %v11529_v23  ;;  %v4504_v47 = vmul.f32 %v4503_v53, %v11673_v40  ;;  %v3280_v7 = vmul.f32 %v8987_v18, %v3247_v55 }
 0x6f9   :  { %v6846_v17 = vpop.eup %6845  ;;  %v11697_v1 = vadd.f32 %v9001_v59, %v3281_v36  ;;  %vm3214_vm6 = vweird.f32 %v11556_v54  ;;  %v4515_v46 = vmul.f32 %v4514_v57, %v11673_v40  ;;  %v5711_v14 = vand.u32 2147483647, %v11670_v20 }
 0x6fa   :  { %v6216_v43 = vadd.f32 1.0, %v6530_v51  ;;  %v5703_v21 = vmul.f32 %v6846_v17, %v11670_v20  ;;  %vm11704_vm10 = vmor %vm3214_vm6, %vm3215_vm8  ;;  %v6531_v23 = vclamps-f32 %v5676_v31, 1.0  ;;  %v5713_v55 = vand.u32 2147483648, %v11670_v20 }
 0x6fb   :  { %v4505_v2 = vadd.f32 0.0036580483, %v4504_v47  ;;  %v3217_v54 = vsel %vm11704_vm10, %v11579_v19, %v3213_v29  ;;  %v4516_v52 = vadd.f32 0.014752088, %v4515_v46  ;;  %vm5707_vm4 = vweird.f32 %v11670_v20 }
 0x6fc   :  { %v6248_v50 = vmul.f32 %v6216_v43, %v11496_v63  ;;  %v5704_v11 = vsub.f32 1.0, %v5703_v21  ;;  %v6217_v45 = vadd.f32 1.0, %v6531_v23  ;;  %v4822_v39 = vpop.f32.mrf.mxu2  ;;  %v11716_v13 = vadd.f32 %v9001_v59, %v3280_v7 }
 0x6fd   :  { %v11719_v56 = vmul.f32 0.70710677, %v11697_v1  ;;  %v6848_v27 = vpop.eup %6847  ;;  %vm5708_vm11 = vweird.f32 %v6846_v17  ;;  %v4506_v19 = vmul.f32 %v4505_v2, %v11673_v40  ;;  %v4517_v63 = vmul.f32 %v4516_v52, %v11673_v40 }
 0x6fe   :  { %6348 = vmatmul.f32.gmra.mxu3 %v6248_v50  ;;  %v5705_v44 = vmul.f32 %v6846_v17, %v5704_v11  ;;  %vm11723_vm12 = vcmp.eq.f32.partialorder %v5711_v14, 8.507059e+37  ;;  %v5714_v8 = vor.u32 1.1754944e-38, %v5713_v55  ;;  %v5743_v5 = vmul.f32 %v6848_v27, %v11688_v24  ;;  %vm5709_vm13 = vmor %vm5707_vm4, %vm5708_vm11 }
 0x6ff   :  { %v11731_v60 = vadd.f32 %v11728_v41, %v4822_v39  ;;  %v5751_v32 = vand.u32 2147483647, %v11688_v24  ;;  %v5753_v15 = vand.u32 2147483648, %v11688_v24  ;;  %v4518_v3 = vadd.f32 0.112945676, %v4517_v63 }
 0x700   :  { %v5706_v61 = vadd.f32 %v6846_v17, %v5705_v44  ;;  %v6249_v38 = vmul.f32 %v6217_v45, %v11504_v4  ;;  %v5744_v37 = vsub.f32 1.0, %v5743_v5  ;;  %v11739_v25 = vmul.f32 0.70710677, %v11716_v13 }
 0x701   :  { %v4580_v62 = vmul.f32 %v11719_v56, %v11719_v56  ;;  %vm5748_vm14 = vweird.f32 %v6848_v27  ;;  %v4507_v34 = vadd.f32 0.05243302, %v4506_v19  ;;  %v4519_v0 = vmul.f32 %v4518_v3, %v11673_v40 }
 0x702   :  { %v5710_v48 = vsel %vm5709_vm13, %v6846_v17, %v5706_v61  ;;  %v5745_v10 = vmul.f32 %v6848_v27, %v5744_v37  ;;  %v11747_v4 = vmul.f32 0.70710677, %v11731_v60  ;;  %v4540_v20 = vmul.f32 %v11739_v25, %v11739_v25 }
 0x703   :  { %v5715_v16 = vsel %vm11723_vm12, %v5714_v8, %v5710_v48  ;;  %v3249_v36 = vmul.f32 %v3217_v54, %v10861_v35  ;;  %v4520_v42 = vadd.f32 0.4994258, %v4519_v0  ;;  %v11753_v53 = vmin.f32 %v4580_v62, 16.0  ;;  %v12324_v8 = vld [vmem:[#allocation26_spill] sm:$0xff] }
 0x704   :  { %v5716_v49 = vmul.f32 %v5715_v16, %v11535_v6  ;;  %v5746_v9 = vadd.f32 %v6848_v27, %v5745_v10  ;;  %vm5747_vm15 = vweird.f32 %v11688_v24  ;;  %vm5752_vm0 = vcmp.eq.f32.partialorder %v5751_v32, 8.507059e+37 }
 0x705   :  { %v11756_v57 = vmin.f32 %v4540_v20, 16.0  ;;  %vm5749_vm1 = vmor %vm5747_vm15, %vm5748_vm14  ;;  %v5754_v51 = vor.u32 1.1754944e-38, %v5753_v15  ;;  %v4508_v28 = vmul.f32 %v4507_v34, %v11673_v40  ;;  %v4521_v35 = vmul.f32 %v4520_v42, %v11673_v40 }
 0x706   :  { %6351 = vmatmul.f32.gmra.mxu3 %v6249_v38  ;;  %v6532_v29 = vclamps-f32 %v5716_v49, 1.0  ;;  %v5750_v17 = vsel %vm5749_vm1, %v6848_v27, %v5746_v9  ;;  %v5759_v6 = vmul.f32 %v11747_v4, %v11747_v4  ;;  %v4582_v21 = vmul.f32 2.1237322e-06, %v11753_v53 }
 0x707   :  { %v4542_v31 = vmul.f32 2.1237322e-06, %v11756_v57  ;;  %v4553_v24 = vmul.f32 3.8918573e-05, %v11756_v57  ;;  %v5755_v7 = vsel %vm5752_vm0, %v5754_v51, %v5750_v17  ;;  %v4522_v43 = vadd.f32 1.0, %v4521_v35 }
 0x708   :  { %v6218_v47 = vadd.f32 1.0, %v6532_v29  ;;  %v5756_v46 = vmul.f32 %v5755_v7, %v11620_v30  ;;  %v3282_v14 = vmul.f32 %v8987_v18, %v3249_v36  ;;  %v4509_v2 = vadd.f32 0.18741608, %v4508_v28 }
 0x709   :  { %v4543_v12 = vadd.f32 0.00028619796, %v4542_v31  ;;  %v4554_v23 = vadd.f32 0.001143296, %v4553_v24  ;;  %6849 = vrcp.f32 %v4522_v43  ;;  %v11769_v50 = vmin.f32 %v5759_v6, 16.0 }
 0x70a   :  { %v6250_v55 = vmul.f32 %v6218_v47, %v11532_v26  ;;  %v6533_v54 = vclamps-f32 %v5756_v46, 1.0  ;;  %v4583_v45 = vadd.f32 0.00028619796, %v4582_v21  ;;  %v4593_v39 = vmul.f32 3.8918573e-05, %v11753_v53 }
 0x70b   :  { %v4544_v11 = vmul.f32 %v4543_v12, %v11756_v57  ;;  %v4555_v52 = vmul.f32 %v4554_v23, %v11756_v57  ;;  %v11775_v30 = vadd.f32 %v9001_v59, %v3282_v14  ;;  %v4510_v26 = vmul.f32 %v4509_v2, %v11673_v40 }
 0x70c   :  { %v6219_v18 = vadd.f32 1.0, %v6533_v54  ;;  %v4594_v19 = vadd.f32 0.001143296, %v4593_v39  ;;  %v5761_v63 = vmul.f32 2.1237322e-06, %v11769_v50  ;;  %v4875_v5 = vmul.f32 0.5, %v12324_v8 }
 0x70d   :  { %v4545_v27 = vadd.f32 0.0036580483, %v4544_v11  ;;  %v4556_v44 = vadd.f32 0.014752088, %v4555_v52  ;;  %v4584_v32 = vmul.f32 %v4583_v45, %v11753_v53  ;;  %v4511_v37 = vadd.f32 1.1283791, %v4510_v26 }
 0x70e   :  { %6354 = vmatmul.f32.gmra.mxu3 %v6250_v55  ;;  %v4595_v15 = vmul.f32 %v4594_v19, %v11753_v53  ;;  %v6251_v38 = vmul.f32 %v6219_v18, %v4875_v5  ;;  %v11785_v40 = vmul.f32 0.70710677, %v11775_v30  ;;  %v5762_v48 = vadd.f32 0.00028619796, %v5761_v63 }
 0x70f   :  { %v6850_v22 = vpop.eup %6849  ;;  %v4557_v61 = vmul.f32 %v4556_v44, %v11756_v57  ;;  %v4546_v59 = vmul.f32 %v4545_v27, %v11756_v57  ;;  %v4532_v16 = vand.u32 2147483647, %v4522_v43  ;;  %v4534_v10 = vand.u32 2147483648, %v4522_v43 }
 0x710   :  { %v4524_v3 = vmul.f32 %v6850_v22, %v4522_v43  ;;  %v4596_v0 = vadd.f32 0.014752088, %v4595_v15  ;;  %v4585_v36 = vadd.f32 0.0036580483, %v4584_v32  ;;  %vm4529_vm2 = vweird.f32 %v6850_v22  ;;  %v4825_v29 = vpop.f32.mrf.mxu2 }
 0x711   :  { %v4558_v62 = vadd.f32 0.112945676, %v4557_v61  ;;  %v4547_v42 = vadd.f32 0.05243302, %v4546_v59  ;;  %v4620_v28 = vmul.f32 %v11785_v40, %v11785_v40  ;;  %v4512_v35 = vmul.f32 %v4511_v37, %v11656_v58 }
 0x712   :  { %v4525_v34 = vsub.f32 1.0, %v4524_v3  ;;  %v4597_v9 = vmul.f32 %v4596_v0, %v11753_v53  ;;  %vm4528_vm3 = vweird.f32 %v4522_v43  ;;  %v5763_v31 = vmul.f32 %v5762_v48, %v11769_v50 }
 0x713   :  { %v4559_v20 = vmul.f32 %v4558_v62, %v11756_v57  ;;  %vm4530_vm5 = vmor %vm4528_vm3, %vm4529_vm2  ;;  %v4535_v24 = vor.u32 1.1754944e-38, %v4534_v10  ;;  %v4586_v7 = vmul.f32 %v4585_v36, %v11753_v53  ;;  %vm4533_vm7 = vcmp.eq.f32.partialorder %v4532_v16, 8.507059e+37 }
 0x714   :  { %v4526_v49 = vmul.f32 %v6850_v22, %v4525_v34  ;;  %v4598_v6 = vadd.f32 0.112945676, %v4597_v9  ;;  %v11796_v46 = vadd.f32 %v11728_v41, %v4825_v29  ;;  %v4548_v12 = vmul.f32 %v4547_v42, %v11756_v57 }
 0x715   :  { %v4560_v51 = vadd.f32 0.4994258, %v4559_v20  ;;  %v11800_v14 = vmin.f32 %v4620_v28, 16.0  ;;  %v5764_v2 = vadd.f32 0.0036580483, %v5763_v31  ;;  %v3344_v18 = vmul.f32 0.5, %v11641_v33 }
 0x716   :  { %6357 = vmatmul.f32.gmra.mxu3 %v6251_v38  ;;  %v4527_v17 = vadd.f32 %v6850_v22, %v4526_v49  ;;  %v4599_v43 = vmul.f32 %v4598_v6, %v11753_v53  ;;  %v4587_v54 = vadd.f32 0.05243302, %v4586_v7  ;;  %v11803_v52 = vmul.f32 0.70710677, %v11796_v46 }
 0x717   :  { %v4561_v47 = vmul.f32 %v4560_v51, %v11756_v57  ;;  %v4549_v45 = vadd.f32 0.18741608, %v4548_v12  ;;  %v4622_v27 = vmul.f32 2.1237322e-06, %v11800_v14  ;;  %v4633_v63 = vmul.f32 3.8918573e-05, %v11800_v14 }
 0x718   :  { %v4531_v21 = vsel %vm4530_vm5, %v6850_v22, %v4527_v17  ;;  %v4600_v39 = vadd.f32 0.4994258, %v4599_v43  ;;  %v4588_v44 = vmul.f32 %v4587_v54, %v11753_v53  ;;  %v5765_v22 = vmul.f32 %v5764_v2, %v11769_v50  ;;  %v4828_v32 = vpop.f32.mrf.mxu2 }
 0x719   :  { %v4536_v23 = vsel %vm4533_vm7, %v4535_v24, %v4531_v21  ;;  %v4562_v58 = vadd.f32 1.0, %v4561_v47  ;;  %v5799_v5 = vmul.f32 %v11803_v52, %v11803_v52  ;;  %v4550_v61 = vmul.f32 %v4549_v45, %v11756_v57 }
 0x71a   :  { %v4537_v55 = vmul.f32 %v4536_v23, %v4512_v35  ;;  %v4601_v19 = vmul.f32 %v4600_v39, %v11753_v53  ;;  %v4623_v33 = vadd.f32 0.00028619796, %v4622_v27  ;;  %v4634_v59 = vadd.f32 0.001143296, %v4633_v63 }
 0x71b   :  { %6851 = vrcp.f32 %v4562_v58  ;;  %v4589_v37 = vadd.f32 0.18741608, %v4588_v44  ;;  %v5766_v62 = vadd.f32 0.05243302, %v5765_v22  ;;  %v11817_v48 = vmin.f32 %v5799_v5, 16.0 }
 0x71c   :  { %v6509_v11 = vclamps-f32 %v4537_v55, 1.0  ;;  %v11814_v3 = vadd.f32 1.0, %v4601_v19  ;;  %v4551_v34 = vadd.f32 1.1283791, %v4550_v61  ;;  %v4574_v16 = vand.u32 2147483648, %v4562_v58 }
 0x71d   :  { %v4624_v10 = vmul.f32 %v4623_v33, %v11800_v14  ;;  %v4635_v57 = vmul.f32 %v4634_v59, %v11800_v14  ;;  %v5772_v20 = vmul.f32 3.8918573e-05, %v11769_v50  ;;  %v4572_v49 = vand.u32 2147483647, %v4562_v58 }
 0x71e   :  { %v4688_v26 = vadd.f32 1.0, %v6509_v11  ;;  %6853 = vrcp.f32 %v11814_v3  ;;  %v11823_v42 = vadd.f32 %v11728_v41, %v4828_v32  ;;  %v3345_v9 = vmul.f32 0.5, %v11716_v13 }
 0x71f   :  { %v4590_v29 = vmul.f32 %v4589_v37, %v11753_v53  ;;  %v4636_v51 = vadd.f32 0.014752088, %v4635_v57  ;;  %v5773_v28 = vadd.f32 0.001143296, %v5772_v20  ;;  %v5767_v35 = vmul.f32 %v5766_v62, %v11769_v50 }
 0x720   :  { %v4720_v8 = vmul.f32 %v4688_v26, %v3344_v18  ;;  %v5801_v17 = vmul.f32 2.1237322e-06, %v11817_v48  ;;  %vm4568_vm9 = vweird.f32 %v4562_v58  ;;  %v4552_v24 = vmul.f32 %v4551_v34, %v11739_v25 }
 0x721   :  { %v6852_v15 = vpop.eup %6851  ;;  %v4575_v47 = vor.u32 1.1754944e-38, %v4574_v16  ;;  %v4625_v7 = vadd.f32 0.0036580483, %v4624_v10  ;;  %v4637_v21 = vmul.f32 %v4636_v51, %v11800_v14  ;;  %vm4573_vm10 = vcmp.eq.f32.partialorder %v4572_v49, 8.507059e+37 }
 0x722   :  { %4842 = vmatmul.f32.gmra.mxu2 %v4720_v8  ;;  %v4564_v38 = vmul.f32 %v6852_v15, %v4562_v58  ;;  %vm4569_vm8 = vweird.f32 %v6852_v15  ;;  %v11832_v13 = vmul.f32 0.70710677, %v11823_v42  ;;  %v4591_v55 = vadd.f32 1.1283791, %v4590_v29 }
 0x723   :  { %vm4570_vm6 = vmor %vm4568_vm9, %vm4569_vm8  ;;  %v5774_v25 = vmul.f32 %v5773_v28, %v11769_v50  ;;  %v5802_v2 = vadd.f32 0.00028619796, %v5801_v17  ;;  %v4638_v45 = vadd.f32 0.112945676, %v4637_v21  ;;  %v4612_v39 = vand.u32 2147483647, %v11814_v3 }
 0x724   :  { %v4565_v0 = vsub.f32 1.0, %v4564_v38  ;;  %v6854_v31 = vpop.eup %6853  ;;  %v4614_v27 = vand.u32 2147483648, %v11814_v3  ;;  %v4626_v26 = vmul.f32 %v4625_v7, %v11800_v14  ;;  %v5839_v22 = vmul.f32 %v11832_v13, %v11832_v13 }
 0x725   :  { %v4604_v53 = vmul.f32 %v6854_v31, %v11814_v3  ;;  %vm4609_vm4 = vweird.f32 %v6854_v31  ;;  %v4639_v63 = vmul.f32 %v4638_v45, %v11800_v14  ;;  %v4592_v8 = vmul.f32 %v4591_v55, %v11719_v56 }
 0x726   :  { %v4566_v36 = vmul.f32 %v6852_v15, %v4565_v0  ;;  %v5775_v61 = vadd.f32 0.014752088, %v5774_v25  ;;  %vm4608_vm11 = vweird.f32 %v11814_v3  ;;  %v4615_v59 = vor.u32 1.1754944e-38, %v4614_v27 }
 0x727   :  { %v4605_v11 = vsub.f32 1.0, %v4604_v53  ;;  %v4640_v33 = vadd.f32 0.4994258, %v4639_v63  ;;  %vm4610_vm12 = vmor %vm4608_vm11, %vm4609_vm4  ;;  %v4627_v37 = vadd.f32 0.05243302, %v4626_v26  ;;  %vm4613_vm13 = vcmp.eq.f32.partialorder %v4612_v39, 8.507059e+37 }
 0x728   :  { %v4567_v6 = vadd.f32 %v6852_v15, %v4566_v36  ;;  %v5776_v62 = vmul.f32 %v5775_v61, %v11769_v50  ;;  %v11856_v16 = vmin.f32 %v5839_v22, 16.0  ;;  %v5812_v49 = vmul.f32 3.8918573e-05, %v11817_v48 }
 0x729   :  { %v4606_v19 = vmul.f32 %v6854_v31, %v4605_v11  ;;  %v4641_v56 = vmul.f32 %v4640_v33, %v11800_v14  ;;  %v5768_v29 = vadd.f32 0.18741608, %v5767_v35  ;;  %v5803_v17 = vmul.f32 %v5802_v2, %v11817_v48 }
 0x72a   :  { %v4571_v12 = vsel %vm4570_vm6, %v6852_v15, %v4567_v6  ;;  %v4831_v23 = vpop.f32.mrf.mxu2  ;;  %v5777_v20 = vadd.f32 0.112945676, %v5776_v62 }
 0x72b   :  { %v4576_v43 = vsel %vm4573_vm10, %v4575_v47, %v4571_v12  ;;  %v11836_v58 = vadd.f32 %v11728_v41, %v4831_v23  ;;  %v4607_v15 = vadd.f32 %v6854_v31, %v4606_v19  ;;  %v11859_v36 = vadd.f32 1.0, %v4641_v56 }
 0x72c   :  { %v4577_v54 = vmul.f32 %v4576_v43, %v4552_v24  ;;  %v5778_v28 = vmul.f32 %v5777_v20, %v11769_v50  ;;  %v3346_v47 = vmul.f32 0.5, %v11697_v1  ;;  %v5813_v12 = vadd.f32 0.001143296, %v5812_v49 }
 0x72d   :  { %v11842_v18 = vmul.f32 0.70710677, %v11836_v58  ;;  %v4611_v0 = vsel %vm4610_vm12, %v6854_v31, %v4607_v15  ;;  %6855 = vrcp.f32 %v11859_v36  ;;  %v5841_v31 = vmul.f32 2.1237322e-06, %v11856_v16 }
 0x72e   :  { %v6510_v44 = vclamps-f32 %v4577_v54, 1.0  ;;  %v4616_v10 = vsel %vm4613_vm13, %v4615_v59, %v4611_v0  ;;  %v5779_v21 = vadd.f32 0.4994258, %v5778_v28  ;;  %v5769_v35 = vmul.f32 %v5768_v29, %v11769_v50 }
 0x72f   :  { %v5879_v5 = vmul.f32 %v11842_v18, %v11842_v18  ;;  %v4617_v3 = vmul.f32 %v4616_v10, %v4592_v8  ;;  %v5804_v43 = vadd.f32 0.0036580483, %v5803_v17  ;;  %v5814_v54 = vmul.f32 %v5813_v12, %v11817_v48 }
 0x730   :  { %v4689_v32 = vadd.f32 1.0, %v6510_v44  ;;  %v5780_v2 = vmul.f32 %v5779_v21, %v11769_v50  ;;  %v5842_v11 = vadd.f32 0.00028619796, %v5841_v31  ;;  %v5770_v22 = vadd.f32 1.1283791, %v5769_v35 }
 0x731   :  { %v11852_v38 = vmin.f32 %v5879_v5, 16.0  ;;  %v6511_v6 = vclamps-f32 %v4617_v3, 1.0  ;;  %v5815_v44 = vadd.f32 0.014752088, %v5814_v54  ;;  %v5852_v5 = vmul.f32 3.8918573e-05, %v11856_v16 }
 0x732   :  { %v4721_v34 = vmul.f32 %v4689_v32, %v3345_v9  ;;  %v4628_v9 = vmul.f32 %v4627_v37, %v11800_v14  ;;  %v11877_v26 = vadd.f32 1.0, %v5780_v2  ;;  %v5805_v61 = vmul.f32 %v5804_v43, %v11817_v48 }
 0x733   :  { %v5892_v57 = vmul.f32 3.8918573e-05, %v11852_v38  ;;  %v4690_v7 = vadd.f32 1.0, %v6511_v6  ;;  %v5881_v45 = vmul.f32 2.1237322e-06, %v11852_v38  ;;  %v6856_v27 = vpop.eup %6855  ;;  %v5843_v32 = vmul.f32 %v5842_v11, %v11856_v16 }
 0x734   :  { %4845 = vmatmul.f32.gmra.mxu2 %v4721_v34  ;;  %v4629_v23 = vadd.f32 0.18741608, %v4628_v9  ;;  %v4644_v50 = vmul.f32 %v6856_v27, %v11859_v36  ;;  %6857 = vrcp.f32 %v11877_v26  ;;  %v5816_v62 = vmul.f32 %v5815_v44, %v11817_v48 }
 0x735   :  { %v5893_v51 = vadd.f32 0.001143296, %v5892_v57  ;;  %v4722_v55 = vmul.f32 %v4690_v7, %v3346_v47  ;;  %v5882_v15 = vadd.f32 0.00028619796, %v5881_v45  ;;  %vm4649_vm14 = vweird.f32 %v6856_v27 }
 0x736   :  { %v4630_v63 = vmul.f32 %v4629_v23, %v11800_v14  ;;  %v4645_v33 = vsub.f32 1.0, %v4644_v50  ;;  %v4654_v14 = vand.u32 2147483648, %v11859_v36  ;;  %v4652_v56 = vand.u32 2147483647, %v11859_v36 }
 0x737   :  { %v5894_v24 = vmul.f32 %v5893_v51, %v11852_v38  ;;  %v5817_v57 = vadd.f32 0.112945676, %v5816_v62  ;;  %v5853_v20 = vadd.f32 0.001143296, %v5852_v5  ;;  %v5806_v3 = vadd.f32 0.05243302, %v5805_v61 }
 0x738   :  { %v4631_v34 = vadd.f32 1.1283791, %v4630_v63  ;;  %v4646_v0 = vmul.f32 %v6856_v27, %v4645_v33  ;;  %v5844_v49 = vadd.f32 0.0036580483, %v5843_v32  ;;  %vm4648_vm15 = vweird.f32 %v11859_v36 }
 0x739   :  { %v5895_v53 = vadd.f32 0.014752088, %v5894_v24  ;;  %v5883_v9 = vmul.f32 %v5882_v15, %v11852_v38  ;;  %vm4650_vm0 = vmor %vm4648_vm15, %vm4649_vm14  ;;  %v4655_v17 = vor.u32 1.1754944e-38, %v4654_v14  ;;  %vm4653_vm1 = vcmp.eq.f32.partialorder %v4652_v56, 8.507059e+37 }
 0x73a   :  { %v4834_v25 = vpop.f32.mrf.mxu2  ;;  %v4647_v29 = vadd.f32 %v6856_v27, %v4646_v0  ;;  %v6858_v51 = vpop.eup %6857  ;;  %v5818_v47 = vmul.f32 %v5817_v57, %v11817_v48  ;;  %v4632_v7 = vmul.f32 %v4631_v34, %v11785_v40  ;;  %v5854_v36 = vmul.f32 %v5853_v20, %v11856_v16 }
 0x73b   :  { %v5896_v39 = vmul.f32 %v5895_v53, %v11852_v38  ;;  %v11875_v1 = vadd.f32 %v11728_v41, %v4834_v25  ;;  %v5783_v24 = vmul.f32 %v6858_v51, %v11877_v26  ;;  %v5771_v35 = vmul.f32 %v5770_v22, %v11747_v4 }
 0x73c   :  { %4848 = vmatmul.f32.gmra.mxu2 %v4722_v55  ;;  %v4651_v31 = vsel %vm4650_vm0, %v6856_v27, %v4647_v29  ;;  %v5807_v53 = vmul.f32 %v5806_v3, %v11817_v48  ;;  %v3347_v23 = vmul.f32 0.5, %v11775_v30  ;;  %v5884_v43 = vadd.f32 0.0036580483, %v5883_v9 }
 0x73d   :  { %v5897_v19 = vadd.f32 0.112945676, %v5896_v39  ;;  %v11882_v8 = vmul.f32 0.70710677, %v11875_v1  ;;  %v4656_v21 = vsel %vm4653_vm1, %v4655_v17, %v4651_v31  ;;  %v5845_v54 = vmul.f32 %v5844_v49, %v11856_v16 }
 0x73e   :  { %v4657_v25 = vmul.f32 %v4656_v21, %v4632_v7  ;;  %v5784_v11 = vsub.f32 1.0, %v5783_v24  ;;  %v5791_v40 = vand.u32 2147483647, %v11877_v26  ;;  %v5819_v45 = vadd.f32 0.4994258, %v5818_v47 }
 0x73f   :  { %v5898_v59 = vmul.f32 %v5897_v19, %v11852_v38  ;;  %v5919_v37 = vmul.f32 %v11882_v8, %v11882_v8  ;;  %v5793_v4 = vand.u32 2147483648, %v11877_v26  ;;  %v5855_v19 = vadd.f32 0.014752088, %v5854_v36 }
 0x740   :  { %v6512_v39 = vclamps-f32 %v4657_v25, 1.0  ;;  %v5785_v63 = vmul.f32 %v6858_v51, %v5784_v11  ;;  %vm5788_vm2 = vweird.f32 %v6858_v51  ;;  %v5820_v50 = vmul.f32 %v5819_v45, %v11817_v48 }
 0x741   :  { %v11894_v10 = vmin.f32 %v5919_v37, 16.0  ;;  %v5899_v28 = vadd.f32 0.4994258, %v5898_v59  ;;  %vm5787_vm3 = vweird.f32 %v11877_v26  ;;  %vm5792_vm5 = vcmp.eq.f32.partialorder %v5791_v40, 8.507059e+37 }
 0x742   :  { %v4691_v5 = vadd.f32 1.0, %v6512_v39  ;;  %v5786_v15 = vadd.f32 %v6858_v51, %v5785_v63  ;;  %v11922_v33 = vadd.f32 1.0, %v5820_v50  ;;  %vm5789_vm7 = vmor %vm5787_vm3, %vm5788_vm2  ;;  %v5794_v37 = vor.u32 1.1754944e-38, %v5793_v4 }
 0x743   :  { %v5932_v6 = vmul.f32 3.8918573e-05, %v11894_v10  ;;  %v5900_v55 = vmul.f32 %v5899_v28, %v11852_v38  ;;  %v5921_v14 = vmul.f32 2.1237322e-06, %v11894_v10  ;;  %v5856_v62 = vmul.f32 %v5855_v19, %v11856_v16 }
 0x744   :  { %v4723_v59 = vmul.f32 %v4691_v5, %v3347_v23  ;;  %v5790_v56 = vsel %vm5789_vm7, %v6858_v51, %v5786_v15  ;;  %6859 = vrcp.f32 %v11922_v33  ;;  %v5808_v26 = vadd.f32 0.18741608, %v5807_v53 }
 0x745   :  { %v5933_v12 = vadd.f32 0.001143296, %v5932_v6  ;;  %v11915_v22 = vadd.f32 1.0, %v5900_v55  ;;  %v5795_v57 = vsel %vm5792_vm5, %v5794_v37, %v5790_v56  ;;  %v5885_v20 = vmul.f32 %v5884_v43, %v11852_v38  ;;  %v11934_v6 = vld [vmem:[#allocation16] ss:$0 sm:$0xff] }
 0x746   :  { %4851 = vmatmul.f32.gmra.mxu2 %v4723_v59  ;;  %v5796_v9 = vmul.f32 %v5795_v57, %v5771_v35  ;;  %v5846_v28 = vadd.f32 0.05243302, %v5845_v54  ;;  %v5922_v17 = vadd.f32 0.00028619796, %v5921_v14  ;;  %v5857_v47 = vadd.f32 0.112945676, %v5856_v62 }
 0x747   :  { %v5934_v2 = vmul.f32 %v5933_v12, %v11894_v10  ;;  %6861 = vrcp.f32 %v11915_v22  ;;  %v5809_v7 = vmul.f32 %v5808_v26, %v11817_v48  ;;  %v5886_v36 = vadd.f32 0.05243302, %v5885_v20 }
 0x748   :  { %v4837_v44 = vpop.f32.mrf.mxu2  ;;  %v6534_v21 = vclamps-f32 %v5796_v9, 1.0  ;;  %v4876_v43 = vmul.f32 0.5, %v11731_v60  ;;  %v5923_v54 = vmul.f32 %v5922_v17, %v11894_v10  ;;  %v5858_v11 = vmul.f32 %v5857_v47, %v11856_v16 }
 0x749   :  { %v5935_v27 = vadd.f32 0.014752088, %v5934_v2  ;;  %v11912_v30 = vadd.f32 %v11728_v41, %v4837_v44  ;;  %v5847_v2 = vmul.f32 %v5846_v28, %v11856_v16  ;;  %v5810_v40 = vadd.f32 1.1283791, %v5809_v7 }
 0x74a   :  { %v6860_v12 = vpop.eup %6859  ;;  %v6220_v55 = vadd.f32 1.0, %v6534_v21  ;;  %v5887_v44 = vmul.f32 %v5886_v36, %v11852_v38  ;;  %v5833_v19 = vand.u32 2147483648, %v11922_v33  ;;  %v5831_v5 = vand.u32 2147483647, %v11922_v33 }
 0x74b   :  { %v5936_v61 = vmul.f32 %v5935_v27, %v11894_v10  ;;  %v11920_v32 = vmul.f32 0.70710677, %v11912_v30  ;;  %v6340_v29 = vpop.f32.mrf.mxu3  ;;  %v5823_v25 = vmul.f32 %v6860_v12, %v11922_v33  ;;  %vm5828_vm8 = vweird.f32 %v6860_v12 }
 0x74c   :  { %v6341_v51 = vadd.f32 %v11934_v6, %v6340_v29  ;;  %v6252_v39 = vmul.f32 %v6220_v55, %v4876_v43  ;;  %v5924_v15 = vadd.f32 0.0036580483, %v5923_v54  ;;  %v5859_v59 = vadd.f32 0.4994258, %v5858_v11 }
 0x74d   :  { %v5937_v34 = vadd.f32 0.112945676, %v5936_v61  ;;  %v5959_v0 = vmul.f32 %v11920_v32, %v11920_v32  ;;  %v11940_v35 = vpop.eup %6861  ;;  %v5824_v27 = vsub.f32 1.0, %v5823_v25  ;;  %v5848_v61 = vadd.f32 0.18741608, %v5847_v2 }
 0x74e   :  { %6408 = vst [vmem:[#allocation17 + $0x70] sm:$0xff] %v6341_v51  ;;  %v5903_v60 = vmul.f32 %v11940_v35, %v11915_v22  ;;  %6360 = vmatmul.f32.gmra.mxu3 %v6252_v39  ;;  %vm5827_vm9 = vweird.f32 %v11922_v33  ;;  %v5860_v56 = vmul.f32 %v5859_v59, %v11856_v16  ;;  %vm5832_vm10 = vcmp.eq.f32.partialorder %v5831_v5, 8.507059e+37 }
 0x74f   :  { %v5938_v3 = vmul.f32 %v5937_v34, %v11894_v10  ;;  %v11932_v49 = vmin.f32 %v5959_v0, 16.0  ;;  %v5825_v50 = vmul.f32 %v6860_v12, %v5824_v27  ;;  %v5888_v34 = vadd.f32 0.18741608, %v5887_v44  ;;  %vm5829_vm6 = vmor %vm5827_vm9, %vm5828_vm8 }
 0x750   :  { %v5834_v0 = vor.u32 1.1754944e-38, %v5833_v19  ;;  %v5904_v26 = vsub.f32 1.0, %v5903_v60  ;;  %v5925_v29 = vmul.f32 %v5924_v15, %v11894_v10  ;;  %v11962_v28 = vadd.f32 1.0, %v5860_v56 }
 0x751   :  { %v5939_v31 = vadd.f32 0.4994258, %v5938_v3  ;;  %v5972_v24 = vmul.f32 3.8918573e-05, %v11932_v49  ;;  %v5961_v45 = vmul.f32 2.1237322e-06, %v11932_v49  ;;  %v5826_v62 = vadd.f32 %v6860_v12, %v5825_v50 }
 0x752   :  { %v5811_v3 = vmul.f32 %v5810_v40, %v11803_v52  ;;  %v5849_v51 = vmul.f32 %v5848_v61, %v11856_v16  ;;  %v5905_v47 = vmul.f32 %v11940_v35, %v5904_v26  ;;  %v5926_v21 = vadd.f32 0.05243302, %v5925_v29 }
 0x753   :  { %v5940_v53 = vmul.f32 %v5939_v31, %v11894_v10  ;;  %v5973_v23 = vadd.f32 0.001143296, %v5972_v24  ;;  %v5962_v14 = vadd.f32 0.00028619796, %v5961_v45  ;;  %v5830_v20 = vsel %vm5829_vm6, %v6860_v12, %v5826_v62 }
 0x754   :  { %v5835_v9 = vsel %vm5832_vm10, %v5834_v0, %v5830_v20  ;;  %v5889_v31 = vmul.f32 %v5888_v34, %v11852_v38  ;;  %v4877_v16 = vmul.f32 0.5, %v11796_v46  ;;  %v5850_v38 = vadd.f32 1.1283791, %v5849_v51 }
 0x755   :  { %v5974_v48 = vmul.f32 %v5973_v23, %v11932_v49  ;;  %v11952_v4 = vadd.f32 1.0, %v5940_v53  ;;  %v5963_v33 = vmul.f32 %v5962_v14, %v11932_v49  ;;  %v5836_v24 = vmul.f32 %v5835_v9, %v5811_v3 }
 0x756   :  { %v5890_v55 = vadd.f32 1.1283791, %v5889_v31  ;;  %v5906_v2 = vadd.f32 %v11940_v35, %v5905_v47  ;;  %vm5908_vm4 = vweird.f32 %v11940_v35  ;;  %v5913_v40 = vand.u32 2147483648, %v11915_v22 }
 0x757   :  { %v5975_v63 = vadd.f32 0.014752088, %v5974_v48  ;;  %6863 = vrcp.f32 %v11952_v4  ;;  %v6535_v36 = vclamps-f32 %v5836_v24, 1.0  ;;  %v5964_v53 = vadd.f32 0.0036580483, %v5963_v33 }
 0x758   :  { %6865 = vrcp.f32 %v11962_v28  ;;  %vm5907_vm11 = vweird.f32 %v11915_v22  ;;  %v5911_v39 = vand.u32 2147483647, %v11915_v22  ;;  %v5851_v61 = vmul.f32 %v5850_v38, %v11832_v13 }
 0x759   :  { %v5976_v37 = vmul.f32 %v5975_v63, %v11932_v49  ;;  %v6221_v25 = vadd.f32 1.0, %v6535_v36  ;;  %v5965_v27 = vmul.f32 %v5964_v53, %v11932_v49  ;;  %vm11992_vm12 = vmor %vm5907_vm11, %vm5908_vm4  ;;  %v5914_v15 = vor.u32 1.1754944e-38, %v5913_v40 }
 0x75a   :  { %v5910_v63 = vsel %vm11992_vm12, %v11940_v35, %v5906_v2  ;;  %vm5912_vm13 = vcmp.eq.f32.partialorder %v5911_v39, 8.507059e+37  ;;  %v5873_v26 = vand.u32 2147483648, %v11962_v28  ;;  %v5871_v3 = vand.u32 2147483647, %v11962_v28 }
 0x75b   :  { %v5977_v57 = vadd.f32 0.112945676, %v5976_v37  ;;  %v6253_v46 = vmul.f32 %v6221_v25, %v4877_v16  ;;  %v5891_v37 = vmul.f32 %v5890_v55, %v11842_v18  ;;  %v5966_v62 = vadd.f32 0.05243302, %v5965_v27 }
 0x75c   :  { %v5915_v0 = vsel %vm5912_vm13, %v5914_v15, %v5910_v63  ;;  %vm5867_vm15 = vweird.f32 %v11962_v28  ;;  %vm5872_vm2 = vcmp.eq.f32.partialorder %v5871_v3, 8.507059e+37  ;;  %v5951_v36 = vand.u32 2147483647, %v11952_v4 }
 0x75d   :  { %v5978_v17 = vmul.f32 %v5977_v57, %v11932_v49  ;;  %v11970_v52 = vpop.eup %6863  ;;  %6363 = vmatmul.f32.gmra.mxu3 %v6253_v46  ;;  %v5967_v51 = vmul.f32 %v5966_v62, %v11932_v49  ;;  %v5953_v53 = vand.u32 2147483648, %v11952_v4  ;;  %vm5947_vm3 = vweird.f32 %v11952_v4 }
 0x75e   :  { %v5943_v54 = vmul.f32 %v11970_v52, %v11952_v4  ;;  %v6866_v11 = vpop.eup %6865  ;;  %vm5948_vm1 = vweird.f32 %v11970_v52  ;;  %vm5952_vm7 = vcmp.eq.f32.partialorder %v5951_v36, 8.507059e+37 }
 0x75f   :  { %v5979_v7 = vadd.f32 0.4994258, %v5978_v17  ;;  %v5863_v5 = vmul.f32 %v6866_v11, %v11962_v28  ;;  %vm5868_vm14 = vweird.f32 %v6866_v11  ;;  %v5916_v17 = vmul.f32 %v5915_v0, %v5891_v37  ;;  %vm12026_vm5 = vmor %vm5947_vm3, %vm5948_vm1 }
 0x760   :  { %v5944_v50 = vsub.f32 1.0, %v5943_v54  ;;  %vm5869_vm0 = vmor %vm5867_vm15, %vm5868_vm14  ;;  %v5968_v28 = vadd.f32 0.18741608, %v5967_v51  ;;  %v5954_v39 = vor.u32 1.1754944e-38, %v5953_v53 }
 0x761   :  { %v5980_v23 = vmul.f32 %v5979_v7, %v11932_v49  ;;  %v5864_v34 = vsub.f32 1.0, %v5863_v5 }
 0x762   :  { %v5945_v13 = vmul.f32 %v11970_v52, %v5944_v50  ;;  %v5969_v60 = vmul.f32 %v5968_v28, %v11932_v49  ;;  %v6537_v50 = vclamps-f32 %v5916_v17, 1.0 }
 0x763   :  { %v4840_v12 = vpop.f32.mrf.mxu2  ;;  %v11981_v48 = vadd.f32 1.0, %v5980_v23  ;;  %v5865_v20 = vmul.f32 %v6866_v11, %v5864_v34 }
 0x764   :  { %v11974_v43 = vadd.f32 %v11728_v41, %v4840_v12  ;;  %v5927_v41 = vmul.f32 %v5926_v21, %v11894_v10  ;;  %v5874_v21 = vor.u32 1.1754944e-38, %v5873_v26  ;;  %v6223_v34 = vadd.f32 1.0, %v6537_v50 }
 0x765   :  { %6867 = vrcp.f32 %v11981_v48  ;;  %v5866_v31 = vadd.f32 %v6866_v11, %v5865_v20  ;;  %vm5987_vm9 = vweird.f32 %v11981_v48  ;;  %v5991_v49 = vand.u32 2147483647, %v11981_v48 }
 0x766   :  { %v11986_v45 = vmul.f32 0.70710677, %v11974_v43  ;;  %v5928_v59 = vadd.f32 0.18741608, %v5927_v41  ;;  %v5970_v0 = vadd.f32 1.1283791, %v5969_v60 }
 0x767   :  { %v5870_v12 = vsel %vm5869_vm0, %v6866_v11, %v5866_v31  ;;  %v4878_v11 = vmul.f32 0.5, %v11823_v42  ;;  %vm5992_vm10 = vcmp.eq.f32.partialorder %v5991_v49, 8.507059e+37  ;;  %v12060_v60 = vld [vmem:[#allocation13] ss:$0 sm:$0xff] }
 0x768   :  { %v6343_v44 = vpop.f32.mrf.mxu3  ;;  %v5999_v19 = vmul.f32 %v11986_v45, %v11986_v45  ;;  %v5929_v18 = vmul.f32 %v5928_v59, %v11894_v10  ;;  %v5946_v10 = vadd.f32 %v11970_v52, %v5945_v13  ;;  %v5875_v16 = vsel %vm5872_vm2, %v5874_v21, %v5870_v12 }
 0x769   :  { %v6344_v22 = vadd.f32 %v11934_v6, %v6343_v44  ;;  %v5876_v55 = vmul.f32 %v5875_v16, %v5851_v61  ;;  %v5993_v61 = vand.u32 2147483648, %v11981_v48 }
 0x76a   :  { %v12004_v14 = vmin.f32 %v5999_v19, 16.0  ;;  %v5930_v40 = vadd.f32 1.1283791, %v5929_v18  ;;  %v5950_v41 = vsel %vm12026_vm5, %v11970_v52, %v5946_v10 }
 0x76b   :  { %6409 = vst [vmem:[#allocation17 + $0x78] sm:$0xff] %v6344_v22  ;;  %v12010_v57 = vpop.eup %6867  ;;  %v6536_v4 = vclamps-f32 %v5876_v55, 1.0  ;;  %v5955_v22 = vsel %vm5952_vm7, %v5954_v39, %v5950_v41  ;;  %v5994_v26 = vor.u32 1.1754944e-38, %v5993_v61 }
 0x76c   :  { %v6001_v35 = vmul.f32 2.1237322e-06, %v12004_v14  ;;  %v6012_v56 = vmul.f32 3.8918573e-05, %v12004_v14  ;;  %v5983_v29 = vmul.f32 %v12010_v57, %v11981_v48  ;;  %vm5988_vm8 = vweird.f32 %v12010_v57 }
 0x76d   :  { %v6222_v63 = vadd.f32 1.0, %v6536_v4  ;;  %v5931_v5 = vmul.f32 %v5930_v40, %v11882_v8  ;;  %vm5989_vm6 = vmor %vm5987_vm9, %vm5988_vm8  ;;  %v4879_v8 = vmul.f32 0.5, %v11836_v58  ;;  %v4880_v58 = vmul.f32 0.5, %v11875_v1 }
 0x76e   :  { %v6002_v9 = vadd.f32 0.00028619796, %v6001_v35  ;;  %v6013_v33 = vadd.f32 0.001143296, %v6012_v56  ;;  %v5984_v24 = vsub.f32 1.0, %v5983_v29  ;;  %v4881_v1 = vmul.f32 0.5, %v11912_v30 }
 0x76f   :  { %v6254_v15 = vmul.f32 %v6222_v63, %v4878_v11  ;;  %v5956_v37 = vmul.f32 %v5955_v22, %v5931_v5  ;;  %v6255_v18 = vmul.f32 %v6223_v34, %v4879_v8  ;;  %v4882_v4 = vmul.f32 0.5, %v11974_v43 }
 0x770   :  { %v6003_v47 = vmul.f32 %v6002_v9, %v12004_v14  ;;  %v6014_v7 = vmul.f32 %v6013_v33, %v12004_v14  ;;  %v5985_v2 = vmul.f32 %v12010_v57, %v5984_v24  ;;  %v5971_v9 = vmul.f32 %v5970_v0, %v11920_v32 }
 0x771   :  { %6366 = vmatmul.f32.gmra.mxu3 %v6254_v15  ;;  %v6538_v29 = vclamps-f32 %v5956_v37, 1.0 }
 0x772   :  { %v6015_v23 = vadd.f32 0.014752088, %v6014_v7  ;;  %v6004_v38 = vadd.f32 0.0036580483, %v6003_v47  ;;  %v5986_v42 = vadd.f32 %v12010_v57, %v5985_v2 }
 0x773   :  { %v6224_v51 = vadd.f32 1.0, %v6538_v29 }
 0x774   :  { %v6016_v54 = vmul.f32 %v6015_v23, %v12004_v14  ;;  %v6005_v19 = vmul.f32 %v6004_v38, %v12004_v14  ;;  %v5990_v35 = vsel %vm5989_vm6, %v12010_v57, %v5986_v42 }
 0x775   :  { %v5995_v20 = vsel %vm5992_vm10, %v5994_v26, %v5990_v35  ;;  %v6256_v10 = vmul.f32 %v6224_v51, %v4880_v58 }
 0x776   :  { %v6017_v27 = vadd.f32 0.112945676, %v6016_v54  ;;  %v6006_v62 = vadd.f32 0.05243302, %v6005_v19  ;;  %v5996_v17 = vmul.f32 %v5995_v20, %v5971_v9 }
 0x777   :  { %v6346_v46 = vpop.f32.mrf.mxu3 }
 0x778   :  { %v6347_v44 = vadd.f32 %v11934_v6, %v6346_v46  ;;  %v6018_v52 = vmul.f32 %v6017_v27, %v12004_v14  ;;  %v6007_v3 = vmul.f32 %v6006_v62, %v12004_v14  ;;  %v6539_v24 = vclamps-f32 %v5996_v17, 1.0 }
 0x779   :  { %6369 = vmatmul.f32.gmra.mxu3 %v6255_v18 }
 0x77a   :  { %6410 = vst [vmem:[#allocation17 + $0x80] sm:$0xff] %v6347_v44  ;;  %v6019_v59 = vadd.f32 0.4994258, %v6018_v52  ;;  %v6008_v57 = vadd.f32 0.18741608, %v6007_v3  ;;  %v6225_v53 = vadd.f32 1.0, %v6539_v24 }
 0x77c   :  { %v6020_v56 = vmul.f32 %v6019_v59, %v12004_v14  ;;  %v6009_v47 = vmul.f32 %v6008_v57, %v12004_v14  ;;  %v6257_v54 = vmul.f32 %v6225_v53, %v4881_v1 }
 0x77e   :  { %v6021_v13 = vadd.f32 1.0, %v6020_v56  ;;  %v6010_v23 = vadd.f32 1.1283791, %v6009_v47 }
 0x780   :  { %6869 = vrcp.f32 %v6021_v13  ;;  %v6033_v36 = vand.u32 2147483648, %v6021_v13  ;;  %v6031_v28 = vand.u32 2147483647, %v6021_v13  ;;  %vm6027_vm11 = vweird.f32 %v6021_v13 }
 0x781   :  { %v6349_v48 = vpop.f32.mrf.mxu3  ;;  %6372 = vmatmul.f32.gmra.mxu3 %v6256_v10  ;;  %v6011_v55 = vmul.f32 %v6010_v23, %v11986_v45 }
 0x782   :  { %v6350_v33 = vadd.f32 %v11934_v6, %v6349_v48  ;;  %v6034_v14 = vor.u32 1.1754944e-38, %v6033_v36  ;;  %vm6032_vm13 = vcmp.eq.f32.partialorder %v6031_v28, 8.507059e+37 }
 0x784   :  { %6411 = vst [vmem:[#allocation17 + $0x88] sm:$0xff] %v6350_v33 }
 0x786   :  { %v6870_v31 = vpop.eup %6869 }
 0x787   :  { %v6023_v7 = vmul.f32 %v6870_v31, %v6021_v13  ;;  %vm6028_vm4 = vweird.f32 %v6870_v31 }
 0x788   :  { %vm6029_vm12 = vmor %vm6027_vm11, %vm6028_vm4 }
 0x789   :  { %v6352_v21 = vpop.f32.mrf.mxu3  ;;  %v6024_v32 = vsub.f32 1.0, %v6023_v7  ;;  %6375 = vmatmul.f32.gmra.mxu3 %v6257_v54 }
 0x78a   :  { %v6353_v12 = vadd.f32 %v11934_v6, %v6352_v21 }
 0x78b   :  { %v6025_v16 = vmul.f32 %v6870_v31, %v6024_v32 }
 0x78c   :  { %6412 = vst [vmem:[#allocation17 + $0x90] sm:$0xff] %v6353_v12 }
 0x78d   :  { %v6026_v38 = vadd.f32 %v6870_v31, %v6025_v16 }
 0x78f   :  { %v6030_v25 = vsel %vm6029_vm12, %v6870_v31, %v6026_v38 }
 0x790   :  { %v6035_v11 = vsel %vm6032_vm13, %v6034_v14, %v6030_v25 }
 0x791   :  { %v6355_v2 = vpop.f32.mrf.mxu3  ;;  %v6036_v41 = vmul.f32 %v6035_v11, %v6011_v55 }
 0x792   :  { %v6356_v40 = vadd.f32 %v11934_v6, %v6355_v2 }
 0x793   :  { %v6540_v46 = vclamps-f32 %v6036_v41, 1.0 }
 0x794   :  { %6413 = vst [vmem:[#allocation17 + $0x98] sm:$0xff] %v6356_v40 }
 0x795   :  { %v6226_v30 = vadd.f32 1.0, %v6540_v46 }
 0x797   :  { %v6258_v27 = vmul.f32 %v6226_v30, %v4882_v4 }
 0x799   :  { %v6358_v39 = vpop.f32.mrf.mxu3  ;;  %6378 = vmatmul.f32.gmra.mxu3 %v6258_v27 }
 0x79a   :  { %v6359_v44 = vadd.f32 %v11934_v6, %v6358_v39 }
 0x79c   :  { %6414 = vst [vmem:[#allocation17 + $0xa0] sm:$0xff] %v6359_v44 }
 0x7a5   :  { %v4843_v45 = vpop.f32.mrf.mxu2 }
 0x7a6   :  { %v12063_v19 = vadd.f32 %v12060_v60, %v4843_v45 }
 0x7a8   :  { %v12066_v63 = vmul.f32 0.70710677, %v12063_v19 }
 0x7aa   :  { %v6039_v50 = vmul.f32 %v12066_v63, %v12066_v63 }
 0x7ac   :  { %v6040_v43 = vmin.f32 %v6039_v50, 16.0 }
 0x7ae   :  { %v6041_v22 = vmul.f32 2.1237322e-06, %v6040_v43  ;;  %v6052_v42 = vmul.f32 3.8918573e-05, %v6040_v43 }
 0x7b0   :  { %v6042_v52 = vadd.f32 0.00028619796, %v6041_v22  ;;  %v6053_v5 = vadd.f32 0.001143296, %v6052_v42 }
 0x7b2   :  { %v6043_v61 = vmul.f32 %v6042_v52, %v6040_v43  ;;  %v6054_v15 = vmul.f32 %v6053_v5, %v6040_v43 }
 0x7b4   :  { %v6044_v49 = vadd.f32 0.0036580483, %v6043_v61  ;;  %v6055_v59 = vadd.f32 0.014752088, %v6054_v15 }
 0x7b6   :  { %v6056_v37 = vmul.f32 %v6055_v59, %v6040_v43  ;;  %v6045_v62 = vmul.f32 %v6044_v49, %v6040_v43 }
 0x7b7   :  { %v4846_v34 = vpop.f32.mrf.mxu2 }
 0x7b8   :  { %v6057_v0 = vadd.f32 0.112945676, %v6056_v37  ;;  %v12071_v35 = vadd.f32 %v12060_v60, %v4846_v34  ;;  %v6046_v26 = vadd.f32 0.05243302, %v6045_v62 }
 0x7ba   :  { %v6058_v56 = vmul.f32 %v6057_v0, %v6040_v43  ;;  %v12074_v8 = vmul.f32 0.70710677, %v12071_v35  ;;  %v6047_v18 = vmul.f32 %v6046_v26, %v6040_v43 }
 0x7bc   :  { %v6059_v13 = vadd.f32 0.4994258, %v6058_v56  ;;  %v6079_v20 = vmul.f32 %v12074_v8, %v12074_v8  ;;  %v6048_v51 = vadd.f32 0.18741608, %v6047_v18  ;;  %v4883_v18 = vmul.f32 0.5, %v12063_v19 }
 0x7be   :  { %v6060_v3 = vmul.f32 %v6059_v13, %v6040_v43  ;;  %v12078_v48 = vmin.f32 %v6079_v20, 16.0  ;;  %v6049_v10 = vmul.f32 %v6048_v51, %v6040_v43 }
 0x7bf   :  { %v4849_v29 = vpop.f32.mrf.mxu2 }
 0x7c0   :  { %v6061_v9 = vadd.f32 1.0, %v6060_v3  ;;  %v6081_v33 = vmul.f32 2.1237322e-06, %v12078_v48  ;;  %v12082_v17 = vadd.f32 %v12060_v60, %v4849_v29  ;;  %v6092_v57 = vmul.f32 3.8918573e-05, %v12078_v48 }
 0x7c1   :  { %v6050_v14 = vadd.f32 1.1283791, %v6049_v10 }
 0x7c2   :  { %6871 = vrcp.f32 %v6061_v9  ;;  %v6082_v58 = vadd.f32 0.00028619796, %v6081_v33  ;;  %v6093_v31 = vadd.f32 0.001143296, %v6092_v57  ;;  %v12086_v24 = vmul.f32 0.70710677, %v12082_v17 }
 0x7c3   :  { %v6073_v2 = vand.u32 2147483648, %v6061_v9  ;;  %v6071_v41 = vand.u32 2147483647, %v6061_v9  ;;  %vm6067_vm15 = vweird.f32 %v6061_v9  ;;  %v6051_v22 = vmul.f32 %v6050_v14, %v12066_v63 }
 0x7c4   :  { %v6083_v47 = vmul.f32 %v6082_v58, %v12078_v48  ;;  %v6094_v7 = vmul.f32 %v6093_v31, %v12078_v48  ;;  %v6119_v21 = vmul.f32 %v12086_v24, %v12086_v24 }
 0x7c5   :  { %v6074_v45 = vor.u32 1.1754944e-38, %v6073_v2  ;;  %vm6072_vm1 = vcmp.eq.f32.partialorder %v6071_v41, 8.507059e+37 }
 0x7c6   :  { %v6084_v12 = vadd.f32 0.0036580483, %v6083_v47  ;;  %v6095_v32 = vadd.f32 0.014752088, %v6094_v7  ;;  %v12092_v53 = vmin.f32 %v6119_v21, 16.0 }
 0x7c8   :  { %v6872_v36 = vpop.eup %6871  ;;  %v6096_v16 = vmul.f32 %v6095_v32, %v12078_v48  ;;  %v6085_v28 = vmul.f32 %v6084_v12, %v12078_v48  ;;  %v6121_v1 = vmul.f32 2.1237322e-06, %v12092_v53  ;;  %v6132_v38 = vmul.f32 3.8918573e-05, %v12092_v53 }
 0x7c9   :  { %v6063_v23 = vmul.f32 %v6872_v36, %v6061_v9  ;;  %vm6068_vm14 = vweird.f32 %v6872_v36  ;;  %v4852_v37 = vpop.f32.mrf.mxu2 }
 0x7ca   :  { %v6097_v25 = vadd.f32 0.112945676, %v6096_v16  ;;  %v6122_v54 = vadd.f32 0.00028619796, %v6121_v1  ;;  %v6133_v11 = vadd.f32 0.001143296, %v6132_v38  ;;  %vm6069_vm0 = vmor %vm6067_vm15, %vm6068_vm14  ;;  %v12107_v0 = vadd.f32 %v12060_v60, %v4852_v37 }
 0x7cb   :  { %v6064_v55 = vsub.f32 1.0, %v6063_v23  ;;  %v6086_v4 = vadd.f32 0.05243302, %v6085_v28 }
 0x7cc   :  { %v6098_v46 = vmul.f32 %v6097_v25, %v12078_v48  ;;  %v6123_v30 = vmul.f32 %v6122_v54, %v12092_v53  ;;  %v6134_v39 = vmul.f32 %v6133_v11, %v12092_v53  ;;  %v12111_v26 = vmul.f32 0.70710677, %v12107_v0 }
 0x7cd   :  { %v6065_v40 = vmul.f32 %v6872_v36, %v6064_v55  ;;  %v6087_v61 = vmul.f32 %v6086_v4, %v12078_v48 }
 0x7ce   :  { %v6099_v44 = vadd.f32 0.4994258, %v6098_v46  ;;  %v6124_v50 = vadd.f32 0.0036580483, %v6123_v30  ;;  %v6135_v43 = vadd.f32 0.014752088, %v6134_v39  ;;  %v6159_v29 = vmul.f32 %v12111_v26, %v12111_v26 }
 0x7cf   :  { %v6066_v27 = vadd.f32 %v6872_v36, %v6065_v40  ;;  %v6088_v63 = vadd.f32 0.18741608, %v6087_v61  ;;  %v4884_v61 = vmul.f32 0.5, %v12071_v35 }
 0x7d0   :  { %v6100_v52 = vmul.f32 %v6099_v44, %v12078_v48  ;;  %v6136_v15 = vmul.f32 %v6135_v43, %v12092_v53  ;;  %v6125_v62 = vmul.f32 %v6124_v50, %v12092_v53  ;;  %v12118_v51 = vmin.f32 %v6159_v29, 16.0 }
 0x7d1   :  { %v6070_v42 = vsel %vm6069_vm0, %v6872_v36, %v6066_v27  ;;  %v6089_v33 = vmul.f32 %v6088_v63, %v12078_v48  ;;  %v6361_v10 = vpop.f32.mrf.mxu3 }
 0x7d2   :  { %v6075_v5 = vsel %vm6072_vm1, %v6074_v45, %v6070_v42  ;;  %v6101_v59 = vadd.f32 1.0, %v6100_v52  ;;  %v6137_v34 = vadd.f32 0.112945676, %v6136_v15  ;;  %v6126_v20 = vadd.f32 0.05243302, %v6125_v62 }
 0x7d3   :  { %v6076_v49 = vmul.f32 %v6075_v5, %v6051_v22  ;;  %v6161_v21 = vmul.f32 2.1237322e-06, %v12118_v51  ;;  %v6172_v19 = vmul.f32 3.8918573e-05, %v12118_v51  ;;  %v6090_v12 = vadd.f32 1.1283791, %v6089_v33 }
 0x7d4   :  { %6873 = vrcp.f32 %v6101_v59  ;;  %v6138_v56 = vmul.f32 %v6137_v34, %v12092_v53  ;;  %v6127_v47 = vmul.f32 %v6126_v20, %v12092_v53  ;;  %v6111_v48 = vand.u32 2147483647, %v6101_v59 }
 0x7d5   :  { %v6541_v13 = vclamps-f32 %v6076_v49, 1.0  ;;  %v6113_v36 = vand.u32 2147483648, %v6101_v59  ;;  %v6162_v23 = vadd.f32 0.00028619796, %v6161_v21  ;;  %v6362_v16 = vadd.f32 %v11934_v6, %v6361_v10 }
 0x7d6   :  { %v6139_v3 = vadd.f32 0.4994258, %v6138_v56  ;;  %v6128_v1 = vadd.f32 0.18741608, %v6127_v47  ;;  %v6173_v38 = vadd.f32 0.001143296, %v6172_v19  ;;  %vm6107_vm3 = vweird.f32 %v6101_v59 }
 0x7d7   :  { %v6227_v9 = vadd.f32 1.0, %v6541_v13  ;;  %v6163_v14 = vmul.f32 %v6162_v23, %v12118_v51  ;;  %6415 = vst [vmem:[#allocation17 + $0xa8] sm:$0xff] %v6362_v16  ;;  %v6091_v2 = vmul.f32 %v6090_v12, %v12074_v8  ;;  %v6114_v54 = vor.u32 1.1754944e-38, %v6113_v36 }
 0x7d8   :  { %v6140_v60 = vmul.f32 %v6139_v3, %v12092_v53  ;;  %v6174_v25 = vmul.f32 %v6173_v38, %v12118_v51  ;;  %vm6112_vm7 = vcmp.eq.f32.partialorder %v6111_v48, 8.507059e+37  ;;  %v6129_v41 = vmul.f32 %v6128_v1, %v12092_v53 }
 0x7d9   :  { %v6259_v58 = vmul.f32 %v6227_v9, %v4883_v18  ;;  %v6164_v39 = vadd.f32 0.0036580483, %v6163_v14  ;;  %v4885_v33 = vmul.f32 0.5, %v12082_v17  ;;  %v4886_v14 = vmul.f32 0.5, %v12107_v0 }
 0x7da   :  { %v6874_v57 = vpop.eup %6873  ;;  %v6141_v7 = vadd.f32 1.0, %v6140_v60  ;;  %v6175_v46 = vadd.f32 0.014752088, %v6174_v25  ;;  %v6130_v50 = vadd.f32 1.1283791, %v6129_v41 }
 0x7db   :  { %v6103_v31 = vmul.f32 %v6874_v57, %v6101_v59  ;;  %6381 = vmatmul.f32.gmra.mxu3 %v6259_v58  ;;  %vm6108_vm2 = vweird.f32 %v6874_v57  ;;  %v6165_v5 = vmul.f32 %v6164_v39, %v12118_v51 }
 0x7dc   :  { %6875 = vrcp.f32 %v6141_v7  ;;  %vm6109_vm5 = vmor %vm6107_vm3, %vm6108_vm2  ;;  %v6176_v44 = vmul.f32 %v6175_v46, %v12118_v51  ;;  %v6153_v43 = vand.u32 2147483648, %v6141_v7  ;;  %v6151_v52 = vand.u32 2147483647, %v6141_v7 }
 0x7dd   :  { %v6104_v32 = vsub.f32 1.0, %v6103_v31  ;;  %vm6147_vm9 = vweird.f32 %v6141_v7  ;;  %v6131_v59 = vmul.f32 %v6130_v50, %v12086_v24  ;;  %v6166_v13 = vadd.f32 0.05243302, %v6165_v5 }
 0x7de   :  { %v6177_v22 = vadd.f32 0.112945676, %v6176_v44  ;;  %v6154_v37 = vor.u32 1.1754944e-38, %v6153_v43  ;;  %vm6152_vm10 = vcmp.eq.f32.partialorder %v6151_v52, 8.507059e+37 }
 0x7df   :  { %v6105_v28 = vmul.f32 %v6874_v57, %v6104_v32  ;;  %v6167_v9 = vmul.f32 %v6166_v13, %v12118_v51 }
 0x7e0   :  { %v6178_v53 = vmul.f32 %v6177_v22, %v12118_v51  ;;  %v6364_v34 = vpop.f32.mrf.mxu3 }
 0x7e1   :  { %v6106_v55 = vadd.f32 %v6874_v57, %v6105_v28  ;;  %v6365_v20 = vadd.f32 %v11934_v6, %v6364_v34 }
 0x7e2   :  { %v6876_v11 = vpop.eup %6875  ;;  %v6179_v62 = vadd.f32 0.4994258, %v6178_v53 }
 0x7e3   :  { %v6110_v40 = vsel %vm6109_vm5, %v6874_v57, %v6106_v55  ;;  %v6143_v30 = vmul.f32 %v6876_v11, %v6141_v7  ;;  %vm6148_vm8 = vweird.f32 %v6876_v11  ;;  %6416 = vst [vmem:[#allocation17 + $0xb0] sm:$0xff] %v6365_v20  ;;  %v6168_v57 = vadd.f32 0.18741608, %v6167_v9 }
 0x7e4   :  { %v6115_v4 = vsel %vm6112_vm7, %v6114_v54, %v6110_v40  ;;  %vm6149_vm6 = vmor %vm6147_vm9, %vm6148_vm8  ;;  %v6180_v35 = vmul.f32 %v6179_v62, %v12118_v51 }
 0x7e5   :  { %v6116_v27 = vmul.f32 %v6115_v4, %v6091_v2  ;;  %v6144_v45 = vsub.f32 1.0, %v6143_v30  ;;  %v6169_v47 = vmul.f32 %v6168_v57, %v12118_v51 }
 0x7e6   :  { %v6181_v29 = vadd.f32 1.0, %v6180_v35 }
 0x7e7   :  { %v6542_v42 = vclamps-f32 %v6116_v27, 1.0  ;;  %v6145_v8 = vmul.f32 %v6876_v11, %v6144_v45  ;;  %v6170_v10 = vadd.f32 1.1283791, %v6169_v47 }
 0x7e8   :  { %6877 = vrcp.f32 %v6181_v29  ;;  %v6193_v19 = vand.u32 2147483648, %v6181_v29  ;;  %v6191_v32 = vand.u32 2147483647, %v6181_v29  ;;  %vm6187_vm11 = vweird.f32 %v6181_v29 }
 0x7e9   :  { %v6228_v15 = vadd.f32 1.0, %v6542_v42  ;;  %v6146_v49 = vadd.f32 %v6876_v11, %v6145_v8  ;;  %v6171_v16 = vmul.f32 %v6170_v10, %v12111_v26 }
 0x7ea   :  { %v6194_v23 = vor.u32 1.1754944e-38, %v6193_v19  ;;  %vm6192_vm13 = vcmp.eq.f32.partialorder %v6191_v32, 8.507059e+37 }
 0x7eb   :  { %v6260_v63 = vmul.f32 %v6228_v15, %v4884_v61  ;;  %v6150_v56 = vsel %vm6149_vm6, %v6876_v11, %v6146_v49 }
 0x7ec   :  { %v6155_v3 = vsel %vm6152_vm10, %v6154_v37, %v6150_v56 }
 0x7ed   :  { %6384 = vmatmul.f32.gmra.mxu3 %v6260_v63  ;;  %v6156_v18 = vmul.f32 %v6155_v3, %v6131_v59 }
 0x7ee   :  { %v6878_v31 = vpop.eup %6877 }
 0x7ef   :  { %v6543_v24 = vclamps-f32 %v6156_v18, 1.0  ;;  %v6183_v7 = vmul.f32 %v6878_v31, %v6181_v29  ;;  %vm6188_vm4 = vweird.f32 %v6878_v31 }
 0x7f0   :  { %vm6189_vm12 = vmor %vm6187_vm11, %vm6188_vm4 }
 0x7f1   :  { %v6229_v60 = vadd.f32 1.0, %v6543_v24  ;;  %v6184_v21 = vsub.f32 1.0, %v6183_v7 }
 0x7f3   :  { %v6261_v58 = vmul.f32 %v6229_v60, %v4885_v33  ;;  %v6185_v12 = vmul.f32 %v6878_v31, %v6184_v21 }
 0x7f4   :  { %v6367_v36 = vpop.f32.mrf.mxu3 }
 0x7f5   :  { %6387 = vmatmul.f32.gmra.mxu3 %v6261_v58  ;;  %v6186_v48 = vadd.f32 %v6878_v31, %v6185_v12  ;;  %v6368_v17 = vadd.f32 %v11934_v6, %v6367_v36 }
 0x7f7   :  { %v6190_v28 = vsel %vm6189_vm12, %v6878_v31, %v6186_v48  ;;  %6417 = vst [vmem:[#allocation17 + $0xb8] sm:$0xff] %v6368_v17 }
 0x7f8   :  { %v6195_v1 = vsel %vm6192_vm13, %v6194_v23, %v6190_v28 }
 0x7f9   :  { %v6196_v51 = vmul.f32 %v6195_v1, %v6171_v16 }
 0x7fb   :  { %v6544_v38 = vclamps-f32 %v6196_v51, 1.0 }
 0x7fc   :  { %v6370_v55 = vpop.f32.mrf.mxu3 }
 0x7fd   :  { %v6230_v25 = vadd.f32 1.0, %v6544_v38  ;;  %v6371_v2 = vadd.f32 %v11934_v6, %v6370_v55 }
 0x7ff   :  { %v6262_v54 = vmul.f32 %v6230_v25, %v4886_v14  ;;  %6418 = vst [vmem:[#allocation17 + $0xc0] sm:$0xff] %v6371_v2 }
 0x801   :  { %6390 = vmatmul.f32.gmra.mxu3 %v6262_v54 }
 0x804   :  { %v6373_v11 = vpop.f32.mrf.mxu3 }
 0x805   :  { %v6374_v40 = vadd.f32 %v11934_v6, %v6373_v11 }
 0x807   :  { %6419 = vst [vmem:[#allocation17 + $0xc8] sm:$0xff] %v6374_v40 }
 0x80c   :  { %v6376_v26 = vpop.f32.mrf.mxu3 }
 0x80d   :  { %v6377_v41 = vadd.f32 %v11934_v6, %v6376_v26 }
 0x80f   :  { %6420 = vst [vmem:[#allocation17 + $0xd0] sm:$0xff] %v6377_v41 }
 0x81c   :  { %v6379_v46 = vpop.f32.mrf.mxu3 }
 0x81d   :  { %v6380_v4 = vadd.f32 %v11934_v6, %v6379_v46 }
 0x81f   :  { %6421 = vst [vmem:[#allocation17 + $0xd8] sm:$0xff] %v6380_v4 }
 0x85e   :  { %v6382_v0 = vpop.f32.mrf.mxu3 }
 0x85f   :  { %v6383_v30 = vadd.f32 %v11934_v6, %v6382_v0 }
 0x861   :  { %6422 = vst [vmem:[#allocation17 + $0xe0] sm:$0xff] %v6383_v30 }
 0x870   :  { %v6385_v39 = vpop.f32.mrf.mxu3 }
 0x871   :  { %v6386_v27 = vadd.f32 %v11934_v6, %v6385_v39 }
 0x873   :  { %6423 = vst [vmem:[#allocation17 + $0xe8] sm:$0xff] %v6386_v27 }
 0x878   :  { %v6388_v44 = vpop.f32.mrf.mxu3 }
 0x879   :  { %v6389_v45 = vadd.f32 %v11934_v6, %v6388_v44 }
 0x87b   :  { %6424 = vst [vmem:[#allocation17 + $0xf0] sm:$0xff] %v6389_v45 }
 0x884   :  { %v6391_v50 = vpop.f32.mrf.mxu3 }
 0x885   :  { %v6392_v43 = vadd.f32 %v11934_v6, %v6391_v50 }
 0x887   :  { %6425 = vst [vmem:[#allocation17 + $0xf8] sm:$0xff] %v6392_v43 }
 0x888   :  { %6438 = dma.vmem_to_hbm [thread:$0]  %s6431_s8, 4096, %s6433_s29, [#allocation4], %s7139_s17, %s7139_s17, %s7140_s18  }
 0x889   :  { %7136 = dma.done.wait [#allocation4], 4096  }
 0x88a   :  { %7137 = vsyncadd [#allocation4], 4294963200 }
 0x88b   :  { %6443 = vsyncpa [#allocation3], 1 }
 0x88c   :  { %6444 = vsyncpa [#allocation6], 1 }
 0x88d   :  { %6445 = vsyncpa [#allocation9], 1 }
 0x88e   :  { %6446 = vsyncpa [#allocation12], 1 }
 0x88f   :  { %6447 = vsyncpa [#allocation15], 1 }
 0x890   :  { %6448 = vsyncpa [#allocation4], 1 }

</bundles_post_ra>
